<compile_context>
chip_gen: v6e
topology: v6e:2x2x1
jax: 0.10.0
libtpu: 0.0.40
codegen_flags: <defaults>
</compile_context>

<pallas_src>
import numpy as np
import jax
import jax.numpy as jnp
from jax.experimental import pallas as pl
from jax.experimental.pallas import tpu as pltpu


# ---------------------------------------------------------------------------
# Deterministic "parameters": packed Hann-windowed DFT matrix + HTK mel
# filterbank (torchaudio MelSpectrogram defaults: power=2.0, hop=n_fft//2,
# center=True reflect pad, f_min=0, f_max=sr/2, htk mel scale, norm=None).
# ---------------------------------------------------------------------------
def _hz_to_mel(f):
    return 2595.0 * np.log10(1.0 + f / 700.0)


def _mel_to_hz(m):
    return 700.0 * (10.0 ** (m / 2595.0) - 1.0)


def melscale_fbanks(n_freqs, f_min, f_max, n_mels, sample_rate):
    all_freqs = np.linspace(0.0, sample_rate // 2, n_freqs)
    m_pts = np.linspace(_hz_to_mel(f_min), _hz_to_mel(f_max), n_mels + 2)
    f_pts = _mel_to_hz(m_pts)
    f_diff = f_pts[1:] - f_pts[:-1]                       # (n_mels+1,)
    slopes = f_pts[None, :] - all_freqs[:, None]          # (n_freqs, n_mels+2)
    down = (-1.0 * slopes[:, :-2]) / f_diff[:-1]
    up = slopes[:, 2:] / f_diff[1:]
    fb = np.maximum(0.0, np.minimum(down, up))
    return fb.astype(np.float32)                          # (n_freqs, n_mels)


def windowed_dft_mats(n_fft):
    """Hann window (periodic) baked into real/imag DFT matrices."""
    n = np.arange(n_fft)
    window = 0.5 * (1.0 - np.cos(2.0 * np.pi * n / n_fft))
    n_freqs = n_fft // 2 + 1
    k = np.arange(n_freqs)
    ang = 2.0 * np.pi * np.outer(n, k) / n_fft            # (n_fft, n_freqs)
    cos_mat = (window[:, None] * np.cos(ang)).astype(np.float32)
    sin_mat = (-window[:, None] * np.sin(ang)).astype(np.float32)
    return cos_mat, sin_mat


def packed_dft_and_fb(n_fft, sample_rate, n_mels, n_mels_pad):
    """Pack cos/sin into one (n_fft, n_fft) matrix; duplicate fb rows to match.

    Real-input DFT: the sin columns for k=0 and k=n_fft/2 are identically
    zero, so dropping them makes the packed width exactly n_fft and
        mel = ((frames @ dft_packed) ** 2) @ fb_packed
            = sum_k fb[k] * (re_k^2 + im_k^2).
    Mel columns are zero-padded to `n_mels_pad` for lane-dense output stores.
    """
    n_freqs = n_fft // 2 + 1
    cos_mat, sin_mat = windowed_dft_mats(n_fft)
    dft_packed = np.concatenate([cos_mat, sin_mat[:, 1:n_freqs - 1]], axis=1)
    fb = melscale_fbanks(n_freqs, 0.0, sample_rate / 2.0, n_mels, sample_rate)
    fb_packed = np.concatenate([fb, fb[1:n_freqs - 1, :]], axis=0)
    fb_packed = np.pad(fb_packed, ((0, 0), (0, n_mels_pad - n_mels)))
    assert dft_packed.shape == (n_fft, n_fft)
    assert fb_packed.shape == (n_fft, n_mels_pad)
    return dft_packed.astype(np.float32), fb_packed.astype(np.float32)


def _frame_waveform(waveform, n_fft):
    """center=True reflect pad + 50%-overlap framing WITHOUT a gather.

    hop == n_fft // 2 (torchaudio MelSpectrogram default), so frame i is
    [block_i | block_{i+1}] with block_j = x[j*hop:(j+1)*hop]: two shifted
    hop-block views + one concat, no gather slab.  The waveform is cast to
    bf16 BEFORE padding/framing so the 2x frame slab is written once at
    half width.
    """
    hop = n_fft // 2
    pad = n_fft // 2
    assert waveform.ndim == 2, "expected (channels, time)"
    assert n_fft % 2 == 0, "n_fft must be even (hop == n_fft // 2 framing)"
    assert waveform.shape[-1] > pad, (
        f"waveform too short for center reflect pad: need > {pad} samples, "
        f"got {waveform.shape[-1]}")
    x = jnp.pad(waveform.astype(jnp.bfloat16), ((0, 0), (pad, pad)),
                mode="reflect")
    C, L = x.shape
    num_frames = 1 + (L - n_fft) // hop
    nb = num_frames + 1
    blocks = x[:, :nb * hop].reshape(C, nb, hop)
    frames = jnp.concatenate([blocks[:, :-1, :], blocks[:, 1:, :]], axis=-1)
    return frames                                  # (C, num_frames, n_fft) bf16


def _round_up(x, m):
    return ((x + m - 1) // m) * m


def _tpu_defaults():
    """Per-generation frame-tile default + whether the chip has >1 TensorCore."""
    try:
        kind = jax.devices()[0].device_kind.lower()
    except Exception:  # pragma: no cover - CPU/interpret fallbacks
        kind = ""
    multi_core = ("v4" in kind) or ("v5p" in kind) or ("v7" in kind) or ("7x" in kind)
    if ("v5e" in kind) or ("v5 lite" in kind) or ("v5lite" in kind):
        tile = 512      # v5e: per-step overhead already <6% at 512
    elif ("v7" in kind) or ("7x" in kind):
        tile = 1024     # v7x: cap at 1024 (64 MiB physical VMEM)
    elif "v6" in kind:
        tile = 1024     # v6e: amortize ~0.35 us per-step overhead
    else:
        tile = 512
    return tile, multi_core


def _pick_tile(F16, tile_frames, multi_core):
    """Row tile: multiple of 16 (bf16 sublane packing); on multi-TensorCore
    chips force an EVEN grid-step count so both cores get balanced work."""
    tile = max(min(tile_frames, F16), 16)
    tile = _round_up(tile, 16)
    if multi_core and F16 > 16:
        n_steps = -(-F16 // tile)
        if n_steps % 2 == 1:
            n_steps += 1
            tile = _round_up(-(-F16 // n_steps), 16)
    return tile


# ---------------------------------------------------------------------------
# Pallas kernel: per frame-tile, frequency-chunked fused pipeline:
#   (frames @ dft_chunk) -> square -> (@ fb_chunk) accumulated in f32.
# bf16 MXU inputs, f32 accumulation; no full-width power intermediate.
# ---------------------------------------------------------------------------
def mel_kernel(frames_ref, dft_ref, fb_ref, out_ref):
    n_fft = dft_ref.shape[0]
    chunk = 256 if (n_fft % 256 == 0) else n_fft      # keep full MXU tiles
    frames = frames_ref[...]                           # (tile, n_fft) bf16
    acc = jnp.zeros(out_ref.shape, jnp.float32)
    for c0 in range(0, n_fft, chunk):
        # Packed windowed-DFT slice: (tile, chunk) f32 on the MXU.
        y = jnp.dot(frames, dft_ref[:, c0:c0 + chunk],
                    preferred_element_type=jnp.float32)
        # Square (VPU) and fold straight into the mel accumulation; the
        # full-width (tile, n_fft) f32/bf16 intermediates never hit VMEM.
        p = (y * y).astype(jnp.bfloat16)
        acc = acc + jnp.dot(p, fb_ref[c0:c0 + chunk, :],
                            preferred_element_type=jnp.float32)
    out_ref[...] = acc


def mel_spectrogram_pallas(waveform, sample_rate, n_fft=1024, n_mels=80,
                           tile_frames=None):
    """waveform: (channels, time) -> (channels, n_mels, num_frames)."""
    frames = _frame_waveform(waveform, n_fft)          # (C, F, n_fft) bf16
    C, num_frames, _ = frames.shape
    F = C * num_frames
    frames = frames.reshape(F, n_fft)

    default_tile, multi_core = _tpu_defaults()
    if tile_frames is None:
        tile_frames = default_tile

    F16 = _round_up(F, 16)
    tile = _pick_tile(F16, tile_frames, multi_core)
    F_pad = _round_up(max(F, tile), tile)
    if F_pad != F:
        frames = jnp.pad(frames, ((0, F_pad - F), (0, 0)))

    n_mels_pad = _round_up(n_mels, 128)                # lane-dense stores
    dft_np, fb_np = packed_dft_and_fb(n_fft, sample_rate, n_mels, n_mels_pad)
    dft_packed = jnp.asarray(dft_np, dtype=jnp.bfloat16)
    fb_packed = jnp.asarray(fb_np, dtype=jnp.bfloat16)

    grid = (F_pad // tile,)
    out_shape = jax.ShapeDtypeStruct((F_pad, n_mels_pad), jnp.float32)
    cost = pl.CostEstimate(
        flops=2 * F_pad * n_fft * (n_fft + n_mels_pad) + F_pad * n_fft,
        transcendentals=0,
        bytes_accessed=(F_pad * n_fft * 2 + n_fft * n_fft * 2
                        + n_fft * n_mels_pad * 2 + F_pad * n_mels_pad * 4),
    )

    def build(single_buffer_consts):
        # Constant operands (index_map == (0,0) forever): single-buffer them
        # so they don't waste a second VMEM copy (matters on v7x's 64 MiB).
        const_kw = ({"pipeline_mode": pl.Buffered(1)}
                    if single_buffer_consts else {})
        return pl.pallas_call(
            mel_kernel,
            out_shape=out_shape,
            grid=grid,
            in_specs=[
                pl.BlockSpec((tile, n_fft), lambda i: (i, 0)),
                pl.BlockSpec((n_fft, n_fft), lambda i: (0, 0), **const_kw),
                pl.BlockSpec((n_fft, n_mels_pad), lambda i: (0, 0), **const_kw),
            ],
            out_specs=pl.BlockSpec((tile, n_mels_pad), lambda i: (i, 0)),
            compiler_params=pltpu.CompilerParams(
                dimension_semantics=("parallel",),
                vmem_limit_bytes=32 * 1024 * 1024),
            cost_estimate=cost,
        )

    try:
        out = build(True)(frames, dft_packed, fb_packed)
        out = jax.block_until_ready(out)
    except Exception:
        # Fallback: default double buffering if Buffered(1) is rejected.
        out = build(False)(frames, dft_packed, fb_packed)

    mel = out[:F, :n_mels].reshape(C, num_frames, n_mels)
    return jnp.transpose(mel, (0, 2, 1))               # (C, n_mels, F)


# ---------------------------------------------------------------------------
# AudioProcessing.forward equivalent (n_fft=1024, n_mel=80 module defaults).
# ---------------------------------------------------------------------------
def audio_processing_forward(waveform, sr, n_fft=1024, n_mels=80):
    # TODO(synk): noisereduce.reduce_noise (spectral-gating denoise) has no
    # clean Pallas equivalent; passed through unchanged.
    reduced_noise = waveform.astype(jnp.float32)
    # TODO(synk): torchaudio.functional.vad front/back trimming (stateful
    # data-dependent trigger logic) has no clean Pallas equivalent; passed
    # through unchanged.
    trimmed_waveform = reduced_noise
    return mel_spectrogram_pallas(trimmed_waveform, int(sr),
                                  n_fft=n_fft, n_mels=n_mels)


def _mel_reference(waveform, sample_rate, n_fft, n_mels):
    """Pure-JAX reference (unpacked cos/sin path) with the same bf16 input
    quantization as the kernel — checks both the numerics and the packing."""
    frames = _frame_waveform(waveform, n_fft)
    frames = frames.astype(jnp.bfloat16).astype(jnp.float32)
    cos_np, sin_np = windowed_dft_mats(n_fft)
    n_freqs = n_fft // 2 + 1
    cos = jnp.asarray(cos_np).astype(jnp.bfloat16).astype(jnp.float32)
    sin = jnp.asarray(sin_np).astype(jnp.bfloat16).astype(jnp.float32)
    fb = jnp.asarray(melscale_fbanks(n_freqs, 0.0, sample_rate / 2.0,
                                     n_mels, sample_rate))
    fb = fb.astype(jnp.bfloat16).astype(jnp.float32)
    re = jnp.einsum("cfn,nk->cfk", frames, cos)
    im = jnp.einsum("cfn,nk->cfk", frames, sin)
    power = re * re + im * im
    power = power.astype(jnp.bfloat16).astype(jnp.float32)
    mel = jnp.einsum("cfk,km->cfm", power, fb)
    return jnp.transpose(mel, (0, 2, 1))


if __name__ == "__main__":
    key = jax.random.PRNGKey(0)
    # Small synthetic waveform: 2 channels, 16000 samples at 16 kHz.
    C, T = 2, 16000
    waveform = jax.random.normal(key, (C, T), dtype=jnp.float32)
    sr = jnp.int32(16000)

    mel = audio_processing_forward(waveform, sr, n_fft=1024, n_mels=80)
    mel = jax.block_until_ready(mel)

    ref = jax.block_until_ready(
        _mel_reference(waveform, 16000, n_fft=1024, n_mels=80))
    assert mel.shape == ref.shape, (mel.shape, ref.shape)
    err = float(jnp.max(jnp.abs(mel - ref)) / (jnp.max(jnp.abs(ref)) + 1e-6))
    assert err < 1e-2, f"relative error too large: {err}"

    print("KERNEL_OK")
</pallas_src>

<mosaic_0001>
module attributes {stable_mosaic.version = 11 : i64} {
  func.func @mel_kernel(%arg0: i32, %arg1: memref<64x1024xbf16, #tpu.memory_space<vmem>>, %arg2: memref<1024x1024xbf16, #tpu.memory_space<vmem>>, %arg3: memref<1024x128xbf16, #tpu.memory_space<vmem>>, %arg4: memref<64x128xf32, #tpu.memory_space<vmem>>) attributes {dimension_semantics = [#tpu.dimension_semantics<parallel>], iteration_bounds = array<i64: 1>, scalar_prefetch = 0 : i64, scratch_operands = 0 : i64, tpu.core_type = #tpu.core_type<tc>, window_params = [{transform_indices = @transform_0, window_bounds = array<i64: 64, 1024>}, {pipeline_mode = #tpu.pipeline_mode<synchronous>, transform_indices = @transform_1, window_bounds = array<i64: 1024, 1024>}, {pipeline_mode = #tpu.pipeline_mode<synchronous>, transform_indices = @transform_2, window_bounds = array<i64: 1024, 128>}, {transform_indices = @transform_3, window_bounds = array<i64: 64, 128>}]} {
    %c0 = arith.constant 0 : index
    %c0_0 = arith.constant 0 : index
    %0 = vector.load %arg1[%c0, %c0_0] : memref<64x1024xbf16, #tpu.memory_space<vmem>>, vector<64x1024xbf16>
    %cst = arith.constant 0.000000e+00 : f32
    %1 = vector.broadcast %cst : f32 to vector<64x128xf32>
    %c0_1 = arith.constant 0 : index
    %c0_2 = arith.constant 0 : index
    %2 = vector.load %arg2[%c0_1, %c0_2] : memref<1024x1024xbf16, #tpu.memory_space<vmem>>, vector<1024x256xbf16>
    %cst_3 = arith.constant dense<0.000000e+00> : vector<64x256xf32>
    %3 = tpu.matmul %0, %2, %cst_3 {dimension_numbers = #tpu.dot_dimension_numbers<[1], [0], [0], [1], [0, 0, 1, 1], [], []>} : vector<64x1024xbf16>, vector<1024x256xbf16>, vector<64x256xf32> -> vector<64x256xf32>
    %4 = arith.mulf %3, %3 : vector<64x256xf32>
    %5 = arith.truncf %4 : vector<64x256xf32> to vector<64x256xbf16>
    %c0_4 = arith.constant 0 : index
    %c0_5 = arith.constant 0 : index
    %6 = vector.load %arg3[%c0_4, %c0_5] : memref<1024x128xbf16, #tpu.memory_space<vmem>>, vector<256x128xbf16>
    %cst_6 = arith.constant dense<0.000000e+00> : vector<64x128xf32>
    %7 = tpu.matmul %5, %6, %cst_6 {dimension_numbers = #tpu.dot_dimension_numbers<[1], [0], [0], [1], [0, 0, 1, 1], [], []>} : vector<64x256xbf16>, vector<256x128xbf16>, vector<64x128xf32> -> vector<64x128xf32>
    %8 = arith.addf %1, %7 : vector<64x128xf32>
    %c0_7 = arith.constant 0 : index
    %c256 = arith.constant 256 : index
    %9 = vector.load %arg2[%c0_7, %c256] : memref<1024x1024xbf16, #tpu.memory_space<vmem>>, vector<1024x256xbf16>
    %cst_8 = arith.constant dense<0.000000e+00> : vector<64x256xf32>
    %10 = tpu.matmul %0, %9, %cst_8 {dimension_numbers = #tpu.dot_dimension_numbers<[1], [0], [0], [1], [0, 0, 1, 1], [], []>} : vector<64x1024xbf16>, vector<1024x256xbf16>, vector<64x256xf32> -> vector<64x256xf32>
    %11 = arith.mulf %10, %10 : vector<64x256xf32>
    %12 = arith.truncf %11 : vector<64x256xf32> to vector<64x256xbf16>
    %c256_9 = arith.constant 256 : index
    %c0_10 = arith.constant 0 : index
    %13 = vector.load %arg3[%c256_9, %c0_10] : memref<1024x128xbf16, #tpu.memory_space<vmem>>, vector<256x128xbf16>
    %cst_11 = arith.constant dense<0.000000e+00> : vector<64x128xf32>
    %14 = tpu.matmul %12, %13, %cst_11 {dimension_numbers = #tpu.dot_dimension_numbers<[1], [0], [0], [1], [0, 0, 1, 1], [], []>} : vector<64x256xbf16>, vector<256x128xbf16>, vector<64x128xf32> -> vector<64x128xf32>
    %15 = arith.addf %8, %14 : vector<64x128xf32>
    %c0_12 = arith.constant 0 : index
    %c512 = arith.constant 512 : index
    %16 = vector.load %arg2[%c0_12, %c512] : memref<1024x1024xbf16, #tpu.memory_space<vmem>>, vector<1024x256xbf16>
    %cst_13 = arith.constant dense<0.000000e+00> : vector<64x256xf32>
    %17 = tpu.matmul %0, %16, %cst_13 {dimension_numbers = #tpu.dot_dimension_numbers<[1], [0], [0], [1], [0, 0, 1, 1], [], []>} : vector<64x1024xbf16>, vector<1024x256xbf16>, vector<64x256xf32> -> vector<64x256xf32>
    %18 = arith.mulf %17, %17 : vector<64x256xf32>
    %19 = arith.truncf %18 : vector<64x256xf32> to vector<64x256xbf16>
    %c512_14 = arith.constant 512 : index
    %c0_15 = arith.constant 0 : index
    %20 = vector.load %arg3[%c512_14, %c0_15] : memref<1024x128xbf16, #tpu.memory_space<vmem>>, vector<256x128xbf16>
    %cst_16 = arith.constant dense<0.000000e+00> : vector<64x128xf32>
    %21 = tpu.matmul %19, %20, %cst_16 {dimension_numbers = #tpu.dot_dimension_numbers<[1], [0], [0], [1], [0, 0, 1, 1], [], []>} : vector<64x256xbf16>, vector<256x128xbf16>, vector<64x128xf32> -> vector<64x128xf32>
    %22 = arith.addf %15, %21 : vector<64x128xf32>
    %c0_17 = arith.constant 0 : index
    %c768 = arith.constant 768 : index
    %23 = vector.load %arg2[%c0_17, %c768] : memref<1024x1024xbf16, #tpu.memory_space<vmem>>, vector<1024x256xbf16>
    %cst_18 = arith.constant dense<0.000000e+00> : vector<64x256xf32>
    %24 = tpu.matmul %0, %23, %cst_18 {dimension_numbers = #tpu.dot_dimension_numbers<[1], [0], [0], [1], [0, 0, 1, 1], [], []>} : vector<64x1024xbf16>, vector<1024x256xbf16>, vector<64x256xf32> -> vector<64x256xf32>
    %25 = arith.mulf %24, %24 : vector<64x256xf32>
    %26 = arith.truncf %25 : vector<64x256xf32> to vector<64x256xbf16>
    %c768_19 = arith.constant 768 : index
    %c0_20 = arith.constant 0 : index
    %27 = vector.load %arg3[%c768_19, %c0_20] : memref<1024x128xbf16, #tpu.memory_space<vmem>>, vector<256x128xbf16>
    %cst_21 = arith.constant dense<0.000000e+00> : vector<64x128xf32>
    %28 = tpu.matmul %26, %27, %cst_21 {dimension_numbers = #tpu.dot_dimension_numbers<[1], [0], [0], [1], [0, 0, 1, 1], [], []>} : vector<64x256xbf16>, vector<256x128xbf16>, vector<64x128xf32> -> vector<64x128xf32>
    %29 = arith.addf %22, %28 : vector<64x128xf32>
    %c0_22 = arith.constant 0 : index
    %c0_23 = arith.constant 0 : index
    %30 = vector.load %arg4[%c0_22, %c0_23] : memref<64x128xf32, #tpu.memory_space<vmem>>, vector<64x128xf32>
    tpu.vector_store %arg4[%c0_22, %c0_23], %29 {strides = array<i32>} : memref<64x128xf32, #tpu.memory_space<vmem>>, vector<64x128xf32>,
    return
  }
  func.func @transform_0(%arg0: i32) -> (i32, i32) {
    %c0_i32 = arith.constant 0 : i32
    %c0_i32_0 = arith.constant 0 : i32
    return %arg0, %c0_i32 : i32, i32
  }
  func.func @transform_1(%arg0: i32) -> (i32, i32) {
    %c0_i32 = arith.constant 0 : i32
    %c0_i32_0 = arith.constant 0 : i32
    %c0_i32_1 = arith.constant 0 : i32
    return %c0_i32, %c0_i32_0 : i32, i32
  }
  func.func @transform_2(%arg0: i32) -> (i32, i32) {
    %c0_i32 = arith.constant 0 : i32
    %c0_i32_0 = arith.constant 0 : i32
    %c0_i32_1 = arith.constant 0 : i32
    return %c0_i32, %c0_i32_0 : i32, i32
  }
  func.func @transform_3(%arg0: i32) -> (i32, i32) {
    %c0_i32 = arith.constant 0 : i32
    %c0_i32_0 = arith.constant 0 : i32
    return %arg0, %c0_i32 : i32, i32
  }
}

module attributes {stable_mosaic.version = 11 : i64} {
  func.func @mel_kernel(%arg0: i32, %arg1: memref<64x1024xbf16, #tpu.memory_space<vmem>>, %arg2: memref<1024x1024xbf16, #tpu.memory_space<vmem>>, %arg3: memref<1024x128xbf16, #tpu.memory_space<vmem>>, %arg4: memref<64x128xf32, #tpu.memory_space<vmem>>) attributes {dimension_semantics = [#tpu.dimension_semantics<parallel>], iteration_bounds = array<i64: 1>, scalar_prefetch = 0 : i64, scratch_operands = 0 : i64, tpu.core_type = #tpu.core_type<tc>, window_params = [{transform_indices = @transform_0, window_bounds = array<i64: 64, 1024>}, {pipeline_mode = #tpu.pipeline_mode<synchronous>, transform_indices = @transform_1, window_bounds = array<i64: 1024, 1024>}, {pipeline_mode = #tpu.pipeline_mode<synchronous>, transform_indices = @transform_2, window_bounds = array<i64: 1024, 128>}, {transform_indices = @transform_3, window_bounds = array<i64: 64, 128>}]} {
    %c0 = arith.constant 0 : index
    %c0_0 = arith.constant 0 : index
    %0 = vector.load %arg1[%c0, %c0_0] : memref<64x1024xbf16, #tpu.memory_space<vmem>>, vector<64x1024xbf16>
    %cst = arith.constant 0.000000e+00 : f32
    %1 = vector.broadcast %cst : f32 to vector<64x128xf32>
    %c0_1 = arith.constant 0 : index
    %c0_2 = arith.constant 0 : index
    %2 = vector.load %arg2[%c0_1, %c0_2] : memref<1024x1024xbf16, #tpu.memory_space<vmem>>, vector<1024x256xbf16>
    %cst_3 = arith.constant dense<0.000000e+00> : vector<64x256xf32>
    %3 = tpu.matmul %0, %2, %cst_3 {dimension_numbers = #tpu.dot_dimension_numbers<[1], [0], [0], [1], [0, 0, 1, 1], [], []>} : vector<64x1024xbf16>, vector<1024x256xbf16>, vector<64x256xf32> -> vector<64x256xf32>
    %4 = arith.mulf %3, %3 : vector<64x256xf32>
    %5 = arith.truncf %4 : vector<64x256xf32> to vector<64x256xbf16>
    %c0_4 = arith.constant 0 : index
    %c0_5 = arith.constant 0 : index
    %6 = vector.load %arg3[%c0_4, %c0_5] : memref<1024x128xbf16, #tpu.memory_space<vmem>>, vector<256x128xbf16>
    %cst_6 = arith.constant dense<0.000000e+00> : vector<64x128xf32>
    %7 = tpu.matmul %5, %6, %cst_6 {dimension_numbers = #tpu.dot_dimension_numbers<[1], [0], [0], [1], [0, 0, 1, 1], [], []>} : vector<64x256xbf16>, vector<256x128xbf16>, vector<64x128xf32> -> vector<64x128xf32>
    %8 = arith.addf %1, %7 : vector<64x128xf32>
    %c0_7 = arith.constant 0 : index
    %c256 = arith.constant 256 : index
    %9 = vector.load %arg2[%c0_7, %c256] : memref<1024x1024xbf16, #tpu.memory_space<vmem>>, vector<1024x256xbf16>
    %cst_8 = arith.constant dense<0.000000e+00> : vector<64x256xf32>
    %10 = tpu.matmul %0, %9, %cst_8 {dimension_numbers = #tpu.dot_dimension_numbers<[1], [0], [0], [1], [0, 0, 1, 1], [], []>} : vector<64x1024xbf16>, vector<1024x256xbf16>, vector<64x256xf32> -> vector<64x256xf32>
    %11 = arith.mulf %10, %10 : vector<64x256xf32>
    %12 = arith.truncf %11 : vector<64x256xf32> to vector<64x256xbf16>
    %c256_9 = arith.constant 256 : index
    %c0_10 = arith.constant 0 : index
    %13 = vector.load %arg3[%c256_9, %c0_10] : memref<1024x128xbf16, #tpu.memory_space<vmem>>, vector<256x128xbf16>
    %cst_11 = arith.constant dense<0.000000e+00> : vector<64x128xf32>
    %14 = tpu.matmul %12, %13, %cst_11 {dimension_numbers = #tpu.dot_dimension_numbers<[1], [0], [0], [1], [0, 0, 1, 1], [], []>} : vector<64x256xbf16>, vector<256x128xbf16>, vector<64x128xf32> -> vector<64x128xf32>
    %15 = arith.addf %8, %14 : vector<64x128xf32>
    %c0_12 = arith.constant 0 : index
    %c512 = arith.constant 512 : index
    %16 = vector.load %arg2[%c0_12, %c512] : memref<1024x1024xbf16, #tpu.memory_space<vmem>>, vector<1024x256xbf16>
    %cst_13 = arith.constant dense<0.000000e+00> : vector<64x256xf32>
    %17 = tpu.matmul %0, %16, %cst_13 {dimension_numbers = #tpu.dot_dimension_numbers<[1], [0], [0], [1], [0, 0, 1, 1], [], []>} : vector<64x1024xbf16>, vector<1024x256xbf16>, vector<64x256xf32> -> vector<64x256xf32>
    %18 = arith.mulf %17, %17 : vector<64x256xf32>
    %19 = arith.truncf %18 : vector<64x256xf32> to vector<64x256xbf16>
    %c512_14 = arith.constant 512 : index
    %c0_15 = arith.constant 0 : index
    %20 = vector.load %arg3[%c512_14, %c0_15] : memref<1024x128xbf16, #tpu.memory_space<vmem>>, vector<256x128xbf16>
    %cst_16 = arith.constant dense<0.000000e+00> : vector<64x128xf32>
    %21 = tpu.matmul %19, %20, %cst_16 {dimension_numbers = #tpu.dot_dimension_numbers<[1], [0], [0], [1], [0, 0, 1, 1], [], []>} : vector<64x256xbf16>, vector<256x128xbf16>, vector<64x128xf32> -> vector<64x128xf32>
    %22 = arith.addf %15, %21 : vector<64x128xf32>
    %c0_17 = arith.constant 0 : index
    %c768 = arith.constant 768 : index
    %23 = vector.load %arg2[%c0_17, %c768] : memref<1024x1024xbf16, #tpu.memory_space<vmem>>, vector<1024x256xbf16>
    %cst_18 = arith.constant dense<0.000000e+00> : vector<64x256xf32>
    %24 = tpu.matmul %0, %23, %cst_18 {dimension_numbers = #tpu.dot_dimension_numbers<[1], [0], [0], [1], [0, 0, 1, 1], [], []>} : vector<64x1024xbf16>, vector<1024x256xbf16>, vector<64x256xf32> -> vector<64x256xf32>
    %25 = arith.mulf %24, %24 : vector<64x256xf32>
    %26 = arith.truncf %25 : vector<64x256xf32> to vector<64x256xbf16>
    %c768_19 = arith.constant 768 : index
    %c0_20 = arith.constant 0 : index
    %27 = vector.load %arg3[%c768_19, %c0_20] : memref<1024x128xbf16, #tpu.memory_space<vmem>>, vector<256x128xbf16>
    %cst_21 = arith.constant dense<0.000000e+00> : vector<64x128xf32>
    %28 = tpu.matmul %26, %27, %cst_21 {dimension_numbers = #tpu.dot_dimension_numbers<[1], [0], [0], [1], [0, 0, 1, 1], [], []>} : vector<64x256xbf16>, vector<256x128xbf16>, vector<64x128xf32> -> vector<64x128xf32>
    %29 = arith.addf %22, %28 : vector<64x128xf32>
    %c0_22 = arith.constant 0 : index
    %c0_23 = arith.constant 0 : index
    %30 = vector.load %arg4[%c0_22, %c0_23] : memref<64x128xf32, #tpu.memory_space<vmem>>, vector<64x128xf32>
    tpu.vector_store %arg4[%c0_22, %c0_23], %29 {strides = array<i32>} : memref<64x128xf32, #tpu.memory_space<vmem>>, vector<64x128xf32>,
    return
  }
  func.func @transform_0(%arg0: i32) -> (i32, i32) {
    %c0_i32 = arith.constant 0 : i32
    %c0_i32_0 = arith.constant 0 : i32
    return %arg0, %c0_i32 : i32, i32
  }
  func.func @transform_1(%arg0: i32) -> (i32, i32) {
    %c0_i32 = arith.constant 0 : i32
    %c0_i32_0 = arith.constant 0 : i32
    %c0_i32_1 = arith.constant 0 : i32
    return %c0_i32, %c0_i32_0 : i32, i32
  }
  func.func @transform_2(%arg0: i32) -> (i32, i32) {
    %c0_i32 = arith.constant 0 : i32
    %c0_i32_0 = arith.constant 0 : i32
    %c0_i32_1 = arith.constant 0 : i32
    return %c0_i32, %c0_i32_0 : i32, i32
  }
  func.func @transform_3(%arg0: i32) -> (i32, i32) {
    %c0_i32 = arith.constant 0 : i32
    %c0_i32_0 = arith.constant 0 : i32
    return %arg0, %c0_i32 : i32, i32
  }
}

</mosaic_0001>

<bundles_post_ra>
// kernel: tpu_custom_call.1
= control target key start
LH: loop header
LB: loop body
LE: loop exit
PB: predicated region body
PF: predicated region fallthrough
CT: control target
= control target key end

     0   :  { %8 = vsyncpa [#allocation3], 0  ;;  %s6996_s0 = inlined_call_operand.hbm [shape: bf16[64,1024], index: 0, kind: input, shape index: {}]   ;;  %s6997_s1 = inlined_call_operand.hbm [shape: bf16[1024,1024], index: 1, kind: input, shape index: {}]   ;;  %s6998_s2 = inlined_call_operand.hbm [shape: bf16[1024,128], index: 2, kind: input, shape index: {}]   ;;  %s6999_s3 = inlined_call_operand.hbm [shape: f32[64,128], index: 3, kind: output, shape index: {}]  }
   0x1   :  { %9 = vsyncpa [#allocation6], 0 }
   0x2   :  { %10 = vsyncpa [#allocation4], 0  ;;  %s6327_s12 = smov [#allocation5]   ;;  %s6328_s14 = smov [#allocation2]  }
   0x3   :  { %s28_s13 = sshll.u32 %s6327_s12, 4  ;;  %s16_s15 = sshll.u32 %s6328_s14, 4  ;;  %s29_s13 = int_to_ptr.vmem [resolvable:$true] %s28_s13  ;;  %s17_s15 = int_to_ptr.vmem [resolvable:$true] %s16_s15 }
   0x4   :  { %s6249_s16 = scalar_lea.vmem %s29_s13, 65536  ;;  %p6254_p1 = scmp.lt.s32.totalorder %s29_s13, %s29_s13 }
   0x5   :  { %p6250_p0 = scmp.ne.s32.totalorder %s29_s13, %s6249_s16  ;;  %p6255_p2 = scmp.lt.s32.totalorder %s6249_s16, %s6249_s16 }
   0x7   :  { %p6256_p3 = por %p6255_p2, %p6254_p1 }
   0x9   :  { %p6257_p4 = pnand %p6256_p3, %p6250_p0 }
   0xb   :  { %6260 = shalt.err (!%p6257_p4)
}
   0xc   :  { %s6329_s17 = smov 512   ;;  %s6330_s18 = smov 32  }
   0xd   :  { %34 = dma.hbm_to_vmem [thread:$0]  %s6997_s1, 65536, %s29_s13, [#allocation6], %s6329_s17, %s6329_s17, %s6330_s18  }
   0xe   :  { %s6269_s21 = scalar_lea.vmem %s17_s15, 4096  ;;  %p6274_p6 = scmp.lt.s32.totalorder %s17_s15, %s17_s15 }
   0xf   :  { %p6270_p5 = scmp.ne.s32.totalorder %s17_s15, %s6269_s21  ;;  %p6275_p7 = scmp.lt.s32.totalorder %s6269_s21, %s6269_s21 }
  0x11   :  { %p6276_p8 = por %p6275_p7, %p6274_p6 }
  0x13   :  { %p6277_p9 = pnand %p6276_p8, %p6270_p5 }
  0x15   :  { %6280 = shalt.err (!%p6277_p9)
}
  0x16   :  { %22 = dma.hbm_to_vmem [thread:$0]  %s6996_s0, 4096, %s17_s15, [#allocation3], %s6329_s17, %s6329_s17, %s6330_s18  }
  0x17   :  { %s6331_s24 = smov [#allocation7]  }
  0x18   :  { %s40_s25 = sshll.u32 %s6331_s24, 4  ;;  %s41_s25 = int_to_ptr.vmem [resolvable:$true] %s40_s25 }
  0x19   :  { %s6289_s26 = scalar_lea.vmem %s41_s25, 8192  ;;  %p6294_p11 = scmp.lt.s32.totalorder %s41_s25, %s41_s25 }
  0x1a   :  { %p6290_p10 = scmp.ne.s32.totalorder %s41_s25, %s6289_s26  ;;  %p6295_p12 = scmp.lt.s32.totalorder %s6289_s26, %s6289_s26 }
  0x1c   :  { %p6296_p13 = por %p6295_p12, %p6294_p11 }
  0x1e   :  { %p6297_p0 = pnand %p6296_p13, %p6290_p10 }
  0x20   :  { %6300 = shalt.err (!%p6297_p0)
}
  0x21   :  { %s6332_s1 = smov 64   ;;  %s6333_s27 = smov 4  }
  0x22   :  { %46 = dma.hbm_to_vmem [thread:$0]  %s6998_s2, 8192, %s41_s25, [#allocation6], %s6332_s1, %s6332_s1, %s6333_s27  }
  0x23   :  { %6321 = dma.done.wait [#allocation3], 4096  }
  0x24   :  { %6322 = vsyncadd [#allocation3], 4294963200 }
  0x25   :  { %6323 = dma.done.wait [#allocation6], 73728  }
  0x26   :  { %6324 = vsyncadd [#allocation6], 4294893568  ;;  %v103_v0 = vld [vmem:[#allocation5 + $0x1c0] sm:$0xff]  ;;  %v6374_v59 = vld [vmem:[#allocation2 + $0x8] sm:$0xff]  ;;  %s6334_s0 = smov [#allocation8]  }
  0x27   :  { %v104_v1 = vld [vmem:[#allocation5 + $0x1e0] sm:$0xff]  ;;  %v6376_v60 = vld [vmem:[#allocation2 + $0x28] sm:$0xff]  ;;  %s5386_s2 = sshll.u32 %s6334_s0, 4  ;;  %s5387_s2 = int_to_ptr.vmem [resolvable:$true] %s5386_s2 }
  0x28   :  { %v135_v2 = vld [vmem:[#allocation5 + $0x5c0] sm:$0xff]  ;;  %v5446_v3 = vcombine.high %v103_v0, %v104_v1  ;;  %v5445_v5 = vcombine.low %v103_v0, %v104_v1  ;;  %v6380_v63 = vcombine.high %v6374_v59, %v6376_v60  ;;  %s6301_s30 = scalar_lea.vmem %s5387_s2, 1024  ;;  %p6306_p2 = scmp.lt.s32.totalorder %s5387_s2, %s5387_s2 }
  0x29   :  { %v136_v4 = vld [vmem:[#allocation5 + $0x5e0] sm:$0xff]  ;;  %p6302_p1 = scmp.ne.s32.totalorder %s5387_s2, %s6301_s30  ;;  %p6307_p3 = scmp.lt.s32.totalorder %s6301_s30, %s6301_s30 }
  0x2a   :  { %v101_v6 = vld [vmem:[#allocation5 + $0x180] sm:$0xff]  ;;  %v5478_v8 = vcombine.high %v135_v2, %v136_v4  ;;  %v5477_v9 = vcombine.low %v135_v2, %v136_v4  ;;  %1017 = vmatprep.subr.bf16.mxu0 %v5446_v3  ;;  %1122 = vmatprep.mubr.bf16.mxu1 %v6380_v63 }
  0x2b   :  { %v102_v7 = vld [vmem:[#allocation5 + $0x1a0] sm:$0xff]  ;;  %1018 = vmatpush1.bf16.msra.mxu0 %v5445_v5  ;;  %p6308_p4 = por %p6307_p3, %p6306_p2 }
  0x2c   :  { %v5444_v10 = vcombine.high %v101_v6, %v102_v7  ;;  %v133_v11 = vld [vmem:[#allocation5 + $0x580] sm:$0xff]  ;;  %1090 = vmatprep.subr.bf16.mxu1 %v5478_v8  ;;  %v5443_v18 = vcombine.low %v101_v6, %v102_v7 }
  0x2d   :  { %v134_v12 = vld [vmem:[#allocation5 + $0x5a0] sm:$0xff]  ;;  %1091 = vmatpush1.bf16.msra.mxu1 %v5477_v9  ;;  %p6309_p5 = pnand %p6308_p4, %p6302_p1 }
  0x2e   :  { %v99_v13 = vld [vmem:[#allocation5 + $0x140] sm:$0xff]  ;;  %v5476_v14 = vcombine.high %v133_v11, %v134_v12  ;;  %1019 = vmatprep.subr.bf16.mxu0 %v5444_v10  ;;  %v5475_v19 = vcombine.low %v133_v11, %v134_v12 }
  0x2f   :  { %v100_v15 = vld [vmem:[#allocation5 + $0x160] sm:$0xff]  ;;  %1020 = vmatpush1.bf16.msra.mxu0 %v5443_v18 }
  0x30   :  { %v131_v16 = vld [vmem:[#allocation5 + $0x540] sm:$0xff]  ;;  %v5442_v20 = vcombine.high %v99_v13, %v100_v15  ;;  %1092 = vmatprep.subr.bf16.mxu1 %v5476_v14  ;;  %v5441_v26 = vcombine.low %v99_v13, %v100_v15 }
  0x31   :  { %v132_v17 = vld [vmem:[#allocation5 + $0x560] sm:$0xff]  ;;  %1093 = vmatpush1.bf16.msra.mxu1 %v5475_v19 }
  0x32   :  { %v5474_v21 = vcombine.high %v131_v16, %v132_v17  ;;  %v97_v22 = vld [vmem:[#allocation5 + $0x100] sm:$0xff]  ;;  %1021 = vmatprep.subr.bf16.mxu0 %v5442_v20  ;;  %v5473_v27 = vcombine.low %v131_v16, %v132_v17 }
  0x33   :  { %v98_v23 = vld [vmem:[#allocation5 + $0x120] sm:$0xff]  ;;  %1022 = vmatpush1.bf16.msra.mxu0 %v5441_v26 }
  0x34   :  { %v129_v24 = vld [vmem:[#allocation5 + $0x500] sm:$0xff]  ;;  %v5440_v28 = vcombine.high %v97_v22, %v98_v23  ;;  %1094 = vmatprep.subr.bf16.mxu1 %v5474_v21  ;;  %v5439_v34 = vcombine.low %v97_v22, %v98_v23 }
  0x35   :  { %v130_v25 = vld [vmem:[#allocation5 + $0x520] sm:$0xff]  ;;  %1095 = vmatpush1.bf16.msra.mxu1 %v5473_v27 }
  0x36   :  { %v5472_v29 = vcombine.high %v129_v24, %v130_v25  ;;  %v95_v30 = vld [vmem:[#allocation5 + $0xc0] sm:$0xff]  ;;  %1023 = vmatprep.subr.bf16.mxu0 %v5440_v28  ;;  %v5471_v35 = vcombine.low %v129_v24, %v130_v25 }
  0x37   :  { %v96_v31 = vld [vmem:[#allocation5 + $0xe0] sm:$0xff]  ;;  %1024 = vmatpush1.bf16.msra.mxu0 %v5439_v34 }
  0x38   :  { %v127_v32 = vld [vmem:[#allocation5 + $0x4c0] sm:$0xff]  ;;  %v5438_v36 = vcombine.high %v95_v30, %v96_v31  ;;  %1096 = vmatprep.subr.bf16.mxu1 %v5472_v29  ;;  %v5437_v42 = vcombine.low %v95_v30, %v96_v31 }
  0x39   :  { %v128_v33 = vld [vmem:[#allocation5 + $0x4e0] sm:$0xff]  ;;  %1097 = vmatpush1.bf16.msra.mxu1 %v5471_v35 }
  0x3a   :  { %v5470_v37 = vcombine.high %v127_v32, %v128_v33  ;;  %v93_v38 = vld [vmem:[#allocation5 + $0x80] sm:$0xff]  ;;  %1025 = vmatprep.subr.bf16.mxu0 %v5438_v36  ;;  %v5469_v43 = vcombine.low %v127_v32, %v128_v33 }
  0x3b   :  { %v94_v39 = vld [vmem:[#allocation5 + $0xa0] sm:$0xff]  ;;  %1026 = vmatpush1.bf16.msra.mxu0 %v5437_v42 }
  0x3c   :  { %v125_v40 = vld [vmem:[#allocation5 + $0x480] sm:$0xff]  ;;  %v5436_v44 = vcombine.high %v93_v38, %v94_v39  ;;  %1098 = vmatprep.subr.bf16.mxu1 %v5470_v37  ;;  %v5435_v50 = vcombine.low %v93_v38, %v94_v39 }
  0x3d   :  { %v126_v41 = vld [vmem:[#allocation5 + $0x4a0] sm:$0xff]  ;;  %1099 = vmatpush1.bf16.msra.mxu1 %v5469_v43 }
  0x3e   :  { %v5468_v45 = vcombine.high %v125_v40, %v126_v41  ;;  %v91_v46 = vld [vmem:[#allocation5 + $0x40] sm:$0xff]  ;;  %1027 = vmatprep.subr.bf16.mxu0 %v5436_v44  ;;  %v5467_v51 = vcombine.low %v125_v40, %v126_v41 }
  0x3f   :  { %v92_v47 = vld [vmem:[#allocation5 + $0x60] sm:$0xff]  ;;  %1028 = vmatpush1.bf16.msra.mxu0 %v5435_v50 }
  0x40   :  { %v123_v48 = vld [vmem:[#allocation5 + $0x440] sm:$0xff]  ;;  %v5434_v52 = vcombine.high %v91_v46, %v92_v47  ;;  %1100 = vmatprep.subr.bf16.mxu1 %v5468_v45  ;;  %v5433_v0 = vcombine.low %v91_v46, %v92_v47 }
  0x41   :  { %v124_v49 = vld [vmem:[#allocation5 + $0x460] sm:$0xff]  ;;  %1101 = vmatpush1.bf16.msra.mxu1 %v5467_v51 }
  0x42   :  { %v89_v53 = vld [vmem:[#allocation5] sm:$0xff]  ;;  %v5466_v56 = vcombine.high %v123_v48, %v124_v49  ;;  %1029 = vmatprep.subr.bf16.mxu0 %v5434_v52  ;;  %v5465_v1 = vcombine.low %v123_v48, %v124_v49 }
  0x43   :  { %v6366_v54 = vld [vmem:[#allocation2] sm:$0xff]  ;;  %1030 = vmatpush1.bf16.msra.mxu0 %v5433_v0 }
  0x44   :  { %v6368_v55 = vld [vmem:[#allocation2 + $0x20] sm:$0xff]  ;;  %1102 = vmatprep.subr.bf16.mxu1 %v5466_v56 }
  0x45   :  { %v90_v57 = vld [vmem:[#allocation5 + $0x20] sm:$0xff]  ;;  %v6372_v58 = vcombine.high %v6366_v54, %v6368_v55  ;;  %1103 = vmatpush1.bf16.msra.mxu1 %v5465_v1 }
  0x46   :  { %v121_v61 = vld [vmem:[#allocation5 + $0x400] sm:$0xff]  ;;  %v5432_v2 = vcombine.high %v89_v53, %v90_v57  ;;  %v5431_v8 = vcombine.low %v89_v53, %v90_v57 }
  0x47   :  { %7045 = vst [vmem:[#allocation12_spill] sm:$0xff] %v6372_v58  ;;  %v122_v62 = vld [vmem:[#allocation5 + $0x420] sm:$0xff]  ;;  %1049 = vmatprep.mubr.bf16.mxu0 %v6372_v58 }
  0x48   :  { %v5464_v3 = vcombine.high %v121_v61, %v122_v62  ;;  %v119_v4 = vld [vmem:[#allocation5 + $0x3c0] sm:$0xff]  ;;  %1031 = vmatprep.subr.bf16.mxu0 %v5432_v2  ;;  %v5463_v9 = vcombine.low %v121_v61, %v122_v62 }
  0x49   :  { %v120_v5 = vld [vmem:[#allocation5 + $0x3e0] sm:$0xff]  ;;  %1032 = vmatpush1.bf16.msra.mxu0 %v5431_v8 }
  0x4a   :  { %v151_v6 = vld [vmem:[#allocation5 + $0x7c0] sm:$0xff]  ;;  %v5462_v10 = vcombine.high %v119_v4, %v120_v5  ;;  %1104 = vmatprep.subr.bf16.mxu1 %v5464_v3  ;;  %v5461_v16 = vcombine.low %v119_v4, %v120_v5 }
  0x4b   :  { %v152_v7 = vld [vmem:[#allocation5 + $0x7e0] sm:$0xff]  ;;  %1105 = vmatpush1.bf16.msra.mxu1 %v5463_v9 }
  0x4c   :  { %v5494_v11 = vcombine.high %v151_v6, %v152_v7  ;;  %v117_v12 = vld [vmem:[#allocation5 + $0x380] sm:$0xff]  ;;  %1033 = vmatprep.subr.bf16.mxu0 %v5462_v10  ;;  %v5493_v17 = vcombine.low %v151_v6, %v152_v7 }
  0x4d   :  { %v118_v13 = vld [vmem:[#allocation5 + $0x3a0] sm:$0xff]  ;;  %1034 = vmatpush2.bf16.msra.mxu0 %v5461_v16 }
  0x4e   :  { %v149_v14 = vld [vmem:[#allocation5 + $0x780] sm:$0xff]  ;;  %v5460_v18 = vcombine.high %v117_v12, %v118_v13  ;;  %1106 = vmatprep.subr.bf16.mxu1 %v5494_v11  ;;  %v5459_v24 = vcombine.low %v117_v12, %v118_v13 }
  0x4f   :  { %v150_v15 = vld [vmem:[#allocation5 + $0x7a0] sm:$0xff]  ;;  %1107 = vmatpush2.bf16.msra.mxu1 %v5493_v17 }
  0x50   :  { %v5492_v19 = vcombine.high %v149_v14, %v150_v15  ;;  %v115_v20 = vld [vmem:[#allocation5 + $0x340] sm:$0xff]  ;;  %1035 = vmatprep.subr.bf16.mxu0 %v5460_v18  ;;  %v5491_v25 = vcombine.low %v149_v14, %v150_v15 }
  0x51   :  { %v116_v21 = vld [vmem:[#allocation5 + $0x360] sm:$0xff]  ;;  %1036 = vmatpush2.bf16.msra.mxu0 %v5459_v24 }
  0x52   :  { %v147_v22 = vld [vmem:[#allocation5 + $0x740] sm:$0xff]  ;;  %v5458_v26 = vcombine.high %v115_v20, %v116_v21  ;;  %1108 = vmatprep.subr.bf16.mxu1 %v5492_v19  ;;  %v5457_v32 = vcombine.low %v115_v20, %v116_v21  ;;  %v6386_v21 = vcombine.low %v6366_v54, %v6368_v55 }
  0x53   :  { %v148_v23 = vld [vmem:[#allocation5 + $0x760] sm:$0xff]  ;;  %1109 = vmatpush2.bf16.msra.mxu1 %v5491_v25  ;;  %v6390_v25 = vcombine.low %v6374_v59, %v6376_v60 }
  0x54   :  { %v5490_v27 = vcombine.high %v147_v22, %v148_v23  ;;  %v113_v28 = vld [vmem:[#allocation5 + $0x300] sm:$0xff]  ;;  %1037 = vmatprep.subr.bf16.mxu0 %v5458_v26  ;;  %v5489_v33 = vcombine.low %v147_v22, %v148_v23  ;;  %7046 = vst [vmem:[#allocation13_spill] sm:$0xff] %v6386_v21 }
  0x55   :  { %v114_v29 = vld [vmem:[#allocation5 + $0x320] sm:$0xff]  ;;  %1038 = vmatpush2.bf16.msra.mxu0 %v5457_v32 }
  0x56   :  { %v145_v30 = vld [vmem:[#allocation5 + $0x700] sm:$0xff]  ;;  %v5456_v34 = vcombine.high %v113_v28, %v114_v29  ;;  %1110 = vmatprep.subr.bf16.mxu1 %v5490_v27  ;;  %v5455_v40 = vcombine.low %v113_v28, %v114_v29  ;;  %v66_v27 = vld [vmem:[#allocation2 + $0x48] sm:$0xff] }
  0x57   :  { %v146_v31 = vld [vmem:[#allocation5 + $0x720] sm:$0xff]  ;;  %1111 = vmatpush2.bf16.msra.mxu1 %v5489_v33  ;;  %v70_v28 = vld [vmem:[#allocation2 + $0x68] sm:$0xff] }
  0x58   :  { %v5488_v35 = vcombine.high %v145_v30, %v146_v31  ;;  %v111_v36 = vld [vmem:[#allocation5 + $0x2c0] sm:$0xff]  ;;  %1039 = vmatprep.subr.bf16.mxu0 %v5456_v34  ;;  %v5487_v41 = vcombine.low %v145_v30, %v146_v31 }
  0x59   :  { %v112_v37 = vld [vmem:[#allocation5 + $0x2e0] sm:$0xff]  ;;  %1040 = vmatpush2.bf16.msra.mxu0 %v5455_v40 }
  0x5a   :  { %v143_v38 = vld [vmem:[#allocation5 + $0x6c0] sm:$0xff]  ;;  %v5454_v42 = vcombine.high %v111_v36, %v112_v37  ;;  %1112 = vmatprep.subr.bf16.mxu1 %v5488_v35  ;;  %v5453_v48 = vcombine.low %v111_v36, %v112_v37  ;;  %v6395_v35 = vcombine.high %v66_v27, %v70_v28 }
  0x5b   :  { %v144_v39 = vld [vmem:[#allocation5 + $0x6e0] sm:$0xff]  ;;  %1113 = vmatpush2.bf16.msra.mxu1 %v5487_v41 }
  0x5c   :  { %v5486_v43 = vcombine.high %v143_v38, %v144_v39  ;;  %v109_v44 = vld [vmem:[#allocation5 + $0x280] sm:$0xff]  ;;  %1041 = vmatprep.subr.bf16.mxu0 %v5454_v42  ;;  %v5485_v49 = vcombine.low %v143_v38, %v144_v39 }
  0x5d   :  { %v110_v45 = vld [vmem:[#allocation5 + $0x2a0] sm:$0xff]  ;;  %1042 = vmatpush2.bf16.msra.mxu0 %v5453_v48  ;;  %v78_v48 = vld [vmem:[#allocation2 + $0xa8] sm:$0xff] }
  0x5e   :  { %v141_v46 = vld [vmem:[#allocation5 + $0x680] sm:$0xff]  ;;  %v5452_v50 = vcombine.high %v109_v44, %v110_v45  ;;  %1114 = vmatprep.subr.bf16.mxu1 %v5486_v43  ;;  %v5451_v61 = vcombine.low %v109_v44, %v110_v45 }
  0x5f   :  { %v142_v47 = vld [vmem:[#allocation5 + $0x6a0] sm:$0xff]  ;;  %1115 = vmatpush2.bf16.msra.mxu1 %v5485_v49 }
  0x60   :  { %v5484_v51 = vcombine.high %v141_v46, %v142_v47  ;;  %v107_v52 = vld [vmem:[#allocation5 + $0x240] sm:$0xff]  ;;  %1043 = vmatprep.subr.bf16.mxu0 %v5452_v50  ;;  %v5483_v62 = vcombine.low %v141_v46, %v142_v47  ;;  %v6402_v46 = vcombine.low %v66_v27, %v70_v28  ;;  %v74_v47 = vld [vmem:[#allocation2 + $0x88] sm:$0xff] }
  0x61   :  { %v108_v53 = vld [vmem:[#allocation5 + $0x260] sm:$0xff]  ;;  %1044 = vmatpush2.bf16.msra.mxu0 %v5451_v61 }
  0x62   :  { %v139_v56 = vld [vmem:[#allocation5 + $0x640] sm:$0xff]  ;;  %v5450_v0 = vcombine.high %v107_v52, %v108_v53  ;;  %1116 = vmatprep.subr.bf16.mxu1 %v5484_v51  ;;  %v5449_v6 = vcombine.low %v107_v52, %v108_v53 }
  0x63   :  { %v140_v57 = vld [vmem:[#allocation5 + $0x660] sm:$0xff]  ;;  %1117 = vmatpush2.bf16.msra.mxu1 %v5483_v62  ;;  %v6407_v62 = vcombine.high %v74_v47, %v78_v48 }
  0x64   :  { %v5482_v1 = vcombine.high %v139_v56, %v140_v57  ;;  %v105_v2 = vld [vmem:[#allocation5 + $0x200] sm:$0xff]  ;;  %1045 = vmatprep.subr.bf16.mxu0 %v5450_v0  ;;  %v5481_v7 = vcombine.low %v139_v56, %v140_v57 }
  0x65   :  { %v106_v3 = vld [vmem:[#allocation5 + $0x220] sm:$0xff]  ;;  %1046 = vmatpush2.bf16.msra.mxu0 %v5449_v6 }
  0x66   :  { %v137_v4 = vld [vmem:[#allocation5 + $0x600] sm:$0xff]  ;;  %v5448_v8 = vcombine.high %v105_v2, %v106_v3  ;;  %1118 = vmatprep.subr.bf16.mxu1 %v5482_v1  ;;  %v5447_v14 = vcombine.low %v105_v2, %v106_v3 }
  0x67   :  { %v138_v5 = vld [vmem:[#allocation5 + $0x620] sm:$0xff]  ;;  %1119 = vmatpush2.bf16.msra.mxu1 %v5481_v7 }
  0x68   :  { %v5480_v9 = vcombine.high %v137_v4, %v138_v5  ;;  %v167_v10 = vld [vmem:[#allocation5 + $0x9c0] sm:$0xff]  ;;  %1047 = vmatprep.subr.bf16.mxu0 %v5448_v8  ;;  %v5479_v15 = vcombine.low %v137_v4, %v138_v5 }
  0x69   :  { %v168_v11 = vld [vmem:[#allocation5 + $0x9e0] sm:$0xff]  ;;  %1048 = vmatpush2.bf16.msra.mxu0 %v5447_v14  ;;  %v6414_v14 = vcombine.low %v74_v47, %v78_v48 }
  0x6a   :  { %v199_v12 = vld [vmem:[#allocation5 + $0xdc0] sm:$0xff]  ;;  %v5510_v16 = vcombine.high %v167_v10, %v168_v11  ;;  %1120 = vmatprep.subr.bf16.mxu1 %v5480_v9  ;;  %v5509_v26 = vcombine.low %v167_v10, %v168_v11  ;;  %v82_v11 = vld [vmem:[#allocation2 + $0xc8] sm:$0xff] }
  0x6b   :  { %v200_v13 = vld [vmem:[#allocation5 + $0xde0] sm:$0xff]  ;;  %1121 = vmatpush2.bf16.msra.mxu1 %v5479_v15  ;;  %7051 = vst [vmem:[#allocation18_spill] sm:$0xff] %v6414_v14 }
  0x6c   :  { %v5542_v17 = vcombine.high %v199_v12, %v200_v13  ;;  %v165_v18 = vld [vmem:[#allocation5 + $0x980] sm:$0xff]  ;;  %1163 = vmatprep.subr.bf16.mxu0 %v5510_v16  ;;  %v5541_v29 = vcombine.low %v199_v12, %v200_v13  ;;  %1050 = vmatmul.mubr.bf16.vlgmr.msra.gmra.mxu0 %v6386_v21  ;;  %v86_v12 = vld [vmem:[#allocation2 + $0xe8] sm:$0xff] }
  0x6d   :  { %v166_v19 = vld [vmem:[#allocation5 + $0x9a0] sm:$0xff]  ;;  %1164 = vmatpush1.bf16.msra.mxu0 %v5509_v26 }
  0x6e   :  { %v197_v20 = vld [vmem:[#allocation5 + $0xd80] sm:$0xff]  ;;  %v5508_v30 = vcombine.high %v165_v18, %v166_v19  ;;  %1236 = vmatprep.subr.bf16.mxu1 %v5542_v17  ;;  %1123 = vmatmul.mubr.bf16.vlgmr.msra.gmra.mxu1 %v6390_v25  ;;  %v5507_v59 = vcombine.low %v165_v18, %v166_v19 }
  0x6f   :  { %v198_v22 = vld [vmem:[#allocation5 + $0xda0] sm:$0xff]  ;;  %1237 = vmatpush1.bf16.msra.mxu1 %v5541_v29  ;;  %1132 = vmatprep.mubr.bf16.mxu1 %v6395_v35 }
  0x70   :  { %v65_v23 = vld [vmem:[#allocation2 + $0x40] sm:$0xff]  ;;  %v5540_v31 = vcombine.high %v197_v20, %v198_v22  ;;  %1165 = vmatprep.subr.bf16.mxu0 %v5508_v30  ;;  %v5539_v60 = vcombine.low %v197_v20, %v198_v22 }
  0x71   :  { %v69_v24 = vld [vmem:[#allocation2 + $0x60] sm:$0xff]  ;;  %1166 = vmatpush1.bf16.msra.mxu0 %v5507_v59  ;;  %v6427_v59 = vld [vmem:[#allocation2 + $0x18] sm:$0xff] }
  0x72   :  { %v163_v32 = vld [vmem:[#allocation5 + $0x940] sm:$0xff]  ;;  %v6392_v55 = vcombine.high %v65_v23, %v69_v24  ;;  %1238 = vmatprep.subr.bf16.mxu1 %v5540_v31  ;;  %v6400_v42 = vcombine.low %v65_v23, %v69_v24  ;;  %v6419_v24 = vcombine.high %v82_v11, %v86_v12 }
  0x73   :  { %v164_v54 = vld [vmem:[#allocation5 + $0x960] sm:$0xff]  ;;  %1239 = vmatpush1.bf16.msra.mxu1 %v5539_v60  ;;  %v6429_v60 = vld [vmem:[#allocation2 + $0x38] sm:$0xff] }
  0x74   :  { %7047 = vst [vmem:[#allocation14_spill] sm:$0xff] %v6392_v55  ;;  %v195_v33 = vld [vmem:[#allocation5 + $0xd40] sm:$0xff]  ;;  %v5506_v36 = vcombine.high %v163_v32, %v164_v54  ;;  %1059 = vmatprep.mubr.bf16.mxu0 %v6392_v55  ;;  %7048 = vst [vmem:[#allocation15_spill] sm:$0xff] %v6400_v42  ;;  %v5505_v45 = vcombine.low %v163_v32, %v164_v54  ;;  %v6422_v54 = vld [vmem:[#allocation2 + $0x10] sm:$0xff] }
  0x75   :  { %v196_v34 = vld [vmem:[#allocation5 + $0xd60] sm:$0xff]  ;;  %1060 = vmatmul.mubr.bf16.gmra.mxu0 %v6400_v42  ;;  %7053 = vst [vmem:[#allocation20_spill] sm:$0xff] %v6419_v24 }
  0x76   :  { %v5538_v37 = vcombine.high %v195_v33, %v196_v34  ;;  %v161_v38 = vld [vmem:[#allocation5 + $0x900] sm:$0xff]  ;;  %1167 = vmatprep.subr.bf16.mxu0 %v5506_v36  ;;  %v5537_v49 = vcombine.low %v195_v33, %v196_v34  ;;  %1133 = vmatmul.mubr.bf16.gmra.mxu1 %v6402_v46  ;;  %v6424_v33 = vld [vmem:[#allocation2 + $0x30] sm:$0xff] }
  0x77   :  { %v162_v39 = vld [vmem:[#allocation5 + $0x920] sm:$0xff]  ;;  %1168 = vmatpush1.bf16.msra.mxu0 %v5505_v45  ;;  %1142 = vmatprep.mubr.bf16.mxu1 %v6407_v62  ;;  %v6438_v48 = vcombine.high %v6422_v54, %v6424_v33 }
  0x78   :  { %v193_v40 = vld [vmem:[#allocation5 + $0xd00] sm:$0xff]  ;;  %v5504_v50 = vcombine.high %v161_v38, %v162_v39  ;;  %1240 = vmatprep.subr.bf16.mxu1 %v5538_v37  ;;  %v5503_v0 = vcombine.low %v161_v38, %v162_v39  ;;  %v6434_v38 = vcombine.low %v82_v11, %v86_v12 }
  0x79   :  { %v194_v41 = vld [vmem:[#allocation5 + $0xd20] sm:$0xff]  ;;  %1241 = vmatpush1.bf16.msra.mxu1 %v5537_v49  ;;  %7056 = vst [vmem:[#allocation23_spill] sm:$0xff] %v6438_v48  ;;  %v6443_v49 = vcombine.high %v6427_v59, %v6429_v60 }
  0x7a   :  { %v73_v43 = vld [vmem:[#allocation2 + $0x80] sm:$0xff]  ;;  %v5536_v51 = vcombine.high %v193_v40, %v194_v41  ;;  %1169 = vmatprep.subr.bf16.mxu0 %v5504_v50  ;;  %v5535_v1 = vcombine.low %v193_v40, %v194_v41  ;;  %7055 = vst [vmem:[#allocation22_spill] sm:$0xff] %v6434_v38 }
  0x7b   :  { %v77_v44 = vld [vmem:[#allocation2 + $0xa0] sm:$0xff]  ;;  %1170 = vmatpush1.bf16.msra.mxu0 %v5503_v0  ;;  %7057 = vst [vmem:[#allocation24_spill] sm:$0xff] %v6443_v49 }
  0x7c   :  { %v159_v52 = vld [vmem:[#allocation5 + $0x8c0] sm:$0xff]  ;;  %v6404_v56 = vcombine.high %v73_v43, %v77_v44  ;;  %1242 = vmatprep.subr.bf16.mxu1 %v5536_v51  ;;  %v6412_v9 = vcombine.low %v73_v43, %v77_v44 }
  0x7d   :  { %v160_v53 = vld [vmem:[#allocation5 + $0x8e0] sm:$0xff]  ;;  %1243 = vmatpush1.bf16.msra.mxu1 %v5535_v1 }
  0x7e   :  { %7049 = vst [vmem:[#allocation16_spill] sm:$0xff] %v6404_v56  ;;  %v191_v57 = vld [vmem:[#allocation5 + $0xcc0] sm:$0xff]  ;;  %v5502_v2 = vcombine.high %v159_v52, %v160_v53  ;;  %1069 = vmatprep.mubr.bf16.mxu0 %v6404_v56  ;;  %7050 = vst [vmem:[#allocation17_spill] sm:$0xff] %v6412_v9  ;;  %v5501_v13 = vcombine.low %v159_v52, %v160_v53  ;;  %1143 = vmatmul.mubr.bf16.gmra.mxu1 %v6414_v14 }
  0x7f   :  { %v192_v61 = vld [vmem:[#allocation5 + $0xce0] sm:$0xff]  ;;  %1070 = vmatmul.mubr.bf16.gmra.mxu0 %v6412_v9  ;;  %1152 = vmatprep.mubr.bf16.mxu1 %v6419_v24 }
  0x80   :  { %v157_v3 = vld [vmem:[#allocation5 + $0x880] sm:$0xff]  ;;  %v5534_v5 = vcombine.high %v191_v57, %v192_v61  ;;  %1171 = vmatprep.subr.bf16.mxu0 %v5502_v2  ;;  %v5533_v15 = vcombine.low %v191_v57, %v192_v61 }
  0x81   :  { %v158_v4 = vld [vmem:[#allocation5 + $0x8a0] sm:$0xff]  ;;  %1172 = vmatpush1.bf16.msra.mxu0 %v5501_v13 }
  0x82   :  { %v189_v6 = vld [vmem:[#allocation5 + $0xc80] sm:$0xff]  ;;  %v5500_v16 = vcombine.high %v157_v3, %v158_v4  ;;  %1244 = vmatprep.subr.bf16.mxu1 %v5534_v5  ;;  %v5499_v26 = vcombine.low %v157_v3, %v158_v4 }
  0x83   :  { %v190_v7 = vld [vmem:[#allocation5 + $0xca0] sm:$0xff]  ;;  %1245 = vmatpush1.bf16.msra.mxu1 %v5533_v15 }
  0x84   :  { %v81_v8 = vld [vmem:[#allocation2 + $0xc0] sm:$0xff]  ;;  %v5532_v20 = vcombine.high %v189_v6, %v190_v7  ;;  %1173 = vmatprep.subr.bf16.mxu0 %v5500_v16  ;;  %v5531_v29 = vcombine.low %v189_v6, %v190_v7 }
  0x85   :  { %v85_v10 = vld [vmem:[#allocation2 + $0xe0] sm:$0xff]  ;;  %1174 = vmatpush1.bf16.msra.mxu0 %v5499_v26 }
  0x86   :  { %v155_v17 = vld [vmem:[#allocation5 + $0x840] sm:$0xff]  ;;  %v6416_v23 = vcombine.high %v81_v8, %v85_v10  ;;  %1246 = vmatprep.subr.bf16.mxu1 %v5532_v20  ;;  %v6432_v36 = vcombine.low %v81_v8, %v85_v10  ;;  %1153 = vmatmul.mubr.bf16.gmra.mxu1 %v6434_v38 }
  0x87   :  { %v156_v18 = vld [vmem:[#allocation5 + $0x860] sm:$0xff]  ;;  %1247 = vmatpush1.bf16.msra.mxu1 %v5531_v29  ;;  %1268 = vmatprep.mubr.bf16.mxu1 %v6443_v49 }
  0x88   :  { %v187_v19 = vld [vmem:[#allocation5 + $0xc40] sm:$0xff]  ;;  %7052 = vst [vmem:[#allocation19_spill] sm:$0xff] %v6416_v23  ;;  %v5498_v30 = vcombine.high %v155_v17, %v156_v18  ;;  %1079 = vmatprep.mubr.bf16.mxu0 %v6416_v23  ;;  %7054 = vst [vmem:[#allocation21_spill] sm:$0xff] %v6432_v36  ;;  %v5497_v37 = vcombine.low %v155_v17, %v156_v18 }
  0x89   :  { %v188_v22 = vld [vmem:[#allocation5 + $0xc60] sm:$0xff]  ;;  %1080 = vmatmul.mubr.bf16.gmra.mxu0 %v6432_v36 }
  0x8a   :  { %v153_v27 = vld [vmem:[#allocation5 + $0x800] sm:$0xff]  ;;  %v5530_v34 = vcombine.high %v187_v19, %v188_v22  ;;  %1175 = vmatprep.subr.bf16.mxu0 %v5498_v30  ;;  %v5529_v39 = vcombine.low %v187_v19, %v188_v22  ;;  %1195 = vmatprep.mubr.bf16.mxu0 %v6438_v48 }
  0x8b   :  { %v154_v28 = vld [vmem:[#allocation5 + $0x820] sm:$0xff]  ;;  %1176 = vmatpush1.bf16.msra.mxu0 %v5497_v37 }
  0x8c   :  { %v185_v31 = vld [vmem:[#allocation5 + $0xc00] sm:$0xff]  ;;  %v5496_v40 = vcombine.high %v153_v27, %v154_v28  ;;  %1248 = vmatprep.subr.bf16.mxu1 %v5530_v34  ;;  %v5495_v50 = vcombine.low %v153_v27, %v154_v28 }
  0x8d   :  { %v186_v32 = vld [vmem:[#allocation5 + $0xc20] sm:$0xff]  ;;  %1249 = vmatpush1.bf16.msra.mxu1 %v5529_v39 }
  0x8e   :  { %v183_v41 = vld [vmem:[#allocation5 + $0xbc0] sm:$0xff]  ;;  %v5528_v45 = vcombine.high %v185_v31, %v186_v32  ;;  %1177 = vmatprep.subr.bf16.mxu0 %v5496_v40  ;;  %v5527_v51 = vcombine.low %v185_v31, %v186_v32 }
  0x8f   :  { %v184_v43 = vld [vmem:[#allocation5 + $0xbe0] sm:$0xff]  ;;  %1178 = vmatpush1.bf16.msra.mxu0 %v5495_v50 }
  0x90   :  { %v215_v44 = vld [vmem:[#allocation5 + $0xfc0] sm:$0xff]  ;;  %v5526_v52 = vcombine.high %v183_v41, %v184_v43  ;;  %1250 = vmatprep.subr.bf16.mxu1 %v5528_v45  ;;  %v5525_v2 = vcombine.low %v183_v41, %v184_v43 }
  0x91   :  { %v216_v47 = vld [vmem:[#allocation5 + $0xfe0] sm:$0xff]  ;;  %1251 = vmatpush1.bf16.msra.mxu1 %v5527_v51 }
  0x92   :  { %v181_v53 = vld [vmem:[#allocation5 + $0xb80] sm:$0xff]  ;;  %v5558_v0 = vcombine.high %v215_v44, %v216_v47  ;;  %1179 = vmatprep.subr.bf16.mxu0 %v5526_v52  ;;  %v5557_v3 = vcombine.low %v215_v44, %v216_v47 }
  0x93   :  { %v182_v57 = vld [vmem:[#allocation5 + $0xba0] sm:$0xff]  ;;  %1180 = vmatpush2.bf16.msra.mxu0 %v5525_v2 }
  0x94   :  { %v213_v61 = vld [vmem:[#allocation5 + $0xf80] sm:$0xff]  ;;  %v5524_v4 = vcombine.high %v181_v53, %v182_v57  ;;  %1252 = vmatprep.subr.bf16.mxu1 %v5558_v0  ;;  %v5523_v11 = vcombine.low %v181_v53, %v182_v57 }
  0x95   :  { %v214_v1 = vld [vmem:[#allocation5 + $0xfa0] sm:$0xff]  ;;  %1253 = vmatpush2.bf16.msra.mxu1 %v5557_v3 }
  0x96   :  { %v179_v5 = vld [vmem:[#allocation5 + $0xb40] sm:$0xff]  ;;  %v5556_v8 = vcombine.high %v213_v61, %v214_v1  ;;  %1181 = vmatprep.subr.bf16.mxu0 %v5524_v4  ;;  %v5555_v12 = vcombine.low %v213_v61, %v214_v1 }
  0x97   :  { %v180_v6 = vld [vmem:[#allocation5 + $0xb60] sm:$0xff]  ;;  %1182 = vmatpush2.bf16.msra.mxu0 %v5523_v11 }
  0x98   :  { %v211_v7 = vld [vmem:[#allocation5 + $0xf40] sm:$0xff]  ;;  %v5522_v13 = vcombine.high %v179_v5, %v180_v6  ;;  %1254 = vmatprep.subr.bf16.mxu1 %v5556_v8  ;;  %v5521_v20 = vcombine.low %v179_v5, %v180_v6 }
  0x99   :  { %v212_v10 = vld [vmem:[#allocation5 + $0xf60] sm:$0xff]  ;;  %1255 = vmatpush2.bf16.msra.mxu1 %v5555_v12  ;;  %v1379_v12 = vld [vmem:[#allocation5 + $0x1c8] sm:$0xff] }
  0x9a   :  { %v177_v15 = vld [vmem:[#allocation5 + $0xb00] sm:$0xff]  ;;  %v5554_v18 = vcombine.high %v211_v7, %v212_v10  ;;  %1183 = vmatprep.subr.bf16.mxu0 %v5522_v13  ;;  %v5553_v22 = vcombine.low %v211_v7, %v212_v10  ;;  %v1380_v13 = vld [vmem:[#allocation5 + $0x1e8] sm:$0xff] }
  0x9b   :  { %v178_v16 = vld [vmem:[#allocation5 + $0xb20] sm:$0xff]  ;;  %1184 = vmatpush2.bf16.msra.mxu0 %v5521_v20  ;;  %v1378_v20 = vld [vmem:[#allocation5 + $0x1a8] sm:$0xff] }
  0x9c   :  { %v209_v17 = vld [vmem:[#allocation5 + $0xf00] sm:$0xff]  ;;  %v5520_v26 = vcombine.high %v177_v15, %v178_v16  ;;  %1256 = vmatprep.subr.bf16.mxu1 %v5554_v18  ;;  %v5519_v32 = vcombine.low %v177_v15, %v178_v16  ;;  %v1411_v15 = vld [vmem:[#allocation5 + $0x5c8] sm:$0xff] }
  0x9d   :  { %v210_v19 = vld [vmem:[#allocation5 + $0xf20] sm:$0xff]  ;;  %1257 = vmatpush2.bf16.msra.mxu1 %v5553_v22 }
  0x9e   :  { %v175_v27 = vld [vmem:[#allocation5 + $0xac0] sm:$0xff]  ;;  %v5552_v30 = vcombine.high %v209_v17, %v210_v19  ;;  %1185 = vmatprep.subr.bf16.mxu0 %v5520_v26  ;;  %v5551_v34 = vcombine.low %v209_v17, %v210_v19  ;;  %v1412_v17 = vld [vmem:[#allocation5 + $0x5e8] sm:$0xff]  ;;  %v5574_v26 = vcombine.high %v1379_v12, %v1380_v13 }
  0x9f   :  { %v176_v28 = vld [vmem:[#allocation5 + $0xae0] sm:$0xff]  ;;  %1186 = vmatpush2.bf16.msra.mxu0 %v5519_v32  ;;  %v1377_v19 = vld [vmem:[#allocation5 + $0x188] sm:$0xff]  ;;  %v68_v32 = vld [vmem:[#allocation2 + $0x58] sm:$0xff] }
  0xa0   :  { %v207_v29 = vld [vmem:[#allocation5 + $0xec0] sm:$0xff]  ;;  %v5518_v37 = vcombine.high %v175_v27, %v176_v28  ;;  %1258 = vmatprep.subr.bf16.mxu1 %v5552_v30  ;;  %v5517_v45 = vcombine.low %v175_v27, %v176_v28  ;;  %v1409_v27 = vld [vmem:[#allocation5 + $0x588] sm:$0xff]  ;;  %v71_v30 = vld [vmem:[#allocation2 + $0x70] sm:$0xff] }
  0xa1   :  { %v208_v31 = vld [vmem:[#allocation5 + $0xee0] sm:$0xff]  ;;  %1259 = vmatpush2.bf16.msra.mxu1 %v5551_v34  ;;  %v1410_v28 = vld [vmem:[#allocation5 + $0x5a8] sm:$0xff]  ;;  %v72_v34 = vld [vmem:[#allocation2 + $0x78] sm:$0xff] }
  0xa2   :  { %v173_v39 = vld [vmem:[#allocation5 + $0xa80] sm:$0xff]  ;;  %v5550_v43 = vcombine.high %v207_v29, %v208_v31  ;;  %1187 = vmatprep.subr.bf16.mxu0 %v5518_v37  ;;  %v5549_v47 = vcombine.low %v207_v29, %v208_v31  ;;  %v67_v29 = vld [vmem:[#allocation2 + $0x50] sm:$0xff]  ;;  %v5606_v31 = vcombine.high %v1411_v15, %v1412_v17  ;;  %v6450_v37 = vcombine.low %v6422_v54, %v6424_v33 }
  0xa3   :  { %v174_v40 = vld [vmem:[#allocation5 + $0xaa0] sm:$0xff]  ;;  %1188 = vmatpush2.bf16.msra.mxu0 %v5517_v45  ;;  %v5572_v45 = vcombine.high %v1377_v19, %v1378_v20  ;;  %v6459_v54 = vcombine.high %v68_v32, %v72_v34  ;;  %v5571_v33 = vcombine.low %v1377_v19, %v1378_v20 }
  0xa4   :  { %v205_v41 = vld [vmem:[#allocation5 + $0xe80] sm:$0xff]  ;;  %v5516_v50 = vcombine.high %v173_v39, %v174_v40  ;;  %1260 = vmatprep.subr.bf16.mxu1 %v5550_v43  ;;  %v5515_v0 = vcombine.low %v173_v39, %v174_v40  ;;  %7058 = vst [vmem:[#allocation25_spill] sm:$0xff] %v6450_v37  ;;  %v6454_v39 = vcombine.low %v6427_v59, %v6429_v60  ;;  %v1376_v43 = vld [vmem:[#allocation5 + $0x168] sm:$0xff] }
  0xa5   :  { %v206_v44 = vld [vmem:[#allocation5 + $0xea0] sm:$0xff]  ;;  %1261 = vmatpush2.bf16.msra.mxu1 %v5549_v47  ;;  %v5573_v40 = vcombine.low %v1379_v12, %v1380_v13  ;;  %v1407_v47 = vld [vmem:[#allocation5 + $0x548] sm:$0xff]  ;;  %7061 = vst [vmem:[#allocation28_spill] sm:$0xff] %v6459_v54 }
  0xa6   :  { %v171_v51 = vld [vmem:[#allocation5 + $0xa40] sm:$0xff]  ;;  %v5548_v57 = vcombine.high %v205_v41, %v206_v44  ;;  %1189 = vmatprep.subr.bf16.mxu0 %v5516_v50  ;;  %v5547_v1 = vcombine.low %v205_v41, %v206_v44  ;;  %7059 = vst [vmem:[#allocation26_spill] sm:$0xff] %v6454_v39  ;;  %v1375_v41 = vld [vmem:[#allocation5 + $0x148] sm:$0xff]  ;;  %v5605_v44 = vcombine.low %v1411_v15, %v1412_v17 }
  0xa7   :  { %v172_v52 = vld [vmem:[#allocation5 + $0xa60] sm:$0xff]  ;;  %1190 = vmatpush2.bf16.msra.mxu0 %v5515_v0  ;;  %v1408_v50 = vld [vmem:[#allocation5 + $0x568] sm:$0xff] }
  0xa8   :  { %v203_v53 = vld [vmem:[#allocation5 + $0xe40] sm:$0xff]  ;;  %v5514_v2 = vcombine.high %v171_v51, %v172_v52  ;;  %1262 = vmatprep.subr.bf16.mxu1 %v5548_v57  ;;  %v5513_v8 = vcombine.low %v171_v51, %v172_v52  ;;  %v5604_v51 = vcombine.high %v1409_v27, %v1410_v28  ;;  %v6456_v52 = vcombine.high %v67_v29, %v71_v30  ;;  %v1373_v59 = vld [vmem:[#allocation5 + $0x108] sm:$0xff] }
  0xa9   :  { %v204_v61 = vld [vmem:[#allocation5 + $0xe60] sm:$0xff]  ;;  %1263 = vmatpush2.bf16.msra.mxu1 %v5547_v1  ;;  %v1374_v60 = vld [vmem:[#allocation5 + $0x128] sm:$0xff]  ;;  %v5570_v57 = vcombine.high %v1375_v41, %v1376_v43  ;;  %v75_v1 = vld [vmem:[#allocation2 + $0x90] sm:$0xff] }
  0xaa   :  { %v169_v3 = vld [vmem:[#allocation5 + $0xa00] sm:$0xff]  ;;  %v5546_v6 = vcombine.high %v203_v53, %v204_v61  ;;  %1191 = vmatprep.subr.bf16.mxu0 %v5514_v2  ;;  %v5545_v10 = vcombine.low %v203_v53, %v204_v61  ;;  %7060 = vst [vmem:[#allocation27_spill] sm:$0xff] %v6456_v52  ;;  %v5603_v53 = vcombine.low %v1409_v27, %v1410_v28  ;;  %v1405_v61 = vld [vmem:[#allocation5 + $0x508] sm:$0xff]  ;;  %v79_v2 = vld [vmem:[#allocation2 + $0xb0] sm:$0xff] }
  0xab   :  { %v170_v4 = vld [vmem:[#allocation5 + $0xa20] sm:$0xff]  ;;  %1192 = vmatpush2.bf16.msra.mxu0 %v5513_v8  ;;  %v1406_v0 = vld [vmem:[#allocation5 + $0x528] sm:$0xff]  ;;  %v6466_v8 = vcombine.low %v68_v32, %v72_v34  ;;  %v5568_v12 = vcombine.high %v1373_v59, %v1374_v60  ;;  %v6468_v15 = vcombine.high %v75_v1, %v79_v2  ;;  %v5567_v20 = vcombine.low %v1373_v59, %v1374_v60  ;;  %v83_v34 = vld [vmem:[#allocation2 + $0xd0] sm:$0xff] }
  0xac   :  { %v201_v5 = vld [vmem:[#allocation5 + $0xe00] sm:$0xff]  ;;  %v5512_v11 = vcombine.high %v169_v3, %v170_v4  ;;  %1264 = vmatprep.subr.bf16.mxu1 %v5546_v6  ;;  %v5511_v18 = vcombine.low %v169_v3, %v170_v4  ;;  %v5602_v3 = vcombine.high %v1407_v47, %v1408_v50  ;;  %v76_v4 = vld [vmem:[#allocation2 + $0x98] sm:$0xff]  ;;  %v6463_v6 = vcombine.low %v67_v29, %v71_v30  ;;  %v1403_v17 = vld [vmem:[#allocation5 + $0x4c8] sm:$0xff] }
  0xad   :  { %v202_v7 = vld [vmem:[#allocation5 + $0xe20] sm:$0xff]  ;;  %1265 = vmatpush2.bf16.msra.mxu1 %v5545_v10  ;;  %7063 = vst [vmem:[#allocation30_spill] sm:$0xff] %v6466_v8  ;;  %v1371_v10 = vld [vmem:[#allocation5 + $0xc8] sm:$0xff]  ;;  %v5600_v13 = vcombine.high %v1405_v61, %v1406_v0  ;;  %7064 = vst [vmem:[#allocation31_spill] sm:$0xff] %v6468_v15 }
  0xae   :  { %v5544_v16 = vcombine.high %v201_v5, %v202_v7  ;;  %1193 = vmatprep.subr.bf16.mxu0 %v5512_v11  ;;  %v5543_v22 = vcombine.low %v201_v5, %v202_v7  ;;  %v80_v5 = vld [vmem:[#allocation2 + $0xb8] sm:$0xff]  ;;  %7062 = vst [vmem:[#allocation29_spill] sm:$0xff] %v6463_v6  ;;  %v5569_v7 = vcombine.low %v1375_v41, %v1376_v43  ;;  %v1369_v28 = vld [vmem:[#allocation5 + $0x88] sm:$0xff] }
  0xaf   :  { %1194 = vmatpush2.bf16.msra.mxu0 %v5511_v18  ;;  %v5601_v11 = vcombine.low %v1407_v47, %v1408_v50  ;;  %v1404_v18 = vld [vmem:[#allocation5 + $0x4e8] sm:$0xff]  ;;  %v6471_v19 = vcombine.high %v76_v4, %v80_v5  ;;  %v6478_v43 = vcombine.low %v76_v4, %v80_v5 }
  0xb0   :  { %1266 = vmatprep.subr.bf16.mxu1 %v5544_v16  ;;  %2133 = vmatprep.subr.bf16.mxu0 %v5574_v26  ;;  %v1372_v16 = vld [vmem:[#allocation5 + $0xe8] sm:$0xff]  ;;  %v5598_v27 = vcombine.high %v1403_v17, %v1404_v18  ;;  %v5597_v47 = vcombine.low %v1403_v17, %v1404_v18 }
  0xb1   :  { %1267 = vmatpush2.bf16.msra.mxu1 %v5543_v22  ;;  %7065 = vst [vmem:[#allocation32_spill] sm:$0xff] %v6471_v19  ;;  %v5599_v22 = vcombine.low %v1405_v61, %v1406_v0  ;;  %v5566_v26 = vcombine.high %v1371_v10, %v1372_v16  ;;  %v1370_v29 = vld [vmem:[#allocation5 + $0xa8] sm:$0xff]  ;;  %v5565_v41 = vcombine.low %v1371_v10, %v1372_v16  ;;  %7067 = vst [vmem:[#allocation34_spill] sm:$0xff] %v6478_v43 }
  0xb2   :  { %2206 = vmatprep.subr.bf16.mxu1 %v5606_v31  ;;  %1196 = vmatmul.mubr.bf16.vlgmr.msra.gmra.mxu0 %v6450_v37  ;;  %v1401_v30 = vld [vmem:[#allocation5 + $0x488] sm:$0xff]  ;;  %v6475_v31 = vcombine.low %v75_v1, %v79_v2  ;;  %v5564_v50 = vcombine.high %v1369_v28, %v1370_v29  ;;  %v5563_v0 = vcombine.low %v1369_v28, %v1370_v29 }
  0xb3   :  { %2134 = vmatpush1.bf16.msra.mxu0 %v5573_v40  ;;  %1205 = vmatprep.mubr.bf16.mxu0 %v6456_v52  ;;  %v1402_v32 = vld [vmem:[#allocation5 + $0x4a8] sm:$0xff]  ;;  %v87_v40 = vld [vmem:[#allocation2 + $0xf0] sm:$0xff] }
  0xb4   :  { %1269 = vmatmul.mubr.bf16.vlgmr.msra.gmra.mxu1 %v6454_v39  ;;  %2135 = vmatprep.subr.bf16.mxu0 %v5572_v45  ;;  %7066 = vst [vmem:[#allocation33_spill] sm:$0xff] %v6475_v31  ;;  %v88_v45 = vld [vmem:[#allocation2 + $0xf8] sm:$0xff]  ;;  %v1367_v59 = vld [vmem:[#allocation5 + $0x48] sm:$0xff]  ;;  %v5595_v1 = vcombine.low %v1401_v30, %v1402_v32 }
  0xb5   :  { %2207 = vmatpush1.bf16.msra.mxu1 %v5605_v44  ;;  %1278 = vmatprep.mubr.bf16.mxu1 %v6459_v54  ;;  %v84_v44 = vld [vmem:[#allocation2 + $0xd8] sm:$0xff]  ;;  %v1368_v60 = vld [vmem:[#allocation5 + $0x68] sm:$0xff] }
  0xb6   :  { %2208 = vmatprep.subr.bf16.mxu1 %v5604_v51  ;;  %v5596_v51 = vcombine.high %v1401_v30, %v1402_v32  ;;  %v6483_v61 = vcombine.high %v84_v44, %v88_v45  ;;  %v5562_v2 = vcombine.high %v1367_v59, %v1368_v60  ;;  %v1365_v4 = vld [vmem:[#allocation5 + $0x8] sm:$0xff] }
  0xb7   :  { %2136 = vmatpush1.bf16.msra.mxu0 %v5571_v33  ;;  %v6480_v33 = vcombine.high %v83_v34, %v87_v40  ;;  %v1366_v5 = vld [vmem:[#allocation5 + $0x28] sm:$0xff] }
  0xb8   :  { %2137 = vmatprep.subr.bf16.mxu0 %v5570_v57  ;;  %v1400_v57 = vld [vmem:[#allocation5 + $0x468] sm:$0xff]  ;;  %7069 = vst [vmem:[#allocation36_spill] sm:$0xff] %v6483_v61  ;;  %v5560_v17 = vcombine.high %v1365_v4, %v1366_v5  ;;  %v5559_v28 = vcombine.low %v1365_v4, %v1366_v5 }
  0xb9   :  { %2209 = vmatpush1.bf16.msra.mxu1 %v5603_v53  ;;  %7068 = vst [vmem:[#allocation35_spill] sm:$0xff] %v6480_v33  ;;  %v1399_v53 = vld [vmem:[#allocation5 + $0x448] sm:$0xff] }
  0xba   :  { %2210 = vmatprep.subr.bf16.mxu1 %v5602_v3  ;;  %1206 = vmatmul.mubr.bf16.gmra.mxu0 %v6463_v6  ;;  %v5594_v3 = vcombine.high %v1399_v53, %v1400_v57  ;;  %v1397_v10 = vld [vmem:[#allocation5 + $0x408] sm:$0xff]  ;;  %v5593_v16 = vcombine.low %v1399_v53, %v1400_v57 }
  0xbb   :  { %2138 = vmatpush1.bf16.msra.mxu0 %v5569_v7  ;;  %1215 = vmatprep.mubr.bf16.mxu0 %v6468_v15  ;;  %v6487_v7 = vcombine.low %v83_v34, %v87_v40  ;;  %v1393_v34 = vld [vmem:[#allocation5 + $0x388] sm:$0xff] }
  0xbc   :  { %1279 = vmatmul.mubr.bf16.gmra.mxu1 %v6466_v8  ;;  %2139 = vmatprep.subr.bf16.mxu0 %v5568_v12  ;;  %v5561_v12 = vcombine.low %v1367_v59, %v1368_v60  ;;  %v1394_v40 = vld [vmem:[#allocation5 + $0x3a8] sm:$0xff] }
  0xbd   :  { %2211 = vmatpush1.bf16.msra.mxu1 %v5601_v11  ;;  %1288 = vmatprep.mubr.bf16.mxu1 %v6471_v19  ;;  %7070 = vst [vmem:[#allocation37_spill] sm:$0xff] %v6487_v7  ;;  %v1398_v11 = vld [vmem:[#allocation5 + $0x428] sm:$0xff] }
  0xbe   :  { %2212 = vmatprep.subr.bf16.mxu1 %v5600_v13  ;;  %v6490_v13 = vcombine.low %v84_v44, %v88_v45  ;;  %v5592_v18 = vcombine.high %v1397_v10, %v1398_v11  ;;  %v5591_v29 = vcombine.low %v1397_v10, %v1398_v11  ;;  %v1426_v44 = vld [vmem:[#allocation5 + $0x7a8] sm:$0xff] }
  0xbf   :  { %2140 = vmatpush1.bf16.msra.mxu0 %v5567_v20  ;;  %v1395_v20 = vld [vmem:[#allocation5 + $0x3c8] sm:$0xff] }
  0xc0   :  { %2141 = vmatprep.subr.bf16.mxu0 %v5566_v26  ;;  %7071 = vst [vmem:[#allocation38_spill] sm:$0xff] %v6490_v13  ;;  %v1427_v26 = vld [vmem:[#allocation5 + $0x7c8] sm:$0xff] }
  0xc1   :  { %2213 = vmatpush1.bf16.msra.mxu1 %v5599_v22  ;;  %v1396_v22 = vld [vmem:[#allocation5 + $0x3e8] sm:$0xff] }
  0xc2   :  { %2214 = vmatprep.subr.bf16.mxu1 %v5598_v27  ;;  %1216 = vmatmul.mubr.bf16.gmra.mxu0 %v6475_v31  ;;  %v1428_v27 = vld [vmem:[#allocation5 + $0x7e8] sm:$0xff]  ;;  %v5590_v30 = vcombine.high %v1395_v20, %v1396_v22  ;;  %v5589_v45 = vcombine.low %v1395_v20, %v1396_v22 }
  0xc3   :  { %2142 = vmatpush1.bf16.msra.mxu0 %v5565_v41  ;;  %1225 = vmatprep.mubr.bf16.mxu0 %v6480_v33  ;;  %v5622_v32 = vcombine.high %v1427_v26, %v1428_v27  ;;  %v1425_v41 = vld [vmem:[#allocation5 + $0x788] sm:$0xff] }
  0xc4   :  { %1289 = vmatmul.mubr.bf16.gmra.mxu1 %v6478_v43  ;;  %2143 = vmatprep.subr.bf16.mxu0 %v5564_v50  ;;  %v5588_v50 = vcombine.high %v1393_v34, %v1394_v40  ;;  %v1391_v59 = vld [vmem:[#allocation5 + $0x348] sm:$0xff] }
  0xc5   :  { %2215 = vmatpush1.bf16.msra.mxu1 %v5597_v47  ;;  %1298 = vmatprep.mubr.bf16.mxu1 %v6483_v61  ;;  %v5621_v47 = vcombine.low %v1427_v26, %v1428_v27  ;;  %v1392_v60 = vld [vmem:[#allocation5 + $0x368] sm:$0xff] }
  0xc6   :  { %2216 = vmatprep.subr.bf16.mxu1 %v5596_v51  ;;  %v5620_v51 = vcombine.high %v1425_v41, %v1426_v44  ;;  %v1423_v53 = vld [vmem:[#allocation5 + $0x748] sm:$0xff] }
  0xc7   :  { %2144 = vmatpush1.bf16.msra.mxu0 %v5563_v0  ;;  %v1424_v57 = vld [vmem:[#allocation5 + $0x768] sm:$0xff]  ;;  %v5587_v0 = vcombine.low %v1393_v34, %v1394_v40 }
  0xc8   :  { %2145 = vmatprep.subr.bf16.mxu0 %v5562_v2  ;;  %v5586_v2 = vcombine.high %v1391_v59, %v1392_v60  ;;  %v1389_v4 = vld [vmem:[#allocation5 + $0x308] sm:$0xff] }
  0xc9   :  { %2217 = vmatpush1.bf16.msra.mxu1 %v5595_v1  ;;  %v5619_v1 = vcombine.low %v1425_v41, %v1426_v44  ;;  %v1390_v5 = vld [vmem:[#allocation5 + $0x328] sm:$0xff] }
  0xca   :  { %2218 = vmatprep.subr.bf16.mxu1 %v5594_v3  ;;  %1226 = vmatmul.mubr.bf16.gmra.mxu0 %v6487_v7  ;;  %v5618_v3 = vcombine.high %v1423_v53, %v1424_v57  ;;  %v1421_v10 = vld [vmem:[#allocation5 + $0x708] sm:$0xff] }
  0xcb   :  { %2146 = vmatpush1.bf16.msra.mxu0 %v5561_v12  ;;  %2165 = vmatprep.mubr.bf16.mxu0 %v6372_v58  ;;  %v1422_v11 = vld [vmem:[#allocation5 + $0x728] sm:$0xff]  ;;  %v5585_v12 = vcombine.low %v1391_v59, %v1392_v60 }
  0xcc   :  { %1299 = vmatmul.mubr.bf16.gmra.mxu1 %v6490_v13  ;;  %2147 = vmatprep.subr.bf16.mxu0 %v5560_v17  ;;  %v5584_v17 = vcombine.high %v1389_v4, %v1390_v5  ;;  %v1387_v20 = vld [vmem:[#allocation5 + $0x2c8] sm:$0xff] }
  0xcd   :  { %2219 = vmatpush1.bf16.msra.mxu1 %v5593_v16  ;;  %2238 = vmatprep.mubr.bf16.mxu1 %v6380_v63  ;;  %v5617_v16 = vcombine.low %v1423_v53, %v1424_v57  ;;  %v1388_v22 = vld [vmem:[#allocation5 + $0x2e8] sm:$0xff] }
  0xce   :  { %2220 = vmatprep.subr.bf16.mxu1 %v5592_v18  ;;  %v5616_v18 = vcombine.high %v1421_v10, %v1422_v11  ;;  %v1419_v26 = vld [vmem:[#allocation5 + $0x6c8] sm:$0xff] }
  0xcf   :  { %2148 = vmatpush1.bf16.msra.mxu0 %v5559_v28  ;;  %v1420_v27 = vld [vmem:[#allocation5 + $0x6e8] sm:$0xff]  ;;  %v5583_v28 = vcombine.low %v1389_v4, %v1390_v5 }
  0xd0   :  { %2149 = vmatprep.subr.bf16.mxu0 %v5590_v30  ;;  %v5582_v30 = vcombine.high %v1387_v20, %v1388_v22  ;;  %v1385_v34 = vld [vmem:[#allocation5 + $0x288] sm:$0xff] }
  0xd1   :  { %2221 = vmatpush1.bf16.msra.mxu1 %v5591_v29  ;;  %v5615_v29 = vcombine.low %v1421_v10, %v1422_v11  ;;  %v1386_v40 = vld [vmem:[#allocation5 + $0x2a8] sm:$0xff] }
  0xd2   :  { %2222 = vmatprep.subr.bf16.mxu1 %v5622_v32  ;;  %v5614_v32 = vcombine.high %v1419_v26, %v1420_v27  ;;  %v1417_v41 = vld [vmem:[#allocation5 + $0x688] sm:$0xff] }
  0xd3   :  { %2150 = vmatpush2.bf16.msra.mxu0 %v5589_v45  ;;  %v1418_v44 = vld [vmem:[#allocation5 + $0x6a8] sm:$0xff]  ;;  %v5581_v45 = vcombine.low %v1387_v20, %v1388_v22 }
  0xd4   :  { %2151 = vmatprep.subr.bf16.mxu0 %v5588_v50  ;;  %v5580_v50 = vcombine.high %v1385_v34, %v1386_v40  ;;  %v1383_v59 = vld [vmem:[#allocation5 + $0x248] sm:$0xff] }
  0xd5   :  { %2223 = vmatpush2.bf16.msra.mxu1 %v5621_v47  ;;  %v5613_v47 = vcombine.low %v1419_v26, %v1420_v27  ;;  %v1384_v60 = vld [vmem:[#allocation5 + $0x268] sm:$0xff] }
  0xd6   :  { %2224 = vmatprep.subr.bf16.mxu1 %v5620_v51  ;;  %v5612_v51 = vcombine.high %v1417_v41, %v1418_v44  ;;  %v1415_v53 = vld [vmem:[#allocation5 + $0x648] sm:$0xff] }
  0xd7   :  { %2152 = vmatpush2.bf16.msra.mxu0 %v5587_v0  ;;  %v1416_v57 = vld [vmem:[#allocation5 + $0x668] sm:$0xff]  ;;  %v5579_v0 = vcombine.low %v1385_v34, %v1386_v40 }
  0xd8   :  { %2153 = vmatprep.subr.bf16.mxu0 %v5586_v2  ;;  %v5578_v2 = vcombine.high %v1383_v59, %v1384_v60  ;;  %v1381_v4 = vld [vmem:[#allocation5 + $0x208] sm:$0xff] }
  0xd9   :  { %2225 = vmatpush2.bf16.msra.mxu1 %v5619_v1  ;;  %v5611_v1 = vcombine.low %v1417_v41, %v1418_v44  ;;  %v1382_v5 = vld [vmem:[#allocation5 + $0x228] sm:$0xff] }
  0xda   :  { %2226 = vmatprep.subr.bf16.mxu1 %v5618_v3  ;;  %v5610_v3 = vcombine.high %v1415_v53, %v1416_v57  ;;  %v1413_v10 = vld [vmem:[#allocation5 + $0x608] sm:$0xff] }
  0xdb   :  { %2154 = vmatpush2.bf16.msra.mxu0 %v5585_v12  ;;  %v1414_v11 = vld [vmem:[#allocation5 + $0x628] sm:$0xff]  ;;  %v5577_v12 = vcombine.low %v1383_v59, %v1384_v60 }
  0xdc   :  { %2155 = vmatprep.subr.bf16.mxu0 %v5584_v17  ;;  %v5576_v17 = vcombine.high %v1381_v4, %v1382_v5  ;;  %v1443_v20 = vld [vmem:[#allocation5 + $0x9c8] sm:$0xff] }
  0xdd   :  { %2227 = vmatpush2.bf16.msra.mxu1 %v5617_v16  ;;  %v5609_v16 = vcombine.low %v1415_v53, %v1416_v57  ;;  %v1444_v22 = vld [vmem:[#allocation5 + $0x9e8] sm:$0xff] }
  0xde   :  { %2228 = vmatprep.subr.bf16.mxu1 %v5616_v18  ;;  %v5608_v18 = vcombine.high %v1413_v10, %v1414_v11  ;;  %v1475_v26 = vld [vmem:[#allocation5 + $0xdc8] sm:$0xff] }
  0xdf   :  { %2156 = vmatpush2.bf16.msra.mxu0 %v5583_v28  ;;  %v1476_v27 = vld [vmem:[#allocation5 + $0xde8] sm:$0xff]  ;;  %v5575_v28 = vcombine.low %v1381_v4, %v1382_v5 }
  0xe0   :  { %2157 = vmatprep.subr.bf16.mxu0 %v5582_v30  ;;  %v5638_v30 = vcombine.high %v1443_v20, %v1444_v22  ;;  %v1441_v34 = vld [vmem:[#allocation5 + $0x988] sm:$0xff] }
  0xe1   :  { %2229 = vmatpush2.bf16.msra.mxu1 %v5615_v29  ;;  %v5607_v29 = vcombine.low %v1413_v10, %v1414_v11  ;;  %v1442_v40 = vld [vmem:[#allocation5 + $0x9a8] sm:$0xff] }
  0xe2   :  { %2230 = vmatprep.subr.bf16.mxu1 %v5614_v32  ;;  %v5670_v32 = vcombine.high %v1475_v26, %v1476_v27  ;;  %v1473_v41 = vld [vmem:[#allocation5 + $0xd88] sm:$0xff] }
  0xe3   :  { %2158 = vmatpush2.bf16.msra.mxu0 %v5581_v45  ;;  %v1474_v44 = vld [vmem:[#allocation5 + $0xda8] sm:$0xff]  ;;  %v5637_v45 = vcombine.low %v1443_v20, %v1444_v22 }
  0xe4   :  { %2159 = vmatprep.subr.bf16.mxu0 %v5580_v50  ;;  %v5636_v50 = vcombine.high %v1441_v34, %v1442_v40  ;;  %v1439_v59 = vld [vmem:[#allocation5 + $0x948] sm:$0xff] }
  0xe5   :  { %2231 = vmatpush2.bf16.msra.mxu1 %v5613_v47  ;;  %v5669_v47 = vcombine.low %v1475_v26, %v1476_v27  ;;  %v1440_v60 = vld [vmem:[#allocation5 + $0x968] sm:$0xff] }
  0xe6   :  { %2232 = vmatprep.subr.bf16.mxu1 %v5612_v51  ;;  %v5668_v51 = vcombine.high %v1473_v41, %v1474_v44  ;;  %v1471_v53 = vld [vmem:[#allocation5 + $0xd48] sm:$0xff] }
  0xe7   :  { %2160 = vmatpush2.bf16.msra.mxu0 %v5579_v0  ;;  %v1472_v57 = vld [vmem:[#allocation5 + $0xd68] sm:$0xff]  ;;  %v5635_v0 = vcombine.low %v1441_v34, %v1442_v40 }
  0xe8   :  { %2161 = vmatprep.subr.bf16.mxu0 %v5578_v2  ;;  %v5634_v2 = vcombine.high %v1439_v59, %v1440_v60  ;;  %v1437_v4 = vld [vmem:[#allocation5 + $0x908] sm:$0xff] }
  0xe9   :  { %2233 = vmatpush2.bf16.msra.mxu1 %v5611_v1  ;;  %v5667_v1 = vcombine.low %v1473_v41, %v1474_v44  ;;  %v1438_v5 = vld [vmem:[#allocation5 + $0x928] sm:$0xff] }
  0xea   :  { %2234 = vmatprep.subr.bf16.mxu1 %v5610_v3  ;;  %v5666_v3 = vcombine.high %v1471_v53, %v1472_v57  ;;  %v1469_v10 = vld [vmem:[#allocation5 + $0xd08] sm:$0xff] }
  0xeb   :  { %2162 = vmatpush2.bf16.msra.mxu0 %v5577_v12  ;;  %v1470_v11 = vld [vmem:[#allocation5 + $0xd28] sm:$0xff]  ;;  %v5633_v12 = vcombine.low %v1439_v59, %v1440_v60 }
  0xec   :  { %2163 = vmatprep.subr.bf16.mxu0 %v5576_v17  ;;  %v5632_v17 = vcombine.high %v1437_v4, %v1438_v5  ;;  %v1435_v20 = vld [vmem:[#allocation5 + $0x8c8] sm:$0xff] }
  0xed   :  { %2235 = vmatpush2.bf16.msra.mxu1 %v5609_v16  ;;  %v5665_v16 = vcombine.low %v1471_v53, %v1472_v57  ;;  %v1436_v22 = vld [vmem:[#allocation5 + $0x8e8] sm:$0xff] }
  0xee   :  { %2236 = vmatprep.subr.bf16.mxu1 %v5608_v18  ;;  %v5664_v18 = vcombine.high %v1469_v10, %v1470_v11  ;;  %v1467_v26 = vld [vmem:[#allocation5 + $0xcc8] sm:$0xff] }
  0xef   :  { %2164 = vmatpush2.bf16.msra.mxu0 %v5575_v28  ;;  %v1468_v27 = vld [vmem:[#allocation5 + $0xce8] sm:$0xff]  ;;  %v5631_v28 = vcombine.low %v1437_v4, %v1438_v5 }
  0xf0   :  { %2279 = vmatprep.subr.bf16.mxu0 %v5638_v30  ;;  %v5630_v30 = vcombine.high %v1435_v20, %v1436_v22  ;;  %v1433_v34 = vld [vmem:[#allocation5 + $0x888] sm:$0xff] }
  0xf1   :  { %2237 = vmatpush2.bf16.msra.mxu1 %v5607_v29  ;;  %v5663_v29 = vcombine.low %v1469_v10, %v1470_v11  ;;  %v1434_v40 = vld [vmem:[#allocation5 + $0x8a8] sm:$0xff] }
  0xf2   :  { %2352 = vmatprep.subr.bf16.mxu1 %v5670_v32  ;;  %2166 = vmatmul.mubr.bf16.vlgmr.msra.gmra.mxu0 %v6386_v21  ;;  %v5662_v32 = vcombine.high %v1467_v26, %v1468_v27  ;;  %v1465_v41 = vld [vmem:[#allocation5 + $0xc88] sm:$0xff] }
  0xf3   :  { %2280 = vmatpush1.bf16.msra.mxu0 %v5637_v45  ;;  %2175 = vmatprep.mubr.bf16.mxu0 %v6392_v55  ;;  %v1466_v44 = vld [vmem:[#allocation5 + $0xca8] sm:$0xff]  ;;  %v5629_v45 = vcombine.low %v1435_v20, %v1436_v22 }
  0xf4   :  { %2239 = vmatmul.mubr.bf16.vlgmr.msra.gmra.mxu1 %v6390_v25  ;;  %2281 = vmatprep.subr.bf16.mxu0 %v5636_v50  ;;  %v5628_v50 = vcombine.high %v1433_v34, %v1434_v40  ;;  %v1431_v59 = vld [vmem:[#allocation5 + $0x848] sm:$0xff] }
  0xf5   :  { %2353 = vmatpush1.bf16.msra.mxu1 %v5669_v47  ;;  %2248 = vmatprep.mubr.bf16.mxu1 %v6395_v35  ;;  %v5661_v47 = vcombine.low %v1467_v26, %v1468_v27  ;;  %v1432_v60 = vld [vmem:[#allocation5 + $0x868] sm:$0xff] }
  0xf6   :  { %2354 = vmatprep.subr.bf16.mxu1 %v5668_v51  ;;  %v5660_v51 = vcombine.high %v1465_v41, %v1466_v44  ;;  %v1463_v53 = vld [vmem:[#allocation5 + $0xc48] sm:$0xff] }
  0xf7   :  { %2282 = vmatpush1.bf16.msra.mxu0 %v5635_v0  ;;  %v1464_v57 = vld [vmem:[#allocation5 + $0xc68] sm:$0xff]  ;;  %v5627_v0 = vcombine.low %v1433_v34, %v1434_v40 }
  0xf8   :  { %2283 = vmatprep.subr.bf16.mxu0 %v5634_v2  ;;  %v5626_v2 = vcombine.high %v1431_v59, %v1432_v60  ;;  %v1429_v4 = vld [vmem:[#allocation5 + $0x808] sm:$0xff] }
  0xf9   :  { %2355 = vmatpush1.bf16.msra.mxu1 %v5667_v1  ;;  %v5659_v1 = vcombine.low %v1465_v41, %v1466_v44  ;;  %v1430_v5 = vld [vmem:[#allocation5 + $0x828] sm:$0xff] }
  0xfa   :  { %2356 = vmatprep.subr.bf16.mxu1 %v5666_v3  ;;  %2176 = vmatmul.mubr.bf16.gmra.mxu0 %v6400_v42  ;;  %v5658_v3 = vcombine.high %v1463_v53, %v1464_v57  ;;  %v1461_v10 = vld [vmem:[#allocation5 + $0xc08] sm:$0xff] }
  0xfb   :  { %2284 = vmatpush1.bf16.msra.mxu0 %v5633_v12  ;;  %2185 = vmatprep.mubr.bf16.mxu0 %v6404_v56  ;;  %v1462_v11 = vld [vmem:[#allocation5 + $0xc28] sm:$0xff]  ;;  %v5625_v12 = vcombine.low %v1431_v59, %v1432_v60 }
  0xfc   :  { %2249 = vmatmul.mubr.bf16.gmra.mxu1 %v6402_v46  ;;  %2285 = vmatprep.subr.bf16.mxu0 %v5632_v17  ;;  %v5624_v17 = vcombine.high %v1429_v4, %v1430_v5  ;;  %v1459_v20 = vld [vmem:[#allocation5 + $0xbc8] sm:$0xff] }
  0xfd   :  { %2357 = vmatpush1.bf16.msra.mxu1 %v5665_v16  ;;  %2258 = vmatprep.mubr.bf16.mxu1 %v6407_v62  ;;  %v5657_v16 = vcombine.low %v1463_v53, %v1464_v57  ;;  %v1460_v22 = vld [vmem:[#allocation5 + $0xbe8] sm:$0xff] }
  0xfe   :  { %2358 = vmatprep.subr.bf16.mxu1 %v5664_v18  ;;  %v5656_v18 = vcombine.high %v1461_v10, %v1462_v11  ;;  %v1491_v26 = vld [vmem:[#allocation5 + $0xfc8] sm:$0xff] }
  0xff   :  { %2286 = vmatpush1.bf16.msra.mxu0 %v5631_v28  ;;  %v1492_v27 = vld [vmem:[#allocation5 + $0xfe8] sm:$0xff]  ;;  %v5623_v28 = vcombine.low %v1429_v4, %v1430_v5 }
 0x100   :  { %2287 = vmatprep.subr.bf16.mxu0 %v5630_v30  ;;  %v5654_v30 = vcombine.high %v1459_v20, %v1460_v22  ;;  %v1457_v34 = vld [vmem:[#allocation5 + $0xb88] sm:$0xff] }
 0x101   :  { %2359 = vmatpush1.bf16.msra.mxu1 %v5663_v29  ;;  %v5655_v29 = vcombine.low %v1461_v10, %v1462_v11  ;;  %v1458_v40 = vld [vmem:[#allocation5 + $0xba8] sm:$0xff] }
 0x102   :  { %2360 = vmatprep.subr.bf16.mxu1 %v5662_v32  ;;  %2186 = vmatmul.mubr.bf16.gmra.mxu0 %v6412_v9  ;;  %v5686_v32 = vcombine.high %v1491_v26, %v1492_v27  ;;  %v1489_v41 = vld [vmem:[#allocation5 + $0xf88] sm:$0xff]  ;;  %v6204_v9 = vld [vmem:[#allocation7 + $0x90] sm:$0xff]  }
 0x103   :  { %2288 = vmatpush1.bf16.msra.mxu0 %v5629_v45  ;;  %2195 = vmatprep.mubr.bf16.mxu0 %v6416_v23  ;;  %v1490_v44 = vld [vmem:[#allocation5 + $0xfa8] sm:$0xff]  ;;  %v5653_v45 = vcombine.low %v1459_v20, %v1460_v22 }
 0x104   :  { %2259 = vmatmul.mubr.bf16.gmra.mxu1 %v6414_v14  ;;  %2289 = vmatprep.subr.bf16.mxu0 %v5628_v50  ;;  %v5652_v50 = vcombine.high %v1457_v34, %v1458_v40  ;;  %v1455_v59 = vld [vmem:[#allocation5 + $0xb48] sm:$0xff] }
 0x105   :  { %2361 = vmatpush1.bf16.msra.mxu1 %v5661_v47  ;;  %2268 = vmatprep.mubr.bf16.mxu1 %v6419_v24  ;;  %v5685_v47 = vcombine.low %v1491_v26, %v1492_v27  ;;  %v1456_v60 = vld [vmem:[#allocation5 + $0xb68] sm:$0xff] }
 0x106   :  { %2362 = vmatprep.subr.bf16.mxu1 %v5660_v51  ;;  %v5684_v51 = vcombine.high %v1489_v41, %v1490_v44  ;;  %v1487_v53 = vld [vmem:[#allocation5 + $0xf48] sm:$0xff] }
 0x107   :  { %2290 = vmatpush1.bf16.msra.mxu0 %v5627_v0  ;;  %v1488_v57 = vld [vmem:[#allocation5 + $0xf68] sm:$0xff]  ;;  %v5651_v0 = vcombine.low %v1457_v34, %v1458_v40 }
 0x108   :  { %2291 = vmatprep.subr.bf16.mxu0 %v5626_v2  ;;  %v5650_v2 = vcombine.high %v1455_v59, %v1456_v60  ;;  %v1453_v4 = vld [vmem:[#allocation5 + $0xb08] sm:$0xff] }
 0x109   :  { %2363 = vmatpush1.bf16.msra.mxu1 %v5659_v1  ;;  %v5683_v1 = vcombine.low %v1489_v41, %v1490_v44  ;;  %v1454_v5 = vld [vmem:[#allocation5 + $0xb28] sm:$0xff] }
 0x10a   :  { %2364 = vmatprep.subr.bf16.mxu1 %v5658_v3  ;;  %2196 = vmatmul.mubr.bf16.gmra.mxu0 %v6432_v36  ;;  %v5682_v3 = vcombine.high %v1487_v53, %v1488_v57  ;;  %v1485_v10 = vld [vmem:[#allocation5 + $0xf08] sm:$0xff] }
 0x10b   :  { %2292 = vmatpush1.bf16.msra.mxu0 %v5625_v12  ;;  %2311 = vmatprep.mubr.bf16.mxu0 %v6438_v48  ;;  %v1486_v11 = vld [vmem:[#allocation5 + $0xf28] sm:$0xff]  ;;  %v5649_v12 = vcombine.low %v1455_v59, %v1456_v60 }
 0x10c   :  { %2269 = vmatmul.mubr.bf16.gmra.mxu1 %v6434_v38  ;;  %2293 = vmatprep.subr.bf16.mxu0 %v5624_v17  ;;  %v5648_v17 = vcombine.high %v1453_v4, %v1454_v5  ;;  %v1451_v20 = vld [vmem:[#allocation5 + $0xac8] sm:$0xff] }
 0x10d   :  { %2365 = vmatpush1.bf16.msra.mxu1 %v5657_v16  ;;  %2384 = vmatprep.mubr.bf16.mxu1 %v6443_v49  ;;  %v5681_v16 = vcombine.low %v1487_v53, %v1488_v57  ;;  %v1452_v22 = vld [vmem:[#allocation5 + $0xae8] sm:$0xff] }
 0x10e   :  { %2366 = vmatprep.subr.bf16.mxu1 %v5656_v18  ;;  %v5680_v18 = vcombine.high %v1485_v10, %v1486_v11  ;;  %v1483_v26 = vld [vmem:[#allocation5 + $0xec8] sm:$0xff] }
 0x10f   :  { %2294 = vmatpush1.bf16.msra.mxu0 %v5623_v28  ;;  %v1484_v27 = vld [vmem:[#allocation5 + $0xee8] sm:$0xff]  ;;  %v5647_v28 = vcombine.low %v1453_v4, %v1454_v5 }
 0x110   :  { %2295 = vmatprep.subr.bf16.mxu0 %v5654_v30  ;;  %v5646_v30 = vcombine.high %v1451_v20, %v1452_v22  ;;  %v1449_v34 = vld [vmem:[#allocation5 + $0xa88] sm:$0xff] }
 0x111   :  { %2367 = vmatpush1.bf16.msra.mxu1 %v5655_v29  ;;  %v5679_v29 = vcombine.low %v1485_v10, %v1486_v11  ;;  %v1450_v40 = vld [vmem:[#allocation5 + $0xaa8] sm:$0xff] }
 0x112   :  { %2368 = vmatprep.subr.bf16.mxu1 %v5686_v32  ;;  %v5678_v32 = vcombine.high %v1483_v26, %v1484_v27  ;;  %v1481_v41 = vld [vmem:[#allocation5 + $0xe88] sm:$0xff] }
 0x113   :  { %2296 = vmatpush2.bf16.msra.mxu0 %v5653_v45  ;;  %v1482_v44 = vld [vmem:[#allocation5 + $0xea8] sm:$0xff]  ;;  %v5645_v45 = vcombine.low %v1451_v20, %v1452_v22 }
 0x114   :  { %2297 = vmatprep.subr.bf16.mxu0 %v5652_v50  ;;  %v5644_v50 = vcombine.high %v1449_v34, %v1450_v40  ;;  %v1447_v59 = vld [vmem:[#allocation5 + $0xa48] sm:$0xff] }
 0x115   :  { %2369 = vmatpush2.bf16.msra.mxu1 %v5685_v47  ;;  %v5677_v47 = vcombine.low %v1483_v26, %v1484_v27  ;;  %v1448_v60 = vld [vmem:[#allocation5 + $0xa68] sm:$0xff]  ;;  %v6177_v26 = vld [vmem:[#allocation7 + $0x78] sm:$0xff]  }
 0x116   :  { %2370 = vmatprep.subr.bf16.mxu1 %v5684_v51  ;;  %v5676_v51 = vcombine.high %v1481_v41, %v1482_v44  ;;  %v1479_v53 = vld [vmem:[#allocation5 + $0xe48] sm:$0xff]  ;;  %v6178_v27 = vld [vmem:[#allocation7 + $0x38] sm:$0xff]  }
 0x117   :  { %2298 = vmatpush2.bf16.msra.mxu0 %v5651_v0  ;;  %v1480_v57 = vld [vmem:[#allocation5 + $0xe68] sm:$0xff]  ;;  %v5643_v0 = vcombine.low %v1449_v34, %v1450_v40 }
 0x118   :  { %2299 = vmatprep.subr.bf16.mxu0 %v5650_v2  ;;  %v5642_v2 = vcombine.high %v1447_v59, %v1448_v60  ;;  %v1445_v4 = vld [vmem:[#allocation5 + $0xa08] sm:$0xff] }
 0x119   :  { %2371 = vmatpush2.bf16.msra.mxu1 %v5683_v1  ;;  %v5675_v1 = vcombine.low %v1481_v41, %v1482_v44  ;;  %v1446_v5 = vld [vmem:[#allocation5 + $0xa28] sm:$0xff]  ;;  %v6183_v41 = vld [vmem:[#allocation7 + $0x60] sm:$0xff]  }
 0x11a   :  { %2372 = vmatprep.subr.bf16.mxu1 %v5682_v3  ;;  %v5674_v3 = vcombine.high %v1479_v53, %v1480_v57  ;;  %v1477_v10 = vld [vmem:[#allocation5 + $0xe08] sm:$0xff]  ;;  %v5639_v20 = vcombine.low %v1445_v4, %v1446_v5 }
 0x11b   :  { %2300 = vmatpush2.bf16.msra.mxu0 %v5649_v12  ;;  %v1478_v11 = vld [vmem:[#allocation5 + $0xe28] sm:$0xff]  ;;  %v5641_v12 = vcombine.low %v1447_v59, %v1448_v60  ;;  %v6186_v60 = vld [vmem:[#allocation7 + $0x18] sm:$0xff]  }
 0x11c   :  { %2301 = vmatprep.subr.bf16.mxu0 %v5648_v17  ;;  %v5640_v17 = vcombine.high %v1445_v4, %v1446_v5  ;;  %v5671_v22 = vcombine.low %v1477_v10, %v1478_v11  ;;  %v6182_v40 = vld [vmem:[#allocation7 + $0x28] sm:$0xff]  }
 0x11d   :  { %2373 = vmatpush2.bf16.msra.mxu1 %v5681_v16  ;;  %v5673_v16 = vcombine.low %v1479_v53, %v1480_v57  ;;  %v6187_v53 = vld [vmem:[#allocation7 + $0x50] sm:$0xff]   ;;  %v6189_v4 = vld [vmem:[#allocation7 + $0x48] sm:$0xff]  }
 0x11e   :  { %2374 = vmatprep.subr.bf16.mxu1 %v5680_v18  ;;  %v5672_v18 = vcombine.high %v1477_v10, %v1478_v11  ;;  %v6190_v10 = vld [vmem:[#allocation7 + $0x8] sm:$0xff]   ;;  %v6193_v11 = vld [vmem:[#allocation7 + $0xf8] sm:$0xff]  }
 0x11f   :  { %2302 = vmatpush2.bf16.msra.mxu0 %v5647_v28  ;;  %v6179_v28 = vld [vmem:[#allocation7 + $0x70] sm:$0xff]   ;;  %v6205_v21 = vld [vmem:[#allocation7 + $0xc8] sm:$0xff]  }
 0x120   :  { %2303 = vmatprep.subr.bf16.mxu0 %v5646_v30  ;;  %v6181_v30 = vld [vmem:[#allocation7 + $0x68] sm:$0xff]  }
 0x121   :  { %2375 = vmatpush2.bf16.msra.mxu1 %v5679_v29  ;;  %v6180_v29 = vld [vmem:[#allocation7 + $0x30] sm:$0xff]  }
 0x122   :  { %2376 = vmatprep.subr.bf16.mxu1 %v5678_v32 }
 0x123   :  { %2304 = vmatpush2.bf16.msra.mxu0 %v5645_v45 }
 0x124   :  { %2305 = vmatprep.subr.bf16.mxu0 %v5644_v50  ;;  %v6185_v50 = vld [vmem:[#allocation7 + $0x58] sm:$0xff]  }
 0x125   :  { %2377 = vmatpush2.bf16.msra.mxu1 %v5677_v47  ;;  %v6184_v47 = vld [vmem:[#allocation7 + $0x20] sm:$0xff]  }
 0x126   :  { %2378 = vmatprep.subr.bf16.mxu1 %v5676_v51 }
 0x127   :  { %2306 = vmatpush2.bf16.msra.mxu0 %v5643_v0 }
 0x128   :  { %2307 = vmatprep.subr.bf16.mxu0 %v5642_v2  ;;  %v6188_v2 = vld [vmem:[#allocation7 + $0x10] sm:$0xff]  }
 0x129   :  { %2379 = vmatpush2.bf16.msra.mxu1 %v5675_v1 }
 0x12a   :  { %2380 = vmatprep.subr.bf16.mxu1 %v5674_v3 }
 0x12b   :  { %2308 = vmatpush2.bf16.msra.mxu0 %v5641_v12 }
 0x12c   :  { %2309 = vmatprep.subr.bf16.mxu0 %v5640_v17  ;;  %v6516_v32 = vpop.f32.mrf.mxu0  ;;  %v6194_v17 = vld [vmem:[#allocation7 + $0xb8] sm:$0xff]  }
 0x12d   :  { %2381 = vmatpush2.bf16.msra.mxu1 %v5673_v16  ;;  %v6191_v16 = vld [vmem:[#allocation7 + $0x40] sm:$0xff]  }
 0x12e   :  { %2382 = vmatprep.subr.bf16.mxu1 %v5672_v18  ;;  %v6518_v34 = vpop.f32.mrf.mxu1  ;;  %v6520_v44 = vpop.f32.mrf.mxu0 }
 0x12f   :  { %2310 = vmatpush2.bf16.msra.mxu0 %v5639_v20  ;;  %v6192_v20 = vld [vmem:[#allocation7] sm:$0xff]  }
 0x130   :  { %v6523_v45 = vpop.f32.mrf.mxu1  ;;  %v6528_v51 = vpop.f32.mrf.mxu0  ;;  %6007 = vmatprep.subr.bf16.mxu0 %v6193_v11 }
 0x131   :  { %2383 = vmatpush2.bf16.msra.mxu1 %v5671_v22  ;;  %v6195_v22 = vld [vmem:[#allocation7 + $0xf0] sm:$0xff]  }
 0x132   :  { %6047 = vmatprep.subr.bf16.mxu1 %v6177_v26  ;;  %2312 = vmatmul.mubr.bf16.vlgmr.msra.gmra.mxu0 %v6450_v37  ;;  %v6530_v59 = vpop.f32.mrf.mxu1  ;;  %v6532_v57 = vpop.f32.mrf.mxu0  ;;  %v6203_v37 = vld [vmem:[#allocation7 + $0xd0] sm:$0xff]  }
 0x133   :  { %2321 = vmatprep.mubr.bf16.mxu0 %v6456_v52  ;;  %6008 = vmatpush3.bf16.msra.mxu0 %v6194_v17  ;;  %v1129_v48 = vadd.f32 %v6530_v59, %v6528_v51 }
 0x134   :  { %2385 = vmatmul.mubr.bf16.vlgmr.msra.gmra.mxu1 %v6454_v39  ;;  %v6535_v0 = vpop.f32.mrf.mxu1  ;;  %6009 = vmatprep.subr.bf16.mxu0 %v6195_v22 }
 0x135   :  { %2394 = vmatprep.mubr.bf16.mxu1 %v6459_v54  ;;  %6048 = vmatpush3.bf16.msra.mxu1 %v6178_v27  ;;  %v6540_v1 = vpop.f32.mrf.mxu0  ;;  %v6196_v27 = vld [vmem:[#allocation7 + $0xb0] sm:$0xff]   ;;  %v1131_v55 = vadd.f32 %v6535_v0, %v6532_v57  ;;  %v6208_v0 = vld [vmem:[#allocation7 + $0x80] sm:$0xff]  }
 0x136   :  { %6049 = vmatprep.subr.bf16.mxu1 %v6179_v28  ;;  %v6542_v3 = vpop.f32.mrf.mxu1 }
 0x137   :  { %v6544_v5 = vpop.f32.mrf.mxu0  ;;  %6010 = vmatpush3.bf16.msra.mxu0 %v6196_v27 }
 0x138   :  { %v6546_v12 = vpop.f32.mrf.mxu1 }
 0x139   :  { %6050 = vmatpush3.bf16.msra.mxu1 %v6180_v29  ;;  %v6550_v18 = vpop.f32.mrf.mxu0  ;;  %v6197_v29 = vld [vmem:[#allocation7 + $0xe8] sm:$0xff]  }
 0x13a   :  { %6051 = vmatprep.subr.bf16.mxu1 %v6181_v30  ;;  %2322 = vmatmul.mubr.bf16.gmra.mxu0 %v6463_v6  ;;  %v6552_v26 = vpop.f32.mrf.mxu1  ;;  %v1125_v6 = vadd.f32 %v6518_v34, %v6516_v32 }
 0x13b   :  { %2331 = vmatprep.mubr.bf16.mxu0 %v6468_v15  ;;  %v6554_v28 = vpop.f32.mrf.mxu0  ;;  %6011 = vmatprep.subr.bf16.mxu0 %v6197_v29 }
 0x13c   :  { %2395 = vmatmul.mubr.bf16.gmra.mxu1 %v6466_v8  ;;  %v6556_v30 = vpop.f32.mrf.mxu1 }
 0x13d   :  { %2404 = vmatprep.mubr.bf16.mxu1 %v6471_v19  ;;  %6052 = vmatpush3.bf16.msra.mxu1 %v6182_v40  ;;  %v6198_v40 = vld [vmem:[#allocation7 + $0xa8] sm:$0xff]  }
 0x13e   :  { %6053 = vmatprep.subr.bf16.mxu1 %v6183_v41  ;;  %v6199_v41 = vld [vmem:[#allocation7 + $0xe0] sm:$0xff]   ;;  %6012 = vmatpush3.bf16.msra.mxu0 %v6198_v40 }
 0x13f   :  { %6013 = vmatprep.subr.bf16.mxu0 %v6199_v41 }
 0x141   :  { %6054 = vmatpush3.bf16.msra.mxu1 %v6184_v47  ;;  %v6558_v47 = vpop.f32.mrf.mxu0 }
 0x142   :  { %6055 = vmatprep.subr.bf16.mxu1 %v6185_v50  ;;  %2332 = vmatmul.mubr.bf16.gmra.mxu0 %v6475_v31  ;;  %v6200_v50 = vld [vmem:[#allocation7 + $0xa0] sm:$0xff]   ;;  %v1127_v31 = vadd.f32 %v6523_v45, %v6520_v44 }
 0x143   :  { %2341 = vmatprep.mubr.bf16.mxu0 %v6480_v33  ;;  %6014 = vmatpush3.bf16.msra.mxu0 %v6200_v50 }
 0x144   :  { %2405 = vmatmul.mubr.bf16.gmra.mxu1 %v6478_v43 }
 0x145   :  { %2414 = vmatprep.mubr.bf16.mxu1 %v6483_v61  ;;  %6056 = vmatpush3.bf16.msra.mxu1 %v6186_v60  ;;  %v6560_v60 = vpop.f32.mrf.mxu1  ;;  %v6206_v61 = vld [vmem:[#allocation7 + $0x88] sm:$0xff]  }
 0x146   :  { %6057 = vmatprep.subr.bf16.mxu1 %v6187_v53  ;;  %v6201_v53 = vld [vmem:[#allocation7 + $0xd8] sm:$0xff]  }
 0x147   :  { %6015 = vmatprep.subr.bf16.mxu0 %v6201_v53 }
 0x149   :  { %6058 = vmatpush3.bf16.msra.mxu1 %v6188_v2  ;;  %v6562_v2 = vpop.f32.mrf.mxu0 }
 0x14a   :  { %6059 = vmatprep.subr.bf16.mxu1 %v6189_v4  ;;  %2342 = vmatmul.mubr.bf16.gmra.mxu0 %v6487_v7  ;;  %v6564_v4 = vpop.f32.mrf.mxu1  ;;  %v6202_v7 = vld [vmem:[#allocation7 + $0x98] sm:$0xff]  }
 0x14b   :  { %6016 = vmatpush3.bf16.msra.mxu0 %v6202_v7 }
 0x14c   :  { %2415 = vmatmul.mubr.bf16.gmra.mxu1 %v6490_v13  ;;  %v6568_v11 = vpop.f32.mrf.mxu1  ;;  %6017 = vmatprep.subr.bf16.mxu0 %v6203_v37 }
 0x14d   :  { %6060 = vmatpush3.bf16.msra.mxu1 %v6190_v10  ;;  %v6566_v10 = vpop.f32.mrf.mxu0 }
 0x14e   :  { %6061 = vmatprep.subr.bf16.mxu1 %v6191_v16  ;;  %v6572_v17 = vpop.f32.mrf.mxu1 }
 0x14f   :  { %v6570_v16 = vpop.f32.mrf.mxu0  ;;  %6018 = vmatpush3.bf16.msra.mxu0 %v6204_v9  ;;  %v1135_v9 = vadd.f32 %v6542_v3, %v6540_v1  ;;  %v1141_v1 = vadd.f32 %v6556_v30, %v6554_v28 }
 0x150   :  { %v6576_v22 = vpop.f32.mrf.mxu1  ;;  %6019 = vmatprep.subr.bf16.mxu0 %v6205_v21 }
 0x151   :  { %6062 = vmatpush3.bf16.msra.mxu1 %v6192_v20  ;;  %v6574_v20 = vpop.f32.mrf.mxu0 }
 0x152   :  { %v6580_v29 = vpop.f32.mrf.mxu1 }
 0x153   :  { %v6578_v27 = vpop.f32.mrf.mxu0  ;;  %6020 = vmatpush3.bf16.msra.mxu0 %v6206_v61 }
 0x154   :  { %v6584_v41 = vpop.f32.mrf.mxu1 }
 0x155   :  { %v6582_v40 = vpop.f32.mrf.mxu0 }
 0x156   :  { %v6588_v53 = vpop.f32.mrf.mxu1 }
 0x157   :  { %v6586_v50 = vpop.f32.mrf.mxu0 }
 0x172   :  { %v1197_v33 = vpop.f32.mrf.mxu0 }
 0x173   :  { %v1198_v56 = vadd.f32 %v1197_v33, %v1125_v6  ;;  %v1137_v6 = vadd.f32 %v6546_v12, %v6544_v5  ;;  %v2849_v33 = vld [vmem:[#allocation5 + $0x5d0] sm:$0xff] }
 0x174   :  { %v1270_v15 = vpop.f32.mrf.mxu1  ;;  %v1199_v52 = vpop.f32.mrf.mxu0 }
 0x175   :  { %v1200_v36 = vadd.f32 %v1199_v52, %v1127_v31  ;;  %v1271_v51 = vadd.f32 %v1270_v15, %v1198_v56  ;;  %v1139_v56 = vadd.f32 %v6552_v26, %v6550_v18  ;;  %v6608_v18 = vld [vmem:[#allocation5 + $0x1f0] sm:$0xff] }
 0x176   :  { %v1272_v23 = vpop.f32.mrf.mxu1  ;;  %v1201_v42 = vpop.f32.mrf.mxu0  ;;  %v2847_v26 = vld [vmem:[#allocation5 + $0x590] sm:$0xff] }
 0x177   :  { %v1202_v44 = vadd.f32 %v1201_v42, %v1129_v48  ;;  %v1273_v32 = vadd.f32 %v1272_v23, %v1200_v36  ;;  %v2850_v42 = vld [vmem:[#allocation5 + $0x5f0] sm:$0xff]  ;;  %v6207_v36 = vld [vmem:[#allocation7 + $0xc0] sm:$0xff]  }
 0x178   :  { %v1274_v45 = vpop.f32.mrf.mxu1  ;;  %v1203_v7 = vpop.f32.mrf.mxu0  ;;  %6021 = vmatprep.subr.bf16.mxu0 %v6207_v36 }
 0x179   :  { %v1275_v34 = vadd.f32 %v1274_v45, %v1202_v44  ;;  %v1204_v58 = vadd.f32 %v1203_v7, %v1131_v55  ;;  %v5766_v55 = vcombine.high %v2849_v33, %v2850_v42  ;;  %v1310_v15 = vmul.f32 %v1273_v32, %v1273_v32  ;;  %6022 = vmatpush3.bf16.msra.mxu0 %v6208_v0  ;;  %v6606_v45 = vld [vmem:[#allocation5 + $0x1d0] sm:$0xff] }
 0x17a   :  { %v1276_v13 = vpop.f32.mrf.mxu1  ;;  %v1207_v52 = vpop.f32.mrf.mxu0  ;;  %v5765_v44 = vcombine.low %v2849_v33, %v2850_v42 }
 0x17b   :  { %v1277_v37 = vadd.f32 %v1276_v13, %v1204_v58  ;;  %v1311_v48 = vmul.f32 %v1275_v34, %v1275_v34  ;;  %v1309_v58 = vmul.f32 %v1271_v51, %v1271_v51  ;;  %v1208_v13 = vadd.f32 %v1207_v52, %v1135_v9  ;;  %3644 = vmatprep.subr.bf16.mxu1 %v5766_v55  ;;  %v2848_v51 = vld [vmem:[#allocation5 + $0x5b0] sm:$0xff] }
 0x17c   :  { %v1280_v31 = vpop.f32.mrf.mxu1  ;;  %v1209_v23 = vpop.f32.mrf.mxu0  ;;  %v5734_v34 = vcombine.high %v6606_v45, %v6608_v18  ;;  %v5764_v9 = vcombine.high %v2847_v26, %v2848_v51  ;;  %v5763_v55 = vcombine.low %v2847_v26, %v2848_v51  ;;  %v2843_v26 = vld [vmem:[#allocation5 + $0x510] sm:$0xff] }
 0x17d   :  { %v1312_v21 = vmul.f32 %v1277_v37, %v1277_v37  ;;  %v1210_v59 = vadd.f32 %v1209_v23, %v1137_v6  ;;  %v1325_v7 = vpack.c.bf16 %v1311_v48, %v1309_v58  ;;  %v1281_v33 = vadd.f32 %v1280_v31, %v1208_v13 }
 0x17e   :  { %v1282_v57 = vpop.f32.mrf.mxu1  ;;  %v1211_v61 = vpop.f32.mrf.mxu0  ;;  %3571 = vmatprep.subr.bf16.mxu0 %v5734_v34  ;;  %v1147_v48 = vadd.f32 %v6564_v4, %v6562_v2  ;;  %v1149_v31 = vadd.f32 %v6568_v11, %v6566_v10  ;;  %v2844_v10 = vld [vmem:[#allocation5 + $0x530] sm:$0xff] }
 0x17f   :  { %v1212_v3 = vadd.f32 %v1211_v61, %v1139_v56  ;;  %v1326_v12 = vpack.c.bf16 %v1312_v21, %v1310_v15  ;;  %v1283_v52 = vadd.f32 %v1282_v57, %v1210_v59  ;;  %v2845_v56 = vld [vmem:[#allocation5 + $0x550] sm:$0xff]  ;;  %v1145_v15 = vadd.f32 %v6560_v60, %v6558_v47 }
 0x180   :  { %v1284_v5 = vpop.f32.mrf.mxu1  ;;  %v1213_v32 = vpop.f32.mrf.mxu0  ;;  %v2846_v57 = vld [vmem:[#allocation5 + $0x570] sm:$0xff]  ;;  %v1313_v2 = vmul.f32 %v1281_v33, %v1281_v33 }
 0x181   :  { %v1214_v6 = vadd.f32 %v1213_v32, %v1141_v1  ;;  %v1285_v37 = vadd.f32 %v1284_v5, %v1212_v3  ;;  %2770 = vmatprep.mubr.bf16.mxu1 %v1326_v12  ;;  %v1314_v0 = vmul.f32 %v1283_v52, %v1283_v52  ;;  %v5762_v3 = vcombine.high %v2845_v56, %v2846_v57 }
 0x182   :  { %v1286_v28 = vpop.f32.mrf.mxu1  ;;  %v1217_v42 = vpop.f32.mrf.mxu0  ;;  %2771 = vmatmul.mubr.bf16.vlgmr.msra.gmra.mxu1 %v1325_v7  ;;  %v1151_v5 = vadd.f32 %v6572_v17, %v6570_v16  ;;  %v1157_v16 = vadd.f32 %v6580_v29, %v6578_v27 }
 0x183   :  { %v1287_v23 = vadd.f32 %v1286_v28, %v1214_v6  ;;  %3645 = vmatpush1.bf16.msra.mxu1 %v5765_v44  ;;  %v1315_v21 = vmul.f32 %v1285_v37, %v1285_v37  ;;  %v1218_v4 = vadd.f32 %v1217_v42, %v1145_v15  ;;  %v5761_v44 = vcombine.low %v2845_v56, %v2846_v57  ;;  %v2842_v56 = vld [vmem:[#allocation5 + $0x4f0] sm:$0xff] }
 0x184   :  { %v1290_v36 = vpop.f32.mrf.mxu1  ;;  %v1219_v59 = vpop.f32.mrf.mxu0  ;;  %3646 = vmatprep.subr.bf16.mxu1 %v5764_v9  ;;  %v5760_v28 = vcombine.high %v2843_v26, %v2844_v10  ;;  %v5759_v42 = vcombine.low %v2843_v26, %v2844_v10  ;;  %v2841_v9 = vld [vmem:[#allocation5 + $0x4d0] sm:$0xff] }
 0x185   :  { %v1316_v58 = vmul.f32 %v1287_v23, %v1287_v23  ;;  %v1220_v13 = vadd.f32 %v1219_v59, %v1147_v48  ;;  %v1327_v7 = vpack.c.bf16 %v1315_v21, %v1313_v2  ;;  %v1291_v6 = vadd.f32 %v1290_v36, %v1218_v4  ;;  %v2839_v2 = vld [vmem:[#allocation5 + $0x490] sm:$0xff] }
 0x186   :  { %v1292_v61 = vpop.f32.mrf.mxu1  ;;  %v1221_v1 = vpop.f32.mrf.mxu0  ;;  %v1155_v48 = vadd.f32 %v6576_v22, %v6574_v20  ;;  %v1159_v36 = vadd.f32 %v6584_v41, %v6582_v40  ;;  %v2840_v40 = vld [vmem:[#allocation5 + $0x4b0] sm:$0xff] }
 0x187   :  { %v1222_v12 = vadd.f32 %v1221_v1, %v1149_v31  ;;  %v1328_v60 = vpack.c.bf16 %v1316_v58, %v1314_v0  ;;  %3647 = vmatpush1.bf16.msra.mxu1 %v5763_v55  ;;  %v1293_v11 = vadd.f32 %v1292_v61, %v1220_v13  ;;  %v1317_v27 = vmul.f32 %v1291_v6, %v1291_v6  ;;  %v2835_v6 = vld [vmem:[#allocation5 + $0x410] sm:$0xff] }
 0x188   :  { %v1294_v47 = vpop.f32.mrf.mxu1  ;;  %v1223_v32 = vpop.f32.mrf.mxu0  ;;  %3648 = vmatprep.subr.bf16.mxu1 %v5762_v3  ;;  %v5758_v0 = vcombine.high %v2841_v9, %v2842_v56  ;;  %v1161_v58 = vadd.f32 %v6588_v53, %v6586_v50  ;;  %v5757_v61 = vcombine.low %v2841_v9, %v2842_v56  ;;  %v5755_v50 = vcombine.low %v2839_v2, %v2840_v40  ;;  %v2837_v53 = vld [vmem:[#allocation5 + $0x450] sm:$0xff] }
 0x189   :  { %v1224_v34 = vadd.f32 %v1223_v32, %v1151_v5  ;;  %v1295_v51 = vadd.f32 %v1294_v47, %v1222_v12  ;;  %2778 = vmatprep.mubr.bf16.mxu1 %v1328_v60  ;;  %v1318_v15 = vmul.f32 %v1293_v11, %v1293_v11  ;;  %v5756_v60 = vcombine.high %v2839_v2, %v2840_v40  ;;  %v2856_v2 = vld [vmem:[#allocation5 + $0x6b0] sm:$0xff] }
 0x18a   :  { %v1296_v52 = vpop.f32.mrf.mxu1  ;;  %v1227_v37 = vpop.f32.mrf.mxu0  ;;  %2779 = vmatmul.mubr.bf16.gmra.mxu1 %v1327_v7  ;;  %v2838_v7 = vld [vmem:[#allocation5 + $0x470] sm:$0xff] }
 0x18b   :  { %v1297_v17 = vadd.f32 %v1296_v52, %v1224_v34  ;;  %3649 = vmatpush1.bf16.msra.mxu1 %v5761_v44  ;;  %v1319_v23 = vmul.f32 %v1295_v51, %v1295_v51  ;;  %v1228_v29 = vadd.f32 %v1227_v37, %v1155_v48  ;;  %v5754_v34 = vcombine.high %v2837_v53, %v2838_v7  ;;  %v2853_v40 = vld [vmem:[#allocation5 + $0x650] sm:$0xff] }
 0x18c   :  { %v1300_v33 = vpop.f32.mrf.mxu1  ;;  %v1229_v55 = vpop.f32.mrf.mxu0  ;;  %3650 = vmatprep.subr.bf16.mxu1 %v5760_v28  ;;  %v5753_v52 = vcombine.low %v2837_v53, %v2838_v7  ;;  %v2836_v28 = vld [vmem:[#allocation5 + $0x430] sm:$0xff] }
 0x18d   :  { %v1320_v21 = vmul.f32 %v1297_v17, %v1297_v17  ;;  %v1230_v59 = vadd.f32 %v1229_v55, %v1157_v16  ;;  %v1329_v4 = vpack.c.bf16 %v1319_v23, %v1317_v27  ;;  %v1301_v47 = vadd.f32 %v1300_v33, %v1228_v29  ;;  %v2865_v33 = vld [vmem:[#allocation5 + $0x7d0] sm:$0xff] }
 0x18e   :  { %v1302_v57 = vpop.f32.mrf.mxu1  ;;  %v1231_v31 = vpop.f32.mrf.mxu0  ;;  %v5752_v16 = vcombine.high %v2835_v6, %v2836_v28  ;;  %v5751_v17 = vcombine.low %v2835_v6, %v2836_v28  ;;  %v2863_v23 = vld [vmem:[#allocation5 + $0x790] sm:$0xff] }
 0x18f   :  { %v1232_v13 = vadd.f32 %v1231_v31, %v1159_v36  ;;  %v1330_v22 = vpack.c.bf16 %v1320_v21, %v1318_v15  ;;  %3651 = vmatpush1.bf16.msra.mxu1 %v5759_v42  ;;  %v1303_v41 = vadd.f32 %v1302_v57, %v1230_v59  ;;  %v1321_v11 = vmul.f32 %v1301_v47, %v1301_v47  ;;  %v2866_v42 = vld [vmem:[#allocation5 + $0x7f0] sm:$0xff] }
 0x190   :  { %v1304_v20 = vpop.f32.mrf.mxu1  ;;  %v1233_v1 = vpop.f32.mrf.mxu0  ;;  %3652 = vmatprep.subr.bf16.mxu1 %v5758_v0  ;;  %v5782_v9 = vcombine.high %v2865_v33, %v2866_v42  ;;  %v5781_v48 = vcombine.low %v2865_v33, %v2866_v42  ;;  %v2864_v55 = vld [vmem:[#allocation5 + $0x7b0] sm:$0xff] }
 0x191   :  { %v1234_v3 = vadd.f32 %v1233_v1, %v1161_v58  ;;  %v1305_v5 = vadd.f32 %v1304_v20, %v1232_v13  ;;  %2786 = vmatprep.mubr.bf16.mxu1 %v1330_v22  ;;  %v1322_v32 = vmul.f32 %v1303_v41, %v1303_v41  ;;  %v5780_v56 = vcombine.high %v2863_v23, %v2864_v55  ;;  %v2861_v15 = vld [vmem:[#allocation5 + $0x750] sm:$0xff] }
 0x192   :  { %v1306_v12 = vpop.f32.mrf.mxu1  ;;  %2787 = vmatmul.mubr.bf16.gmra.mxu1 %v1329_v4  ;;  %v5779_v36 = vcombine.low %v2863_v23, %v2864_v55  ;;  %v2862_v21 = vld [vmem:[#allocation5 + $0x770] sm:$0xff] }
 0x193   :  { %v1307_v44 = vadd.f32 %v1306_v12, %v1234_v3  ;;  %3653 = vmatpush1.bf16.msra.mxu1 %v5757_v61  ;;  %v1323_v26 = vmul.f32 %v1305_v5, %v1305_v5  ;;  %v5778_v59 = vcombine.high %v2861_v15, %v2862_v21  ;;  %v5777_v57 = vcombine.low %v2861_v15, %v2862_v21  ;;  %v2859_v27 = vld [vmem:[#allocation5 + $0x710] sm:$0xff] }
 0x194   :  { %3654 = vmatprep.subr.bf16.mxu1 %v5756_v60  ;;  %v2860_v29 = vld [vmem:[#allocation5 + $0x730] sm:$0xff] }
 0x195   :  { %v1324_v10 = vmul.f32 %v1307_v44, %v1307_v44  ;;  %v1331_v37 = vpack.c.bf16 %v1323_v26, %v1321_v11  ;;  %v5776_v31 = vcombine.high %v2859_v27, %v2860_v29  ;;  %v5775_v0 = vcombine.low %v2859_v27, %v2860_v29  ;;  %v2857_v58 = vld [vmem:[#allocation5 + $0x6d0] sm:$0xff] }
 0x196   :  { %v2858_v13 = vld [vmem:[#allocation5 + $0x6f0] sm:$0xff] }
 0x197   :  { %v1332_v51 = vpack.c.bf16 %v1324_v10, %v1322_v32  ;;  %3655 = vmatpush1.bf16.msra.mxu1 %v5755_v50  ;;  %v5774_v20 = vcombine.high %v2857_v58, %v2858_v13  ;;  %v5773_v22 = vcombine.low %v2857_v58, %v2858_v13  ;;  %v2855_v61 = vld [vmem:[#allocation5 + $0x690] sm:$0xff] }
 0x198   :  { %3656 = vmatprep.subr.bf16.mxu1 %v5754_v34  ;;  %v5772_v4 = vcombine.high %v2855_v61, %v2856_v2  ;;  %v5771_v1 = vcombine.low %v2855_v61, %v2856_v2  ;;  %v2854_v41 = vld [vmem:[#allocation5 + $0x670] sm:$0xff] }
 0x199   :  { %2794 = vmatprep.mubr.bf16.mxu1 %v1332_v51  ;;  %v5770_v3 = vcombine.high %v2853_v40, %v2854_v41  ;;  %v5769_v47 = vcombine.low %v2853_v40, %v2854_v41  ;;  %v2851_v60 = vld [vmem:[#allocation5 + $0x610] sm:$0xff] }
 0x19a   :  { %2795 = vmatmul.mubr.bf16.gmra.mxu1 %v1331_v37  ;;  %v2852_v44 = vld [vmem:[#allocation5 + $0x630] sm:$0xff] }
 0x19b   :  { %3657 = vmatpush1.bf16.msra.mxu1 %v5753_v52  ;;  %3676 = vmatprep.mubr.bf16.mxu1 %v6380_v63  ;;  %v5768_v50 = vcombine.high %v2851_v60, %v2852_v44  ;;  %v5767_v7 = vcombine.low %v2851_v60, %v2852_v44  ;;  %v2913_v32 = vld [vmem:[#allocation5 + $0xdd0] sm:$0xff] }
 0x19c   :  { %3658 = vmatprep.subr.bf16.mxu1 %v5752_v16  ;;  %v2914_v10 = vld [vmem:[#allocation5 + $0xdf0] sm:$0xff] }
 0x19d   :  { %v5830_v11 = vcombine.high %v2913_v32, %v2914_v10  ;;  %v5829_v52 = vcombine.low %v2913_v32, %v2914_v10  ;;  %v2911_v6 = vld [vmem:[#allocation5 + $0xd90] sm:$0xff] }
 0x19e   :  { %v2912_v37 = vld [vmem:[#allocation5 + $0xdb0] sm:$0xff] }
 0x19f   :  { %3659 = vmatpush1.bf16.msra.mxu1 %v5751_v17  ;;  %v5828_v28 = vcombine.high %v2911_v6, %v2912_v37  ;;  %v5827_v33 = vcombine.low %v2911_v6, %v2912_v37  ;;  %v2909_v42 = vld [vmem:[#allocation5 + $0xd50] sm:$0xff] }
 0x1a0   :  { %3660 = vmatprep.subr.bf16.mxu1 %v5782_v9  ;;  %v2908_v21 = vld [vmem:[#allocation5 + $0xd30] sm:$0xff] }
 0x1a1   :  { %v2905_v29 = vld [vmem:[#allocation5 + $0xcd0] sm:$0xff] }
 0x1a2   :  { %v2904_v2 = vld [vmem:[#allocation5 + $0xcb0] sm:$0xff] }
 0x1a3   :  { %3661 = vmatpush2.bf16.msra.mxu1 %v5781_v48  ;;  %v2910_v48 = vld [vmem:[#allocation5 + $0xd70] sm:$0xff] }
 0x1a4   :  { %3662 = vmatprep.subr.bf16.mxu1 %v5780_v56  ;;  %v5826_v55 = vcombine.high %v2909_v42, %v2910_v48  ;;  %v5825_v56 = vcombine.low %v2909_v42, %v2910_v48  ;;  %v2901_v41 = vld [vmem:[#allocation5 + $0xc50] sm:$0xff] }
 0x1a5   :  { %v2900_v10 = vld [vmem:[#allocation5 + $0xc30] sm:$0xff] }
 0x1a6   :  { %v2929_v37 = vld [vmem:[#allocation5 + $0xfd0] sm:$0xff] }
 0x1a7   :  { %3663 = vmatpush2.bf16.msra.mxu1 %v5779_v36  ;;  %v2907_v36 = vld [vmem:[#allocation5 + $0xd10] sm:$0xff] }
 0x1a8   :  { %3664 = vmatprep.subr.bf16.mxu1 %v5778_v59  ;;  %v5823_v27 = vcombine.low %v2907_v36, %v2908_v21 }
 0x1ab   :  { %3665 = vmatpush2.bf16.msra.mxu1 %v5777_v57  ;;  %v5824_v57 = vcombine.high %v2907_v36, %v2908_v21  ;;  %v2928_v21 = vld [vmem:[#allocation5 + $0xfb0] sm:$0xff] }
 0x1ac   :  { %3666 = vmatprep.subr.bf16.mxu1 %v5776_v31 }
 0x1af   :  { %3667 = vmatpush2.bf16.msra.mxu1 %v5775_v0  ;;  %v2906_v0 = vld [vmem:[#allocation5 + $0xcf0] sm:$0xff] }
 0x1b0   :  { %3668 = vmatprep.subr.bf16.mxu1 %v5774_v20  ;;  %v5822_v13 = vcombine.high %v2905_v29, %v2906_v0  ;;  %v5821_v20 = vcombine.low %v2905_v29, %v2906_v0  ;;  %v2925_v0 = vld [vmem:[#allocation5 + $0xf50] sm:$0xff] }
 0x1b2   :  { %v6631_v5 = vpop.f32.mrf.mxu0 }
 0x1b3   :  { %3669 = vmatpush2.bf16.msra.mxu1 %v5773_v22  ;;  %v2903_v22 = vld [vmem:[#allocation5 + $0xc90] sm:$0xff] }
 0x1b4   :  { %3670 = vmatprep.subr.bf16.mxu1 %v5772_v4  ;;  %v6633_v12 = vpop.f32.mrf.mxu1  ;;  %v6635_v53 = vpop.f32.mrf.mxu0  ;;  %v5819_v40 = vcombine.low %v2903_v22, %v2904_v2 }
 0x1b6   :  { %v6637_v26 = vpop.f32.mrf.mxu1  ;;  %v6639_v34 = vpop.f32.mrf.mxu0 }
 0x1b7   :  { %3671 = vmatpush2.bf16.msra.mxu1 %v5771_v1  ;;  %v5820_v1 = vcombine.high %v2903_v22, %v2904_v2 }
 0x1b8   :  { %3672 = vmatprep.subr.bf16.mxu1 %v5770_v3  ;;  %v6641_v51 = vpop.f32.mrf.mxu1  ;;  %v6643_v16 = vpop.f32.mrf.mxu0 }
 0x1ba   :  { %v6646_v17 = vpop.f32.mrf.mxu1  ;;  %v6649_v9 = vpop.f32.mrf.mxu0 }
 0x1bb   :  { %3673 = vmatpush2.bf16.msra.mxu1 %v5769_v47  ;;  %v2902_v47 = vld [vmem:[#allocation5 + $0xc70] sm:$0xff] }
 0x1bc   :  { %3674 = vmatprep.subr.bf16.mxu1 %v5768_v50  ;;  %v6651_v23 = vpop.f32.mrf.mxu1  ;;  %v6653_v15 = vpop.f32.mrf.mxu0  ;;  %v5818_v44 = vcombine.high %v2901_v41, %v2902_v47  ;;  %v5817_v50 = vcombine.low %v2901_v41, %v2902_v47  ;;  %v2924_v47 = vld [vmem:[#allocation5 + $0xf30] sm:$0xff] }
 0x1be   :  { %v6655_v59 = vpop.f32.mrf.mxu1  ;;  %v6659_v31 = vpop.f32.mrf.mxu0 }
 0x1bf   :  { %3675 = vmatpush2.bf16.msra.mxu1 %v5767_v7  ;;  %v2899_v7 = vld [vmem:[#allocation5 + $0xc10] sm:$0xff] }
 0x1c0   :  { %3790 = vmatprep.subr.bf16.mxu1 %v5830_v11  ;;  %v6661_v58 = vpop.f32.mrf.mxu1  ;;  %v6663_v61 = vpop.f32.mrf.mxu0  ;;  %v5815_v6 = vcombine.low %v2899_v7, %v2900_v10 }
 0x1c2   :  { %3677 = vmatmul.mubr.bf16.vlgmr.msra.gmra.mxu1 %v6390_v25  ;;  %v6665_v4 = vpop.f32.mrf.mxu1  ;;  %v6669_v3 = vpop.f32.mrf.mxu0 }
 0x1c3   :  { %3791 = vmatpush1.bf16.msra.mxu1 %v5829_v52  ;;  %3686 = vmatprep.mubr.bf16.mxu1 %v6395_v35  ;;  %v5816_v52 = vcombine.high %v2899_v7, %v2900_v10  ;;  %v2921_v10 = vld [vmem:[#allocation5 + $0xed0] sm:$0xff] }
 0x1c4   :  { %3792 = vmatprep.subr.bf16.mxu1 %v5828_v28  ;;  %v6671_v60 = vpop.f32.mrf.mxu1  ;;  %v6673_v32 = vpop.f32.mrf.mxu0 }
 0x1c6   :  { %v6675_v11 = vpop.f32.mrf.mxu1  ;;  %v6679_v28 = vpop.f32.mrf.mxu0 }
 0x1c7   :  { %3793 = vmatpush1.bf16.msra.mxu1 %v5827_v33  ;;  %v2930_v33 = vld [vmem:[#allocation5 + $0xff0] sm:$0xff] }
 0x1c8   :  { %3794 = vmatprep.subr.bf16.mxu1 %v5826_v55  ;;  %v6681_v42 = vpop.f32.mrf.mxu1  ;;  %v5846_v48 = vcombine.high %v2929_v37, %v2930_v33  ;;  %v5845_v55 = vcombine.low %v2929_v37, %v2930_v33  ;;  %v6683_v36 = vpop.f32.mrf.mxu0 }
 0x1ca   :  { %3687 = vmatmul.mubr.bf16.gmra.mxu1 %v6402_v46 }
 0x1cb   :  { %3795 = vmatpush1.bf16.msra.mxu1 %v5825_v56  ;;  %3696 = vmatprep.mubr.bf16.mxu1 %v6407_v62  ;;  %v2927_v56 = vld [vmem:[#allocation5 + $0xf90] sm:$0xff] }
 0x1cc   :  { %3796 = vmatprep.subr.bf16.mxu1 %v5824_v57  ;;  %v6685_v57 = vpop.f32.mrf.mxu1  ;;  %v5843_v29 = vcombine.low %v2927_v56, %v2928_v21 }
 0x1ce   :  { %v6689_v22 = vpop.f32.mrf.mxu1 }
 0x1cf   :  { %3797 = vmatpush1.bf16.msra.mxu1 %v5823_v27  ;;  %v5844_v27 = vcombine.high %v2927_v56, %v2928_v21  ;;  %v2920_v21 = vld [vmem:[#allocation5 + $0xeb0] sm:$0xff] }
 0x1d0   :  { %3798 = vmatprep.subr.bf16.mxu1 %v5822_v13  ;;  %v6687_v13 = vpop.f32.mrf.mxu0 }
 0x1d2   :  { %3697 = vmatmul.mubr.bf16.gmra.mxu1 %v6414_v14  ;;  %v6691_v41 = vpop.f32.mrf.mxu0 }
 0x1d3   :  { %3799 = vmatpush1.bf16.msra.mxu1 %v5821_v20  ;;  %3706 = vmatprep.mubr.bf16.mxu1 %v6419_v24  ;;  %v2926_v20 = vld [vmem:[#allocation5 + $0xf70] sm:$0xff] }
 0x1d4   :  { %3800 = vmatprep.subr.bf16.mxu1 %v5820_v1  ;;  %v5842_v2 = vcombine.high %v2925_v0, %v2926_v20  ;;  %v5841_v1 = vcombine.low %v2925_v0, %v2926_v20  ;;  %v2243_v20 = vadd.f32 %v6637_v26, %v6635_v53  ;;  %v2247_v53 = vadd.f32 %v6646_v17, %v6643_v16 }
 0x1d5   :  { %v2251_v17 = vadd.f32 %v6651_v23, %v6649_v9 }
 0x1d7   :  { %3801 = vmatpush1.bf16.msra.mxu1 %v5819_v40  ;;  %v2923_v40 = vld [vmem:[#allocation5 + $0xf10] sm:$0xff] }
 0x1d8   :  { %3802 = vmatprep.subr.bf16.mxu1 %v5818_v44  ;;  %v6693_v44 = vpop.f32.mrf.mxu1  ;;  %v5839_v7 = vcombine.low %v2923_v40, %v2924_v47 }
 0x1da   :  { %3707 = vmatmul.mubr.bf16.gmra.mxu1 %v6434_v38  ;;  %v6697_v37 = vpop.f32.mrf.mxu1 }
 0x1db   :  { %3803 = vmatpush1.bf16.msra.mxu1 %v5817_v50  ;;  %3822 = vmatprep.mubr.bf16.mxu1 %v6443_v49  ;;  %v5840_v50 = vcombine.high %v2923_v40, %v2924_v47  ;;  %v2917_v40 = vld [vmem:[#allocation5 + $0xe50] sm:$0xff]  ;;  %v2241_v47 = vadd.f32 %v6633_v12, %v6631_v5 }
 0x1dc   :  { %3804 = vmatprep.subr.bf16.mxu1 %v5816_v52  ;;  %v6695_v52 = vpop.f32.mrf.mxu0  ;;  %v2916_v12 = vld [vmem:[#allocation5 + $0xe30] sm:$0xff] }
 0x1de   :  { %v6699_v56 = vpop.f32.mrf.mxu0 }
 0x1df   :  { %3805 = vmatpush1.bf16.msra.mxu1 %v5815_v6  ;;  %v2922_v6 = vld [vmem:[#allocation5 + $0xef0] sm:$0xff] }
 0x1e0   :  { %3806 = vmatprep.subr.bf16.mxu1 %v5846_v48  ;;  %v5838_v33 = vcombine.high %v2921_v10, %v2922_v6  ;;  %v5837_v48 = vcombine.low %v2921_v10, %v2922_v6  ;;  %v2245_v10 = vadd.f32 %v6641_v51, %v6639_v34 }
 0x1e3   :  { %3807 = vmatpush2.bf16.msra.mxu1 %v5845_v55  ;;  %v2919_v55 = vld [vmem:[#allocation5 + $0xe90] sm:$0xff] }
 0x1e4   :  { %3808 = vmatprep.subr.bf16.mxu1 %v5844_v27  ;;  %v6701_v27 = vpop.f32.mrf.mxu1 }
 0x1e7   :  { %3809 = vmatpush2.bf16.msra.mxu1 %v5843_v29  ;;  %v5836_v29 = vcombine.high %v2919_v55, %v2920_v21 }
 0x1e8   :  { %3810 = vmatprep.subr.bf16.mxu1 %v5842_v2 }
 0x1eb   :  { %3811 = vmatpush2.bf16.msra.mxu1 %v5841_v1  ;;  %v5835_v1 = vcombine.low %v2919_v55, %v2920_v21  ;;  %v2915_v21 = vld [vmem:[#allocation5 + $0xe10] sm:$0xff] }
 0x1ec   :  { %3812 = vmatprep.subr.bf16.mxu1 %v5840_v50 }
 0x1ef   :  { %3813 = vmatpush2.bf16.msra.mxu1 %v5839_v7  ;;  %v2918_v7 = vld [vmem:[#allocation5 + $0xe70] sm:$0xff] }
 0x1f0   :  { %3814 = vmatprep.subr.bf16.mxu1 %v5838_v33  ;;  %v5834_v30 = vcombine.high %v2917_v40, %v2918_v7  ;;  %v5833_v55 = vcombine.low %v2917_v40, %v2918_v7  ;;  %v2255_v40 = vadd.f32 %v6661_v58, %v6659_v31 }
 0x1f2   :  { %v2313_v0 = vpop.f32.mrf.mxu0 }
 0x1f3   :  { %3815 = vmatpush2.bf16.msra.mxu1 %v5837_v48  ;;  %v2314_v49 = vadd.f32 %v2313_v0, %v2241_v47  ;;  %v2253_v0 = vadd.f32 %v6655_v59, %v6653_v15 }
 0x1f4   :  { %v2386_v2 = vpop.f32.mrf.mxu1  ;;  %v2315_v50 = vpop.f32.mrf.mxu0  ;;  %3816 = vmatprep.subr.bf16.mxu1 %v5836_v29 }
 0x1f5   :  { %v2316_v6 = vadd.f32 %v2315_v50, %v2243_v20  ;;  %v2387_v51 = vadd.f32 %v2386_v2, %v2314_v49  ;;  %v5832_v50 = vcombine.high %v2915_v21, %v2916_v12 }
 0x1f6   :  { %v2388_v33 = vpop.f32.mrf.mxu1  ;;  %v2317_v38 = vpop.f32.mrf.mxu0 }
 0x1f7   :  { %v2318_v26 = vadd.f32 %v2317_v38, %v2245_v10  ;;  %3817 = vmatpush2.bf16.msra.mxu1 %v5835_v1  ;;  %v2389_v29 = vadd.f32 %v2388_v33, %v2316_v6  ;;  %v5831_v38 = vcombine.low %v2915_v21, %v2916_v12  ;;  %v2815_v6 = vld [vmem:[#allocation5 + $0x190] sm:$0xff]  ;;  %v2425_v15 = vmul.f32 %v2387_v51, %v2387_v51 }
 0x1f8   :  { %v2390_v48 = vpop.f32.mrf.mxu1  ;;  %v2319_v5 = vpop.f32.mrf.mxu0  ;;  %3818 = vmatprep.subr.bf16.mxu1 %v5834_v30  ;;  %v2816_v33 = vld [vmem:[#allocation5 + $0x1b0] sm:$0xff] }
 0x1f9   :  { %v2391_v24 = vadd.f32 %v2390_v48, %v2318_v26  ;;  %v2320_v14 = vadd.f32 %v2319_v5, %v2247_v53  ;;  %v2426_v7 = vmul.f32 %v2389_v29, %v2389_v29  ;;  %v2257_v53 = vadd.f32 %v6665_v4, %v6663_v61  ;;  %v2813_v12 = vld [vmem:[#allocation5 + $0x150] sm:$0xff] }
 0x1fa   :  { %v2392_v34 = vpop.f32.mrf.mxu1  ;;  %v2323_v20 = vpop.f32.mrf.mxu0  ;;  %v2814_v29 = vld [vmem:[#allocation5 + $0x170] sm:$0xff]  ;;  %v2263_v61 = vadd.f32 %v6675_v11, %v6673_v32 }
 0x1fb   :  { %v2393_v47 = vadd.f32 %v2392_v34, %v2320_v14  ;;  %3819 = vmatpush2.bf16.msra.mxu1 %v5833_v55  ;;  %v2427_v1 = vmul.f32 %v2391_v24, %v2391_v24  ;;  %v2324_v14 = vadd.f32 %v2323_v20, %v2251_v17  ;;  %v5732_v55 = vcombine.high %v2815_v6, %v2816_v33 }
 0x1fc   :  { %v2396_v16 = vpop.f32.mrf.mxu1  ;;  %v2325_v30 = vpop.f32.mrf.mxu0  ;;  %3820 = vmatprep.subr.bf16.mxu1 %v5832_v50  ;;  %v7072_v20 = vcombine.low %v6606_v45, %v6608_v18  ;;  %v5730_v17 = vcombine.high %v2813_v12, %v2814_v29  ;;  %v2811_v45 = vld [vmem:[#allocation5 + $0x110] sm:$0xff] }
 0x1fd   :  { %v2428_v49 = vmul.f32 %v2393_v47, %v2393_v47  ;;  %v2326_v2 = vadd.f32 %v2325_v30, %v2253_v0  ;;  %v2441_v23 = vpack.c.bf16 %v2427_v1, %v2425_v15  ;;  %v2397_v34 = vadd.f32 %v2396_v16, %v2324_v14  ;;  %v2812_v18 = vld [vmem:[#allocation5 + $0x130] sm:$0xff] }
 0x1fe   :  { %v2398_v10 = vpop.f32.mrf.mxu1  ;;  %v2327_v59 = vpop.f32.mrf.mxu0  ;;  %v5731_v0 = vcombine.low %v2815_v6, %v2816_v33  ;;  %v2261_v47 = vadd.f32 %v6671_v60, %v6669_v3  ;;  %v2265_v1 = vadd.f32 %v6681_v42, %v6679_v28  ;;  %v5729_v33 = vcombine.low %v2813_v12, %v2814_v29 }
 0x1ff   :  { %v2442_v26 = vpack.c.bf16 %v2428_v49, %v2426_v7  ;;  %v2328_v9 = vadd.f32 %v2327_v59, %v2255_v40  ;;  %3821 = vmatpush2.bf16.msra.mxu1 %v5831_v38  ;;  %v2399_v31 = vadd.f32 %v2398_v10, %v2326_v2  ;;  %v2429_v7 = vmul.f32 %v2397_v34, %v2397_v34 }
 0x200   :  { %v2400_v24 = vpop.f32.mrf.mxu1  ;;  %v2329_v48 = vpop.f32.mrf.mxu0  ;;  %v2267_v10 = vadd.f32 %v6685_v57, %v6683_v36  ;;  %v5728_v28 = vcombine.high %v2811_v45, %v2812_v18  ;;  %v2273_v36 = vadd.f32 %v6693_v44, %v6691_v41  ;;  %v2275_v29 = vadd.f32 %v6697_v37, %v6695_v52  ;;  %v2807_v44 = vld [vmem:[#allocation5 + $0x90] sm:$0xff] }
 0x201   :  { %v2330_v58 = vadd.f32 %v2329_v48, %v2257_v53  ;;  %v2401_v21 = vadd.f32 %v2400_v24, %v2328_v9  ;;  %2609 = vmatprep.mubr.bf16.mxu0 %v2442_v26  ;;  %v2430_v32 = vmul.f32 %v2399_v31, %v2399_v31  ;;  %v2809_v9 = vld [vmem:[#allocation5 + $0xd0] sm:$0xff]  ;;  %v5727_v31 = vcombine.low %v2811_v45, %v2812_v18 }
 0x202   :  { %v2402_v5 = vpop.f32.mrf.mxu1  ;;  %v2333_v51 = vpop.f32.mrf.mxu0  ;;  %2610 = vmatmul.mubr.bf16.vlgmr.msra.gmra.mxu0 %v2441_v23  ;;  %3823 = vmatmul.mubr.bf16.vlgmr.msra.gmra.mxu1 %v6454_v39  ;;  %v2810_v24 = vld [vmem:[#allocation5 + $0xf0] sm:$0xff] }
 0x203   :  { %v2403_v4 = vadd.f32 %v2402_v5, %v2330_v58  ;;  %3572 = vmatpush1.bf16.msra.mxu0 %v7072_v20  ;;  %3832 = vmatprep.mubr.bf16.mxu1 %v6459_v54  ;;  %v2431_v16 = vmul.f32 %v2401_v21, %v2401_v21  ;;  %v2334_v49 = vadd.f32 %v2333_v51, %v2261_v47  ;;  %v2806_v45 = vld [vmem:[#allocation5 + $0x70] sm:$0xff] }
 0x204   :  { %v2406_v50 = vpop.f32.mrf.mxu1  ;;  %v2335_v38 = vpop.f32.mrf.mxu0  ;;  %3573 = vmatprep.subr.bf16.mxu0 %v5732_v55  ;;  %v2271_v58 = vadd.f32 %v6689_v22, %v6687_v13  ;;  %v5726_v12 = vcombine.high %v2809_v9, %v2810_v24  ;;  %v2277_v47 = vadd.f32 %v6701_v27, %v6699_v56 }
 0x205   :  { %v2432_v11 = vmul.f32 %v2403_v4, %v2403_v4  ;;  %v2336_v30 = vadd.f32 %v2335_v38, %v2263_v61  ;;  %v2443_v15 = vpack.c.bf16 %v2431_v16, %v2429_v7  ;;  %v2407_v23 = vadd.f32 %v2406_v50, %v2334_v49  ;;  %v2808_v4 = vld [vmem:[#allocation5 + $0xb0] sm:$0xff]  ;;  %v7073_v7 = vld [vmem:[#allocation36_spill] sm:$0xff] }
 0x206   :  { %v2408_v40 = vpop.f32.mrf.mxu1  ;;  %v2337_v2 = vpop.f32.mrf.mxu0  ;;  %v5725_v38 = vcombine.low %v2809_v9, %v2810_v24  ;;  %v5724_v52 = vcombine.high %v2807_v44, %v2808_v4  ;;  %v5723_v27 = vcombine.low %v2807_v44, %v2808_v4  ;;  %v7075_v24 = vld [vmem:[#allocation12_spill] sm:$0xff] }
 0x207   :  { %v2444_v3 = vpack.c.bf16 %v2432_v11, %v2430_v32  ;;  %v2338_v60 = vadd.f32 %v2337_v2, %v2265_v1  ;;  %3574 = vmatpush1.bf16.msra.mxu0 %v5731_v0  ;;  %v2409_v42 = vadd.f32 %v2408_v40, %v2336_v30  ;;  %v2433_v20 = vmul.f32 %v2407_v23, %v2407_v23  ;;  %v2805_v40 = vld [vmem:[#allocation5 + $0x50] sm:$0xff] }
 0x208   :  { %v2410_v6 = vpop.f32.mrf.mxu1  ;;  %v2339_v14 = vpop.f32.mrf.mxu0  ;;  %3575 = vmatprep.subr.bf16.mxu0 %v5730_v17  ;;  %v5722_v2 = vcombine.high %v2805_v40, %v2806_v45 }
 0x209   :  { %v2340_v59 = vadd.f32 %v2339_v14, %v2267_v10  ;;  %v2411_v53 = vadd.f32 %v2410_v6, %v2338_v60  ;;  %2617 = vmatprep.mubr.bf16.mxu0 %v2444_v3  ;;  %v2434_v34 = vmul.f32 %v2409_v42, %v2409_v42  ;;  %v2803_v60 = vld [vmem:[#allocation5 + $0x10] sm:$0xff]  ;;  %v5721_v14 = vcombine.low %v2805_v40, %v2806_v45 }
 0x20a   :  { %v2412_v26 = vpop.f32.mrf.mxu1  ;;  %v2343_v48 = vpop.f32.mrf.mxu0  ;;  %2618 = vmatmul.mubr.bf16.gmra.mxu0 %v2443_v15  ;;  %3833 = vmatmul.mubr.bf16.gmra.mxu1 %v6466_v8  ;;  %v2804_v6 = vld [vmem:[#allocation5 + $0x30] sm:$0xff] }
 0x20b   :  { %v2413_v57 = vadd.f32 %v2412_v26, %v2340_v59  ;;  %3576 = vmatpush1.bf16.msra.mxu0 %v5729_v33  ;;  %3842 = vmatprep.mubr.bf16.mxu1 %v6471_v19  ;;  %v2435_v21 = vmul.f32 %v2411_v53, %v2411_v53  ;;  %v2344_v50 = vadd.f32 %v2343_v48, %v2271_v58  ;;  %v2833_v59 = vld [vmem:[#allocation5 + $0x3d0] sm:$0xff] }
 0x20c   :  { %v2416_v55 = vpop.f32.mrf.mxu1  ;;  %v2345_v5 = vpop.f32.mrf.mxu0  ;;  %3577 = vmatprep.subr.bf16.mxu0 %v5728_v28  ;;  %v5720_v42 = vcombine.high %v2803_v60, %v2804_v6  ;;  %v2834_v53 = vld [vmem:[#allocation5 + $0x3f0] sm:$0xff]  ;;  %v5719_v9 = vcombine.low %v2803_v60, %v2804_v6 }
 0x20d   :  { %v2436_v51 = vmul.f32 %v2413_v57, %v2413_v57  ;;  %v2346_v61 = vadd.f32 %v2345_v5, %v2273_v36  ;;  %v2445_v17 = vpack.c.bf16 %v2435_v21, %v2433_v20  ;;  %v2417_v18 = vadd.f32 %v2416_v55, %v2344_v50  ;;  %v7074_v26 = vld [vmem:[#allocation38_spill] sm:$0xff] }
 0x20e   :  { %v2418_v41 = vpop.f32.mrf.mxu1  ;;  %v2347_v0 = vpop.f32.mrf.mxu0  ;;  %v5750_v23 = vcombine.high %v2833_v59, %v2834_v53  ;;  %v2831_v48 = vld [vmem:[#allocation5 + $0x390] sm:$0xff]  ;;  %v5749_v57 = vcombine.low %v2833_v59, %v2834_v53 }
 0x20f   :  { %v2446_v13 = vpack.c.bf16 %v2436_v51, %v2434_v34  ;;  %v2348_v22 = vadd.f32 %v2347_v0, %v2275_v29  ;;  %3578 = vmatpush1.bf16.msra.mxu0 %v5727_v31  ;;  %v2419_v37 = vadd.f32 %v2418_v41, %v2346_v61  ;;  %v2437_v33 = vmul.f32 %v2417_v18, %v2417_v18  ;;  %v2832_v36 = vld [vmem:[#allocation5 + $0x3b0] sm:$0xff] }
 0x210   :  { %v2420_v16 = vpop.f32.mrf.mxu1  ;;  %v2349_v1 = vpop.f32.mrf.mxu0  ;;  %3579 = vmatprep.subr.bf16.mxu0 %v5726_v12  ;;  %v5748_v55 = vcombine.high %v2831_v48, %v2832_v36  ;;  %v2829_v31 = vld [vmem:[#allocation5 + $0x350] sm:$0xff]  ;;  %v5747_v21 = vcombine.low %v2831_v48, %v2832_v36 }
 0x211   :  { %v2350_v32 = vadd.f32 %v2349_v1, %v2277_v47  ;;  %v2421_v11 = vadd.f32 %v2420_v16, %v2348_v22  ;;  %2625 = vmatprep.mubr.bf16.mxu0 %v2446_v13  ;;  %v2438_v10 = vmul.f32 %v2419_v37, %v2419_v37  ;;  %v2830_v58 = vld [vmem:[#allocation5 + $0x370] sm:$0xff] }
 0x212   :  { %v2422_v30 = vpop.f32.mrf.mxu1  ;;  %2626 = vmatmul.mubr.bf16.gmra.mxu0 %v2445_v17  ;;  %3843 = vmatmul.mubr.bf16.gmra.mxu1 %v6478_v43  ;;  %v5746_v5 = vcombine.high %v2829_v31, %v2830_v58  ;;  %v2827_v12 = vld [vmem:[#allocation5 + $0x310] sm:$0xff]  ;;  %v5745_v34 = vcombine.low %v2829_v31, %v2830_v58  ;;  %v7079_v58 = vld [vmem:[#allocation16_spill] sm:$0xff] }
 0x213   :  { %v2423_v56 = vadd.f32 %v2422_v30, %v2350_v32  ;;  %3580 = vmatpush1.bf16.msra.mxu0 %v5725_v38  ;;  %3852 = vmatprep.mubr.bf16.mxu1 %v7073_v7  ;;  %v2439_v49 = vmul.f32 %v2421_v11, %v2421_v11  ;;  %v2828_v29 = vld [vmem:[#allocation5 + $0x330] sm:$0xff] }
 0x214   :  { %3581 = vmatprep.subr.bf16.mxu0 %v5724_v52  ;;  %v5744_v51 = vcombine.high %v2827_v12, %v2828_v29  ;;  %v2825_v61 = vld [vmem:[#allocation5 + $0x2d0] sm:$0xff]  ;;  %v5743_v44 = vcombine.low %v2827_v12, %v2828_v29 }
 0x215   :  { %v2440_v3 = vmul.f32 %v2423_v56, %v2423_v56  ;;  %v2447_v28 = vpack.c.bf16 %v2439_v49, %v2437_v33  ;;  %v2826_v41 = vld [vmem:[#allocation5 + $0x2f0] sm:$0xff] }
 0x216   :  { %v5742_v4 = vcombine.high %v2825_v61, %v2826_v41  ;;  %v2823_v20 = vld [vmem:[#allocation5 + $0x290] sm:$0xff]  ;;  %v5741_v0 = vcombine.low %v2825_v61, %v2826_v41 }
 0x217   :  { %v2448_v15 = vpack.c.bf16 %v2440_v3, %v2438_v10  ;;  %3582 = vmatpush1.bf16.msra.mxu0 %v5723_v27  ;;  %v2824_v50 = vld [vmem:[#allocation5 + $0x2b0] sm:$0xff]  ;;  %v7076_v10 = vld [vmem:[#allocation13_spill] sm:$0xff] }
 0x218   :  { %3583 = vmatprep.subr.bf16.mxu0 %v5722_v2  ;;  %v5740_v47 = vcombine.high %v2823_v20, %v2824_v50  ;;  %v2821_v13 = vld [vmem:[#allocation5 + $0x250] sm:$0xff]  ;;  %v5739_v16 = vcombine.low %v2823_v20, %v2824_v50 }
 0x219   :  { %2633 = vmatprep.mubr.bf16.mxu0 %v2448_v15  ;;  %v2822_v22 = vld [vmem:[#allocation5 + $0x270] sm:$0xff] }
 0x21a   :  { %2634 = vmatmul.mubr.bf16.gmra.mxu0 %v2447_v28  ;;  %3853 = vmatmul.mubr.bf16.gmra.mxu1 %v7074_v26  ;;  %v5738_v38 = vcombine.high %v2821_v13, %v2822_v22  ;;  %v2819_v17 = vld [vmem:[#allocation5 + $0x210] sm:$0xff]  ;;  %v5737_v52 = vcombine.low %v2821_v13, %v2822_v22  ;;  %v7081_v22 = vld [vmem:[#allocation19_spill] sm:$0xff] }
 0x21b   :  { %3584 = vmatpush1.bf16.msra.mxu0 %v5721_v14  ;;  %3603 = vmatprep.mubr.bf16.mxu0 %v7075_v24  ;;  %v2820_v1 = vld [vmem:[#allocation5 + $0x230] sm:$0xff] }
 0x21c   :  { %3585 = vmatprep.subr.bf16.mxu0 %v5720_v42  ;;  %4888 = vmatprep.mubr.bf16.mxu1 %v7075_v24  ;;  %v5736_v37 = vcombine.high %v2819_v17, %v2820_v1  ;;  %v2881_v32 = vld [vmem:[#allocation5 + $0x9d0] sm:$0xff]  ;;  %v5735_v30 = vcombine.low %v2819_v17, %v2820_v1 }
 0x21d   :  { %v2882_v11 = vld [vmem:[#allocation5 + $0x9f0] sm:$0xff] }
 0x21e   :  { %v5798_v40 = vcombine.high %v2881_v32, %v2882_v11  ;;  %v2879_v45 = vld [vmem:[#allocation5 + $0x990] sm:$0xff]  ;;  %v5797_v56 = vcombine.low %v2881_v32, %v2882_v11 }
 0x21f   :  { %3586 = vmatpush1.bf16.msra.mxu0 %v5719_v9  ;;  %v2880_v18 = vld [vmem:[#allocation5 + $0x9b0] sm:$0xff] }
 0x220   :  { %3587 = vmatprep.subr.bf16.mxu0 %v5750_v23  ;;  %v5796_v27 = vcombine.high %v2879_v45, %v2880_v18  ;;  %v2877_v49 = vld [vmem:[#allocation5 + $0x950] sm:$0xff]  ;;  %v5795_v60 = vcombine.low %v2879_v45, %v2880_v18 }
 0x221   :  { %v2878_v2 = vld [vmem:[#allocation5 + $0x970] sm:$0xff] }
 0x222   :  { %v7077_v6 = vld [vmem:[#allocation14_spill] sm:$0xff]  ;;  %v5794_v15 = vcombine.high %v2877_v49, %v2878_v2  ;;  %v5793_v53 = vcombine.low %v2877_v49, %v2878_v2  ;;  %v7083_v2 = vld [vmem:[#allocation23_spill] sm:$0xff] }
 0x223   :  { %3588 = vmatpush2.bf16.msra.mxu0 %v5749_v57  ;;  %v2875_v28 = vld [vmem:[#allocation5 + $0x910] sm:$0xff] }
 0x224   :  { %3589 = vmatprep.subr.bf16.mxu0 %v5748_v55  ;;  %v2876_v42 = vld [vmem:[#allocation5 + $0x930] sm:$0xff]  ;;  %v7078_v55 = vld [vmem:[#allocation15_spill] sm:$0xff] }
 0x225   :  { %v5792_v24 = vcombine.high %v2875_v28, %v2876_v42  ;;  %v2873_v48 = vld [vmem:[#allocation5 + $0x8d0] sm:$0xff]  ;;  %v5791_v31 = vcombine.low %v2875_v28, %v2876_v42 }
 0x226   :  { %v2874_v36 = vld [vmem:[#allocation5 + $0x8f0] sm:$0xff] }
 0x227   :  { %3590 = vmatpush2.bf16.msra.mxu0 %v5747_v21  ;;  %v2871_v29 = vld [vmem:[#allocation5 + $0x890] sm:$0xff]  ;;  %v5789_v61 = vcombine.low %v2873_v48, %v2874_v36 }
 0x228   :  { %3591 = vmatprep.subr.bf16.mxu0 %v5746_v5  ;;  %v5790_v5 = vcombine.high %v2873_v48, %v2874_v36  ;;  %v2869_v20 = vld [vmem:[#allocation5 + $0x850] sm:$0xff] }
 0x229   :  { %v2870_v50 = vld [vmem:[#allocation5 + $0x870] sm:$0xff] }
 0x22a   :  { %v2867_v1 = vld [vmem:[#allocation5 + $0x810] sm:$0xff]  ;;  %v5785_v32 = vcombine.low %v2869_v20, %v2870_v50 }
 0x22b   :  { %3592 = vmatpush2.bf16.msra.mxu0 %v5745_v34  ;;  %v2872_v34 = vld [vmem:[#allocation5 + $0x8b0] sm:$0xff] }
 0x22c   :  { %3593 = vmatprep.subr.bf16.mxu0 %v5744_v51  ;;  %v5787_v13 = vcombine.low %v2871_v29, %v2872_v34  ;;  %v2897_v45 = vld [vmem:[#allocation5 + $0xbd0] sm:$0xff] }
 0x22d   :  { %v2898_v18 = vld [vmem:[#allocation5 + $0xbf0] sm:$0xff] }
 0x22e   :  { %v2896_v28 = vld [vmem:[#allocation5 + $0xbb0] sm:$0xff] }
 0x22f   :  { %3594 = vmatpush2.bf16.msra.mxu0 %v5743_v44  ;;  %v5788_v44 = vcombine.high %v2871_v29, %v2872_v34  ;;  %v2893_v48 = vld [vmem:[#allocation5 + $0xb50] sm:$0xff] }
 0x230   :  { %3595 = vmatprep.subr.bf16.mxu0 %v5742_v4  ;;  %v2894_v36 = vld [vmem:[#allocation5 + $0xb70] sm:$0xff] }
 0x231   :  { %v5809_v29 = vcombine.low %v2893_v48, %v2894_v36 }
 0x233   :  { %3596 = vmatpush2.bf16.msra.mxu0 %v5741_v0 }
 0x234   :  { %3597 = vmatprep.subr.bf16.mxu0 %v5740_v47  ;;  %v7080_v47 = vld [vmem:[#allocation17_spill] sm:$0xff] }
 0x237   :  { %3598 = vmatpush2.bf16.msra.mxu0 %v5739_v16 }
 0x238   :  { %3599 = vmatprep.subr.bf16.mxu0 %v5738_v38  ;;  %v5786_v38 = vcombine.high %v2869_v20, %v2870_v50  ;;  %v2887_v20 = vld [vmem:[#allocation5 + $0xa90] sm:$0xff] }
 0x239   :  { %v2888_v50 = vld [vmem:[#allocation5 + $0xab0] sm:$0xff] }
 0x23b   :  { %3600 = vmatpush2.bf16.msra.mxu0 %v5737_v52  ;;  %v2868_v52 = vld [vmem:[#allocation5 + $0x830] sm:$0xff] }
 0x23c   :  { %3601 = vmatprep.subr.bf16.mxu0 %v5736_v37  ;;  %v5783_v49 = vcombine.low %v2867_v1, %v2868_v52 }
 0x23f   :  { %3602 = vmatpush2.bf16.msra.mxu0 %v5735_v30  ;;  %v5784_v30 = vcombine.high %v2867_v1, %v2868_v52  ;;  %v5803_v1 = vcombine.low %v2887_v20, %v2888_v50 }
 0x240   :  { %3717 = vmatprep.subr.bf16.mxu0 %v5798_v40 }
 0x242   :  { %3604 = vmatmul.mubr.bf16.vlgmr.msra.gmra.mxu0 %v7076_v10  ;;  %v6063_v3 = vpop.f32.mrf.mxu1 }
 0x243   :  { %3718 = vmatpush1.bf16.msra.mxu0 %v5797_v56  ;;  %3613 = vmatprep.mubr.bf16.mxu0 %v7077_v6 }
 0x244   :  { %v6064_v33 = vpop.f32.mrf.mxu1  ;;  %3719 = vmatprep.subr.bf16.mxu0 %v5796_v27  ;;  %v7082_v27 = vld [vmem:[#allocation21_spill] sm:$0xff] }
 0x245   :  { %v6749_v14 = vadd.f32 %v6064_v33, %v6063_v3 }
 0x246   :  { %v6066_v59 = vpop.f32.mrf.mxu1 }
 0x247   :  { %3720 = vmatpush1.bf16.msra.mxu0 %v5795_v60  ;;  %v5814_v60 = vcombine.high %v2897_v45, %v2898_v18 }
 0x248   :  { %v6067_v9 = vpop.f32.mrf.mxu1  ;;  %3721 = vmatprep.subr.bf16.mxu0 %v5794_v15  ;;  %v2895_v15 = vld [vmem:[#allocation5 + $0xb90] sm:$0xff] }
 0x249   :  { %v6751_v23 = vadd.f32 %v6067_v9, %v6066_v59  ;;  %v5813_v59 = vcombine.low %v2897_v45, %v2898_v18  ;;  %v5812_v9 = vcombine.high %v2895_v15, %v2896_v28  ;;  %v7084_v18 = vld [vmem:[#allocation25_spill] sm:$0xff] }
 0x24a   :  { %v6069_v57 = vpop.f32.mrf.mxu1  ;;  %3614 = vmatmul.mubr.bf16.gmra.mxu0 %v7078_v55 }
 0x24b   :  { %3722 = vmatpush1.bf16.msra.mxu0 %v5793_v53  ;;  %3623 = vmatprep.mubr.bf16.mxu0 %v7079_v58 }
 0x24c   :  { %v6070_v21 = vpop.f32.mrf.mxu1  ;;  %3723 = vmatprep.subr.bf16.mxu0 %v5792_v24 }
 0x24d   :  { %v6755_v12 = vadd.f32 %v6070_v21, %v6069_v57  ;;  %v5811_v57 = vcombine.low %v2895_v15, %v2896_v28  ;;  %v2891_v21 = vld [vmem:[#allocation5 + $0xb10] sm:$0xff]  ;;  %v7086_v15 = vld [vmem:[#allocation29_spill] sm:$0xff] }
 0x24e   :  { %v6072_v51 = vpop.f32.mrf.mxu1 }
 0x24f   :  { %3724 = vmatpush1.bf16.msra.mxu0 %v5791_v31  ;;  %v5810_v31 = vcombine.high %v2893_v48, %v2894_v36  ;;  %v4098_v48 = vld [vmem:[#allocation5 + $0x158] sm:$0xff] }
 0x250   :  { %v6073_v41 = vpop.f32.mrf.mxu1  ;;  %3725 = vmatprep.subr.bf16.mxu0 %v5790_v5  ;;  %v2892_v5 = vld [vmem:[#allocation5 + $0xb30] sm:$0xff]  ;;  %v4099_v36 = vld [vmem:[#allocation5 + $0x178] sm:$0xff] }
 0x251   :  { %v6757_v4 = vadd.f32 %v6073_v41, %v6072_v51  ;;  %v5808_v34 = vcombine.high %v2891_v21, %v2892_v5  ;;  %v2889_v51 = vld [vmem:[#allocation5 + $0xad0] sm:$0xff]  ;;  %v5807_v41 = vcombine.low %v2891_v21, %v2892_v5  ;;  %v4096_v21 = vld [vmem:[#allocation5 + $0x118] sm:$0xff] }
 0x252   :  { %v6075_v0 = vpop.f32.mrf.mxu1  ;;  %3624 = vmatmul.mubr.bf16.gmra.mxu0 %v7080_v47  ;;  %v4097_v5 = vld [vmem:[#allocation5 + $0x138] sm:$0xff] }
 0x253   :  { %3726 = vmatpush1.bf16.msra.mxu0 %v5789_v61  ;;  %3633 = vmatprep.mubr.bf16.mxu0 %v7081_v22  ;;  %v2890_v61 = vld [vmem:[#allocation5 + $0xaf0] sm:$0xff] }
 0x254   :  { %v6076_v16 = vpop.f32.mrf.mxu1  ;;  %3727 = vmatprep.subr.bf16.mxu0 %v5788_v44  ;;  %v5806_v44 = vcombine.high %v2889_v51, %v2890_v61 }
 0x255   :  { %v6761_v17 = vadd.f32 %v6076_v16, %v6075_v0  ;;  %v5805_v0 = vcombine.low %v2889_v51, %v2890_v61  ;;  %v2885_v16 = vld [vmem:[#allocation5 + $0xa50] sm:$0xff]  ;;  %v5872_v51 = vcombine.high %v4096_v21, %v4097_v5  ;;  %v7089_v61 = vld [vmem:[#allocation35_spill] sm:$0xff] }
 0x256   :  { %v6078_v37 = vpop.f32.mrf.mxu1 }
 0x257   :  { %3728 = vmatpush1.bf16.msra.mxu0 %v5787_v13  ;;  %v5804_v13 = vcombine.high %v2887_v20, %v2888_v50  ;;  %v5871_v20 = vcombine.low %v4096_v21, %v4097_v5  ;;  %v6216_v21 = vld [vmem:[#allocation7 + $0x120] sm:$0xff]   ;;  %v6217_v5 = vld [vmem:[#allocation7 + $0x158] sm:$0xff]  }
 0x258   :  { %v6079_v11 = vpop.f32.mrf.mxu1  ;;  %3729 = vmatprep.subr.bf16.mxu0 %v5786_v38  ;;  %v2886_v38 = vld [vmem:[#allocation5 + $0xa70] sm:$0xff] }
 0x259   :  { %v6763_v40 = vadd.f32 %v6079_v11, %v6078_v37  ;;  %v5802_v52 = vcombine.high %v2885_v16, %v2886_v38  ;;  %v2883_v37 = vld [vmem:[#allocation5 + $0xa10] sm:$0xff]  ;;  %v5801_v11 = vcombine.low %v2885_v16, %v2886_v38  ;;  %v6209_v16 = vld [vmem:[#allocation7 + $0x178] sm:$0xff]  }
 0x25a   :  { %v6081_v56 = vpop.f32.mrf.mxu1  ;;  %3634 = vmatmul.mubr.bf16.gmra.mxu0 %v7082_v27 }
 0x25b   :  { %3730 = vmatpush1.bf16.msra.mxu0 %v5785_v32  ;;  %3749 = vmatprep.mubr.bf16.mxu0 %v7083_v2  ;;  %v2884_v32 = vld [vmem:[#allocation5 + $0xa30] sm:$0xff] }
 0x25c   :  { %v6082_v3 = vpop.f32.mrf.mxu1  ;;  %3731 = vmatprep.subr.bf16.mxu0 %v5784_v30  ;;  %v5800_v30 = vcombine.high %v2883_v37, %v2884_v32  ;;  %v5799_v45 = vcombine.low %v2883_v37, %v2884_v32  ;;  %v4090_v32 = vld [vmem:[#allocation5 + $0x58] sm:$0xff] }
 0x25d   :  { %v6767_v33 = vadd.f32 %v6082_v3, %v6081_v56  ;;  %v7085_v56 = vld [vmem:[#allocation27_spill] sm:$0xff] }
 0x25e   :  { %v6084_v42 = vpop.f32.mrf.mxu1  ;;  %v4103_v3 = vld [vmem:[#allocation5 + $0x1f8] sm:$0xff] }
 0x25f   :  { %3732 = vmatpush1.bf16.msra.mxu0 %v5783_v49  ;;  %v4102_v49 = vld [vmem:[#allocation5 + $0x1d8] sm:$0xff] }
 0x260   :  { %v6085_v53 = vpop.f32.mrf.mxu1  ;;  %3733 = vmatprep.subr.bf16.mxu0 %v5814_v60  ;;  %v4100_v60 = vld [vmem:[#allocation5 + $0x198] sm:$0xff]  ;;  %v5877_v28 = vcombine.low %v4102_v49, %v4103_v3 }
 0x261   :  { %v6769_v24 = vadd.f32 %v6085_v53, %v6084_v42  ;;  %v5878_v42 = vcombine.high %v4102_v49, %v4103_v3  ;;  %v7087_v53 = vld [vmem:[#allocation31_spill] sm:$0xff]  ;;  %v6212_v49 = vld [vmem:[#allocation7 + $0x130] sm:$0xff]  }
 0x263   :  { %3734 = vmatpush2.bf16.msra.mxu0 %v5813_v59  ;;  %v4101_v59 = vld [vmem:[#allocation5 + $0x1b8] sm:$0xff]  ;;  %4856 = vmatprep.subr.bf16.mxu1 %v5878_v42  ;;  %v6213_v42 = vld [vmem:[#allocation7 + $0x168] sm:$0xff]  }
 0x264   :  { %3735 = vmatprep.subr.bf16.mxu0 %v5812_v9  ;;  %v5876_v9 = vcombine.high %v4100_v60, %v4101_v59  ;;  %4857 = vmatpush1.bf16.msra.mxu1 %v5877_v28  ;;  %v4089_v28 = vld [vmem:[#allocation5 + $0x38] sm:$0xff] }
 0x266   :  { %4858 = vmatprep.subr.bf16.mxu1 %v5876_v9  ;;  %v6214_v9 = vld [vmem:[#allocation7 + $0x128] sm:$0xff]  }
 0x267   :  { %3736 = vmatpush2.bf16.msra.mxu0 %v5811_v57  ;;  %v5875_v57 = vcombine.low %v4100_v60, %v4101_v59  ;;  %v4088_v60 = vld [vmem:[#allocation5 + $0x18] sm:$0xff] }
 0x268   :  { %3737 = vmatprep.subr.bf16.mxu0 %v5810_v31  ;;  %v5874_v31 = vcombine.high %v4098_v48, %v4099_v36 }
 0x269   :  { %4859 = vmatpush1.bf16.msra.mxu1 %v5875_v57  ;;  %v4118_v57 = vld [vmem:[#allocation5 + $0x3d8] sm:$0xff] }
 0x26a   :  { %4860 = vmatprep.subr.bf16.mxu1 %v5874_v31  ;;  %v4119_v31 = vld [vmem:[#allocation5 + $0x3f8] sm:$0xff] }
 0x26b   :  { %3738 = vmatpush2.bf16.msra.mxu0 %v5809_v29  ;;  %v5873_v29 = vcombine.low %v4098_v48, %v4099_v36  ;;  %v5864_v48 = vcombine.high %v4088_v60, %v4089_v28  ;;  %v6215_v36 = vld [vmem:[#allocation7 + $0x160] sm:$0xff]  }
 0x26c   :  { %3739 = vmatprep.subr.bf16.mxu0 %v5808_v34  ;;  %v7088_v34 = vld [vmem:[#allocation33_spill] sm:$0xff] }
 0x26d   :  { %4861 = vmatpush1.bf16.msra.mxu1 %v5873_v29  ;;  %v5863_v29 = vcombine.low %v4088_v60, %v4089_v28 }
 0x26e   :  { %4862 = vmatprep.subr.bf16.mxu1 %v5872_v51  ;;  %v5894_v51 = vcombine.high %v4118_v57, %v4119_v31 }
 0x26f   :  { %3740 = vmatpush2.bf16.msra.mxu0 %v5807_v41  ;;  %v4094_v41 = vld [vmem:[#allocation5 + $0xd8] sm:$0xff] }
 0x270   :  { %3741 = vmatprep.subr.bf16.mxu0 %v5806_v44  ;;  %v4095_v44 = vld [vmem:[#allocation5 + $0xf8] sm:$0xff] }
 0x271   :  { %v5870_v50 = vcombine.high %v4094_v41, %v4095_v44  ;;  %4863 = vmatpush1.bf16.msra.mxu1 %v5871_v20  ;;  %v5869_v38 = vcombine.low %v4094_v41, %v4095_v44  ;;  %v4116_v41 = vld [vmem:[#allocation5 + $0x398] sm:$0xff]  ;;  %v5893_v20 = vcombine.low %v4118_v57, %v4119_v31 }
 0x272   :  { %v4117_v44 = vld [vmem:[#allocation5 + $0x3b8] sm:$0xff] }
 0x273   :  { %3742 = vmatpush2.bf16.msra.mxu0 %v5805_v0  ;;  %v4092_v0 = vld [vmem:[#allocation5 + $0x98] sm:$0xff]  ;;  %4864 = vmatprep.subr.bf16.mxu1 %v5870_v50  ;;  %v5892_v50 = vcombine.high %v4116_v41, %v4117_v44 }
 0x274   :  { %3743 = vmatprep.subr.bf16.mxu0 %v5804_v13  ;;  %v4093_v13 = vld [vmem:[#allocation5 + $0xb8] sm:$0xff] }
 0x275   :  { %v5868_v37 = vcombine.high %v4092_v0, %v4093_v13  ;;  %4865 = vmatpush1.bf16.msra.mxu1 %v5869_v38  ;;  %v4109_v57 = vld [vmem:[#allocation5 + $0x2b8] sm:$0xff] }
 0x277   :  { %3744 = vmatpush2.bf16.msra.mxu0 %v5803_v1  ;;  %v6210_v1 = vld [vmem:[#allocation7 + $0x138] sm:$0xff]   ;;  %4866 = vmatprep.subr.bf16.mxu1 %v5868_v37 }
 0x278   :  { %3745 = vmatprep.subr.bf16.mxu0 %v5802_v52  ;;  %v7090_v52 = vld [vmem:[#allocation37_spill] sm:$0xff]  ;;  %v4113_v37 = vld [vmem:[#allocation5 + $0x338] sm:$0xff] }
 0x27b   :  { %3746 = vmatpush2.bf16.msra.mxu0 %v5801_v11  ;;  %v4091_v11 = vld [vmem:[#allocation5 + $0x78] sm:$0xff] }
 0x27c   :  { %3747 = vmatprep.subr.bf16.mxu0 %v5800_v30  ;;  %v6211_v30 = vld [vmem:[#allocation7 + $0x170] sm:$0xff]   ;;  %v5866_v3 = vcombine.high %v4090_v32, %v4091_v11  ;;  %v5865_v59 = vcombine.low %v4090_v32, %v4091_v11 }
 0x27f   :  { %3748 = vmatpush2.bf16.msra.mxu0 %v5799_v45  ;;  %v5867_v45 = vcombine.low %v4092_v0, %v4093_v13  ;;  %v4114_v0 = vld [vmem:[#allocation5 + $0x358] sm:$0xff] }
 0x280   :  { %6087 = vmatprep.subr.bf16.mxu0 %v6209_v16  ;;  %v4115_v13 = vld [vmem:[#allocation5 + $0x378] sm:$0xff]  ;;  %v5891_v16 = vcombine.low %v4116_v41, %v4117_v44  ;;  %v6221_v41 = vld [vmem:[#allocation7 + $0x148] sm:$0xff]  }
 0x281   :  { %4867 = vmatpush1.bf16.msra.mxu1 %v5867_v45  ;;  %v5890_v38 = vcombine.high %v4114_v0, %v4115_v13  ;;  %v5889_v32 = vcombine.low %v4114_v0, %v4115_v13  ;;  %v6218_v45 = vld [vmem:[#allocation7 + $0x118] sm:$0xff]  }
 0x282   :  { %3750 = vmatmul.mubr.bf16.vlgmr.msra.gmra.mxu0 %v7084_v18  ;;  %4868 = vmatprep.subr.bf16.mxu1 %v5866_v3  ;;  %v4111_v3 = vld [vmem:[#allocation5 + $0x2f8] sm:$0xff] }
 0x283   :  { %3759 = vmatprep.mubr.bf16.mxu0 %v7085_v56  ;;  %6088 = vmatpush3.bf16.msra.mxu0 %v6210_v1  ;;  %v4112_v1 = vld [vmem:[#allocation5 + $0x318] sm:$0xff] }
 0x284   :  { %6089 = vmatprep.subr.bf16.mxu0 %v6211_v30  ;;  %v5888_v11 = vcombine.high %v4112_v1, %v4113_v37  ;;  %v5887_v30 = vcombine.low %v4112_v1, %v4113_v37  ;;  %v4107_v0 = vld [vmem:[#allocation5 + $0x278] sm:$0xff] }
 0x285   :  { %4869 = vmatpush1.bf16.msra.mxu1 %v5865_v59  ;;  %v6219_v59 = vld [vmem:[#allocation7 + $0x150] sm:$0xff]  }
 0x286   :  { %4870 = vmatprep.subr.bf16.mxu1 %v5864_v48  ;;  %v6220_v48 = vld [vmem:[#allocation7 + $0x110] sm:$0xff]  }
 0x287   :  { %6090 = vmatpush3.bf16.msra.mxu0 %v6212_v49  ;;  %v4110_v49 = vld [vmem:[#allocation5 + $0x2d8] sm:$0xff] }
 0x288   :  { %6091 = vmatprep.subr.bf16.mxu0 %v6213_v42  ;;  %v5886_v60 = vcombine.high %v4110_v49, %v4111_v3  ;;  %v5885_v42 = vcombine.low %v4110_v49, %v4111_v3 }
 0x289   :  { %4871 = vmatpush1.bf16.msra.mxu1 %v5863_v29 }
 0x28a   :  { %3760 = vmatmul.mubr.bf16.gmra.mxu0 %v7086_v15  ;;  %4872 = vmatprep.subr.bf16.mxu1 %v5894_v51 }
 0x28b   :  { %3769 = vmatprep.mubr.bf16.mxu0 %v7087_v53  ;;  %6092 = vmatpush3.bf16.msra.mxu0 %v6214_v9 }
 0x28c   :  { %6093 = vmatprep.subr.bf16.mxu0 %v6215_v36  ;;  %v4108_v36 = vld [vmem:[#allocation5 + $0x298] sm:$0xff] }
 0x28d   :  { %4873 = vmatpush2.bf16.msra.mxu1 %v5893_v20  ;;  %v5883_v29 = vcombine.low %v4108_v36, %v4109_v57  ;;  %v6222_v20 = vld [vmem:[#allocation7 + $0x108] sm:$0xff]  }
 0x28e   :  { %4874 = vmatprep.subr.bf16.mxu1 %v5892_v50  ;;  %v4106_v50 = vld [vmem:[#allocation5 + $0x258] sm:$0xff] }
 0x28f   :  { %6094 = vmatpush3.bf16.msra.mxu0 %v6216_v21  ;;  %v5884_v21 = vcombine.high %v4108_v36, %v4109_v57  ;;  %v5881_v1 = vcombine.low %v4106_v50, %v4107_v0 }
 0x290   :  { %6095 = vmatprep.subr.bf16.mxu0 %v6217_v5 }
 0x291   :  { %4875 = vmatpush2.bf16.msra.mxu1 %v5891_v16  ;;  %v5882_v16 = vcombine.high %v4106_v50, %v4107_v0  ;;  %v4164_v50 = vld [vmem:[#allocation5 + $0x998] sm:$0xff] }
 0x292   :  { %3770 = vmatmul.mubr.bf16.gmra.mxu0 %v7088_v34  ;;  %4876 = vmatprep.subr.bf16.mxu1 %v5890_v38  ;;  %v4165_v0 = vld [vmem:[#allocation5 + $0x9b8] sm:$0xff] }
 0x293   :  { %3779 = vmatprep.mubr.bf16.mxu0 %v7089_v61  ;;  %6096 = vmatpush3.bf16.msra.mxu0 %v6218_v45  ;;  %v4105_v45 = vld [vmem:[#allocation5 + $0x238] sm:$0xff] }
 0x294   :  { %6097 = vmatprep.subr.bf16.mxu0 %v6219_v59  ;;  %v6786_v59 = vld [vmem:[#allocation5 + $0x5f8] sm:$0xff] }
 0x295   :  { %4877 = vmatpush2.bf16.msra.mxu1 %v5889_v32  ;;  %v6223_v32 = vld [vmem:[#allocation7 + $0x140] sm:$0xff]  }
 0x296   :  { %4878 = vmatprep.subr.bf16.mxu1 %v5888_v11  ;;  %v6224_v11 = vld [vmem:[#allocation7 + $0x100] sm:$0xff]  }
 0x297   :  { %6098 = vmatpush3.bf16.msra.mxu0 %v6220_v48 }
 0x298   :  { %6099 = vmatprep.subr.bf16.mxu0 %v6221_v41 }
 0x299   :  { %4879 = vmatpush2.bf16.msra.mxu1 %v5887_v30  ;;  %v4104_v30 = vld [vmem:[#allocation5 + $0x218] sm:$0xff] }
 0x29a   :  { %3780 = vmatmul.mubr.bf16.gmra.mxu0 %v7090_v52  ;;  %4880 = vmatprep.subr.bf16.mxu1 %v5886_v60  ;;  %v5880_v3 = vcombine.high %v4104_v30, %v4105_v45 }
 0x29b   :  { %6100 = vmatpush3.bf16.msra.mxu0 %v6222_v20 }
 0x29c   :  { %6101 = vmatprep.subr.bf16.mxu0 %v6223_v32 }
 0x29d   :  { %4881 = vmatpush2.bf16.msra.mxu1 %v5885_v42  ;;  %v6784_v42 = vld [vmem:[#allocation5 + $0x5d8] sm:$0xff] }
 0x29e   :  { %4882 = vmatprep.subr.bf16.mxu1 %v5884_v21  ;;  %v4167_v21 = vld [vmem:[#allocation5 + $0x9f8] sm:$0xff] }
 0x29f   :  { %6102 = vmatpush3.bf16.msra.mxu0 %v6224_v11 }
 0x2a1   :  { %4883 = vmatpush2.bf16.msra.mxu1 %v5883_v29 }
 0x2a2   :  { %4884 = vmatprep.subr.bf16.mxu1 %v5882_v16  ;;  %v5940_v16 = vcombine.high %v4164_v50, %v4165_v0 }
 0x2a5   :  { %4885 = vmatpush2.bf16.msra.mxu1 %v5881_v1  ;;  %v5939_v1 = vcombine.low %v4164_v50, %v4165_v0  ;;  %v4154_v50 = vld [vmem:[#allocation5 + $0x858] sm:$0xff] }
 0x2a6   :  { %4886 = vmatprep.subr.bf16.mxu1 %v5880_v3  ;;  %v4160_v3 = vld [vmem:[#allocation5 + $0x918] sm:$0xff] }
 0x2a7   :  { %v4155_v0 = vld [vmem:[#allocation5 + $0x878] sm:$0xff] }
 0x2c2   :  { %v6023_v28 = vpop.f32.mrf.mxu0 }
 0x2c4   :  { %v6024_v9 = vpop.f32.mrf.mxu0 }
 0x2c5   :  { %v6025_v31 = vadd.f32 %v6024_v9, %v6023_v28  ;;  %v5879_v28 = vcombine.low %v4104_v30, %v4105_v45  ;;  %v5910_v9 = vcombine.high %v6784_v42, %v6786_v59 }
 0x2c6   :  { %v6026_v5 = vpop.f32.mrf.mxu0 }
 0x2c7   :  { %v6779_v51 = vadd.f32 %v6749_v14, %v6025_v31  ;;  %4887 = vmatpush2.bf16.msra.mxu1 %v5879_v28  ;;  %4929 = vmatprep.subr.bf16.mxu0 %v5910_v9  ;;  %v4166_v31 = vld [vmem:[#allocation5 + $0x9d8] sm:$0xff] }
 0x2c8   :  { %v6027_v44 = vpop.f32.mrf.mxu0  ;;  %v5942_v29 = vcombine.high %v4166_v31, %v4167_v21 }
 0x2c9   :  { %7091 = vst [vmem:[#allocation12_spill] sm:$0xff] %v6779_v51  ;;  %v6028_v13 = vadd.f32 %v6027_v44, %v6026_v5 }
 0x2ca   :  { %v6029_v38 = vpop.f32.mrf.mxu0  ;;  %4889 = vmatmul.mubr.bf16.vlgmr.msra.gmra.mxu1 %v7076_v10  ;;  %5002 = vmatprep.subr.bf16.mxu1 %v5942_v29  ;;  %v4163_v10 = vld [vmem:[#allocation5 + $0x978] sm:$0xff] }
 0x2cb   :  { %v6782_v37 = vadd.f32 %v6751_v23, %v6028_v13  ;;  %4898 = vmatprep.mubr.bf16.mxu1 %v7077_v6 }
 0x2cc   :  { %v6030_v14 = vpop.f32.mrf.mxu0 }
 0x2cd   :  { %7092 = vst [vmem:[#allocation13_spill] sm:$0xff] %v6782_v37  ;;  %v6031_v49 = vadd.f32 %v6030_v14, %v6029_v38  ;;  %v4162_v14 = vld [vmem:[#allocation5 + $0x958] sm:$0xff] }
 0x2ce   :  { %v6032_v60 = vpop.f32.mrf.mxu0  ;;  %v5938_v30 = vcombine.high %v4162_v14, %v4163_v10  ;;  %v5937_v45 = vcombine.low %v4162_v14, %v4163_v10  ;;  %v4182_v14 = vld [vmem:[#allocation5 + $0xbd8] sm:$0xff] }
 0x2cf   :  { %v6789_v23 = vadd.f32 %v6755_v12, %v6031_v49  ;;  %v5941_v12 = vcombine.low %v4166_v31, %v4167_v21  ;;  %v4158_v21 = vld [vmem:[#allocation5 + $0x8d8] sm:$0xff] }
 0x2d0   :  { %v6033_v48 = vpop.f32.mrf.mxu0  ;;  %v4183_v10 = vld [vmem:[#allocation5 + $0xbf8] sm:$0xff] }
 0x2d1   :  { %7093 = vst [vmem:[#allocation14_spill] sm:$0xff] %v6789_v23  ;;  %v6034_v57 = vadd.f32 %v6033_v48, %v6032_v60  ;;  %5003 = vmatpush1.bf16.msra.mxu1 %v5941_v12  ;;  %v4161_v60 = vld [vmem:[#allocation5 + $0x938] sm:$0xff] }
 0x2d2   :  { %v6035_v5 = vpop.f32.mrf.mxu0  ;;  %5004 = vmatprep.subr.bf16.mxu1 %v5940_v16  ;;  %4899 = vmatmul.mubr.bf16.gmra.mxu1 %v7078_v55  ;;  %v5936_v9 = vcombine.high %v4160_v3, %v4161_v60  ;;  %v4159_v55 = vld [vmem:[#allocation5 + $0x8f8] sm:$0xff]  ;;  %v5930_v16 = vcombine.high %v4154_v50, %v4155_v0 }
 0x2d3   :  { %v6796_v41 = vadd.f32 %v6757_v4, %v6034_v57  ;;  %4908 = vmatprep.mubr.bf16.mxu1 %v7079_v58  ;;  %v5935_v57 = vcombine.low %v4160_v3, %v4161_v60  ;;  %v5933_v58 = vcombine.low %v4158_v21, %v4159_v55  ;;  %v4157_v12 = vld [vmem:[#allocation5 + $0x8b8] sm:$0xff] }
 0x2d4   :  { %v6036_v44 = vpop.f32.mrf.mxu0 }
 0x2d5   :  { %7094 = vst [vmem:[#allocation15_spill] sm:$0xff] %v6796_v41  ;;  %v6037_v20 = vadd.f32 %v6036_v44, %v6035_v5  ;;  %5005 = vmatpush1.bf16.msra.mxu1 %v5939_v1  ;;  %v5934_v5 = vcombine.high %v4158_v21, %v4159_v55  ;;  %v4176_v21 = vld [vmem:[#allocation5 + $0xb18] sm:$0xff] }
 0x2d6   :  { %v6038_v13 = vpop.f32.mrf.mxu0  ;;  %5006 = vmatprep.subr.bf16.mxu1 %v5938_v30  ;;  %v5958_v30 = vcombine.high %v4182_v14, %v4183_v10  ;;  %v4177_v55 = vld [vmem:[#allocation5 + $0xb38] sm:$0xff] }
 0x2d7   :  { %v6801_v38 = vadd.f32 %v6761_v17, %v6037_v20 }
 0x2d8   :  { %v6039_v32 = vpop.f32.mrf.mxu0 }
 0x2d9   :  { %7095 = vst [vmem:[#allocation16_spill] sm:$0xff] %v6801_v38  ;;  %v6040_v4 = vadd.f32 %v6039_v32, %v6038_v13  ;;  %5007 = vmatpush1.bf16.msra.mxu1 %v5937_v45  ;;  %v6816_v13 = vpop.f32.mrf.mxu1  ;;  %v5957_v45 = vcombine.low %v4182_v14, %v4183_v10  ;;  %v4170_v14 = vld [vmem:[#allocation5 + $0xa58] sm:$0xff] }
 0x2da   :  { %v6041_v11 = vpop.f32.mrf.mxu0  ;;  %5008 = vmatprep.subr.bf16.mxu1 %v5936_v9  ;;  %4909 = vmatmul.mubr.bf16.gmra.mxu1 %v7080_v47  ;;  %v4152_v47 = vld [vmem:[#allocation5 + $0x818] sm:$0xff] }
 0x2db   :  { %v6804_v6 = vadd.f32 %v6763_v40, %v6040_v4  ;;  %4918 = vmatprep.mubr.bf16.mxu1 %v7081_v22  ;;  %v4153_v22 = vld [vmem:[#allocation5 + $0x838] sm:$0xff]  ;;  %v6820_v1 = vpop.f32.mrf.mxu1 }
 0x2dc   :  { %v6042_v49 = vpop.f32.mrf.mxu0  ;;  %v5928_v32 = vcombine.high %v4152_v47, %v4153_v22  ;;  %v5927_v4 = vcombine.low %v4152_v47, %v4153_v22  ;;  %v4179_v9 = vld [vmem:[#allocation5 + $0xb78] sm:$0xff] }
 0x2dd   :  { %7096 = vst [vmem:[#allocation17_spill] sm:$0xff] %v6804_v6  ;;  %v6043_v17 = vadd.f32 %v6042_v49, %v6041_v11  ;;  %5009 = vmatpush1.bf16.msra.mxu1 %v5935_v57  ;;  %v6822_v11 = vpop.f32.mrf.mxu1  ;;  %v4181_v49 = vld [vmem:[#allocation5 + $0xbb8] sm:$0xff] }
 0x2de   :  { %v6044_v28 = vpop.f32.mrf.mxu0  ;;  %5010 = vmatprep.subr.bf16.mxu1 %v5934_v5  ;;  %v5952_v5 = vcombine.high %v4176_v21, %v4177_v55  ;;  %v4171_v10 = vld [vmem:[#allocation5 + $0xa78] sm:$0xff] }
 0x2df   :  { %v6809_v48 = vadd.f32 %v6767_v33, %v6043_v17  ;;  %v4156_v33 = vld [vmem:[#allocation5 + $0x898] sm:$0xff] }
 0x2e0   :  { %v6045_v31 = vpop.f32.mrf.mxu0  ;;  %v5932_v44 = vcombine.high %v4156_v33, %v4157_v12  ;;  %v5931_v20 = vcombine.low %v4156_v33, %v4157_v12  ;;  %v4174_v12 = vld [vmem:[#allocation5 + $0xad8] sm:$0xff] }
 0x2e1   :  { %7097 = vst [vmem:[#allocation19_spill] sm:$0xff] %v6809_v48  ;;  %v6046_v40 = vadd.f32 %v6045_v31, %v6044_v28  ;;  %5011 = vmatpush1.bf16.msra.mxu1 %v5933_v58  ;;  %v4178_v28 = vld [vmem:[#allocation5 + $0xb58] sm:$0xff]  ;;  %v5951_v58 = vcombine.low %v4176_v21, %v4177_v55 }
 0x2e2   :  { %5012 = vmatprep.subr.bf16.mxu1 %v5932_v44  ;;  %4919 = vmatmul.mubr.bf16.gmra.mxu1 %v7082_v27  ;;  %v4180_v27 = vld [vmem:[#allocation5 + $0xb98] sm:$0xff]  ;;  %v5954_v57 = vcombine.high %v4178_v28, %v4179_v9  ;;  %v5953_v31 = vcombine.low %v4178_v28, %v4179_v9 }
 0x2e3   :  { %v6812_v29 = vadd.f32 %v6769_v24, %v6046_v40  ;;  %v5929_v24 = vcombine.low %v4154_v50, %v4155_v0  ;;  %5034 = vmatprep.mubr.bf16.mxu1 %v7083_v2  ;;  %v6824_v2 = vpop.f32.mrf.mxu1  ;;  %v5956_v17 = vcombine.high %v4180_v27, %v4181_v49  ;;  %v5955_v3 = vcombine.low %v4180_v27, %v4181_v49  ;;  %v4175_v44 = vld [vmem:[#allocation5 + $0xaf8] sm:$0xff] }
 0x2e4   :  { %v5949_v50 = vcombine.low %v4174_v12, %v4175_v44  ;;  %v5945_v27 = vcombine.low %v4170_v14, %v4171_v10 }
 0x2e5   :  { %7098 = vst [vmem:[#allocation21_spill] sm:$0xff] %v6812_v29  ;;  %5013 = vmatpush1.bf16.msra.mxu1 %v5931_v20  ;;  %v6826_v60 = vpop.f32.mrf.mxu1  ;;  %v5950_v20 = vcombine.high %v4174_v12, %v4175_v44 }
 0x2e6   :  { %5014 = vmatprep.subr.bf16.mxu1 %v5930_v16  ;;  %v4172_v16 = vld [vmem:[#allocation5 + $0xa98] sm:$0xff] }
 0x2e7   :  { %v6828_v40 = vpop.f32.mrf.mxu1 }
 0x2e9   :  { %5015 = vmatpush1.bf16.msra.mxu1 %v5929_v24  ;;  %v6830_v33 = vpop.f32.mrf.mxu1  ;;  %v4173_v24 = vld [vmem:[#allocation5 + $0xab8] sm:$0xff] }
 0x2ea   :  { %5016 = vmatprep.subr.bf16.mxu1 %v5928_v32  ;;  %v5948_v22 = vcombine.high %v4172_v16, %v4173_v24  ;;  %v5947_v32 = vcombine.low %v4172_v16, %v4173_v24 }
 0x2eb   :  { %v6832_v0 = vpop.f32.mrf.mxu1 }
 0x2ed   :  { %5017 = vmatpush1.bf16.msra.mxu1 %v5927_v4  ;;  %v6834_v4 = vpop.f32.mrf.mxu1 }
 0x2ee   :  { %5018 = vmatprep.subr.bf16.mxu1 %v5958_v30 }
 0x2ef   :  { %v6836_v49 = vpop.f32.mrf.mxu1 }
 0x2f1   :  { %5019 = vmatpush2.bf16.msra.mxu1 %v5957_v45  ;;  %v5946_v45 = vcombine.high %v4170_v14, %v4171_v10 }
 0x2f2   :  { %5020 = vmatprep.subr.bf16.mxu1 %v5956_v17  ;;  %v4168_v17 = vld [vmem:[#allocation5 + $0xa18] sm:$0xff] }
 0x2f5   :  { %5021 = vmatpush2.bf16.msra.mxu1 %v5955_v3  ;;  %v4169_v3 = vld [vmem:[#allocation5 + $0xa38] sm:$0xff] }
 0x2f6   :  { %5022 = vmatprep.subr.bf16.mxu1 %v5954_v57  ;;  %v5944_v9 = vcombine.high %v4168_v17, %v4169_v3  ;;  %v5943_v57 = vcombine.low %v4168_v17, %v4169_v3 }
 0x2f9   :  { %5023 = vmatpush2.bf16.msra.mxu1 %v5953_v31  ;;  %v6838_v31 = vpop.f32.mrf.mxu1 }
 0x2fa   :  { %5024 = vmatprep.subr.bf16.mxu1 %v5952_v5 }
 0x2fb   :  { %v6840_v5 = vpop.f32.mrf.mxu1 }
 0x2fd   :  { %5025 = vmatpush2.bf16.msra.mxu1 %v5951_v58  ;;  %v6844_v12 = vpop.f32.mrf.mxu1 }
 0x2fe   :  { %5026 = vmatprep.subr.bf16.mxu1 %v5950_v20 }
 0x2ff   :  { %v6846_v20 = vpop.f32.mrf.mxu1 }
 0x301   :  { %5027 = vmatpush2.bf16.msra.mxu1 %v5949_v50  ;;  %v6850_v16 = vpop.f32.mrf.mxu1 }
 0x302   :  { %v3605_v47 = vpop.f32.mrf.mxu0  ;;  %5028 = vmatprep.subr.bf16.mxu1 %v5948_v22 }
 0x303   :  { %v6854_v22 = vpop.f32.mrf.mxu1 }
 0x304   :  { %v3607_v30 = vpop.f32.mrf.mxu0 }
 0x305   :  { %5029 = vmatpush2.bf16.msra.mxu1 %v5947_v32  ;;  %v3681_v29 = vadd.f32 %v6820_v1, %v3607_v30 }
 0x306   :  { %5030 = vmatprep.subr.bf16.mxu1 %v5946_v45  ;;  %v3609_v28 = vpop.f32.mrf.mxu0 }
 0x307   :  { %v3683_v38 = vadd.f32 %v6822_v11, %v3609_v28  ;;  %v4132_v28 = vld [vmem:[#allocation5 + $0x598] sm:$0xff] }
 0x308   :  { %v3611_v21 = vpop.f32.mrf.mxu0 }
 0x309   :  { %5031 = vmatpush2.bf16.msra.mxu1 %v5945_v27  ;;  %v3685_v51 = vadd.f32 %v6824_v2, %v3611_v21  ;;  %v4133_v21 = vld [vmem:[#allocation5 + $0x5b8] sm:$0xff] }
 0x30a   :  { %5032 = vmatprep.subr.bf16.mxu1 %v5944_v9  ;;  %v3615_v55 = vpop.f32.mrf.mxu0 }
 0x30b   :  { %v3689_v39 = vadd.f32 %v6826_v60, %v3615_v55  ;;  %v5908_v60 = vcombine.high %v4132_v28, %v4133_v21 }
 0x30c   :  { %v3617_v58 = vpop.f32.mrf.mxu0 }
 0x30d   :  { %5033 = vmatpush2.bf16.msra.mxu1 %v5943_v57 }
 0x30e   :  { %v3619_v44 = vpop.f32.mrf.mxu0 }
 0x310   :  { %5035 = vmatmul.mubr.bf16.vlgmr.msra.gmra.mxu1 %v7084_v18  ;;  %v3621_v50 = vpop.f32.mrf.mxu0  ;;  %v3824_v18 = vpop.f32.mrf.mxu1 }
 0x311   :  { %5044 = vmatprep.mubr.bf16.mxu1 %v7085_v56 }
 0x312   :  { %v6852_v24 = vpop.f32.mrf.mxu0  ;;  %v3826_v32 = vpop.f32.mrf.mxu1 }
 0x314   :  { %v6858_v56 = vpop.f32.mrf.mxu0 }
 0x316   :  { %v6860_v14 = vpop.f32.mrf.mxu0 }
 0x318   :  { %5045 = vmatmul.mubr.bf16.gmra.mxu1 %v7086_v15  ;;  %v3828_v15 = vpop.f32.mrf.mxu1 }
 0x319   :  { %5054 = vmatprep.mubr.bf16.mxu1 %v7087_v53  ;;  %v6863_v53 = vpop.f32.mrf.mxu0 }
 0x31a   :  { %v3830_v10 = vpop.f32.mrf.mxu1 }
 0x31b   :  { %v6865_v45 = vpop.f32.mrf.mxu0 }
 0x31c   :  { %v3834_v27 = vpop.f32.mrf.mxu1 }
 0x31d   :  { %v6867_v17 = vpop.f32.mrf.mxu0 }
 0x31f   :  { %v6869_v3 = vpop.f32.mrf.mxu0 }
 0x320   :  { %5055 = vmatmul.mubr.bf16.gmra.mxu1 %v7088_v34  ;;  %v3836_v34 = vpop.f32.mrf.mxu1 }
 0x321   :  { %5064 = vmatprep.mubr.bf16.mxu1 %v7089_v61  ;;  %v6871_v9 = vpop.f32.mrf.mxu0 }
 0x322   :  { %v3838_v61 = vpop.f32.mrf.mxu1 }
 0x324   :  { %v3840_v57 = vpop.f32.mrf.mxu1 }
 0x326   :  { %v6875_v6 = vpop.f32.mrf.mxu1 }
 0x328   :  { %5065 = vmatmul.mubr.bf16.gmra.mxu1 %v7090_v52  ;;  %v3679_v52 = vadd.f32 %v6816_v13, %v3605_v47  ;;  %v6879_v43 = vpop.f32.mrf.mxu1  ;;  %v3691_v13 = vadd.f32 %v6828_v40, %v3617_v58 }
 0x342   :  { %v3751_v36 = vpop.f32.mrf.mxu0 }
 0x343   :  { %v3752_v23 = vadd.f32 %v3751_v36, %v3679_v52  ;;  %v3848_v36 = vpop.f32.mrf.mxu1 }
 0x344   :  { %v3753_v48 = vpop.f32.mrf.mxu0 }
 0x345   :  { %v3754_v41 = vadd.f32 %v3753_v48, %v3681_v29  ;;  %v3825_v1 = vadd.f32 %v3824_v18, %v3752_v23  ;;  %v3693_v29 = vadd.f32 %v6830_v33, %v3619_v44  ;;  %v4131_v33 = vld [vmem:[#allocation5 + $0x578] sm:$0xff] }
 0x346   :  { %v3755_v37 = vpop.f32.mrf.mxu0 }
 0x347   :  { %v3756_v26 = vadd.f32 %v3755_v37, %v3683_v38  ;;  %v3827_v19 = vadd.f32 %v3826_v32, %v3754_v41  ;;  %v3863_v41 = vmul.f32 %v3825_v1, %v3825_v1 }
 0x348   :  { %v3757_v7 = vpop.f32.mrf.mxu0 }
 0x349   :  { %v3829_v8 = vadd.f32 %v3828_v15, %v3756_v26  ;;  %v3758_v54 = vadd.f32 %v3757_v7, %v3685_v51  ;;  %v3864_v2 = vmul.f32 %v3827_v19, %v3827_v19  ;;  %v3695_v51 = vadd.f32 %v6832_v0, %v3621_v50  ;;  %v4130_v19 = vld [vmem:[#allocation5 + $0x558] sm:$0xff] }
 0x34a   :  { %v3761_v30 = vpop.f32.mrf.mxu0  ;;  %v7099_v0 = vcombine.low %v6784_v42, %v6786_v59  ;;  %v5907_v50 = vcombine.low %v4132_v28, %v4133_v21  ;;  %v5906_v1 = vcombine.high %v4130_v19, %v4131_v33 }
 0x34b   :  { %v3831_v47 = vadd.f32 %v3830_v10, %v3758_v54  ;;  %v3865_v11 = vmul.f32 %v3829_v8, %v3829_v8  ;;  %v3762_v26 = vadd.f32 %v3761_v30, %v3689_v39  ;;  %v3850_v8 = vpop.f32.mrf.mxu1  ;;  %v3701_v39 = vadd.f32 %v6836_v49, %v6858_v56 }
 0x34c   :  { %v3763_v48 = vpop.f32.mrf.mxu0 }
 0x34d   :  { %v3866_v37 = vmul.f32 %v3831_v47, %v3831_v47  ;;  %v3764_v38 = vadd.f32 %v3763_v48, %v3691_v13  ;;  %v3879_v54 = vpack.c.bf16 %v3865_v11, %v3863_v41  ;;  %v3835_v44 = vadd.f32 %v3834_v27, %v3762_v26  ;;  %v6892_v30 = vpop.f32.mrf.mxu1  ;;  %v4129_v47 = vld [vmem:[#allocation5 + $0x538] sm:$0xff] }
 0x34e   :  { %v3765_v7 = vpop.f32.mrf.mxu0  ;;  %v3703_v27 = vadd.f32 %v6838_v31, %v6860_v14  ;;  %v4126_v41 = vld [vmem:[#allocation5 + $0x4d8] sm:$0xff] }
 0x34f   :  { %v3766_v23 = vadd.f32 %v3765_v7, %v3693_v29  ;;  %v3880_v40 = vpack.c.bf16 %v3866_v37, %v3864_v2  ;;  %v3837_v55 = vadd.f32 %v3836_v34, %v3764_v38  ;;  %v3699_v34 = vadd.f32 %v6834_v4, %v6852_v24  ;;  %v3856_v31 = vpop.f32.mrf.mxu1  ;;  %v4127_v26 = vld [vmem:[#allocation5 + $0x4f8] sm:$0xff] }
 0x350   :  { %v3767_v58 = vpop.f32.mrf.mxu0  ;;  %v3867_v42 = vmul.f32 %v3835_v44, %v3835_v44  ;;  %v3705_v4 = vadd.f32 %v6840_v5, %v6863_v53  ;;  %v5905_v29 = vcombine.low %v4130_v19, %v4131_v33  ;;  %v3711_v5 = vadd.f32 %v6846_v20, %v6867_v17  ;;  %v4125_v19 = vld [vmem:[#allocation5 + $0x4b8] sm:$0xff] }
 0x351   :  { %v3768_v18 = vadd.f32 %v3767_v58, %v3695_v51  ;;  %v3839_v32 = vadd.f32 %v3838_v61, %v3766_v23  ;;  %4047 = vmatprep.mubr.bf16.mxu0 %v3880_v40  ;;  %v3868_v13 = vmul.f32 %v3837_v55, %v3837_v55  ;;  %v3709_v40 = vadd.f32 %v6844_v12, %v6865_v45 }
 0x352   :  { %v3771_v15 = vpop.f32.mrf.mxu0  ;;  %4048 = vmatmul.mubr.bf16.vlgmr.msra.gmra.mxu0 %v3879_v54  ;;  %v5902_v58 = vcombine.high %v4126_v41, %v4127_v26  ;;  %v3715_v33 = vadd.f32 %v6854_v22, %v6871_v9  ;;  %v5901_v44 = vcombine.low %v4126_v41, %v4127_v26  ;;  %v4144_v26 = vld [vmem:[#allocation5 + $0x718] sm:$0xff] }
 0x353   :  { %v3841_v10 = vadd.f32 %v3840_v57, %v3768_v18  ;;  %4930 = vmatpush1.bf16.msra.mxu0 %v7099_v0  ;;  %v3869_v52 = vmul.f32 %v3839_v32, %v3839_v32  ;;  %v4128_v57 = vld [vmem:[#allocation5 + $0x518] sm:$0xff]  ;;  %v3772_v59 = vadd.f32 %v3771_v15, %v3699_v34 }
 0x354   :  { %v3773_v61 = vpop.f32.mrf.mxu0  ;;  %4931 = vmatprep.subr.bf16.mxu0 %v5908_v60  ;;  %v5904_v38 = vcombine.high %v4128_v57, %v4129_v47  ;;  %v5903_v23 = vcombine.low %v4128_v57, %v4129_v47  ;;  %v3713_v60 = vadd.f32 %v6850_v16, %v6869_v3  ;;  %v4124_v32 = vld [vmem:[#allocation5 + $0x498] sm:$0xff] }
 0x355   :  { %v3870_v49 = vmul.f32 %v3841_v10, %v3841_v10  ;;  %v3774_v56 = vadd.f32 %v3773_v61, %v3701_v39  ;;  %v3881_v2 = vpack.c.bf16 %v3869_v52, %v3867_v42  ;;  %v3845_v7 = vadd.f32 %v6875_v6, %v3772_v59  ;;  %v4122_v34 = vld [vmem:[#allocation5 + $0x458] sm:$0xff] }
 0x356   :  { %v3775_v11 = vpop.f32.mrf.mxu0  ;;  %v5900_v16 = vcombine.high %v4124_v32, %v4125_v19  ;;  %v4123_v52 = vld [vmem:[#allocation5 + $0x478] sm:$0xff]  ;;  %v5899_v22 = vcombine.low %v4124_v32, %v4125_v19 }
 0x357   :  { %v3882_v24 = vpack.c.bf16 %v3870_v49, %v3868_v13  ;;  %v3776_v48 = vadd.f32 %v3775_v11, %v3703_v27  ;;  %4932 = vmatpush1.bf16.msra.mxu0 %v5907_v50  ;;  %v3847_v14 = vadd.f32 %v6879_v43, %v3774_v56  ;;  %v3871_v20 = vmul.f32 %v3845_v7, %v3845_v7  ;;  %v4120_v56 = vld [vmem:[#allocation5 + $0x418] sm:$0xff] }
 0x358   :  { %v3777_v37 = vpop.f32.mrf.mxu0  ;;  %4933 = vmatprep.subr.bf16.mxu0 %v5906_v1  ;;  %v5898_v27 = vcombine.high %v4122_v34, %v4123_v52  ;;  %v4121_v57 = vld [vmem:[#allocation5 + $0x438] sm:$0xff]  ;;  %v5897_v59 = vcombine.low %v4122_v34, %v4123_v52 }
 0x359   :  { %v3778_v28 = vadd.f32 %v3777_v37, %v3705_v4  ;;  %v3849_v21 = vadd.f32 %v3848_v36, %v3776_v48  ;;  %4055 = vmatprep.mubr.bf16.mxu0 %v3882_v24  ;;  %v3858_v36 = vpop.f32.mrf.mxu1  ;;  %v3872_v6 = vmul.f32 %v3847_v14, %v3847_v14  ;;  %v5896_v4 = vcombine.high %v4120_v56, %v4121_v57  ;;  %v4151_v24 = vld [vmem:[#allocation5 + $0x7f8] sm:$0xff] }
 0x35a   :  { %v3781_v51 = vpop.f32.mrf.mxu0  ;;  %4056 = vmatmul.mubr.bf16.gmra.mxu0 %v3881_v2  ;;  %v5895_v48 = vcombine.low %v4120_v56, %v4121_v57  ;;  %v4148_v2 = vld [vmem:[#allocation5 + $0x798] sm:$0xff] }
 0x35b   :  { %v3851_v53 = vadd.f32 %v3850_v8, %v3778_v28  ;;  %4934 = vmatpush1.bf16.msra.mxu0 %v5905_v29  ;;  %v3873_v54 = vmul.f32 %v3849_v21, %v3849_v21  ;;  %v3782_v17 = vadd.f32 %v3781_v51, %v3709_v40  ;;  %v3860_v10 = vpop.f32.mrf.mxu1  ;;  %v4149_v37 = vld [vmem:[#allocation5 + $0x7b8] sm:$0xff] }
 0x35c   :  { %v3783_v43 = vpop.f32.mrf.mxu0  ;;  %4935 = vmatprep.subr.bf16.mxu0 %v5904_v38  ;;  %v4146_v14 = vld [vmem:[#allocation5 + $0x758] sm:$0xff]  ;;  %v5923_v21 = vcombine.low %v4148_v2, %v4149_v37 }
 0x35d   :  { %v3874_v55 = vmul.f32 %v3851_v53, %v3851_v53  ;;  %v3784_v18 = vadd.f32 %v3783_v43, %v3711_v5  ;;  %v3883_v15 = vpack.c.bf16 %v3873_v54, %v3871_v20  ;;  %v3855_v61 = vadd.f32 %v6892_v30, %v3782_v17  ;;  %v4150_v30 = vld [vmem:[#allocation5 + $0x7d8] sm:$0xff] }
 0x35e   :  { %v3785_v8 = vpop.f32.mrf.mxu0  ;;  %v5926_v29 = vcombine.high %v4150_v30, %v4151_v24  ;;  %v5925_v38 = vcombine.low %v4150_v30, %v4151_v24  ;;  %v4147_v28 = vld [vmem:[#allocation5 + $0x778] sm:$0xff] }
 0x35f   :  { %v3884_v12 = vpack.c.bf16 %v3874_v55, %v3872_v6  ;;  %v3786_v45 = vadd.f32 %v3785_v8, %v3713_v60  ;;  %4936 = vmatpush1.bf16.msra.mxu0 %v5903_v23  ;;  %v3857_v3 = vadd.f32 %v3856_v31, %v3784_v18  ;;  %v3875_v47 = vmul.f32 %v3855_v61, %v3855_v61  ;;  %v4145_v7 = vld [vmem:[#allocation5 + $0x738] sm:$0xff] }
 0x360   :  { %v3787_v39 = vpop.f32.mrf.mxu0  ;;  %4937 = vmatprep.subr.bf16.mxu0 %v5902_v58  ;;  %v5924_v31 = vcombine.high %v4148_v2, %v4149_v37  ;;  %v5922_v41 = vcombine.high %v4146_v14, %v4147_v28  ;;  %v5921_v51 = vcombine.low %v4146_v14, %v4147_v28  ;;  %v4142_v5 = vld [vmem:[#allocation5 + $0x6d8] sm:$0xff]  ;;  %v5919_v23 = vcombine.low %v4144_v26, %v4145_v7  ;;  %v7102_v2 = vld [vmem:[#allocation22_spill] sm:$0xff] }
 0x361   :  { %v3788_v0 = vadd.f32 %v3787_v39, %v3715_v33  ;;  %v3859_v50 = vadd.f32 %v3858_v36, %v3786_v45  ;;  %4063 = vmatprep.mubr.bf16.mxu0 %v3884_v12  ;;  %v3876_v13 = vmul.f32 %v3857_v3, %v3857_v3  ;;  %v4143_v53 = vld [vmem:[#allocation5 + $0x6f8] sm:$0xff] }
 0x362   :  { %4064 = vmatmul.mubr.bf16.gmra.mxu0 %v3883_v15  ;;  %v5918_v40 = vcombine.high %v4142_v5, %v4143_v53  ;;  %v4140_v54 = vld [vmem:[#allocation5 + $0x698] sm:$0xff]  ;;  %v5917_v36 = vcombine.low %v4142_v5, %v4143_v53 }
 0x363   :  { %v3861_v1 = vadd.f32 %v3860_v10, %v3788_v0  ;;  %4938 = vmatpush1.bf16.msra.mxu0 %v5901_v44  ;;  %v3877_v9 = vmul.f32 %v3859_v50, %v3859_v50  ;;  %v4141_v43 = vld [vmem:[#allocation5 + $0x6b8] sm:$0xff] }
 0x364   :  { %4939 = vmatprep.subr.bf16.mxu0 %v5900_v16  ;;  %v5916_v58 = vcombine.high %v4140_v54, %v4141_v43  ;;  %v4138_v60 = vld [vmem:[#allocation5 + $0x658] sm:$0xff]  ;;  %v5915_v55 = vcombine.low %v4140_v54, %v4141_v43 }
 0x365   :  { %v3878_v49 = vmul.f32 %v3861_v1, %v3861_v1  ;;  %v3885_v11 = vpack.c.bf16 %v3877_v9, %v3875_v47  ;;  %v4139_v6 = vld [vmem:[#allocation5 + $0x678] sm:$0xff] }
 0x366   :  { %v5914_v18 = vcombine.high %v4138_v60, %v4139_v6  ;;  %v4136_v32 = vld [vmem:[#allocation5 + $0x618] sm:$0xff]  ;;  %v5913_v20 = vcombine.low %v4138_v60, %v4139_v6 }
 0x367   :  { %v3886_v42 = vpack.c.bf16 %v3878_v49, %v3876_v13  ;;  %4940 = vmatpush1.bf16.msra.mxu0 %v5899_v22  ;;  %v4137_v19 = vld [vmem:[#allocation5 + $0x638] sm:$0xff] }
 0x368   :  { %4941 = vmatprep.subr.bf16.mxu0 %v5898_v27  ;;  %v5912_v17 = vcombine.high %v4136_v32, %v4137_v19  ;;  %v4198_v8 = vld [vmem:[#allocation5 + $0xdd8] sm:$0xff]  ;;  %v5911_v12 = vcombine.low %v4136_v32, %v4137_v19 }
 0x369   :  { %4071 = vmatprep.mubr.bf16.mxu0 %v3886_v42  ;;  %v4199_v33 = vld [vmem:[#allocation5 + $0xdf8] sm:$0xff]  ;;  %v7100_v42 = vld [vmem:[#allocation18_spill] sm:$0xff] }
 0x36a   :  { %4072 = vmatmul.mubr.bf16.gmra.mxu0 %v3885_v11  ;;  %v5974_v45 = vcombine.high %v4198_v8, %v4199_v33  ;;  %v4196_v44 = vld [vmem:[#allocation5 + $0xd98] sm:$0xff]  ;;  %v5973_v39 = vcombine.low %v4198_v8, %v4199_v33  ;;  %v7101_v11 = vld [vmem:[#allocation20_spill] sm:$0xff] }
 0x36b   :  { %4942 = vmatpush1.bf16.msra.mxu0 %v5897_v59  ;;  %4961 = vmatprep.mubr.bf16.mxu0 %v6380_v63  ;;  %v5920_v63 = vcombine.high %v4144_v26, %v4145_v7  ;;  %v4197_v15 = vld [vmem:[#allocation5 + $0xdb8] sm:$0xff] }
 0x36c   :  { %4943 = vmatprep.subr.bf16.mxu0 %v5896_v4  ;;  %v5972_v10 = vcombine.high %v4196_v44, %v4197_v15  ;;  %v4194_v16 = vld [vmem:[#allocation5 + $0xd58] sm:$0xff]  ;;  %v5971_v0 = vcombine.low %v4196_v44, %v4197_v15  ;;  %v7104_v15 = vld [vmem:[#allocation26_spill] sm:$0xff] }
 0x36d   :  { %v4195_v3 = vld [vmem:[#allocation5 + $0xd78] sm:$0xff] }
 0x36e   :  { %v5970_v50 = vcombine.high %v4194_v16, %v4195_v3  ;;  %v4192_v34 = vld [vmem:[#allocation5 + $0xd18] sm:$0xff]  ;;  %v5969_v61 = vcombine.low %v4194_v16, %v4195_v3  ;;  %v7107_v16 = vld [vmem:[#allocation32_spill] sm:$0xff]  ;;  %v7108_v3 = vld [vmem:[#allocation34_spill] sm:$0xff] }
 0x36f   :  { %4944 = vmatpush1.bf16.msra.mxu0 %v5895_v48  ;;  %v4193_v52 = vld [vmem:[#allocation5 + $0xd38] sm:$0xff] }
 0x370   :  { %4945 = vmatprep.subr.bf16.mxu0 %v5926_v29  ;;  %v5968_v1 = vcombine.high %v4192_v34, %v4193_v52  ;;  %v4190_v22 = vld [vmem:[#allocation5 + $0xcd8] sm:$0xff]  ;;  %v5967_v27 = vcombine.low %v4192_v34, %v4193_v52  ;;  %v7110_v52 = vld [vmem:[#allocation38_spill] sm:$0xff] }
 0x371   :  { %v4191_v9 = vld [vmem:[#allocation5 + $0xcf8] sm:$0xff] }
 0x372   :  { %v4188_v13 = vld [vmem:[#allocation5 + $0xc98] sm:$0xff]  ;;  %v5965_v49 = vcombine.low %v4190_v22, %v4191_v9 }
 0x373   :  { %4946 = vmatpush2.bf16.msra.mxu0 %v5925_v38  ;;  %v4186_v57 = vld [vmem:[#allocation5 + $0xc58] sm:$0xff]  ;;  %v7103_v38 = vld [vmem:[#allocation24_spill] sm:$0xff] }
 0x374   :  { %4947 = vmatprep.subr.bf16.mxu0 %v5924_v31  ;;  %v4187_v47 = vld [vmem:[#allocation5 + $0xc78] sm:$0xff] }
 0x375   :  { %v4184_v4 = vld [vmem:[#allocation5 + $0xc18] sm:$0xff]  ;;  %v5961_v30 = vcombine.low %v4186_v57, %v4187_v47 }
 0x376   :  { %v4214_v48 = vld [vmem:[#allocation5 + $0xfd8] sm:$0xff] }
 0x377   :  { %4948 = vmatpush2.bf16.msra.mxu0 %v5923_v21  ;;  %v4215_v29 = vld [vmem:[#allocation5 + $0xff8] sm:$0xff] }
 0x378   :  { %4949 = vmatprep.subr.bf16.mxu0 %v5922_v41  ;;  %v5990_v31 = vcombine.high %v4214_v48, %v4215_v29  ;;  %v4212_v14 = vld [vmem:[#allocation5 + $0xf98] sm:$0xff]  ;;  %v5989_v21 = vcombine.low %v4214_v48, %v4215_v29  ;;  %v6239_v29 = vld [vmem:[#allocation7 + $0x1c0] sm:$0xff]  }
 0x379   :  { %v4213_v28 = vld [vmem:[#allocation5 + $0xfb8] sm:$0xff] }
 0x37a   :  { %v5988_v41 = vcombine.high %v4212_v14, %v4213_v28  ;;  %v4210_v26 = vld [vmem:[#allocation5 + $0xf58] sm:$0xff] }
 0x37b   :  { %4950 = vmatpush2.bf16.msra.mxu0 %v5921_v51  ;;  %v4211_v7 = vld [vmem:[#allocation5 + $0xf78] sm:$0xff]  ;;  %v5987_v51 = vcombine.low %v4212_v14, %v4213_v28 }
 0x37c   :  { %4951 = vmatprep.subr.bf16.mxu0 %v5920_v63  ;;  %v5986_v63 = vcombine.high %v4210_v26, %v4211_v7  ;;  %v4208_v5 = vld [vmem:[#allocation5 + $0xf18] sm:$0xff] }
 0x37d   :  { %v4209_v53 = vld [vmem:[#allocation5 + $0xf38] sm:$0xff] }
 0x37e   :  { %v4206_v54 = vld [vmem:[#allocation5 + $0xed8] sm:$0xff] }
 0x37f   :  { %4952 = vmatpush2.bf16.msra.mxu0 %v5919_v23  ;;  %v5985_v23 = vcombine.low %v4210_v26, %v4211_v7  ;;  %v4207_v43 = vld [vmem:[#allocation5 + $0xef8] sm:$0xff] }
 0x380   :  { %4953 = vmatprep.subr.bf16.mxu0 %v5918_v40  ;;  %v5984_v40 = vcombine.high %v4208_v5, %v4209_v53  ;;  %v4204_v60 = vld [vmem:[#allocation5 + $0xe98] sm:$0xff] }
 0x381   :  { %v4205_v6 = vld [vmem:[#allocation5 + $0xeb8] sm:$0xff] }
 0x382   :  { %v4202_v32 = vld [vmem:[#allocation5 + $0xe58] sm:$0xff] }
 0x383   :  { %4954 = vmatpush2.bf16.msra.mxu0 %v5917_v36  ;;  %v5983_v36 = vcombine.low %v4208_v5, %v4209_v53  ;;  %v4203_v19 = vld [vmem:[#allocation5 + $0xe78] sm:$0xff] }
 0x384   :  { %4955 = vmatprep.subr.bf16.mxu0 %v5916_v58  ;;  %v5982_v58 = vcombine.high %v4206_v54, %v4207_v43  ;;  %v4200_v8 = vld [vmem:[#allocation5 + $0xe18] sm:$0xff] }
 0x385   :  { %v4201_v33 = vld [vmem:[#allocation5 + $0xe38] sm:$0xff] }
 0x386   :  { %v5975_v44 = vcombine.low %v4200_v8, %v4201_v33  ;;  %v6226_v34 = vld [vmem:[#allocation7 + $0x1b8] sm:$0xff]  }
 0x387   :  { %4956 = vmatpush2.bf16.msra.mxu0 %v5915_v55  ;;  %v5981_v55 = vcombine.low %v4206_v54, %v4207_v43  ;;  %v7116_v54 = vld [vmem:[#allocation16_spill] sm:$0xff] }
 0x388   :  { %4957 = vmatprep.subr.bf16.mxu0 %v5914_v18  ;;  %v5980_v18 = vcombine.high %v4204_v60, %v4205_v6 }
 0x38b   :  { %4958 = vmatpush2.bf16.msra.mxu0 %v5913_v20  ;;  %v5979_v20 = vcombine.low %v4204_v60, %v4205_v6  ;;  %v7118_v6 = vld [vmem:[#allocation17_spill] sm:$0xff] }
 0x38c   :  { %4959 = vmatprep.subr.bf16.mxu0 %v5912_v17  ;;  %v5978_v17 = vcombine.high %v4202_v32, %v4203_v19 }
 0x38f   :  { %4960 = vmatpush2.bf16.msra.mxu0 %v5911_v12  ;;  %v5977_v12 = vcombine.low %v4202_v32, %v4203_v19 }
 0x390   :  { %5075 = vmatprep.subr.bf16.mxu0 %v5974_v45  ;;  %v5976_v45 = vcombine.high %v4200_v8, %v4201_v33 }
 0x392   :  { %4962 = vmatmul.mubr.bf16.vlgmr.msra.gmra.mxu0 %v6390_v25  ;;  %v5966_v25 = vcombine.high %v4190_v22, %v4191_v9  ;;  %v6229_v22 = vld [vmem:[#allocation7 + $0x1e8] sm:$0xff]  }
 0x393   :  { %5076 = vmatpush1.bf16.msra.mxu0 %v5973_v39  ;;  %4971 = vmatprep.mubr.bf16.mxu0 %v6395_v35  ;;  %v4189_v35 = vld [vmem:[#allocation5 + $0xcb8] sm:$0xff]  ;;  %v7105_v39 = vld [vmem:[#allocation28_spill] sm:$0xff]  ;;  %v6230_v9 = vld [vmem:[#allocation7 + $0x1a8] sm:$0xff]  }
 0x394   :  { %5077 = vmatprep.subr.bf16.mxu0 %v5972_v10  ;;  %v5964_v56 = vcombine.high %v4188_v13, %v4189_v35  ;;  %v5963_v59 = vcombine.low %v4188_v13, %v4189_v35  ;;  %v7106_v10 = vld [vmem:[#allocation30_spill] sm:$0xff]  ;;  %v6233_v13 = vld [vmem:[#allocation7 + $0x1d8] sm:$0xff]  }
 0x395   :  { %v6234_v35 = vld [vmem:[#allocation7 + $0x198] sm:$0xff]  }
 0x397   :  { %5078 = vmatpush1.bf16.msra.mxu0 %v5971_v0  ;;  %v7109_v0 = vld [vmem:[#allocation36_spill] sm:$0xff] }
 0x398   :  { %5079 = vmatprep.subr.bf16.mxu0 %v5970_v50  ;;  %v6225_v50 = vld [vmem:[#allocation7 + $0x1f8] sm:$0xff]  }
 0x399   :  { %6127 = vmatprep.subr.bf16.mxu1 %v6225_v50 }
 0x39a   :  { %4972 = vmatmul.mubr.bf16.gmra.mxu0 %v6402_v46  ;;  %v5962_v46 = vcombine.high %v4186_v57, %v4187_v47  ;;  %6128 = vmatpush3.bf16.msra.mxu1 %v6226_v34  ;;  %v6236_v57 = vld [vmem:[#allocation7 + $0x190] sm:$0xff]  }
 0x39b   :  { %5080 = vmatpush1.bf16.msra.mxu0 %v5969_v61  ;;  %4981 = vmatprep.mubr.bf16.mxu0 %v6407_v62  ;;  %v4185_v62 = vld [vmem:[#allocation5 + $0xc38] sm:$0xff]  ;;  %v6227_v61 = vld [vmem:[#allocation7 + $0x1f0] sm:$0xff]  }
 0x39c   :  { %5081 = vmatprep.subr.bf16.mxu0 %v5968_v1  ;;  %v5960_v24 = vcombine.high %v4184_v4, %v4185_v62  ;;  %v5959_v37 = vcombine.low %v4184_v4, %v4185_v62  ;;  %6129 = vmatprep.subr.bf16.mxu1 %v6227_v61  ;;  %v6228_v1 = vld [vmem:[#allocation7 + $0x1b0] sm:$0xff]   ;;  %v6238_v62 = vld [vmem:[#allocation7 + $0x188] sm:$0xff]  }
 0x39e   :  { %6130 = vmatpush3.bf16.msra.mxu1 %v6228_v1 }
 0x39f   :  { %5082 = vmatpush1.bf16.msra.mxu0 %v5967_v27  ;;  %6131 = vmatprep.subr.bf16.mxu1 %v6229_v22  ;;  %v6231_v27 = vld [vmem:[#allocation7 + $0x1e0] sm:$0xff]  }
 0x3a0   :  { %5083 = vmatprep.subr.bf16.mxu0 %v5966_v25  ;;  %v6232_v25 = vld [vmem:[#allocation7 + $0x1a0] sm:$0xff]  }
 0x3a2   :  { %4982 = vmatmul.mubr.bf16.gmra.mxu0 %v7100_v42  ;;  %6132 = vmatpush3.bf16.msra.mxu1 %v6230_v9 }
 0x3a3   :  { %5084 = vmatpush1.bf16.msra.mxu0 %v5965_v49  ;;  %4991 = vmatprep.mubr.bf16.mxu0 %v7101_v11  ;;  %v6237_v11 = vld [vmem:[#allocation7 + $0x1c8] sm:$0xff]  }
 0x3a4   :  { %5085 = vmatprep.subr.bf16.mxu0 %v5964_v56  ;;  %6133 = vmatprep.subr.bf16.mxu1 %v6231_v27  ;;  %v6235_v56 = vld [vmem:[#allocation7 + $0x1d0] sm:$0xff]  }
 0x3a6   :  { %6134 = vmatpush3.bf16.msra.mxu1 %v6232_v25 }
 0x3a7   :  { %5086 = vmatpush1.bf16.msra.mxu0 %v5963_v59  ;;  %6135 = vmatprep.subr.bf16.mxu1 %v6233_v13 }
 0x3a8   :  { %5087 = vmatprep.subr.bf16.mxu0 %v5962_v46  ;;  %v7111_v46 = vld [vmem:[#allocation12_spill] sm:$0xff] }
 0x3aa   :  { %4992 = vmatmul.mubr.bf16.gmra.mxu0 %v7102_v2  ;;  %6136 = vmatpush3.bf16.msra.mxu1 %v6234_v35  ;;  %v7112_v2 = vld [vmem:[#allocation13_spill] sm:$0xff] }
 0x3ab   :  { %5088 = vmatpush1.bf16.msra.mxu0 %v5961_v30  ;;  %5107 = vmatprep.mubr.bf16.mxu0 %v7103_v38  ;;  %v6240_v38 = vld [vmem:[#allocation7 + $0x180] sm:$0xff]  }
 0x3ac   :  { %5089 = vmatprep.subr.bf16.mxu0 %v5960_v24  ;;  %6137 = vmatprep.subr.bf16.mxu1 %v6235_v56 }
 0x3ae   :  { %6138 = vmatpush3.bf16.msra.mxu1 %v6236_v57 }
 0x3af   :  { %5090 = vmatpush1.bf16.msra.mxu0 %v5959_v37  ;;  %6139 = vmatprep.subr.bf16.mxu1 %v6237_v11 }
 0x3b0   :  { %5091 = vmatprep.subr.bf16.mxu0 %v5990_v31 }
 0x3b2   :  { %6140 = vmatpush3.bf16.msra.mxu1 %v6238_v62 }
 0x3b3   :  { %5092 = vmatpush2.bf16.msra.mxu0 %v5989_v21  ;;  %6141 = vmatprep.subr.bf16.mxu1 %v6239_v29  ;;  %v7113_v21 = vld [vmem:[#allocation14_spill] sm:$0xff] }
 0x3b4   :  { %5093 = vmatprep.subr.bf16.mxu0 %v5988_v41 }
 0x3b6   :  { %6142 = vmatpush3.bf16.msra.mxu1 %v6240_v38 }
 0x3b7   :  { %5094 = vmatpush2.bf16.msra.mxu0 %v5987_v51 }
 0x3b8   :  { %5095 = vmatprep.subr.bf16.mxu0 %v5986_v63  ;;  %v7114_v63 = vld [vmem:[#allocation15_spill] sm:$0xff] }
 0x3bb   :  { %5096 = vmatpush2.bf16.msra.mxu0 %v5985_v23 }
 0x3bc   :  { %5097 = vmatprep.subr.bf16.mxu0 %v5984_v40 }
 0x3bf   :  { %5098 = vmatpush2.bf16.msra.mxu0 %v5983_v36 }
 0x3c0   :  { %5099 = vmatprep.subr.bf16.mxu0 %v5982_v58 }
 0x3c3   :  { %5100 = vmatpush2.bf16.msra.mxu0 %v5981_v55 }
 0x3c4   :  { %5101 = vmatprep.subr.bf16.mxu0 %v5980_v18 }
 0x3c7   :  { %5102 = vmatpush2.bf16.msra.mxu0 %v5979_v20  ;;  %v7120_v20 = vld [vmem:[#allocation19_spill] sm:$0xff] }
 0x3c8   :  { %5103 = vmatprep.subr.bf16.mxu0 %v5978_v17 }
 0x3cb   :  { %5104 = vmatpush2.bf16.msra.mxu0 %v5977_v12  ;;  %v4890_v12 = vpop.f32.mrf.mxu1 }
 0x3cc   :  { %5105 = vmatprep.subr.bf16.mxu0 %v5976_v45  ;;  %v7122_v45 = vld [vmem:[#allocation21_spill] sm:$0xff] }
 0x3cf   :  { %5106 = vmatpush2.bf16.msra.mxu0 %v5975_v44 }
 0x3d2   :  { %5108 = vmatmul.mubr.bf16.vlgmr.msra.gmra.mxu0 %v7104_v15  ;;  %v4892_v15 = vpop.f32.mrf.mxu1 }
 0x3d3   :  { %5117 = vmatprep.mubr.bf16.mxu0 %v7105_v39 }
 0x3d4   :  { %v4894_v39 = vpop.f32.mrf.mxu1 }
 0x3da   :  { %5118 = vmatmul.mubr.bf16.gmra.mxu0 %v7106_v10  ;;  %v4896_v10 = vpop.f32.mrf.mxu1 }
 0x3db   :  { %5127 = vmatprep.mubr.bf16.mxu0 %v7107_v16 }
 0x3dc   :  { %v4900_v16 = vpop.f32.mrf.mxu1 }
 0x3e2   :  { %5128 = vmatmul.mubr.bf16.gmra.mxu0 %v7108_v3  ;;  %v4902_v3 = vpop.f32.mrf.mxu1 }
 0x3e3   :  { %5137 = vmatprep.mubr.bf16.mxu0 %v7109_v0 }
 0x3e4   :  { %v4904_v0 = vpop.f32.mrf.mxu1 }
 0x3e6   :  { %v4906_v50 = vpop.f32.mrf.mxu1 }
 0x3e8   :  { %v6949_v34 = vpop.f32.mrf.mxu1 }
 0x3ea   :  { %5138 = vmatmul.mubr.bf16.gmra.mxu0 %v7110_v52  ;;  %v6951_v52 = vpop.f32.mrf.mxu1 }
 0x3ec   :  { %v6953_v1 = vpop.f32.mrf.mxu1 }
 0x3ee   :  { %v6955_v9 = vpop.f32.mrf.mxu1 }
 0x3f0   :  { %v6957_v25 = vpop.f32.mrf.mxu1 }
 0x412   :  { %v6103_v49 = vpop.f32.mrf.mxu0 }
 0x414   :  { %v6104_v47 = vpop.f32.mrf.mxu0 }
 0x415   :  { %v6105_v42 = vadd.f32 %v6104_v47, %v6103_v49  ;;  %v6959_v49 = vpop.f32.mrf.mxu1 }
 0x416   :  { %v6106_v59 = vpop.f32.mrf.mxu0 }
 0x417   :  { %v6926_v4 = vadd.f32 %v6105_v42, %v7111_v46  ;;  %v6961_v57 = vpop.f32.mrf.mxu1 }
 0x418   :  { %v6107_v30 = vpop.f32.mrf.mxu0 }
 0x419   :  { %v6108_v24 = vadd.f32 %v6107_v30, %v6106_v59  ;;  %v6963_v42 = vpop.f32.mrf.mxu1 }
 0x41a   :  { %v6109_v48 = vpop.f32.mrf.mxu0 }
 0x41b   :  { %v6929_v37 = vadd.f32 %v6108_v24, %v7112_v2  ;;  %v5036_v11 = vpop.f32.mrf.mxu1 }
 0x41c   :  { %v6110_v31 = vpop.f32.mrf.mxu0 }
 0x41d   :  { %v6111_v14 = vadd.f32 %v6110_v31, %v6109_v48  ;;  %v5038_v62 = vpop.f32.mrf.mxu1 }
 0x41e   :  { %v6112_v28 = vpop.f32.mrf.mxu0 }
 0x41f   :  { %v6932_v41 = vadd.f32 %v6111_v14, %v7113_v21  ;;  %v5040_v24 = vpop.f32.mrf.mxu1 }
 0x420   :  { %v6113_v26 = vpop.f32.mrf.mxu0 }
 0x421   :  { %v6114_v7 = vadd.f32 %v6113_v26, %v6112_v28  ;;  %v5042_v29 = vpop.f32.mrf.mxu1 }
 0x422   :  { %v6115_v51 = vpop.f32.mrf.mxu0 }
 0x423   :  { %v6935_v5 = vadd.f32 %v6114_v7, %v7114_v63  ;;  %v5046_v2 = vpop.f32.mrf.mxu1 }
 0x424   :  { %v6116_v53 = vpop.f32.mrf.mxu0 }
 0x425   :  { %7115 = vst [vmem:[#allocation23_spill] sm:$0xff] %v6935_v5  ;;  %v6117_v23 = vadd.f32 %v6116_v53, %v6115_v51  ;;  %v5048_v31 = vpop.f32.mrf.mxu1 }
 0x426   :  { %v6118_v40 = vpop.f32.mrf.mxu0 }
 0x427   :  { %v6938_v43 = vadd.f32 %v6117_v23, %v7116_v54  ;;  %v5050_v28 = vpop.f32.mrf.mxu1 }
 0x428   :  { %v6119_v36 = vpop.f32.mrf.mxu0 }
 0x429   :  { %7117 = vst [vmem:[#allocation25_spill] sm:$0xff] %v6938_v43  ;;  %v6120_v58 = vadd.f32 %v6119_v36, %v6118_v40  ;;  %v5052_v26 = vpop.f32.mrf.mxu1 }
 0x42a   :  { %v6121_v60 = vpop.f32.mrf.mxu0 }
 0x42b   :  { %v6941_v55 = vadd.f32 %v6120_v58, %v7118_v6  ;;  %v5056_v51 = vpop.f32.mrf.mxu1 }
 0x42c   :  { %v6122_v18 = vpop.f32.mrf.mxu0 }
 0x42d   :  { %7119 = vst [vmem:[#allocation27_spill] sm:$0xff] %v6941_v55  ;;  %v6123_v32 = vadd.f32 %v6122_v18, %v6121_v60  ;;  %v5058_v58 = vpop.f32.mrf.mxu1 }
 0x42e   :  { %v6124_v19 = vpop.f32.mrf.mxu0 }
 0x42f   :  { %v6944_v17 = vadd.f32 %v6123_v32, %v7120_v20 }
 0x430   :  { %v6125_v8 = vpop.f32.mrf.mxu0 }
 0x431   :  { %7121 = vst [vmem:[#allocation29_spill] sm:$0xff] %v6944_v17  ;;  %v6126_v33 = vadd.f32 %v6125_v8, %v6124_v19 }
 0x433   :  { %v6947_v44 = vadd.f32 %v6126_v33, %v7122_v45  ;;  %v5060_v45 = vpop.f32.mrf.mxu1 }
 0x435   :  { %7123 = vst [vmem:[#allocation31_spill] sm:$0xff] %v6947_v44 }
 0x452   :  { %v4963_v61 = vpop.f32.mrf.mxu0 }
 0x453   :  { %v4964_v40 = vadd.f32 %v4963_v61, %v4890_v12 }
 0x454   :  { %v4965_v22 = vpop.f32.mrf.mxu0 }
 0x455   :  { %v4966_v53 = vadd.f32 %v4965_v22, %v4892_v15  ;;  %v5037_v32 = vadd.f32 %v5036_v11, %v4964_v40 }
 0x456   :  { %v4967_v27 = vpop.f32.mrf.mxu0 }
 0x457   :  { %v4968_v23 = vadd.f32 %v4967_v27, %v4894_v39  ;;  %v5039_v6 = vadd.f32 %v5038_v62, %v4966_v53  ;;  %v5062_v27 = vpop.f32.mrf.mxu1 }
 0x458   :  { %v4969_v13 = vpop.f32.mrf.mxu0 }
 0x459   :  { %v4970_v36 = vadd.f32 %v4969_v13, %v4896_v10  ;;  %v5041_v18 = vadd.f32 %v5040_v24, %v4968_v23 }
 0x45a   :  { %v4973_v35 = vpop.f32.mrf.mxu0 }
 0x45b   :  { %v5043_v20 = vadd.f32 %v5042_v29, %v4970_v36  ;;  %v4974_v15 = vadd.f32 %v4973_v35, %v4900_v16 }
 0x45c   :  { %v4975_v56 = vpop.f32.mrf.mxu0 }
 0x45d   :  { %v4976_v55 = vadd.f32 %v4975_v56, %v4902_v3  ;;  %v5047_v53 = vadd.f32 %v5046_v2, %v4974_v15 }
 0x45e   :  { %v4977_v47 = vpop.f32.mrf.mxu0 }
 0x45f   :  { %v4978_v43 = vadd.f32 %v4977_v47, %v4904_v0  ;;  %v5049_v11 = vadd.f32 %v5048_v31, %v4976_v55 }
 0x460   :  { %v4979_v59 = vpop.f32.mrf.mxu0 }
 0x461   :  { %v4980_v61 = vadd.f32 %v4979_v59, %v4906_v50  ;;  %v5051_v24 = vadd.f32 %v5050_v28, %v4978_v43 }
 0x462   :  { %v4983_v46 = vpop.f32.mrf.mxu0 }
 0x463   :  { %v4984_v55 = vadd.f32 %v4983_v46, %v6949_v34 }
 0x464   :  { %v4985_v30 = vpop.f32.mrf.mxu0 }
 0x465   :  { %v4986_v50 = vadd.f32 %v4985_v30, %v6951_v52 }
 0x466   :  { %v4987_v48 = vpop.f32.mrf.mxu0 }
 0x468   :  { %v4989_v38 = vpop.f32.mrf.mxu0 }
 0x469   :  { %v4990_v56 = vadd.f32 %v4989_v38, %v6955_v9 }
 0x46a   :  { %v6965_v14 = vpop.f32.mrf.mxu0 }
 0x46b   :  { %v5063_v30 = vadd.f32 %v5062_v27, %v4990_v56 }
 0x46c   :  { %v6967_v21 = vpop.f32.mrf.mxu0 }
 0x46d   :  { %v4996_v9 = vadd.f32 %v6967_v21, %v6959_v49 }
 0x46e   :  { %v6969_v7 = vpop.f32.mrf.mxu0 }
 0x46f   :  { %v4998_v38 = vadd.f32 %v6969_v7, %v6961_v57 }
 0x470   :  { %v6971_v63 = vpop.f32.mrf.mxu0 }
 0x492   :  { %v5109_v54 = vpop.f32.mrf.mxu0 }
 0x493   :  { %v5110_v44 = vadd.f32 %v5109_v54, %v5037_v32  ;;  %v5053_v54 = vadd.f32 %v5052_v26, %v4980_v61  ;;  %v5059_v26 = vadd.f32 %v5058_v58, %v4986_v50 }
 0x494   :  { %v5111_v60 = vpop.f32.mrf.mxu0 }
 0x495   :  { %v5112_v8 = vadd.f32 %v5111_v60, %v5039_v6  ;;  %v5148_v13 = vmul.f32 %v5110_v44, %v5110_v44 }
 0x496   :  { %v5113_v19 = vpop.f32.mrf.mxu0 }
 0x497   :  { %v5114_v33 = vadd.f32 %v5113_v19, %v5041_v18  ;;  %v5149_v10 = vmul.f32 %v5112_v8, %v5112_v8  ;;  %v5057_v18 = vadd.f32 %v5056_v51, %v4984_v55  ;;  %v4994_v51 = vadd.f32 %v6965_v14, %v6957_v25 }
 0x498   :  { %v5115_v17 = vpop.f32.mrf.mxu0 }
 0x499   :  { %v5116_v5 = vadd.f32 %v5115_v17, %v5043_v20  ;;  %v5150_v39 = vmul.f32 %v5114_v33, %v5114_v33  ;;  %v5066_v17 = vpop.f32.mrf.mxu1  ;;  %v5000_v33 = vadd.f32 %v6971_v63, %v6963_v42 }
 0x49a   :  { %v5119_v12 = vpop.f32.mrf.mxu0  ;;  %v5067_v21 = vadd.f32 %v5066_v17, %v4994_v51 }
 0x49b   :  { %v5151_v22 = vmul.f32 %v5116_v5, %v5116_v5  ;;  %v5164_v23 = vpack.c.bf16 %v5150_v39, %v5148_v13  ;;  %v5120_v16 = vadd.f32 %v5119_v12, %v5047_v53  ;;  %v4988_v5 = vadd.f32 %v4987_v48, %v6953_v1  ;;  %v5068_v2 = vpop.f32.mrf.mxu1 }
 0x49c   :  { %v5121_v62 = vpop.f32.mrf.mxu0 }
 0x49d   :  { %v5165_v29 = vpack.c.bf16 %v5151_v22, %v5149_v10  ;;  %v5122_v36 = vadd.f32 %v5121_v62, %v5049_v11  ;;  %v5152_v31 = vmul.f32 %v5120_v16, %v5120_v16  ;;  %v5061_v60 = vadd.f32 %v5060_v45, %v4988_v5  ;;  %v5070_v34 = vpop.f32.mrf.mxu1 }
 0x49e   :  { %v5123_v40 = vpop.f32.mrf.mxu0  ;;  %v5069_v10 = vadd.f32 %v5068_v2, %v4996_v9  ;;  %v5071_v22 = vadd.f32 %v5070_v34, %v4998_v38  ;;  %v7124_v2 = vld [vmem:[#allocation23_spill] sm:$0xff]  ;;  %v7127_v34 = vld [vmem:[#allocation29_spill] sm:$0xff] }
 0x49f   :  { %v5124_v3 = vadd.f32 %v5123_v40, %v5051_v24  ;;  %5332 = vmatprep.mubr.bf16.mxu1 %v5165_v29  ;;  %v5153_v47 = vmul.f32 %v5122_v36, %v5122_v36  ;;  %v5072_v39 = vpop.f32.mrf.mxu1  ;;  %v7128_v38 = vld [vmem:[#allocation31_spill] sm:$0xff] }
 0x4a0   :  { %v5125_v0 = vpop.f32.mrf.mxu0  ;;  %5333 = vmatmul.mubr.bf16.vlgmr.msra.gmra.mxu1 %v5164_v23  ;;  %v5073_v7 = vadd.f32 %v5072_v39, %v5000_v33 }
 0x4a1   :  { %v5126_v44 = vadd.f32 %v5125_v0, %v5053_v54  ;;  %v5154_v43 = vmul.f32 %v5124_v3, %v5124_v3 }
 0x4a2   :  { %v5129_v35 = vpop.f32.mrf.mxu0 }
 0x4a3   :  { %v5155_v59 = vmul.f32 %v5126_v44, %v5126_v44  ;;  %v5166_v32 = vpack.c.bf16 %v5154_v43, %v5152_v31  ;;  %v5130_v46 = vadd.f32 %v5129_v35, %v5057_v18 }
 0x4a4   :  { %v5131_v28 = vpop.f32.mrf.mxu0 }
 0x4a5   :  { %v5167_v6 = vpack.c.bf16 %v5155_v59, %v5153_v47  ;;  %v5132_v1 = vadd.f32 %v5131_v28, %v5059_v26  ;;  %v5156_v12 = vmul.f32 %v5130_v46, %v5130_v46 }
 0x4a6   :  { %v5133_v52 = vpop.f32.mrf.mxu0 }
 0x4a7   :  { %v5134_v48 = vadd.f32 %v5133_v52, %v5061_v60  ;;  %5340 = vmatprep.mubr.bf16.mxu1 %v5167_v6  ;;  %v5157_v45 = vmul.f32 %v5132_v1, %v5132_v1  ;;  %v7125_v60 = vld [vmem:[#allocation25_spill] sm:$0xff]  ;;  %v7126_v52 = vld [vmem:[#allocation27_spill] sm:$0xff] }
 0x4a8   :  { %v5135_v19 = vpop.f32.mrf.mxu0  ;;  %5341 = vmatmul.mubr.bf16.gmra.mxu1 %v5166_v32 }
 0x4a9   :  { %v5136_v58 = vadd.f32 %v5135_v19, %v5063_v30  ;;  %v5158_v20 = vmul.f32 %v5134_v48, %v5134_v48 }
 0x4aa   :  { %v5139_v8 = vpop.f32.mrf.mxu0 }
 0x4ab   :  { %v5159_v15 = vmul.f32 %v5136_v58, %v5136_v58  ;;  %v5168_v27 = vpack.c.bf16 %v5158_v20, %v5156_v12  ;;  %v5140_v25 = vadd.f32 %v5139_v8, %v5067_v21 }
 0x4ac   :  { %v5141_v61 = vpop.f32.mrf.mxu0 }
 0x4ad   :  { %v5169_v49 = vpack.c.bf16 %v5159_v15, %v5157_v45  ;;  %v5142_v13 = vadd.f32 %v5141_v61, %v5069_v10  ;;  %v5160_v29 = vmul.f32 %v5140_v25, %v5140_v25 }
 0x4ae   :  { %v5143_v57 = vpop.f32.mrf.mxu0 }
 0x4af   :  { %v5144_v62 = vadd.f32 %v5143_v57, %v5071_v22  ;;  %5348 = vmatprep.mubr.bf16.mxu1 %v5169_v49  ;;  %v5161_v63 = vmul.f32 %v5142_v13, %v5142_v13 }
 0x4b0   :  { %v5145_v14 = vpop.f32.mrf.mxu0  ;;  %5349 = vmatmul.mubr.bf16.gmra.mxu1 %v5168_v27 }
 0x4b1   :  { %v5146_v11 = vadd.f32 %v5145_v14, %v5073_v7  ;;  %v5162_v42 = vmul.f32 %v5144_v62, %v5144_v62 }
 0x4b3   :  { %v5163_v24 = vmul.f32 %v5146_v11, %v5146_v11  ;;  %v5170_v23 = vpack.c.bf16 %v5162_v42, %v5160_v29 }
 0x4b5   :  { %v5171_v53 = vpack.c.bf16 %v5163_v24, %v5161_v63 }
 0x4b7   :  { %5356 = vmatprep.mubr.bf16.mxu1 %v5171_v53 }
 0x4b8   :  { %5357 = vmatmul.mubr.bf16.gmra.mxu1 %v5170_v23 }
 0x560   :  { %v6143_v40 = vpop.f32.mrf.mxu1 }
 0x562   :  { %v6144_v54 = vpop.f32.mrf.mxu1 }
 0x563   :  { %v6145_v36 = vadd.f32 %v6144_v54, %v6143_v40 }
 0x564   :  { %v6146_v3 = vpop.f32.mrf.mxu1 }
 0x565   :  { %v5365_v17 = vadd.f32 %v6145_v36, %v6926_v4 }
 0x566   :  { %v6147_v16 = vpop.f32.mrf.mxu1 }
 0x567   :  { %5373 = vst [vmem:[#allocation8] sm:$0xff] %v5365_v17  ;;  %v6148_v0 = vadd.f32 %v6147_v16, %v6146_v3 }
 0x568   :  { %v6149_v50 = vpop.f32.mrf.mxu1 }
 0x569   :  { %v5366_v5 = vadd.f32 %v6148_v0, %v6929_v37 }
 0x56a   :  { %v6150_v44 = vpop.f32.mrf.mxu1 }
 0x56b   :  { %5374 = vst [vmem:[#allocation8 + $0x8] sm:$0xff] %v5366_v5  ;;  %v6151_v55 = vadd.f32 %v6150_v44, %v6149_v50 }
 0x56c   :  { %v6152_v43 = vpop.f32.mrf.mxu1 }
 0x56d   :  { %v5367_v35 = vadd.f32 %v6151_v55, %v6932_v41 }
 0x56e   :  { %v6153_v56 = vpop.f32.mrf.mxu1 }
 0x56f   :  { %5375 = vst [vmem:[#allocation8 + $0x10] sm:$0xff] %v5367_v35  ;;  %v6154_v47 = vadd.f32 %v6153_v56, %v6152_v43 }
 0x570   :  { %v6155_v59 = vpop.f32.mrf.mxu1 }
 0x571   :  { %v5368_v31 = vadd.f32 %v6154_v47, %v7124_v2 }
 0x572   :  { %v6156_v28 = vpop.f32.mrf.mxu1 }
 0x573   :  { %5376 = vst [vmem:[#allocation8 + $0x18] sm:$0xff] %v5368_v31  ;;  %v6157_v4 = vadd.f32 %v6156_v28, %v6155_v59 }
 0x574   :  { %v6158_v26 = vpop.f32.mrf.mxu1 }
 0x575   :  { %v5369_v6 = vadd.f32 %v6157_v4, %v7125_v60 }
 0x576   :  { %v6159_v18 = vpop.f32.mrf.mxu1 }
 0x577   :  { %5377 = vst [vmem:[#allocation8 + $0x20] sm:$0xff] %v5369_v6  ;;  %v6160_v37 = vadd.f32 %v6159_v18, %v6158_v26 }
 0x578   :  { %v6161_v32 = vpop.f32.mrf.mxu1 }
 0x579   :  { %v5370_v30 = vadd.f32 %v6160_v37, %v7126_v52 }
 0x57a   :  { %v6162_v1 = vpop.f32.mrf.mxu1 }
 0x57b   :  { %5378 = vst [vmem:[#allocation8 + $0x28] sm:$0xff] %v5370_v30  ;;  %v6163_v41 = vadd.f32 %v6162_v1, %v6161_v32 }
 0x57c   :  { %v6164_v48 = vpop.f32.mrf.mxu1 }
 0x57d   :  { %v5371_v46 = vadd.f32 %v6163_v41, %v7127_v34 }
 0x57e   :  { %v6165_v19 = vpop.f32.mrf.mxu1 }
 0x57f   :  { %5379 = vst [vmem:[#allocation8 + $0x30] sm:$0xff] %v5371_v46  ;;  %v6166_v9 = vadd.f32 %v6165_v19, %v6164_v48 }
 0x581   :  { %v5372_v58 = vadd.f32 %v6166_v9, %v7128_v38 }
 0x583   :  { %5380 = vst [vmem:[#allocation8 + $0x38] sm:$0xff] %v5372_v58 }
 0x584   :  { %6312 = shalt.err (!%p6309_p5)
}
 0x585   :  { %s6335_s4 = smov 128   ;;  %s6336_s5 = smov 8  }
 0x586   :  { %5392 = dma.vmem_to_hbm [thread:$0]  %s5387_s2, 1024, %s6999_s3, [#allocation4], %s6335_s4, %s6335_s4, %s6336_s5  }
 0x587   :  { %6325 = dma.done.wait [#allocation4], 1024  }
 0x588   :  { %6326 = vsyncadd [#allocation4], 4294966272 }
 0x589   :  { %5396 = vsyncpa [#allocation3], 1 }
 0x58a   :  { %5397 = vsyncpa [#allocation6], 1 }
 0x58b   :  { %5398 = vsyncpa [#allocation4], 1 }

// kernel: tpu_custom_call.1
= control target key start
LH: loop header
LB: loop body
LE: loop exit
PB: predicated region body
PF: predicated region fallthrough
CT: control target
= control target key end

     0   :  { %8 = vsyncpa [#allocation3], 0  ;;  %s6996_s0 = inlined_call_operand.hbm [shape: bf16[64,1024], index: 0, kind: input, shape index: {}]   ;;  %s6997_s1 = inlined_call_operand.hbm [shape: bf16[1024,1024], index: 1, kind: input, shape index: {}]   ;;  %s6998_s2 = inlined_call_operand.hbm [shape: bf16[1024,128], index: 2, kind: input, shape index: {}]   ;;  %s6999_s3 = inlined_call_operand.hbm [shape: f32[64,128], index: 3, kind: output, shape index: {}]  }
   0x1   :  { %9 = vsyncpa [#allocation6], 0 }
   0x2   :  { %10 = vsyncpa [#allocation4], 0  ;;  %s6327_s12 = smov [#allocation5]   ;;  %s6328_s14 = smov [#allocation2]  }
   0x3   :  { %s28_s13 = sshll.u32 %s6327_s12, 4  ;;  %s16_s15 = sshll.u32 %s6328_s14, 4  ;;  %s29_s13 = int_to_ptr.vmem [resolvable:$true] %s28_s13  ;;  %s17_s15 = int_to_ptr.vmem [resolvable:$true] %s16_s15 }
   0x4   :  { %s6249_s16 = scalar_lea.vmem %s29_s13, 65536  ;;  %p6254_p1 = scmp.lt.s32.totalorder %s29_s13, %s29_s13 }
   0x5   :  { %p6250_p0 = scmp.ne.s32.totalorder %s29_s13, %s6249_s16  ;;  %p6255_p2 = scmp.lt.s32.totalorder %s6249_s16, %s6249_s16 }
   0x7   :  { %p6256_p3 = por %p6255_p2, %p6254_p1 }
   0x9   :  { %p6257_p4 = pnand %p6256_p3, %p6250_p0 }
   0xb   :  { %6260 = shalt.err (!%p6257_p4)
}
   0xc   :  { %s6329_s17 = smov 512   ;;  %s6330_s18 = smov 32  }
   0xd   :  { %34 = dma.hbm_to_vmem [thread:$0]  %s6997_s1, 65536, %s29_s13, [#allocation6], %s6329_s17, %s6329_s17, %s6330_s18  }
   0xe   :  { %s6269_s21 = scalar_lea.vmem %s17_s15, 4096  ;;  %p6274_p6 = scmp.lt.s32.totalorder %s17_s15, %s17_s15 }
   0xf   :  { %p6270_p5 = scmp.ne.s32.totalorder %s17_s15, %s6269_s21  ;;  %p6275_p7 = scmp.lt.s32.totalorder %s6269_s21, %s6269_s21 }
  0x11   :  { %p6276_p8 = por %p6275_p7, %p6274_p6 }
  0x13   :  { %p6277_p9 = pnand %p6276_p8, %p6270_p5 }
  0x15   :  { %6280 = shalt.err (!%p6277_p9)
}
  0x16   :  { %22 = dma.hbm_to_vmem [thread:$0]  %s6996_s0, 4096, %s17_s15, [#allocation3], %s6329_s17, %s6329_s17, %s6330_s18  }
  0x17   :  { %s6331_s24 = smov [#allocation7]  }
  0x18   :  { %s40_s25 = sshll.u32 %s6331_s24, 4  ;;  %s41_s25 = int_to_ptr.vmem [resolvable:$true] %s40_s25 }
  0x19   :  { %s6289_s26 = scalar_lea.vmem %s41_s25, 8192  ;;  %p6294_p11 = scmp.lt.s32.totalorder %s41_s25, %s41_s25 }
  0x1a   :  { %p6290_p10 = scmp.ne.s32.totalorder %s41_s25, %s6289_s26  ;;  %p6295_p12 = scmp.lt.s32.totalorder %s6289_s26, %s6289_s26 }
  0x1c   :  { %p6296_p13 = por %p6295_p12, %p6294_p11 }
  0x1e   :  { %p6297_p0 = pnand %p6296_p13, %p6290_p10 }
  0x20   :  { %6300 = shalt.err (!%p6297_p0)
}
  0x21   :  { %s6332_s1 = smov 64   ;;  %s6333_s27 = smov 4  }
  0x22   :  { %46 = dma.hbm_to_vmem [thread:$0]  %s6998_s2, 8192, %s41_s25, [#allocation6], %s6332_s1, %s6332_s1, %s6333_s27  }
  0x23   :  { %6321 = dma.done.wait [#allocation3], 4096  }
  0x24   :  { %6322 = vsyncadd [#allocation3], 4294963200 }
  0x25   :  { %6323 = dma.done.wait [#allocation6], 73728  }
  0x26   :  { %6324 = vsyncadd [#allocation6], 4294893568  ;;  %v103_v0 = vld [vmem:[#allocation5 + $0x1c0] sm:$0xff]  ;;  %v6374_v59 = vld [vmem:[#allocation2 + $0x8] sm:$0xff]  ;;  %s6334_s0 = smov [#allocation8]  }
  0x27   :  { %v104_v1 = vld [vmem:[#allocation5 + $0x1e0] sm:$0xff]  ;;  %v6376_v60 = vld [vmem:[#allocation2 + $0x28] sm:$0xff]  ;;  %s5386_s2 = sshll.u32 %s6334_s0, 4  ;;  %s5387_s2 = int_to_ptr.vmem [resolvable:$true] %s5386_s2 }
  0x28   :  { %v135_v2 = vld [vmem:[#allocation5 + $0x5c0] sm:$0xff]  ;;  %v5446_v3 = vcombine.high %v103_v0, %v104_v1  ;;  %v5445_v5 = vcombine.low %v103_v0, %v104_v1  ;;  %v6380_v63 = vcombine.high %v6374_v59, %v6376_v60  ;;  %s6301_s30 = scalar_lea.vmem %s5387_s2, 1024  ;;  %p6306_p2 = scmp.lt.s32.totalorder %s5387_s2, %s5387_s2 }
  0x29   :  { %v136_v4 = vld [vmem:[#allocation5 + $0x5e0] sm:$0xff]  ;;  %p6302_p1 = scmp.ne.s32.totalorder %s5387_s2, %s6301_s30  ;;  %p6307_p3 = scmp.lt.s32.totalorder %s6301_s30, %s6301_s30 }
  0x2a   :  { %v101_v6 = vld [vmem:[#allocation5 + $0x180] sm:$0xff]  ;;  %v5478_v8 = vcombine.high %v135_v2, %v136_v4  ;;  %v5477_v9 = vcombine.low %v135_v2, %v136_v4  ;;  %1017 = vmatprep.subr.bf16.mxu0 %v5446_v3  ;;  %1122 = vmatprep.mubr.bf16.mxu1 %v6380_v63 }
  0x2b   :  { %v102_v7 = vld [vmem:[#allocation5 + $0x1a0] sm:$0xff]  ;;  %1018 = vmatpush1.bf16.msra.mxu0 %v5445_v5  ;;  %p6308_p4 = por %p6307_p3, %p6306_p2 }
  0x2c   :  { %v5444_v10 = vcombine.high %v101_v6, %v102_v7  ;;  %v133_v11 = vld [vmem:[#allocation5 + $0x580] sm:$0xff]  ;;  %1090 = vmatprep.subr.bf16.mxu1 %v5478_v8  ;;  %v5443_v18 = vcombine.low %v101_v6, %v102_v7 }
  0x2d   :  { %v134_v12 = vld [vmem:[#allocation5 + $0x5a0] sm:$0xff]  ;;  %1091 = vmatpush1.bf16.msra.mxu1 %v5477_v9  ;;  %p6309_p5 = pnand %p6308_p4, %p6302_p1 }
  0x2e   :  { %v99_v13 = vld [vmem:[#allocation5 + $0x140] sm:$0xff]  ;;  %v5476_v14 = vcombine.high %v133_v11, %v134_v12  ;;  %1019 = vmatprep.subr.bf16.mxu0 %v5444_v10  ;;  %v5475_v19 = vcombine.low %v133_v11, %v134_v12 }
  0x2f   :  { %v100_v15 = vld [vmem:[#allocation5 + $0x160] sm:$0xff]  ;;  %1020 = vmatpush1.bf16.msra.mxu0 %v5443_v18 }
  0x30   :  { %v131_v16 = vld [vmem:[#allocation5 + $0x540] sm:$0xff]  ;;  %v5442_v20 = vcombine.high %v99_v13, %v100_v15  ;;  %1092 = vmatprep.subr.bf16.mxu1 %v5476_v14  ;;  %v5441_v26 = vcombine.low %v99_v13, %v100_v15 }
  0x31   :  { %v132_v17 = vld [vmem:[#allocation5 + $0x560] sm:$0xff]  ;;  %1093 = vmatpush1.bf16.msra.mxu1 %v5475_v19 }
  0x32   :  { %v5474_v21 = vcombine.high %v131_v16, %v132_v17  ;;  %v97_v22 = vld [vmem:[#allocation5 + $0x100] sm:$0xff]  ;;  %1021 = vmatprep.subr.bf16.mxu0 %v5442_v20  ;;  %v5473_v27 = vcombine.low %v131_v16, %v132_v17 }
  0x33   :  { %v98_v23 = vld [vmem:[#allocation5 + $0x120] sm:$0xff]  ;;  %1022 = vmatpush1.bf16.msra.mxu0 %v5441_v26 }
  0x34   :  { %v129_v24 = vld [vmem:[#allocation5 + $0x500] sm:$0xff]  ;;  %v5440_v28 = vcombine.high %v97_v22, %v98_v23  ;;  %1094 = vmatprep.subr.bf16.mxu1 %v5474_v21  ;;  %v5439_v34 = vcombine.low %v97_v22, %v98_v23 }
  0x35   :  { %v130_v25 = vld [vmem:[#allocation5 + $0x520] sm:$0xff]  ;;  %1095 = vmatpush1.bf16.msra.mxu1 %v5473_v27 }
  0x36   :  { %v5472_v29 = vcombine.high %v129_v24, %v130_v25  ;;  %v95_v30 = vld [vmem:[#allocation5 + $0xc0] sm:$0xff]  ;;  %1023 = vmatprep.subr.bf16.mxu0 %v5440_v28  ;;  %v5471_v35 = vcombine.low %v129_v24, %v130_v25 }
  0x37   :  { %v96_v31 = vld [vmem:[#allocation5 + $0xe0] sm:$0xff]  ;;  %1024 = vmatpush1.bf16.msra.mxu0 %v5439_v34 }
  0x38   :  { %v127_v32 = vld [vmem:[#allocation5 + $0x4c0] sm:$0xff]  ;;  %v5438_v36 = vcombine.high %v95_v30, %v96_v31  ;;  %1096 = vmatprep.subr.bf16.mxu1 %v5472_v29  ;;  %v5437_v42 = vcombine.low %v95_v30, %v96_v31 }
  0x39   :  { %v128_v33 = vld [vmem:[#allocation5 + $0x4e0] sm:$0xff]  ;;  %1097 = vmatpush1.bf16.msra.mxu1 %v5471_v35 }
  0x3a   :  { %v5470_v37 = vcombine.high %v127_v32, %v128_v33  ;;  %v93_v38 = vld [vmem:[#allocation5 + $0x80] sm:$0xff]  ;;  %1025 = vmatprep.subr.bf16.mxu0 %v5438_v36  ;;  %v5469_v43 = vcombine.low %v127_v32, %v128_v33 }
  0x3b   :  { %v94_v39 = vld [vmem:[#allocation5 + $0xa0] sm:$0xff]  ;;  %1026 = vmatpush1.bf16.msra.mxu0 %v5437_v42 }
  0x3c   :  { %v125_v40 = vld [vmem:[#allocation5 + $0x480] sm:$0xff]  ;;  %v5436_v44 = vcombine.high %v93_v38, %v94_v39  ;;  %1098 = vmatprep.subr.bf16.mxu1 %v5470_v37  ;;  %v5435_v50 = vcombine.low %v93_v38, %v94_v39 }
  0x3d   :  { %v126_v41 = vld [vmem:[#allocation5 + $0x4a0] sm:$0xff]  ;;  %1099 = vmatpush1.bf16.msra.mxu1 %v5469_v43 }
  0x3e   :  { %v5468_v45 = vcombine.high %v125_v40, %v126_v41  ;;  %v91_v46 = vld [vmem:[#allocation5 + $0x40] sm:$0xff]  ;;  %1027 = vmatprep.subr.bf16.mxu0 %v5436_v44  ;;  %v5467_v51 = vcombine.low %v125_v40, %v126_v41 }
  0x3f   :  { %v92_v47 = vld [vmem:[#allocation5 + $0x60] sm:$0xff]  ;;  %1028 = vmatpush1.bf16.msra.mxu0 %v5435_v50 }
  0x40   :  { %v123_v48 = vld [vmem:[#allocation5 + $0x440] sm:$0xff]  ;;  %v5434_v52 = vcombine.high %v91_v46, %v92_v47  ;;  %1100 = vmatprep.subr.bf16.mxu1 %v5468_v45  ;;  %v5433_v0 = vcombine.low %v91_v46, %v92_v47 }
  0x41   :  { %v124_v49 = vld [vmem:[#allocation5 + $0x460] sm:$0xff]  ;;  %1101 = vmatpush1.bf16.msra.mxu1 %v5467_v51 }
  0x42   :  { %v89_v53 = vld [vmem:[#allocation5] sm:$0xff]  ;;  %v5466_v56 = vcombine.high %v123_v48, %v124_v49  ;;  %1029 = vmatprep.subr.bf16.mxu0 %v5434_v52  ;;  %v5465_v1 = vcombine.low %v123_v48, %v124_v49 }
  0x43   :  { %v6366_v54 = vld [vmem:[#allocation2] sm:$0xff]  ;;  %1030 = vmatpush1.bf16.msra.mxu0 %v5433_v0 }
  0x44   :  { %v6368_v55 = vld [vmem:[#allocation2 + $0x20] sm:$0xff]  ;;  %1102 = vmatprep.subr.bf16.mxu1 %v5466_v56 }
  0x45   :  { %v90_v57 = vld [vmem:[#allocation5 + $0x20] sm:$0xff]  ;;  %v6372_v58 = vcombine.high %v6366_v54, %v6368_v55  ;;  %1103 = vmatpush1.bf16.msra.mxu1 %v5465_v1 }
  0x46   :  { %v121_v61 = vld [vmem:[#allocation5 + $0x400] sm:$0xff]  ;;  %v5432_v2 = vcombine.high %v89_v53, %v90_v57  ;;  %v5431_v8 = vcombine.low %v89_v53, %v90_v57 }
  0x47   :  { %7045 = vst [vmem:[#allocation12_spill] sm:$0xff] %v6372_v58  ;;  %v122_v62 = vld [vmem:[#allocation5 + $0x420] sm:$0xff]  ;;  %1049 = vmatprep.mubr.bf16.mxu0 %v6372_v58 }
  0x48   :  { %v5464_v3 = vcombine.high %v121_v61, %v122_v62  ;;  %v119_v4 = vld [vmem:[#allocation5 + $0x3c0] sm:$0xff]  ;;  %1031 = vmatprep.subr.bf16.mxu0 %v5432_v2  ;;  %v5463_v9 = vcombine.low %v121_v61, %v122_v62 }
  0x49   :  { %v120_v5 = vld [vmem:[#allocation5 + $0x3e0] sm:$0xff]  ;;  %1032 = vmatpush1.bf16.msra.mxu0 %v5431_v8 }
  0x4a   :  { %v151_v6 = vld [vmem:[#allocation5 + $0x7c0] sm:$0xff]  ;;  %v5462_v10 = vcombine.high %v119_v4, %v120_v5  ;;  %1104 = vmatprep.subr.bf16.mxu1 %v5464_v3  ;;  %v5461_v16 = vcombine.low %v119_v4, %v120_v5 }
  0x4b   :  { %v152_v7 = vld [vmem:[#allocation5 + $0x7e0] sm:$0xff]  ;;  %1105 = vmatpush1.bf16.msra.mxu1 %v5463_v9 }
  0x4c   :  { %v5494_v11 = vcombine.high %v151_v6, %v152_v7  ;;  %v117_v12 = vld [vmem:[#allocation5 + $0x380] sm:$0xff]  ;;  %1033 = vmatprep.subr.bf16.mxu0 %v5462_v10  ;;  %v5493_v17 = vcombine.low %v151_v6, %v152_v7 }
  0x4d   :  { %v118_v13 = vld [vmem:[#allocation5 + $0x3a0] sm:$0xff]  ;;  %1034 = vmatpush2.bf16.msra.mxu0 %v5461_v16 }
  0x4e   :  { %v149_v14 = vld [vmem:[#allocation5 + $0x780] sm:$0xff]  ;;  %v5460_v18 = vcombine.high %v117_v12, %v118_v13  ;;  %1106 = vmatprep.subr.bf16.mxu1 %v5494_v11  ;;  %v5459_v24 = vcombine.low %v117_v12, %v118_v13 }
  0x4f   :  { %v150_v15 = vld [vmem:[#allocation5 + $0x7a0] sm:$0xff]  ;;  %1107 = vmatpush2.bf16.msra.mxu1 %v5493_v17 }
  0x50   :  { %v5492_v19 = vcombine.high %v149_v14, %v150_v15  ;;  %v115_v20 = vld [vmem:[#allocation5 + $0x340] sm:$0xff]  ;;  %1035 = vmatprep.subr.bf16.mxu0 %v5460_v18  ;;  %v5491_v25 = vcombine.low %v149_v14, %v150_v15 }
  0x51   :  { %v116_v21 = vld [vmem:[#allocation5 + $0x360] sm:$0xff]  ;;  %1036 = vmatpush2.bf16.msra.mxu0 %v5459_v24 }
  0x52   :  { %v147_v22 = vld [vmem:[#allocation5 + $0x740] sm:$0xff]  ;;  %v5458_v26 = vcombine.high %v115_v20, %v116_v21  ;;  %1108 = vmatprep.subr.bf16.mxu1 %v5492_v19  ;;  %v5457_v32 = vcombine.low %v115_v20, %v116_v21  ;;  %v6386_v21 = vcombine.low %v6366_v54, %v6368_v55 }
  0x53   :  { %v148_v23 = vld [vmem:[#allocation5 + $0x760] sm:$0xff]  ;;  %1109 = vmatpush2.bf16.msra.mxu1 %v5491_v25  ;;  %v6390_v25 = vcombine.low %v6374_v59, %v6376_v60 }
  0x54   :  { %v5490_v27 = vcombine.high %v147_v22, %v148_v23  ;;  %v113_v28 = vld [vmem:[#allocation5 + $0x300] sm:$0xff]  ;;  %1037 = vmatprep.subr.bf16.mxu0 %v5458_v26  ;;  %v5489_v33 = vcombine.low %v147_v22, %v148_v23  ;;  %7046 = vst [vmem:[#allocation13_spill] sm:$0xff] %v6386_v21 }
  0x55   :  { %v114_v29 = vld [vmem:[#allocation5 + $0x320] sm:$0xff]  ;;  %1038 = vmatpush2.bf16.msra.mxu0 %v5457_v32 }
  0x56   :  { %v145_v30 = vld [vmem:[#allocation5 + $0x700] sm:$0xff]  ;;  %v5456_v34 = vcombine.high %v113_v28, %v114_v29  ;;  %1110 = vmatprep.subr.bf16.mxu1 %v5490_v27  ;;  %v5455_v40 = vcombine.low %v113_v28, %v114_v29  ;;  %v66_v27 = vld [vmem:[#allocation2 + $0x48] sm:$0xff] }
  0x57   :  { %v146_v31 = vld [vmem:[#allocation5 + $0x720] sm:$0xff]  ;;  %1111 = vmatpush2.bf16.msra.mxu1 %v5489_v33  ;;  %v70_v28 = vld [vmem:[#allocation2 + $0x68] sm:$0xff] }
  0x58   :  { %v5488_v35 = vcombine.high %v145_v30, %v146_v31  ;;  %v111_v36 = vld [vmem:[#allocation5 + $0x2c0] sm:$0xff]  ;;  %1039 = vmatprep.subr.bf16.mxu0 %v5456_v34  ;;  %v5487_v41 = vcombine.low %v145_v30, %v146_v31 }
  0x59   :  { %v112_v37 = vld [vmem:[#allocation5 + $0x2e0] sm:$0xff]  ;;  %1040 = vmatpush2.bf16.msra.mxu0 %v5455_v40 }
  0x5a   :  { %v143_v38 = vld [vmem:[#allocation5 + $0x6c0] sm:$0xff]  ;;  %v5454_v42 = vcombine.high %v111_v36, %v112_v37  ;;  %1112 = vmatprep.subr.bf16.mxu1 %v5488_v35  ;;  %v5453_v48 = vcombine.low %v111_v36, %v112_v37  ;;  %v6395_v35 = vcombine.high %v66_v27, %v70_v28 }
  0x5b   :  { %v144_v39 = vld [vmem:[#allocation5 + $0x6e0] sm:$0xff]  ;;  %1113 = vmatpush2.bf16.msra.mxu1 %v5487_v41 }
  0x5c   :  { %v5486_v43 = vcombine.high %v143_v38, %v144_v39  ;;  %v109_v44 = vld [vmem:[#allocation5 + $0x280] sm:$0xff]  ;;  %1041 = vmatprep.subr.bf16.mxu0 %v5454_v42  ;;  %v5485_v49 = vcombine.low %v143_v38, %v144_v39 }
  0x5d   :  { %v110_v45 = vld [vmem:[#allocation5 + $0x2a0] sm:$0xff]  ;;  %1042 = vmatpush2.bf16.msra.mxu0 %v5453_v48  ;;  %v78_v48 = vld [vmem:[#allocation2 + $0xa8] sm:$0xff] }
  0x5e   :  { %v141_v46 = vld [vmem:[#allocation5 + $0x680] sm:$0xff]  ;;  %v5452_v50 = vcombine.high %v109_v44, %v110_v45  ;;  %1114 = vmatprep.subr.bf16.mxu1 %v5486_v43  ;;  %v5451_v61 = vcombine.low %v109_v44, %v110_v45 }
  0x5f   :  { %v142_v47 = vld [vmem:[#allocation5 + $0x6a0] sm:$0xff]  ;;  %1115 = vmatpush2.bf16.msra.mxu1 %v5485_v49 }
  0x60   :  { %v5484_v51 = vcombine.high %v141_v46, %v142_v47  ;;  %v107_v52 = vld [vmem:[#allocation5 + $0x240] sm:$0xff]  ;;  %1043 = vmatprep.subr.bf16.mxu0 %v5452_v50  ;;  %v5483_v62 = vcombine.low %v141_v46, %v142_v47  ;;  %v6402_v46 = vcombine.low %v66_v27, %v70_v28  ;;  %v74_v47 = vld [vmem:[#allocation2 + $0x88] sm:$0xff] }
  0x61   :  { %v108_v53 = vld [vmem:[#allocation5 + $0x260] sm:$0xff]  ;;  %1044 = vmatpush2.bf16.msra.mxu0 %v5451_v61 }
  0x62   :  { %v139_v56 = vld [vmem:[#allocation5 + $0x640] sm:$0xff]  ;;  %v5450_v0 = vcombine.high %v107_v52, %v108_v53  ;;  %1116 = vmatprep.subr.bf16.mxu1 %v5484_v51  ;;  %v5449_v6 = vcombine.low %v107_v52, %v108_v53 }
  0x63   :  { %v140_v57 = vld [vmem:[#allocation5 + $0x660] sm:$0xff]  ;;  %1117 = vmatpush2.bf16.msra.mxu1 %v5483_v62  ;;  %v6407_v62 = vcombine.high %v74_v47, %v78_v48 }
  0x64   :  { %v5482_v1 = vcombine.high %v139_v56, %v140_v57  ;;  %v105_v2 = vld [vmem:[#allocation5 + $0x200] sm:$0xff]  ;;  %1045 = vmatprep.subr.bf16.mxu0 %v5450_v0  ;;  %v5481_v7 = vcombine.low %v139_v56, %v140_v57 }
  0x65   :  { %v106_v3 = vld [vmem:[#allocation5 + $0x220] sm:$0xff]  ;;  %1046 = vmatpush2.bf16.msra.mxu0 %v5449_v6 }
  0x66   :  { %v137_v4 = vld [vmem:[#allocation5 + $0x600] sm:$0xff]  ;;  %v5448_v8 = vcombine.high %v105_v2, %v106_v3  ;;  %1118 = vmatprep.subr.bf16.mxu1 %v5482_v1  ;;  %v5447_v14 = vcombine.low %v105_v2, %v106_v3 }
  0x67   :  { %v138_v5 = vld [vmem:[#allocation5 + $0x620] sm:$0xff]  ;;  %1119 = vmatpush2.bf16.msra.mxu1 %v5481_v7 }
  0x68   :  { %v5480_v9 = vcombine.high %v137_v4, %v138_v5  ;;  %v167_v10 = vld [vmem:[#allocation5 + $0x9c0] sm:$0xff]  ;;  %1047 = vmatprep.subr.bf16.mxu0 %v5448_v8  ;;  %v5479_v15 = vcombine.low %v137_v4, %v138_v5 }
  0x69   :  { %v168_v11 = vld [vmem:[#allocation5 + $0x9e0] sm:$0xff]  ;;  %1048 = vmatpush2.bf16.msra.mxu0 %v5447_v14  ;;  %v6414_v14 = vcombine.low %v74_v47, %v78_v48 }
  0x6a   :  { %v199_v12 = vld [vmem:[#allocation5 + $0xdc0] sm:$0xff]  ;;  %v5510_v16 = vcombine.high %v167_v10, %v168_v11  ;;  %1120 = vmatprep.subr.bf16.mxu1 %v5480_v9  ;;  %v5509_v26 = vcombine.low %v167_v10, %v168_v11  ;;  %v82_v11 = vld [vmem:[#allocation2 + $0xc8] sm:$0xff] }
  0x6b   :  { %v200_v13 = vld [vmem:[#allocation5 + $0xde0] sm:$0xff]  ;;  %1121 = vmatpush2.bf16.msra.mxu1 %v5479_v15  ;;  %7051 = vst [vmem:[#allocation18_spill] sm:$0xff] %v6414_v14 }
  0x6c   :  { %v5542_v17 = vcombine.high %v199_v12, %v200_v13  ;;  %v165_v18 = vld [vmem:[#allocation5 + $0x980] sm:$0xff]  ;;  %1163 = vmatprep.subr.bf16.mxu0 %v5510_v16  ;;  %v5541_v29 = vcombine.low %v199_v12, %v200_v13  ;;  %1050 = vmatmul.mubr.bf16.vlgmr.msra.gmra.mxu0 %v6386_v21  ;;  %v86_v12 = vld [vmem:[#allocation2 + $0xe8] sm:$0xff] }
  0x6d   :  { %v166_v19 = vld [vmem:[#allocation5 + $0x9a0] sm:$0xff]  ;;  %1164 = vmatpush1.bf16.msra.mxu0 %v5509_v26 }
  0x6e   :  { %v197_v20 = vld [vmem:[#allocation5 + $0xd80] sm:$0xff]  ;;  %v5508_v30 = vcombine.high %v165_v18, %v166_v19  ;;  %1236 = vmatprep.subr.bf16.mxu1 %v5542_v17  ;;  %1123 = vmatmul.mubr.bf16.vlgmr.msra.gmra.mxu1 %v6390_v25  ;;  %v5507_v59 = vcombine.low %v165_v18, %v166_v19 }
  0x6f   :  { %v198_v22 = vld [vmem:[#allocation5 + $0xda0] sm:$0xff]  ;;  %1237 = vmatpush1.bf16.msra.mxu1 %v5541_v29  ;;  %1132 = vmatprep.mubr.bf16.mxu1 %v6395_v35 }
  0x70   :  { %v65_v23 = vld [vmem:[#allocation2 + $0x40] sm:$0xff]  ;;  %v5540_v31 = vcombine.high %v197_v20, %v198_v22  ;;  %1165 = vmatprep.subr.bf16.mxu0 %v5508_v30  ;;  %v5539_v60 = vcombine.low %v197_v20, %v198_v22 }
  0x71   :  { %v69_v24 = vld [vmem:[#allocation2 + $0x60] sm:$0xff]  ;;  %1166 = vmatpush1.bf16.msra.mxu0 %v5507_v59  ;;  %v6427_v59 = vld [vmem:[#allocation2 + $0x18] sm:$0xff] }
  0x72   :  { %v163_v32 = vld [vmem:[#allocation5 + $0x940] sm:$0xff]  ;;  %v6392_v55 = vcombine.high %v65_v23, %v69_v24  ;;  %1238 = vmatprep.subr.bf16.mxu1 %v5540_v31  ;;  %v6400_v42 = vcombine.low %v65_v23, %v69_v24  ;;  %v6419_v24 = vcombine.high %v82_v11, %v86_v12 }
  0x73   :  { %v164_v54 = vld [vmem:[#allocation5 + $0x960] sm:$0xff]  ;;  %1239 = vmatpush1.bf16.msra.mxu1 %v5539_v60  ;;  %v6429_v60 = vld [vmem:[#allocation2 + $0x38] sm:$0xff] }
  0x74   :  { %7047 = vst [vmem:[#allocation14_spill] sm:$0xff] %v6392_v55  ;;  %v195_v33 = vld [vmem:[#allocation5 + $0xd40] sm:$0xff]  ;;  %v5506_v36 = vcombine.high %v163_v32, %v164_v54  ;;  %1059 = vmatprep.mubr.bf16.mxu0 %v6392_v55  ;;  %7048 = vst [vmem:[#allocation15_spill] sm:$0xff] %v6400_v42  ;;  %v5505_v45 = vcombine.low %v163_v32, %v164_v54  ;;  %v6422_v54 = vld [vmem:[#allocation2 + $0x10] sm:$0xff] }
  0x75   :  { %v196_v34 = vld [vmem:[#allocation5 + $0xd60] sm:$0xff]  ;;  %1060 = vmatmul.mubr.bf16.gmra.mxu0 %v6400_v42  ;;  %7053 = vst [vmem:[#allocation20_spill] sm:$0xff] %v6419_v24 }
  0x76   :  { %v5538_v37 = vcombine.high %v195_v33, %v196_v34  ;;  %v161_v38 = vld [vmem:[#allocation5 + $0x900] sm:$0xff]  ;;  %1167 = vmatprep.subr.bf16.mxu0 %v5506_v36  ;;  %v5537_v49 = vcombine.low %v195_v33, %v196_v34  ;;  %1133 = vmatmul.mubr.bf16.gmra.mxu1 %v6402_v46  ;;  %v6424_v33 = vld [vmem:[#allocation2 + $0x30] sm:$0xff] }
  0x77   :  { %v162_v39 = vld [vmem:[#allocation5 + $0x920] sm:$0xff]  ;;  %1168 = vmatpush1.bf16.msra.mxu0 %v5505_v45  ;;  %1142 = vmatprep.mubr.bf16.mxu1 %v6407_v62  ;;  %v6438_v48 = vcombine.high %v6422_v54, %v6424_v33 }
  0x78   :  { %v193_v40 = vld [vmem:[#allocation5 + $0xd00] sm:$0xff]  ;;  %v5504_v50 = vcombine.high %v161_v38, %v162_v39  ;;  %1240 = vmatprep.subr.bf16.mxu1 %v5538_v37  ;;  %v5503_v0 = vcombine.low %v161_v38, %v162_v39  ;;  %v6434_v38 = vcombine.low %v82_v11, %v86_v12 }
  0x79   :  { %v194_v41 = vld [vmem:[#allocation5 + $0xd20] sm:$0xff]  ;;  %1241 = vmatpush1.bf16.msra.mxu1 %v5537_v49  ;;  %7056 = vst [vmem:[#allocation23_spill] sm:$0xff] %v6438_v48  ;;  %v6443_v49 = vcombine.high %v6427_v59, %v6429_v60 }
  0x7a   :  { %v73_v43 = vld [vmem:[#allocation2 + $0x80] sm:$0xff]  ;;  %v5536_v51 = vcombine.high %v193_v40, %v194_v41  ;;  %1169 = vmatprep.subr.bf16.mxu0 %v5504_v50  ;;  %v5535_v1 = vcombine.low %v193_v40, %v194_v41  ;;  %7055 = vst [vmem:[#allocation22_spill] sm:$0xff] %v6434_v38 }
  0x7b   :  { %v77_v44 = vld [vmem:[#allocation2 + $0xa0] sm:$0xff]  ;;  %1170 = vmatpush1.bf16.msra.mxu0 %v5503_v0  ;;  %7057 = vst [vmem:[#allocation24_spill] sm:$0xff] %v6443_v49 }
  0x7c   :  { %v159_v52 = vld [vmem:[#allocation5 + $0x8c0] sm:$0xff]  ;;  %v6404_v56 = vcombine.high %v73_v43, %v77_v44  ;;  %1242 = vmatprep.subr.bf16.mxu1 %v5536_v51  ;;  %v6412_v9 = vcombine.low %v73_v43, %v77_v44 }
  0x7d   :  { %v160_v53 = vld [vmem:[#allocation5 + $0x8e0] sm:$0xff]  ;;  %1243 = vmatpush1.bf16.msra.mxu1 %v5535_v1 }
  0x7e   :  { %7049 = vst [vmem:[#allocation16_spill] sm:$0xff] %v6404_v56  ;;  %v191_v57 = vld [vmem:[#allocation5 + $0xcc0] sm:$0xff]  ;;  %v5502_v2 = vcombine.high %v159_v52, %v160_v53  ;;  %1069 = vmatprep.mubr.bf16.mxu0 %v6404_v56  ;;  %7050 = vst [vmem:[#allocation17_spill] sm:$0xff] %v6412_v9  ;;  %v5501_v13 = vcombine.low %v159_v52, %v160_v53  ;;  %1143 = vmatmul.mubr.bf16.gmra.mxu1 %v6414_v14 }
  0x7f   :  { %v192_v61 = vld [vmem:[#allocation5 + $0xce0] sm:$0xff]  ;;  %1070 = vmatmul.mubr.bf16.gmra.mxu0 %v6412_v9  ;;  %1152 = vmatprep.mubr.bf16.mxu1 %v6419_v24 }
  0x80   :  { %v157_v3 = vld [vmem:[#allocation5 + $0x880] sm:$0xff]  ;;  %v5534_v5 = vcombine.high %v191_v57, %v192_v61  ;;  %1171 = vmatprep.subr.bf16.mxu0 %v5502_v2  ;;  %v5533_v15 = vcombine.low %v191_v57, %v192_v61 }
  0x81   :  { %v158_v4 = vld [vmem:[#allocation5 + $0x8a0] sm:$0xff]  ;;  %1172 = vmatpush1.bf16.msra.mxu0 %v5501_v13 }
  0x82   :  { %v189_v6 = vld [vmem:[#allocation5 + $0xc80] sm:$0xff]  ;;  %v5500_v16 = vcombine.high %v157_v3, %v158_v4  ;;  %1244 = vmatprep.subr.bf16.mxu1 %v5534_v5  ;;  %v5499_v26 = vcombine.low %v157_v3, %v158_v4 }
  0x83   :  { %v190_v7 = vld [vmem:[#allocation5 + $0xca0] sm:$0xff]  ;;  %1245 = vmatpush1.bf16.msra.mxu1 %v5533_v15 }
  0x84   :  { %v81_v8 = vld [vmem:[#allocation2 + $0xc0] sm:$0xff]  ;;  %v5532_v20 = vcombine.high %v189_v6, %v190_v7  ;;  %1173 = vmatprep.subr.bf16.mxu0 %v5500_v16  ;;  %v5531_v29 = vcombine.low %v189_v6, %v190_v7 }
  0x85   :  { %v85_v10 = vld [vmem:[#allocation2 + $0xe0] sm:$0xff]  ;;  %1174 = vmatpush1.bf16.msra.mxu0 %v5499_v26 }
  0x86   :  { %v155_v17 = vld [vmem:[#allocation5 + $0x840] sm:$0xff]  ;;  %v6416_v23 = vcombine.high %v81_v8, %v85_v10  ;;  %1246 = vmatprep.subr.bf16.mxu1 %v5532_v20  ;;  %v6432_v36 = vcombine.low %v81_v8, %v85_v10  ;;  %1153 = vmatmul.mubr.bf16.gmra.mxu1 %v6434_v38 }
  0x87   :  { %v156_v18 = vld [vmem:[#allocation5 + $0x860] sm:$0xff]  ;;  %1247 = vmatpush1.bf16.msra.mxu1 %v5531_v29  ;;  %1268 = vmatprep.mubr.bf16.mxu1 %v6443_v49 }
  0x88   :  { %v187_v19 = vld [vmem:[#allocation5 + $0xc40] sm:$0xff]  ;;  %7052 = vst [vmem:[#allocation19_spill] sm:$0xff] %v6416_v23  ;;  %v5498_v30 = vcombine.high %v155_v17, %v156_v18  ;;  %1079 = vmatprep.mubr.bf16.mxu0 %v6416_v23  ;;  %7054 = vst [vmem:[#allocation21_spill] sm:$0xff] %v6432_v36  ;;  %v5497_v37 = vcombine.low %v155_v17, %v156_v18 }
  0x89   :  { %v188_v22 = vld [vmem:[#allocation5 + $0xc60] sm:$0xff]  ;;  %1080 = vmatmul.mubr.bf16.gmra.mxu0 %v6432_v36 }
  0x8a   :  { %v153_v27 = vld [vmem:[#allocation5 + $0x800] sm:$0xff]  ;;  %v5530_v34 = vcombine.high %v187_v19, %v188_v22  ;;  %1175 = vmatprep.subr.bf16.mxu0 %v5498_v30  ;;  %v5529_v39 = vcombine.low %v187_v19, %v188_v22  ;;  %1195 = vmatprep.mubr.bf16.mxu0 %v6438_v48 }
  0x8b   :  { %v154_v28 = vld [vmem:[#allocation5 + $0x820] sm:$0xff]  ;;  %1176 = vmatpush1.bf16.msra.mxu0 %v5497_v37 }
  0x8c   :  { %v185_v31 = vld [vmem:[#allocation5 + $0xc00] sm:$0xff]  ;;  %v5496_v40 = vcombine.high %v153_v27, %v154_v28  ;;  %1248 = vmatprep.subr.bf16.mxu1 %v5530_v34  ;;  %v5495_v50 = vcombine.low %v153_v27, %v154_v28 }
  0x8d   :  { %v186_v32 = vld [vmem:[#allocation5 + $0xc20] sm:$0xff]  ;;  %1249 = vmatpush1.bf16.msra.mxu1 %v5529_v39 }
  0x8e   :  { %v183_v41 = vld [vmem:[#allocation5 + $0xbc0] sm:$0xff]  ;;  %v5528_v45 = vcombine.high %v185_v31, %v186_v32  ;;  %1177 = vmatprep.subr.bf16.mxu0 %v5496_v40  ;;  %v5527_v51 = vcombine.low %v185_v31, %v186_v32 }
  0x8f   :  { %v184_v43 = vld [vmem:[#allocation5 + $0xbe0] sm:$0xff]  ;;  %1178 = vmatpush1.bf16.msra.mxu0 %v5495_v50 }
  0x90   :  { %v215_v44 = vld [vmem:[#allocation5 + $0xfc0] sm:$0xff]  ;;  %v5526_v52 = vcombine.high %v183_v41, %v184_v43  ;;  %1250 = vmatprep.subr.bf16.mxu1 %v5528_v45  ;;  %v5525_v2 = vcombine.low %v183_v41, %v184_v43 }
  0x91   :  { %v216_v47 = vld [vmem:[#allocation5 + $0xfe0] sm:$0xff]  ;;  %1251 = vmatpush1.bf16.msra.mxu1 %v5527_v51 }
  0x92   :  { %v181_v53 = vld [vmem:[#allocation5 + $0xb80] sm:$0xff]  ;;  %v5558_v0 = vcombine.high %v215_v44, %v216_v47  ;;  %1179 = vmatprep.subr.bf16.mxu0 %v5526_v52  ;;  %v5557_v3 = vcombine.low %v215_v44, %v216_v47 }
  0x93   :  { %v182_v57 = vld [vmem:[#allocation5 + $0xba0] sm:$0xff]  ;;  %1180 = vmatpush2.bf16.msra.mxu0 %v5525_v2 }
  0x94   :  { %v213_v61 = vld [vmem:[#allocation5 + $0xf80] sm:$0xff]  ;;  %v5524_v4 = vcombine.high %v181_v53, %v182_v57  ;;  %1252 = vmatprep.subr.bf16.mxu1 %v5558_v0  ;;  %v5523_v11 = vcombine.low %v181_v53, %v182_v57 }
  0x95   :  { %v214_v1 = vld [vmem:[#allocation5 + $0xfa0] sm:$0xff]  ;;  %1253 = vmatpush2.bf16.msra.mxu1 %v5557_v3 }
  0x96   :  { %v179_v5 = vld [vmem:[#allocation5 + $0xb40] sm:$0xff]  ;;  %v5556_v8 = vcombine.high %v213_v61, %v214_v1  ;;  %1181 = vmatprep.subr.bf16.mxu0 %v5524_v4  ;;  %v5555_v12 = vcombine.low %v213_v61, %v214_v1 }
  0x97   :  { %v180_v6 = vld [vmem:[#allocation5 + $0xb60] sm:$0xff]  ;;  %1182 = vmatpush2.bf16.msra.mxu0 %v5523_v11 }
  0x98   :  { %v211_v7 = vld [vmem:[#allocation5 + $0xf40] sm:$0xff]  ;;  %v5522_v13 = vcombine.high %v179_v5, %v180_v6  ;;  %1254 = vmatprep.subr.bf16.mxu1 %v5556_v8  ;;  %v5521_v20 = vcombine.low %v179_v5, %v180_v6 }
  0x99   :  { %v212_v10 = vld [vmem:[#allocation5 + $0xf60] sm:$0xff]  ;;  %1255 = vmatpush2.bf16.msra.mxu1 %v5555_v12  ;;  %v1379_v12 = vld [vmem:[#allocation5 + $0x1c8] sm:$0xff] }
  0x9a   :  { %v177_v15 = vld [vmem:[#allocation5 + $0xb00] sm:$0xff]  ;;  %v5554_v18 = vcombine.high %v211_v7, %v212_v10  ;;  %1183 = vmatprep.subr.bf16.mxu0 %v5522_v13  ;;  %v5553_v22 = vcombine.low %v211_v7, %v212_v10  ;;  %v1380_v13 = vld [vmem:[#allocation5 + $0x1e8] sm:$0xff] }
  0x9b   :  { %v178_v16 = vld [vmem:[#allocation5 + $0xb20] sm:$0xff]  ;;  %1184 = vmatpush2.bf16.msra.mxu0 %v5521_v20  ;;  %v1378_v20 = vld [vmem:[#allocation5 + $0x1a8] sm:$0xff] }
  0x9c   :  { %v209_v17 = vld [vmem:[#allocation5 + $0xf00] sm:$0xff]  ;;  %v5520_v26 = vcombine.high %v177_v15, %v178_v16  ;;  %1256 = vmatprep.subr.bf16.mxu1 %v5554_v18  ;;  %v5519_v32 = vcombine.low %v177_v15, %v178_v16  ;;  %v1411_v15 = vld [vmem:[#allocation5 + $0x5c8] sm:$0xff] }
  0x9d   :  { %v210_v19 = vld [vmem:[#allocation5 + $0xf20] sm:$0xff]  ;;  %1257 = vmatpush2.bf16.msra.mxu1 %v5553_v22 }
  0x9e   :  { %v175_v27 = vld [vmem:[#allocation5 + $0xac0] sm:$0xff]  ;;  %v5552_v30 = vcombine.high %v209_v17, %v210_v19  ;;  %1185 = vmatprep.subr.bf16.mxu0 %v5520_v26  ;;  %v5551_v34 = vcombine.low %v209_v17, %v210_v19  ;;  %v1412_v17 = vld [vmem:[#allocation5 + $0x5e8] sm:$0xff]  ;;  %v5574_v26 = vcombine.high %v1379_v12, %v1380_v13 }
  0x9f   :  { %v176_v28 = vld [vmem:[#allocation5 + $0xae0] sm:$0xff]  ;;  %1186 = vmatpush2.bf16.msra.mxu0 %v5519_v32  ;;  %v1377_v19 = vld [vmem:[#allocation5 + $0x188] sm:$0xff]  ;;  %v68_v32 = vld [vmem:[#allocation2 + $0x58] sm:$0xff] }
  0xa0   :  { %v207_v29 = vld [vmem:[#allocation5 + $0xec0] sm:$0xff]  ;;  %v5518_v37 = vcombine.high %v175_v27, %v176_v28  ;;  %1258 = vmatprep.subr.bf16.mxu1 %v5552_v30  ;;  %v5517_v45 = vcombine.low %v175_v27, %v176_v28  ;;  %v1409_v27 = vld [vmem:[#allocation5 + $0x588] sm:$0xff]  ;;  %v71_v30 = vld [vmem:[#allocation2 + $0x70] sm:$0xff] }
  0xa1   :  { %v208_v31 = vld [vmem:[#allocation5 + $0xee0] sm:$0xff]  ;;  %1259 = vmatpush2.bf16.msra.mxu1 %v5551_v34  ;;  %v1410_v28 = vld [vmem:[#allocation5 + $0x5a8] sm:$0xff]  ;;  %v72_v34 = vld [vmem:[#allocation2 + $0x78] sm:$0xff] }
  0xa2   :  { %v173_v39 = vld [vmem:[#allocation5 + $0xa80] sm:$0xff]  ;;  %v5550_v43 = vcombine.high %v207_v29, %v208_v31  ;;  %1187 = vmatprep.subr.bf16.mxu0 %v5518_v37  ;;  %v5549_v47 = vcombine.low %v207_v29, %v208_v31  ;;  %v67_v29 = vld [vmem:[#allocation2 + $0x50] sm:$0xff]  ;;  %v5606_v31 = vcombine.high %v1411_v15, %v1412_v17  ;;  %v6450_v37 = vcombine.low %v6422_v54, %v6424_v33 }
  0xa3   :  { %v174_v40 = vld [vmem:[#allocation5 + $0xaa0] sm:$0xff]  ;;  %1188 = vmatpush2.bf16.msra.mxu0 %v5517_v45  ;;  %v5572_v45 = vcombine.high %v1377_v19, %v1378_v20  ;;  %v6459_v54 = vcombine.high %v68_v32, %v72_v34  ;;  %v5571_v33 = vcombine.low %v1377_v19, %v1378_v20 }
  0xa4   :  { %v205_v41 = vld [vmem:[#allocation5 + $0xe80] sm:$0xff]  ;;  %v5516_v50 = vcombine.high %v173_v39, %v174_v40  ;;  %1260 = vmatprep.subr.bf16.mxu1 %v5550_v43  ;;  %v5515_v0 = vcombine.low %v173_v39, %v174_v40  ;;  %7058 = vst [vmem:[#allocation25_spill] sm:$0xff] %v6450_v37  ;;  %v6454_v39 = vcombine.low %v6427_v59, %v6429_v60  ;;  %v1376_v43 = vld [vmem:[#allocation5 + $0x168] sm:$0xff] }
  0xa5   :  { %v206_v44 = vld [vmem:[#allocation5 + $0xea0] sm:$0xff]  ;;  %1261 = vmatpush2.bf16.msra.mxu1 %v5549_v47  ;;  %v5573_v40 = vcombine.low %v1379_v12, %v1380_v13  ;;  %v1407_v47 = vld [vmem:[#allocation5 + $0x548] sm:$0xff]  ;;  %7061 = vst [vmem:[#allocation28_spill] sm:$0xff] %v6459_v54 }
  0xa6   :  { %v171_v51 = vld [vmem:[#allocation5 + $0xa40] sm:$0xff]  ;;  %v5548_v57 = vcombine.high %v205_v41, %v206_v44  ;;  %1189 = vmatprep.subr.bf16.mxu0 %v5516_v50  ;;  %v5547_v1 = vcombine.low %v205_v41, %v206_v44  ;;  %7059 = vst [vmem:[#allocation26_spill] sm:$0xff] %v6454_v39  ;;  %v1375_v41 = vld [vmem:[#allocation5 + $0x148] sm:$0xff]  ;;  %v5605_v44 = vcombine.low %v1411_v15, %v1412_v17 }
  0xa7   :  { %v172_v52 = vld [vmem:[#allocation5 + $0xa60] sm:$0xff]  ;;  %1190 = vmatpush2.bf16.msra.mxu0 %v5515_v0  ;;  %v1408_v50 = vld [vmem:[#allocation5 + $0x568] sm:$0xff] }
  0xa8   :  { %v203_v53 = vld [vmem:[#allocation5 + $0xe40] sm:$0xff]  ;;  %v5514_v2 = vcombine.high %v171_v51, %v172_v52  ;;  %1262 = vmatprep.subr.bf16.mxu1 %v5548_v57  ;;  %v5513_v8 = vcombine.low %v171_v51, %v172_v52  ;;  %v5604_v51 = vcombine.high %v1409_v27, %v1410_v28  ;;  %v6456_v52 = vcombine.high %v67_v29, %v71_v30  ;;  %v1373_v59 = vld [vmem:[#allocation5 + $0x108] sm:$0xff] }
  0xa9   :  { %v204_v61 = vld [vmem:[#allocation5 + $0xe60] sm:$0xff]  ;;  %1263 = vmatpush2.bf16.msra.mxu1 %v5547_v1  ;;  %v1374_v60 = vld [vmem:[#allocation5 + $0x128] sm:$0xff]  ;;  %v5570_v57 = vcombine.high %v1375_v41, %v1376_v43  ;;  %v75_v1 = vld [vmem:[#allocation2 + $0x90] sm:$0xff] }
  0xaa   :  { %v169_v3 = vld [vmem:[#allocation5 + $0xa00] sm:$0xff]  ;;  %v5546_v6 = vcombine.high %v203_v53, %v204_v61  ;;  %1191 = vmatprep.subr.bf16.mxu0 %v5514_v2  ;;  %v5545_v10 = vcombine.low %v203_v53, %v204_v61  ;;  %7060 = vst [vmem:[#allocation27_spill] sm:$0xff] %v6456_v52  ;;  %v5603_v53 = vcombine.low %v1409_v27, %v1410_v28  ;;  %v1405_v61 = vld [vmem:[#allocation5 + $0x508] sm:$0xff]  ;;  %v79_v2 = vld [vmem:[#allocation2 + $0xb0] sm:$0xff] }
  0xab   :  { %v170_v4 = vld [vmem:[#allocation5 + $0xa20] sm:$0xff]  ;;  %1192 = vmatpush2.bf16.msra.mxu0 %v5513_v8  ;;  %v1406_v0 = vld [vmem:[#allocation5 + $0x528] sm:$0xff]  ;;  %v6466_v8 = vcombine.low %v68_v32, %v72_v34  ;;  %v5568_v12 = vcombine.high %v1373_v59, %v1374_v60  ;;  %v6468_v15 = vcombine.high %v75_v1, %v79_v2  ;;  %v5567_v20 = vcombine.low %v1373_v59, %v1374_v60  ;;  %v83_v34 = vld [vmem:[#allocation2 + $0xd0] sm:$0xff] }
  0xac   :  { %v201_v5 = vld [vmem:[#allocation5 + $0xe00] sm:$0xff]  ;;  %v5512_v11 = vcombine.high %v169_v3, %v170_v4  ;;  %1264 = vmatprep.subr.bf16.mxu1 %v5546_v6  ;;  %v5511_v18 = vcombine.low %v169_v3, %v170_v4  ;;  %v5602_v3 = vcombine.high %v1407_v47, %v1408_v50  ;;  %v76_v4 = vld [vmem:[#allocation2 + $0x98] sm:$0xff]  ;;  %v6463_v6 = vcombine.low %v67_v29, %v71_v30  ;;  %v1403_v17 = vld [vmem:[#allocation5 + $0x4c8] sm:$0xff] }
  0xad   :  { %v202_v7 = vld [vmem:[#allocation5 + $0xe20] sm:$0xff]  ;;  %1265 = vmatpush2.bf16.msra.mxu1 %v5545_v10  ;;  %7063 = vst [vmem:[#allocation30_spill] sm:$0xff] %v6466_v8  ;;  %v1371_v10 = vld [vmem:[#allocation5 + $0xc8] sm:$0xff]  ;;  %v5600_v13 = vcombine.high %v1405_v61, %v1406_v0  ;;  %7064 = vst [vmem:[#allocation31_spill] sm:$0xff] %v6468_v15 }
  0xae   :  { %v5544_v16 = vcombine.high %v201_v5, %v202_v7  ;;  %1193 = vmatprep.subr.bf16.mxu0 %v5512_v11  ;;  %v5543_v22 = vcombine.low %v201_v5, %v202_v7  ;;  %v80_v5 = vld [vmem:[#allocation2 + $0xb8] sm:$0xff]  ;;  %7062 = vst [vmem:[#allocation29_spill] sm:$0xff] %v6463_v6  ;;  %v5569_v7 = vcombine.low %v1375_v41, %v1376_v43  ;;  %v1369_v28 = vld [vmem:[#allocation5 + $0x88] sm:$0xff] }
  0xaf   :  { %1194 = vmatpush2.bf16.msra.mxu0 %v5511_v18  ;;  %v5601_v11 = vcombine.low %v1407_v47, %v1408_v50  ;;  %v1404_v18 = vld [vmem:[#allocation5 + $0x4e8] sm:$0xff]  ;;  %v6471_v19 = vcombine.high %v76_v4, %v80_v5  ;;  %v6478_v43 = vcombine.low %v76_v4, %v80_v5 }
  0xb0   :  { %1266 = vmatprep.subr.bf16.mxu1 %v5544_v16  ;;  %2133 = vmatprep.subr.bf16.mxu0 %v5574_v26  ;;  %v1372_v16 = vld [vmem:[#allocation5 + $0xe8] sm:$0xff]  ;;  %v5598_v27 = vcombine.high %v1403_v17, %v1404_v18  ;;  %v5597_v47 = vcombine.low %v1403_v17, %v1404_v18 }
  0xb1   :  { %1267 = vmatpush2.bf16.msra.mxu1 %v5543_v22  ;;  %7065 = vst [vmem:[#allocation32_spill] sm:$0xff] %v6471_v19  ;;  %v5599_v22 = vcombine.low %v1405_v61, %v1406_v0  ;;  %v5566_v26 = vcombine.high %v1371_v10, %v1372_v16  ;;  %v1370_v29 = vld [vmem:[#allocation5 + $0xa8] sm:$0xff]  ;;  %v5565_v41 = vcombine.low %v1371_v10, %v1372_v16  ;;  %7067 = vst [vmem:[#allocation34_spill] sm:$0xff] %v6478_v43 }
  0xb2   :  { %2206 = vmatprep.subr.bf16.mxu1 %v5606_v31  ;;  %1196 = vmatmul.mubr.bf16.vlgmr.msra.gmra.mxu0 %v6450_v37  ;;  %v1401_v30 = vld [vmem:[#allocation5 + $0x488] sm:$0xff]  ;;  %v6475_v31 = vcombine.low %v75_v1, %v79_v2  ;;  %v5564_v50 = vcombine.high %v1369_v28, %v1370_v29  ;;  %v5563_v0 = vcombine.low %v1369_v28, %v1370_v29 }
  0xb3   :  { %2134 = vmatpush1.bf16.msra.mxu0 %v5573_v40  ;;  %1205 = vmatprep.mubr.bf16.mxu0 %v6456_v52  ;;  %v1402_v32 = vld [vmem:[#allocation5 + $0x4a8] sm:$0xff]  ;;  %v87_v40 = vld [vmem:[#allocation2 + $0xf0] sm:$0xff] }
  0xb4   :  { %1269 = vmatmul.mubr.bf16.vlgmr.msra.gmra.mxu1 %v6454_v39  ;;  %2135 = vmatprep.subr.bf16.mxu0 %v5572_v45  ;;  %7066 = vst [vmem:[#allocation33_spill] sm:$0xff] %v6475_v31  ;;  %v88_v45 = vld [vmem:[#allocation2 + $0xf8] sm:$0xff]  ;;  %v1367_v59 = vld [vmem:[#allocation5 + $0x48] sm:$0xff]  ;;  %v5595_v1 = vcombine.low %v1401_v30, %v1402_v32 }
  0xb5   :  { %2207 = vmatpush1.bf16.msra.mxu1 %v5605_v44  ;;  %1278 = vmatprep.mubr.bf16.mxu1 %v6459_v54  ;;  %v84_v44 = vld [vmem:[#allocation2 + $0xd8] sm:$0xff]  ;;  %v1368_v60 = vld [vmem:[#allocation5 + $0x68] sm:$0xff] }
  0xb6   :  { %2208 = vmatprep.subr.bf16.mxu1 %v5604_v51  ;;  %v5596_v51 = vcombine.high %v1401_v30, %v1402_v32  ;;  %v6483_v61 = vcombine.high %v84_v44, %v88_v45  ;;  %v5562_v2 = vcombine.high %v1367_v59, %v1368_v60  ;;  %v1365_v4 = vld [vmem:[#allocation5 + $0x8] sm:$0xff] }
  0xb7   :  { %2136 = vmatpush1.bf16.msra.mxu0 %v5571_v33  ;;  %v6480_v33 = vcombine.high %v83_v34, %v87_v40  ;;  %v1366_v5 = vld [vmem:[#allocation5 + $0x28] sm:$0xff] }
  0xb8   :  { %2137 = vmatprep.subr.bf16.mxu0 %v5570_v57  ;;  %v1400_v57 = vld [vmem:[#allocation5 + $0x468] sm:$0xff]  ;;  %7069 = vst [vmem:[#allocation36_spill] sm:$0xff] %v6483_v61  ;;  %v5560_v17 = vcombine.high %v1365_v4, %v1366_v5  ;;  %v5559_v28 = vcombine.low %v1365_v4, %v1366_v5 }
  0xb9   :  { %2209 = vmatpush1.bf16.msra.mxu1 %v5603_v53  ;;  %7068 = vst [vmem:[#allocation35_spill] sm:$0xff] %v6480_v33  ;;  %v1399_v53 = vld [vmem:[#allocation5 + $0x448] sm:$0xff] }
  0xba   :  { %2210 = vmatprep.subr.bf16.mxu1 %v5602_v3  ;;  %1206 = vmatmul.mubr.bf16.gmra.mxu0 %v6463_v6  ;;  %v5594_v3 = vcombine.high %v1399_v53, %v1400_v57  ;;  %v1397_v10 = vld [vmem:[#allocation5 + $0x408] sm:$0xff]  ;;  %v5593_v16 = vcombine.low %v1399_v53, %v1400_v57 }
  0xbb   :  { %2138 = vmatpush1.bf16.msra.mxu0 %v5569_v7  ;;  %1215 = vmatprep.mubr.bf16.mxu0 %v6468_v15  ;;  %v6487_v7 = vcombine.low %v83_v34, %v87_v40  ;;  %v1393_v34 = vld [vmem:[#allocation5 + $0x388] sm:$0xff] }
  0xbc   :  { %1279 = vmatmul.mubr.bf16.gmra.mxu1 %v6466_v8  ;;  %2139 = vmatprep.subr.bf16.mxu0 %v5568_v12  ;;  %v5561_v12 = vcombine.low %v1367_v59, %v1368_v60  ;;  %v1394_v40 = vld [vmem:[#allocation5 + $0x3a8] sm:$0xff] }
  0xbd   :  { %2211 = vmatpush1.bf16.msra.mxu1 %v5601_v11  ;;  %1288 = vmatprep.mubr.bf16.mxu1 %v6471_v19  ;;  %7070 = vst [vmem:[#allocation37_spill] sm:$0xff] %v6487_v7  ;;  %v1398_v11 = vld [vmem:[#allocation5 + $0x428] sm:$0xff] }
  0xbe   :  { %2212 = vmatprep.subr.bf16.mxu1 %v5600_v13  ;;  %v6490_v13 = vcombine.low %v84_v44, %v88_v45  ;;  %v5592_v18 = vcombine.high %v1397_v10, %v1398_v11  ;;  %v5591_v29 = vcombine.low %v1397_v10, %v1398_v11  ;;  %v1426_v44 = vld [vmem:[#allocation5 + $0x7a8] sm:$0xff] }
  0xbf   :  { %2140 = vmatpush1.bf16.msra.mxu0 %v5567_v20  ;;  %v1395_v20 = vld [vmem:[#allocation5 + $0x3c8] sm:$0xff] }
  0xc0   :  { %2141 = vmatprep.subr.bf16.mxu0 %v5566_v26  ;;  %7071 = vst [vmem:[#allocation38_spill] sm:$0xff] %v6490_v13  ;;  %v1427_v26 = vld [vmem:[#allocation5 + $0x7c8] sm:$0xff] }
  0xc1   :  { %2213 = vmatpush1.bf16.msra.mxu1 %v5599_v22  ;;  %v1396_v22 = vld [vmem:[#allocation5 + $0x3e8] sm:$0xff] }
  0xc2   :  { %2214 = vmatprep.subr.bf16.mxu1 %v5598_v27  ;;  %1216 = vmatmul.mubr.bf16.gmra.mxu0 %v6475_v31  ;;  %v1428_v27 = vld [vmem:[#allocation5 + $0x7e8] sm:$0xff]  ;;  %v5590_v30 = vcombine.high %v1395_v20, %v1396_v22  ;;  %v5589_v45 = vcombine.low %v1395_v20, %v1396_v22 }
  0xc3   :  { %2142 = vmatpush1.bf16.msra.mxu0 %v5565_v41  ;;  %1225 = vmatprep.mubr.bf16.mxu0 %v6480_v33  ;;  %v5622_v32 = vcombine.high %v1427_v26, %v1428_v27  ;;  %v1425_v41 = vld [vmem:[#allocation5 + $0x788] sm:$0xff] }
  0xc4   :  { %1289 = vmatmul.mubr.bf16.gmra.mxu1 %v6478_v43  ;;  %2143 = vmatprep.subr.bf16.mxu0 %v5564_v50  ;;  %v5588_v50 = vcombine.high %v1393_v34, %v1394_v40  ;;  %v1391_v59 = vld [vmem:[#allocation5 + $0x348] sm:$0xff] }
  0xc5   :  { %2215 = vmatpush1.bf16.msra.mxu1 %v5597_v47  ;;  %1298 = vmatprep.mubr.bf16.mxu1 %v6483_v61  ;;  %v5621_v47 = vcombine.low %v1427_v26, %v1428_v27  ;;  %v1392_v60 = vld [vmem:[#allocation5 + $0x368] sm:$0xff] }
  0xc6   :  { %2216 = vmatprep.subr.bf16.mxu1 %v5596_v51  ;;  %v5620_v51 = vcombine.high %v1425_v41, %v1426_v44  ;;  %v1423_v53 = vld [vmem:[#allocation5 + $0x748] sm:$0xff] }
  0xc7   :  { %2144 = vmatpush1.bf16.msra.mxu0 %v5563_v0  ;;  %v1424_v57 = vld [vmem:[#allocation5 + $0x768] sm:$0xff]  ;;  %v5587_v0 = vcombine.low %v1393_v34, %v1394_v40 }
  0xc8   :  { %2145 = vmatprep.subr.bf16.mxu0 %v5562_v2  ;;  %v5586_v2 = vcombine.high %v1391_v59, %v1392_v60  ;;  %v1389_v4 = vld [vmem:[#allocation5 + $0x308] sm:$0xff] }
  0xc9   :  { %2217 = vmatpush1.bf16.msra.mxu1 %v5595_v1  ;;  %v5619_v1 = vcombine.low %v1425_v41, %v1426_v44  ;;  %v1390_v5 = vld [vmem:[#allocation5 + $0x328] sm:$0xff] }
  0xca   :  { %2218 = vmatprep.subr.bf16.mxu1 %v5594_v3  ;;  %1226 = vmatmul.mubr.bf16.gmra.mxu0 %v6487_v7  ;;  %v5618_v3 = vcombine.high %v1423_v53, %v1424_v57  ;;  %v1421_v10 = vld [vmem:[#allocation5 + $0x708] sm:$0xff] }
  0xcb   :  { %2146 = vmatpush1.bf16.msra.mxu0 %v5561_v12  ;;  %2165 = vmatprep.mubr.bf16.mxu0 %v6372_v58  ;;  %v1422_v11 = vld [vmem:[#allocation5 + $0x728] sm:$0xff]  ;;  %v5585_v12 = vcombine.low %v1391_v59, %v1392_v60 }
  0xcc   :  { %1299 = vmatmul.mubr.bf16.gmra.mxu1 %v6490_v13  ;;  %2147 = vmatprep.subr.bf16.mxu0 %v5560_v17  ;;  %v5584_v17 = vcombine.high %v1389_v4, %v1390_v5  ;;  %v1387_v20 = vld [vmem:[#allocation5 + $0x2c8] sm:$0xff] }
  0xcd   :  { %2219 = vmatpush1.bf16.msra.mxu1 %v5593_v16  ;;  %2238 = vmatprep.mubr.bf16.mxu1 %v6380_v63  ;;  %v5617_v16 = vcombine.low %v1423_v53, %v1424_v57  ;;  %v1388_v22 = vld [vmem:[#allocation5 + $0x2e8] sm:$0xff] }
  0xce   :  { %2220 = vmatprep.subr.bf16.mxu1 %v5592_v18  ;;  %v5616_v18 = vcombine.high %v1421_v10, %v1422_v11  ;;  %v1419_v26 = vld [vmem:[#allocation5 + $0x6c8] sm:$0xff] }
  0xcf   :  { %2148 = vmatpush1.bf16.msra.mxu0 %v5559_v28  ;;  %v1420_v27 = vld [vmem:[#allocation5 + $0x6e8] sm:$0xff]  ;;  %v5583_v28 = vcombine.low %v1389_v4, %v1390_v5 }
  0xd0   :  { %2149 = vmatprep.subr.bf16.mxu0 %v5590_v30  ;;  %v5582_v30 = vcombine.high %v1387_v20, %v1388_v22  ;;  %v1385_v34 = vld [vmem:[#allocation5 + $0x288] sm:$0xff] }
  0xd1   :  { %2221 = vmatpush1.bf16.msra.mxu1 %v5591_v29  ;;  %v5615_v29 = vcombine.low %v1421_v10, %v1422_v11  ;;  %v1386_v40 = vld [vmem:[#allocation5 + $0x2a8] sm:$0xff] }
  0xd2   :  { %2222 = vmatprep.subr.bf16.mxu1 %v5622_v32  ;;  %v5614_v32 = vcombine.high %v1419_v26, %v1420_v27  ;;  %v1417_v41 = vld [vmem:[#allocation5 + $0x688] sm:$0xff] }
  0xd3   :  { %2150 = vmatpush2.bf16.msra.mxu0 %v5589_v45  ;;  %v1418_v44 = vld [vmem:[#allocation5 + $0x6a8] sm:$0xff]  ;;  %v5581_v45 = vcombine.low %v1387_v20, %v1388_v22 }
  0xd4   :  { %2151 = vmatprep.subr.bf16.mxu0 %v5588_v50  ;;  %v5580_v50 = vcombine.high %v1385_v34, %v1386_v40  ;;  %v1383_v59 = vld [vmem:[#allocation5 + $0x248] sm:$0xff] }
  0xd5   :  { %2223 = vmatpush2.bf16.msra.mxu1 %v5621_v47  ;;  %v5613_v47 = vcombine.low %v1419_v26, %v1420_v27  ;;  %v1384_v60 = vld [vmem:[#allocation5 + $0x268] sm:$0xff] }
  0xd6   :  { %2224 = vmatprep.subr.bf16.mxu1 %v5620_v51  ;;  %v5612_v51 = vcombine.high %v1417_v41, %v1418_v44  ;;  %v1415_v53 = vld [vmem:[#allocation5 + $0x648] sm:$0xff] }
  0xd7   :  { %2152 = vmatpush2.bf16.msra.mxu0 %v5587_v0  ;;  %v1416_v57 = vld [vmem:[#allocation5 + $0x668] sm:$0xff]  ;;  %v5579_v0 = vcombine.low %v1385_v34, %v1386_v40 }
  0xd8   :  { %2153 = vmatprep.subr.bf16.mxu0 %v5586_v2  ;;  %v5578_v2 = vcombine.high %v1383_v59, %v1384_v60  ;;  %v1381_v4 = vld [vmem:[#allocation5 + $0x208] sm:$0xff] }
  0xd9   :  { %2225 = vmatpush2.bf16.msra.mxu1 %v5619_v1  ;;  %v5611_v1 = vcombine.low %v1417_v41, %v1418_v44  ;;  %v1382_v5 = vld [vmem:[#allocation5 + $0x228] sm:$0xff] }
  0xda   :  { %2226 = vmatprep.subr.bf16.mxu1 %v5618_v3  ;;  %v5610_v3 = vcombine.high %v1415_v53, %v1416_v57  ;;  %v1413_v10 = vld [vmem:[#allocation5 + $0x608] sm:$0xff] }
  0xdb   :  { %2154 = vmatpush2.bf16.msra.mxu0 %v5585_v12  ;;  %v1414_v11 = vld [vmem:[#allocation5 + $0x628] sm:$0xff]  ;;  %v5577_v12 = vcombine.low %v1383_v59, %v1384_v60 }
  0xdc   :  { %2155 = vmatprep.subr.bf16.mxu0 %v5584_v17  ;;  %v5576_v17 = vcombine.high %v1381_v4, %v1382_v5  ;;  %v1443_v20 = vld [vmem:[#allocation5 + $0x9c8] sm:$0xff] }
  0xdd   :  { %2227 = vmatpush2.bf16.msra.mxu1 %v5617_v16  ;;  %v5609_v16 = vcombine.low %v1415_v53, %v1416_v57  ;;  %v1444_v22 = vld [vmem:[#allocation5 + $0x9e8] sm:$0xff] }
  0xde   :  { %2228 = vmatprep.subr.bf16.mxu1 %v5616_v18  ;;  %v5608_v18 = vcombine.high %v1413_v10, %v1414_v11  ;;  %v1475_v26 = vld [vmem:[#allocation5 + $0xdc8] sm:$0xff] }
  0xdf   :  { %2156 = vmatpush2.bf16.msra.mxu0 %v5583_v28  ;;  %v1476_v27 = vld [vmem:[#allocation5 + $0xde8] sm:$0xff]  ;;  %v5575_v28 = vcombine.low %v1381_v4, %v1382_v5 }
  0xe0   :  { %2157 = vmatprep.subr.bf16.mxu0 %v5582_v30  ;;  %v5638_v30 = vcombine.high %v1443_v20, %v1444_v22  ;;  %v1441_v34 = vld [vmem:[#allocation5 + $0x988] sm:$0xff] }
  0xe1   :  { %2229 = vmatpush2.bf16.msra.mxu1 %v5615_v29  ;;  %v5607_v29 = vcombine.low %v1413_v10, %v1414_v11  ;;  %v1442_v40 = vld [vmem:[#allocation5 + $0x9a8] sm:$0xff] }
  0xe2   :  { %2230 = vmatprep.subr.bf16.mxu1 %v5614_v32  ;;  %v5670_v32 = vcombine.high %v1475_v26, %v1476_v27  ;;  %v1473_v41 = vld [vmem:[#allocation5 + $0xd88] sm:$0xff] }
  0xe3   :  { %2158 = vmatpush2.bf16.msra.mxu0 %v5581_v45  ;;  %v1474_v44 = vld [vmem:[#allocation5 + $0xda8] sm:$0xff]  ;;  %v5637_v45 = vcombine.low %v1443_v20, %v1444_v22 }
  0xe4   :  { %2159 = vmatprep.subr.bf16.mxu0 %v5580_v50  ;;  %v5636_v50 = vcombine.high %v1441_v34, %v1442_v40  ;;  %v1439_v59 = vld [vmem:[#allocation5 + $0x948] sm:$0xff] }
  0xe5   :  { %2231 = vmatpush2.bf16.msra.mxu1 %v5613_v47  ;;  %v5669_v47 = vcombine.low %v1475_v26, %v1476_v27  ;;  %v1440_v60 = vld [vmem:[#allocation5 + $0x968] sm:$0xff] }
  0xe6   :  { %2232 = vmatprep.subr.bf16.mxu1 %v5612_v51  ;;  %v5668_v51 = vcombine.high %v1473_v41, %v1474_v44  ;;  %v1471_v53 = vld [vmem:[#allocation5 + $0xd48] sm:$0xff] }
  0xe7   :  { %2160 = vmatpush2.bf16.msra.mxu0 %v5579_v0  ;;  %v1472_v57 = vld [vmem:[#allocation5 + $0xd68] sm:$0xff]  ;;  %v5635_v0 = vcombine.low %v1441_v34, %v1442_v40 }
  0xe8   :  { %2161 = vmatprep.subr.bf16.mxu0 %v5578_v2  ;;  %v5634_v2 = vcombine.high %v1439_v59, %v1440_v60  ;;  %v1437_v4 = vld [vmem:[#allocation5 + $0x908] sm:$0xff] }
  0xe9   :  { %2233 = vmatpush2.bf16.msra.mxu1 %v5611_v1  ;;  %v5667_v1 = vcombine.low %v1473_v41, %v1474_v44  ;;  %v1438_v5 = vld [vmem:[#allocation5 + $0x928] sm:$0xff] }
  0xea   :  { %2234 = vmatprep.subr.bf16.mxu1 %v5610_v3  ;;  %v5666_v3 = vcombine.high %v1471_v53, %v1472_v57  ;;  %v1469_v10 = vld [vmem:[#allocation5 + $0xd08] sm:$0xff] }
  0xeb   :  { %2162 = vmatpush2.bf16.msra.mxu0 %v5577_v12  ;;  %v1470_v11 = vld [vmem:[#allocation5 + $0xd28] sm:$0xff]  ;;  %v5633_v12 = vcombine.low %v1439_v59, %v1440_v60 }
  0xec   :  { %2163 = vmatprep.subr.bf16.mxu0 %v5576_v17  ;;  %v5632_v17 = vcombine.high %v1437_v4, %v1438_v5  ;;  %v1435_v20 = vld [vmem:[#allocation5 + $0x8c8] sm:$0xff] }
  0xed   :  { %2235 = vmatpush2.bf16.msra.mxu1 %v5609_v16  ;;  %v5665_v16 = vcombine.low %v1471_v53, %v1472_v57  ;;  %v1436_v22 = vld [vmem:[#allocation5 + $0x8e8] sm:$0xff] }
  0xee   :  { %2236 = vmatprep.subr.bf16.mxu1 %v5608_v18  ;;  %v5664_v18 = vcombine.high %v1469_v10, %v1470_v11  ;;  %v1467_v26 = vld [vmem:[#allocation5 + $0xcc8] sm:$0xff] }
  0xef   :  { %2164 = vmatpush2.bf16.msra.mxu0 %v5575_v28  ;;  %v1468_v27 = vld [vmem:[#allocation5 + $0xce8] sm:$0xff]  ;;  %v5631_v28 = vcombine.low %v1437_v4, %v1438_v5 }
  0xf0   :  { %2279 = vmatprep.subr.bf16.mxu0 %v5638_v30  ;;  %v5630_v30 = vcombine.high %v1435_v20, %v1436_v22  ;;  %v1433_v34 = vld [vmem:[#allocation5 + $0x888] sm:$0xff] }
  0xf1   :  { %2237 = vmatpush2.bf16.msra.mxu1 %v5607_v29  ;;  %v5663_v29 = vcombine.low %v1469_v10, %v1470_v11  ;;  %v1434_v40 = vld [vmem:[#allocation5 + $0x8a8] sm:$0xff] }
  0xf2   :  { %2352 = vmatprep.subr.bf16.mxu1 %v5670_v32  ;;  %2166 = vmatmul.mubr.bf16.vlgmr.msra.gmra.mxu0 %v6386_v21  ;;  %v5662_v32 = vcombine.high %v1467_v26, %v1468_v27  ;;  %v1465_v41 = vld [vmem:[#allocation5 + $0xc88] sm:$0xff] }
  0xf3   :  { %2280 = vmatpush1.bf16.msra.mxu0 %v5637_v45  ;;  %2175 = vmatprep.mubr.bf16.mxu0 %v6392_v55  ;;  %v1466_v44 = vld [vmem:[#allocation5 + $0xca8] sm:$0xff]  ;;  %v5629_v45 = vcombine.low %v1435_v20, %v1436_v22 }
  0xf4   :  { %2239 = vmatmul.mubr.bf16.vlgmr.msra.gmra.mxu1 %v6390_v25  ;;  %2281 = vmatprep.subr.bf16.mxu0 %v5636_v50  ;;  %v5628_v50 = vcombine.high %v1433_v34, %v1434_v40  ;;  %v1431_v59 = vld [vmem:[#allocation5 + $0x848] sm:$0xff] }
  0xf5   :  { %2353 = vmatpush1.bf16.msra.mxu1 %v5669_v47  ;;  %2248 = vmatprep.mubr.bf16.mxu1 %v6395_v35  ;;  %v5661_v47 = vcombine.low %v1467_v26, %v1468_v27  ;;  %v1432_v60 = vld [vmem:[#allocation5 + $0x868] sm:$0xff] }
  0xf6   :  { %2354 = vmatprep.subr.bf16.mxu1 %v5668_v51  ;;  %v5660_v51 = vcombine.high %v1465_v41, %v1466_v44  ;;  %v1463_v53 = vld [vmem:[#allocation5 + $0xc48] sm:$0xff] }
  0xf7   :  { %2282 = vmatpush1.bf16.msra.mxu0 %v5635_v0  ;;  %v1464_v57 = vld [vmem:[#allocation5 + $0xc68] sm:$0xff]  ;;  %v5627_v0 = vcombine.low %v1433_v34, %v1434_v40 }
  0xf8   :  { %2283 = vmatprep.subr.bf16.mxu0 %v5634_v2  ;;  %v5626_v2 = vcombine.high %v1431_v59, %v1432_v60  ;;  %v1429_v4 = vld [vmem:[#allocation5 + $0x808] sm:$0xff] }
  0xf9   :  { %2355 = vmatpush1.bf16.msra.mxu1 %v5667_v1  ;;  %v5659_v1 = vcombine.low %v1465_v41, %v1466_v44  ;;  %v1430_v5 = vld [vmem:[#allocation5 + $0x828] sm:$0xff] }
  0xfa   :  { %2356 = vmatprep.subr.bf16.mxu1 %v5666_v3  ;;  %2176 = vmatmul.mubr.bf16.gmra.mxu0 %v6400_v42  ;;  %v5658_v3 = vcombine.high %v1463_v53, %v1464_v57  ;;  %v1461_v10 = vld [vmem:[#allocation5 + $0xc08] sm:$0xff] }
  0xfb   :  { %2284 = vmatpush1.bf16.msra.mxu0 %v5633_v12  ;;  %2185 = vmatprep.mubr.bf16.mxu0 %v6404_v56  ;;  %v1462_v11 = vld [vmem:[#allocation5 + $0xc28] sm:$0xff]  ;;  %v5625_v12 = vcombine.low %v1431_v59, %v1432_v60 }
  0xfc   :  { %2249 = vmatmul.mubr.bf16.gmra.mxu1 %v6402_v46  ;;  %2285 = vmatprep.subr.bf16.mxu0 %v5632_v17  ;;  %v5624_v17 = vcombine.high %v1429_v4, %v1430_v5  ;;  %v1459_v20 = vld [vmem:[#allocation5 + $0xbc8] sm:$0xff] }
  0xfd   :  { %2357 = vmatpush1.bf16.msra.mxu1 %v5665_v16  ;;  %2258 = vmatprep.mubr.bf16.mxu1 %v6407_v62  ;;  %v5657_v16 = vcombine.low %v1463_v53, %v1464_v57  ;;  %v1460_v22 = vld [vmem:[#allocation5 + $0xbe8] sm:$0xff] }
  0xfe   :  { %2358 = vmatprep.subr.bf16.mxu1 %v5664_v18  ;;  %v5656_v18 = vcombine.high %v1461_v10, %v1462_v11  ;;  %v1491_v26 = vld [vmem:[#allocation5 + $0xfc8] sm:$0xff] }
  0xff   :  { %2286 = vmatpush1.bf16.msra.mxu0 %v5631_v28  ;;  %v1492_v27 = vld [vmem:[#allocation5 + $0xfe8] sm:$0xff]  ;;  %v5623_v28 = vcombine.low %v1429_v4, %v1430_v5 }
 0x100   :  { %2287 = vmatprep.subr.bf16.mxu0 %v5630_v30  ;;  %v5654_v30 = vcombine.high %v1459_v20, %v1460_v22  ;;  %v1457_v34 = vld [vmem:[#allocation5 + $0xb88] sm:$0xff] }
 0x101   :  { %2359 = vmatpush1.bf16.msra.mxu1 %v5663_v29  ;;  %v5655_v29 = vcombine.low %v1461_v10, %v1462_v11  ;;  %v1458_v40 = vld [vmem:[#allocation5 + $0xba8] sm:$0xff] }
 0x102   :  { %2360 = vmatprep.subr.bf16.mxu1 %v5662_v32  ;;  %2186 = vmatmul.mubr.bf16.gmra.mxu0 %v6412_v9  ;;  %v5686_v32 = vcombine.high %v1491_v26, %v1492_v27  ;;  %v1489_v41 = vld [vmem:[#allocation5 + $0xf88] sm:$0xff]  ;;  %v6204_v9 = vld [vmem:[#allocation7 + $0x90] sm:$0xff]  }
 0x103   :  { %2288 = vmatpush1.bf16.msra.mxu0 %v5629_v45  ;;  %2195 = vmatprep.mubr.bf16.mxu0 %v6416_v23  ;;  %v1490_v44 = vld [vmem:[#allocation5 + $0xfa8] sm:$0xff]  ;;  %v5653_v45 = vcombine.low %v1459_v20, %v1460_v22 }
 0x104   :  { %2259 = vmatmul.mubr.bf16.gmra.mxu1 %v6414_v14  ;;  %2289 = vmatprep.subr.bf16.mxu0 %v5628_v50  ;;  %v5652_v50 = vcombine.high %v1457_v34, %v1458_v40  ;;  %v1455_v59 = vld [vmem:[#allocation5 + $0xb48] sm:$0xff] }
 0x105   :  { %2361 = vmatpush1.bf16.msra.mxu1 %v5661_v47  ;;  %2268 = vmatprep.mubr.bf16.mxu1 %v6419_v24  ;;  %v5685_v47 = vcombine.low %v1491_v26, %v1492_v27  ;;  %v1456_v60 = vld [vmem:[#allocation5 + $0xb68] sm:$0xff] }
 0x106   :  { %2362 = vmatprep.subr.bf16.mxu1 %v5660_v51  ;;  %v5684_v51 = vcombine.high %v1489_v41, %v1490_v44  ;;  %v1487_v53 = vld [vmem:[#allocation5 + $0xf48] sm:$0xff] }
 0x107   :  { %2290 = vmatpush1.bf16.msra.mxu0 %v5627_v0  ;;  %v1488_v57 = vld [vmem:[#allocation5 + $0xf68] sm:$0xff]  ;;  %v5651_v0 = vcombine.low %v1457_v34, %v1458_v40 }
 0x108   :  { %2291 = vmatprep.subr.bf16.mxu0 %v5626_v2  ;;  %v5650_v2 = vcombine.high %v1455_v59, %v1456_v60  ;;  %v1453_v4 = vld [vmem:[#allocation5 + $0xb08] sm:$0xff] }
 0x109   :  { %2363 = vmatpush1.bf16.msra.mxu1 %v5659_v1  ;;  %v5683_v1 = vcombine.low %v1489_v41, %v1490_v44  ;;  %v1454_v5 = vld [vmem:[#allocation5 + $0xb28] sm:$0xff] }
 0x10a   :  { %2364 = vmatprep.subr.bf16.mxu1 %v5658_v3  ;;  %2196 = vmatmul.mubr.bf16.gmra.mxu0 %v6432_v36  ;;  %v5682_v3 = vcombine.high %v1487_v53, %v1488_v57  ;;  %v1485_v10 = vld [vmem:[#allocation5 + $0xf08] sm:$0xff] }
 0x10b   :  { %2292 = vmatpush1.bf16.msra.mxu0 %v5625_v12  ;;  %2311 = vmatprep.mubr.bf16.mxu0 %v6438_v48  ;;  %v1486_v11 = vld [vmem:[#allocation5 + $0xf28] sm:$0xff]  ;;  %v5649_v12 = vcombine.low %v1455_v59, %v1456_v60 }
 0x10c   :  { %2269 = vmatmul.mubr.bf16.gmra.mxu1 %v6434_v38  ;;  %2293 = vmatprep.subr.bf16.mxu0 %v5624_v17  ;;  %v5648_v17 = vcombine.high %v1453_v4, %v1454_v5  ;;  %v1451_v20 = vld [vmem:[#allocation5 + $0xac8] sm:$0xff] }
 0x10d   :  { %2365 = vmatpush1.bf16.msra.mxu1 %v5657_v16  ;;  %2384 = vmatprep.mubr.bf16.mxu1 %v6443_v49  ;;  %v5681_v16 = vcombine.low %v1487_v53, %v1488_v57  ;;  %v1452_v22 = vld [vmem:[#allocation5 + $0xae8] sm:$0xff] }
 0x10e   :  { %2366 = vmatprep.subr.bf16.mxu1 %v5656_v18  ;;  %v5680_v18 = vcombine.high %v1485_v10, %v1486_v11  ;;  %v1483_v26 = vld [vmem:[#allocation5 + $0xec8] sm:$0xff] }
 0x10f   :  { %2294 = vmatpush1.bf16.msra.mxu0 %v5623_v28  ;;  %v1484_v27 = vld [vmem:[#allocation5 + $0xee8] sm:$0xff]  ;;  %v5647_v28 = vcombine.low %v1453_v4, %v1454_v5 }
 0x110   :  { %2295 = vmatprep.subr.bf16.mxu0 %v5654_v30  ;;  %v5646_v30 = vcombine.high %v1451_v20, %v1452_v22  ;;  %v1449_v34 = vld [vmem:[#allocation5 + $0xa88] sm:$0xff] }
 0x111   :  { %2367 = vmatpush1.bf16.msra.mxu1 %v5655_v29  ;;  %v5679_v29 = vcombine.low %v1485_v10, %v1486_v11  ;;  %v1450_v40 = vld [vmem:[#allocation5 + $0xaa8] sm:$0xff] }
 0x112   :  { %2368 = vmatprep.subr.bf16.mxu1 %v5686_v32  ;;  %v5678_v32 = vcombine.high %v1483_v26, %v1484_v27  ;;  %v1481_v41 = vld [vmem:[#allocation5 + $0xe88] sm:$0xff] }
 0x113   :  { %2296 = vmatpush2.bf16.msra.mxu0 %v5653_v45  ;;  %v1482_v44 = vld [vmem:[#allocation5 + $0xea8] sm:$0xff]  ;;  %v5645_v45 = vcombine.low %v1451_v20, %v1452_v22 }
 0x114   :  { %2297 = vmatprep.subr.bf16.mxu0 %v5652_v50  ;;  %v5644_v50 = vcombine.high %v1449_v34, %v1450_v40  ;;  %v1447_v59 = vld [vmem:[#allocation5 + $0xa48] sm:$0xff] }
 0x115   :  { %2369 = vmatpush2.bf16.msra.mxu1 %v5685_v47  ;;  %v5677_v47 = vcombine.low %v1483_v26, %v1484_v27  ;;  %v1448_v60 = vld [vmem:[#allocation5 + $0xa68] sm:$0xff]  ;;  %v6177_v26 = vld [vmem:[#allocation7 + $0x78] sm:$0xff]  }
 0x116   :  { %2370 = vmatprep.subr.bf16.mxu1 %v5684_v51  ;;  %v5676_v51 = vcombine.high %v1481_v41, %v1482_v44  ;;  %v1479_v53 = vld [vmem:[#allocation5 + $0xe48] sm:$0xff]  ;;  %v6178_v27 = vld [vmem:[#allocation7 + $0x38] sm:$0xff]  }
 0x117   :  { %2298 = vmatpush2.bf16.msra.mxu0 %v5651_v0  ;;  %v1480_v57 = vld [vmem:[#allocation5 + $0xe68] sm:$0xff]  ;;  %v5643_v0 = vcombine.low %v1449_v34, %v1450_v40 }
 0x118   :  { %2299 = vmatprep.subr.bf16.mxu0 %v5650_v2  ;;  %v5642_v2 = vcombine.high %v1447_v59, %v1448_v60  ;;  %v1445_v4 = vld [vmem:[#allocation5 + $0xa08] sm:$0xff] }
 0x119   :  { %2371 = vmatpush2.bf16.msra.mxu1 %v5683_v1  ;;  %v5675_v1 = vcombine.low %v1481_v41, %v1482_v44  ;;  %v1446_v5 = vld [vmem:[#allocation5 + $0xa28] sm:$0xff]  ;;  %v6183_v41 = vld [vmem:[#allocation7 + $0x60] sm:$0xff]  }
 0x11a   :  { %2372 = vmatprep.subr.bf16.mxu1 %v5682_v3  ;;  %v5674_v3 = vcombine.high %v1479_v53, %v1480_v57  ;;  %v1477_v10 = vld [vmem:[#allocation5 + $0xe08] sm:$0xff]  ;;  %v5639_v20 = vcombine.low %v1445_v4, %v1446_v5 }
 0x11b   :  { %2300 = vmatpush2.bf16.msra.mxu0 %v5649_v12  ;;  %v1478_v11 = vld [vmem:[#allocation5 + $0xe28] sm:$0xff]  ;;  %v5641_v12 = vcombine.low %v1447_v59, %v1448_v60  ;;  %v6186_v60 = vld [vmem:[#allocation7 + $0x18] sm:$0xff]  }
 0x11c   :  { %2301 = vmatprep.subr.bf16.mxu0 %v5648_v17  ;;  %v5640_v17 = vcombine.high %v1445_v4, %v1446_v5  ;;  %v5671_v22 = vcombine.low %v1477_v10, %v1478_v11  ;;  %v6182_v40 = vld [vmem:[#allocation7 + $0x28] sm:$0xff]  }
 0x11d   :  { %2373 = vmatpush2.bf16.msra.mxu1 %v5681_v16  ;;  %v5673_v16 = vcombine.low %v1479_v53, %v1480_v57  ;;  %v6187_v53 = vld [vmem:[#allocation7 + $0x50] sm:$0xff]   ;;  %v6189_v4 = vld [vmem:[#allocation7 + $0x48] sm:$0xff]  }
 0x11e   :  { %2374 = vmatprep.subr.bf16.mxu1 %v5680_v18  ;;  %v5672_v18 = vcombine.high %v1477_v10, %v1478_v11  ;;  %v6190_v10 = vld [vmem:[#allocation7 + $0x8] sm:$0xff]   ;;  %v6193_v11 = vld [vmem:[#allocation7 + $0xf8] sm:$0xff]  }
 0x11f   :  { %2302 = vmatpush2.bf16.msra.mxu0 %v5647_v28  ;;  %v6179_v28 = vld [vmem:[#allocation7 + $0x70] sm:$0xff]   ;;  %v6205_v21 = vld [vmem:[#allocation7 + $0xc8] sm:$0xff]  }
 0x120   :  { %2303 = vmatprep.subr.bf16.mxu0 %v5646_v30  ;;  %v6181_v30 = vld [vmem:[#allocation7 + $0x68] sm:$0xff]  }
 0x121   :  { %2375 = vmatpush2.bf16.msra.mxu1 %v5679_v29  ;;  %v6180_v29 = vld [vmem:[#allocation7 + $0x30] sm:$0xff]  }
 0x122   :  { %2376 = vmatprep.subr.bf16.mxu1 %v5678_v32 }
 0x123   :  { %2304 = vmatpush2.bf16.msra.mxu0 %v5645_v45 }
 0x124   :  { %2305 = vmatprep.subr.bf16.mxu0 %v5644_v50  ;;  %v6185_v50 = vld [vmem:[#allocation7 + $0x58] sm:$0xff]  }
 0x125   :  { %2377 = vmatpush2.bf16.msra.mxu1 %v5677_v47  ;;  %v6184_v47 = vld [vmem:[#allocation7 + $0x20] sm:$0xff]  }
 0x126   :  { %2378 = vmatprep.subr.bf16.mxu1 %v5676_v51 }
 0x127   :  { %2306 = vmatpush2.bf16.msra.mxu0 %v5643_v0 }
 0x128   :  { %2307 = vmatprep.subr.bf16.mxu0 %v5642_v2  ;;  %v6188_v2 = vld [vmem:[#allocation7 + $0x10] sm:$0xff]  }
 0x129   :  { %2379 = vmatpush2.bf16.msra.mxu1 %v5675_v1 }
 0x12a   :  { %2380 = vmatprep.subr.bf16.mxu1 %v5674_v3 }
 0x12b   :  { %2308 = vmatpush2.bf16.msra.mxu0 %v5641_v12 }
 0x12c   :  { %2309 = vmatprep.subr.bf16.mxu0 %v5640_v17  ;;  %v6516_v32 = vpop.f32.mrf.mxu0  ;;  %v6194_v17 = vld [vmem:[#allocation7 + $0xb8] sm:$0xff]  }
 0x12d   :  { %2381 = vmatpush2.bf16.msra.mxu1 %v5673_v16  ;;  %v6191_v16 = vld [vmem:[#allocation7 + $0x40] sm:$0xff]  }
 0x12e   :  { %2382 = vmatprep.subr.bf16.mxu1 %v5672_v18  ;;  %v6518_v34 = vpop.f32.mrf.mxu1  ;;  %v6520_v44 = vpop.f32.mrf.mxu0 }
 0x12f   :  { %2310 = vmatpush2.bf16.msra.mxu0 %v5639_v20  ;;  %v6192_v20 = vld [vmem:[#allocation7] sm:$0xff]  }
 0x130   :  { %v6523_v45 = vpop.f32.mrf.mxu1  ;;  %v6528_v51 = vpop.f32.mrf.mxu0  ;;  %6007 = vmatprep.subr.bf16.mxu0 %v6193_v11 }
 0x131   :  { %2383 = vmatpush2.bf16.msra.mxu1 %v5671_v22  ;;  %v6195_v22 = vld [vmem:[#allocation7 + $0xf0] sm:$0xff]  }
 0x132   :  { %6047 = vmatprep.subr.bf16.mxu1 %v6177_v26  ;;  %2312 = vmatmul.mubr.bf16.vlgmr.msra.gmra.mxu0 %v6450_v37  ;;  %v6530_v59 = vpop.f32.mrf.mxu1  ;;  %v6532_v57 = vpop.f32.mrf.mxu0  ;;  %v6203_v37 = vld [vmem:[#allocation7 + $0xd0] sm:$0xff]  }
 0x133   :  { %2321 = vmatprep.mubr.bf16.mxu0 %v6456_v52  ;;  %6008 = vmatpush3.bf16.msra.mxu0 %v6194_v17  ;;  %v1129_v48 = vadd.f32 %v6530_v59, %v6528_v51 }
 0x134   :  { %2385 = vmatmul.mubr.bf16.vlgmr.msra.gmra.mxu1 %v6454_v39  ;;  %v6535_v0 = vpop.f32.mrf.mxu1  ;;  %6009 = vmatprep.subr.bf16.mxu0 %v6195_v22 }
 0x135   :  { %2394 = vmatprep.mubr.bf16.mxu1 %v6459_v54  ;;  %6048 = vmatpush3.bf16.msra.mxu1 %v6178_v27  ;;  %v6540_v1 = vpop.f32.mrf.mxu0  ;;  %v6196_v27 = vld [vmem:[#allocation7 + $0xb0] sm:$0xff]   ;;  %v1131_v55 = vadd.f32 %v6535_v0, %v6532_v57  ;;  %v6208_v0 = vld [vmem:[#allocation7 + $0x80] sm:$0xff]  }
 0x136   :  { %6049 = vmatprep.subr.bf16.mxu1 %v6179_v28  ;;  %v6542_v3 = vpop.f32.mrf.mxu1 }
 0x137   :  { %v6544_v5 = vpop.f32.mrf.mxu0  ;;  %6010 = vmatpush3.bf16.msra.mxu0 %v6196_v27 }
 0x138   :  { %v6546_v12 = vpop.f32.mrf.mxu1 }
 0x139   :  { %6050 = vmatpush3.bf16.msra.mxu1 %v6180_v29  ;;  %v6550_v18 = vpop.f32.mrf.mxu0  ;;  %v6197_v29 = vld [vmem:[#allocation7 + $0xe8] sm:$0xff]  }
 0x13a   :  { %6051 = vmatprep.subr.bf16.mxu1 %v6181_v30  ;;  %2322 = vmatmul.mubr.bf16.gmra.mxu0 %v6463_v6  ;;  %v6552_v26 = vpop.f32.mrf.mxu1  ;;  %v1125_v6 = vadd.f32 %v6518_v34, %v6516_v32 }
 0x13b   :  { %2331 = vmatprep.mubr.bf16.mxu0 %v6468_v15  ;;  %v6554_v28 = vpop.f32.mrf.mxu0  ;;  %6011 = vmatprep.subr.bf16.mxu0 %v6197_v29 }
 0x13c   :  { %2395 = vmatmul.mubr.bf16.gmra.mxu1 %v6466_v8  ;;  %v6556_v30 = vpop.f32.mrf.mxu1 }
 0x13d   :  { %2404 = vmatprep.mubr.bf16.mxu1 %v6471_v19  ;;  %6052 = vmatpush3.bf16.msra.mxu1 %v6182_v40  ;;  %v6198_v40 = vld [vmem:[#allocation7 + $0xa8] sm:$0xff]  }
 0x13e   :  { %6053 = vmatprep.subr.bf16.mxu1 %v6183_v41  ;;  %v6199_v41 = vld [vmem:[#allocation7 + $0xe0] sm:$0xff]   ;;  %6012 = vmatpush3.bf16.msra.mxu0 %v6198_v40 }
 0x13f   :  { %6013 = vmatprep.subr.bf16.mxu0 %v6199_v41 }
 0x141   :  { %6054 = vmatpush3.bf16.msra.mxu1 %v6184_v47  ;;  %v6558_v47 = vpop.f32.mrf.mxu0 }
 0x142   :  { %6055 = vmatprep.subr.bf16.mxu1 %v6185_v50  ;;  %2332 = vmatmul.mubr.bf16.gmra.mxu0 %v6475_v31  ;;  %v6200_v50 = vld [vmem:[#allocation7 + $0xa0] sm:$0xff]   ;;  %v1127_v31 = vadd.f32 %v6523_v45, %v6520_v44 }
 0x143   :  { %2341 = vmatprep.mubr.bf16.mxu0 %v6480_v33  ;;  %6014 = vmatpush3.bf16.msra.mxu0 %v6200_v50 }
 0x144   :  { %2405 = vmatmul.mubr.bf16.gmra.mxu1 %v6478_v43 }
 0x145   :  { %2414 = vmatprep.mubr.bf16.mxu1 %v6483_v61  ;;  %6056 = vmatpush3.bf16.msra.mxu1 %v6186_v60  ;;  %v6560_v60 = vpop.f32.mrf.mxu1  ;;  %v6206_v61 = vld [vmem:[#allocation7 + $0x88] sm:$0xff]  }
 0x146   :  { %6057 = vmatprep.subr.bf16.mxu1 %v6187_v53  ;;  %v6201_v53 = vld [vmem:[#allocation7 + $0xd8] sm:$0xff]  }
 0x147   :  { %6015 = vmatprep.subr.bf16.mxu0 %v6201_v53 }
 0x149   :  { %6058 = vmatpush3.bf16.msra.mxu1 %v6188_v2  ;;  %v6562_v2 = vpop.f32.mrf.mxu0 }
 0x14a   :  { %6059 = vmatprep.subr.bf16.mxu1 %v6189_v4  ;;  %2342 = vmatmul.mubr.bf16.gmra.mxu0 %v6487_v7  ;;  %v6564_v4 = vpop.f32.mrf.mxu1  ;;  %v6202_v7 = vld [vmem:[#allocation7 + $0x98] sm:$0xff]  }
 0x14b   :  { %6016 = vmatpush3.bf16.msra.mxu0 %v6202_v7 }
 0x14c   :  { %2415 = vmatmul.mubr.bf16.gmra.mxu1 %v6490_v13  ;;  %v6568_v11 = vpop.f32.mrf.mxu1  ;;  %6017 = vmatprep.subr.bf16.mxu0 %v6203_v37 }
 0x14d   :  { %6060 = vmatpush3.bf16.msra.mxu1 %v6190_v10  ;;  %v6566_v10 = vpop.f32.mrf.mxu0 }
 0x14e   :  { %6061 = vmatprep.subr.bf16.mxu1 %v6191_v16  ;;  %v6572_v17 = vpop.f32.mrf.mxu1 }
 0x14f   :  { %v6570_v16 = vpop.f32.mrf.mxu0  ;;  %6018 = vmatpush3.bf16.msra.mxu0 %v6204_v9  ;;  %v1135_v9 = vadd.f32 %v6542_v3, %v6540_v1  ;;  %v1141_v1 = vadd.f32 %v6556_v30, %v6554_v28 }
 0x150   :  { %v6576_v22 = vpop.f32.mrf.mxu1  ;;  %6019 = vmatprep.subr.bf16.mxu0 %v6205_v21 }
 0x151   :  { %6062 = vmatpush3.bf16.msra.mxu1 %v6192_v20  ;;  %v6574_v20 = vpop.f32.mrf.mxu0 }
 0x152   :  { %v6580_v29 = vpop.f32.mrf.mxu1 }
 0x153   :  { %v6578_v27 = vpop.f32.mrf.mxu0  ;;  %6020 = vmatpush3.bf16.msra.mxu0 %v6206_v61 }
 0x154   :  { %v6584_v41 = vpop.f32.mrf.mxu1 }
 0x155   :  { %v6582_v40 = vpop.f32.mrf.mxu0 }
 0x156   :  { %v6588_v53 = vpop.f32.mrf.mxu1 }
 0x157   :  { %v6586_v50 = vpop.f32.mrf.mxu0 }
 0x172   :  { %v1197_v33 = vpop.f32.mrf.mxu0 }
 0x173   :  { %v1198_v56 = vadd.f32 %v1197_v33, %v1125_v6  ;;  %v1137_v6 = vadd.f32 %v6546_v12, %v6544_v5  ;;  %v2849_v33 = vld [vmem:[#allocation5 + $0x5d0] sm:$0xff] }
 0x174   :  { %v1270_v15 = vpop.f32.mrf.mxu1  ;;  %v1199_v52 = vpop.f32.mrf.mxu0 }
 0x175   :  { %v1200_v36 = vadd.f32 %v1199_v52, %v1127_v31  ;;  %v1271_v51 = vadd.f32 %v1270_v15, %v1198_v56  ;;  %v1139_v56 = vadd.f32 %v6552_v26, %v6550_v18  ;;  %v6608_v18 = vld [vmem:[#allocation5 + $0x1f0] sm:$0xff] }
 0x176   :  { %v1272_v23 = vpop.f32.mrf.mxu1  ;;  %v1201_v42 = vpop.f32.mrf.mxu0  ;;  %v2847_v26 = vld [vmem:[#allocation5 + $0x590] sm:$0xff] }
 0x177   :  { %v1202_v44 = vadd.f32 %v1201_v42, %v1129_v48  ;;  %v1273_v32 = vadd.f32 %v1272_v23, %v1200_v36  ;;  %v2850_v42 = vld [vmem:[#allocation5 + $0x5f0] sm:$0xff]  ;;  %v6207_v36 = vld [vmem:[#allocation7 + $0xc0] sm:$0xff]  }
 0x178   :  { %v1274_v45 = vpop.f32.mrf.mxu1  ;;  %v1203_v7 = vpop.f32.mrf.mxu0  ;;  %6021 = vmatprep.subr.bf16.mxu0 %v6207_v36 }
 0x179   :  { %v1275_v34 = vadd.f32 %v1274_v45, %v1202_v44  ;;  %v1204_v58 = vadd.f32 %v1203_v7, %v1131_v55  ;;  %v5766_v55 = vcombine.high %v2849_v33, %v2850_v42  ;;  %v1310_v15 = vmul.f32 %v1273_v32, %v1273_v32  ;;  %6022 = vmatpush3.bf16.msra.mxu0 %v6208_v0  ;;  %v6606_v45 = vld [vmem:[#allocation5 + $0x1d0] sm:$0xff] }
 0x17a   :  { %v1276_v13 = vpop.f32.mrf.mxu1  ;;  %v1207_v52 = vpop.f32.mrf.mxu0  ;;  %v5765_v44 = vcombine.low %v2849_v33, %v2850_v42 }
 0x17b   :  { %v1277_v37 = vadd.f32 %v1276_v13, %v1204_v58  ;;  %v1311_v48 = vmul.f32 %v1275_v34, %v1275_v34  ;;  %v1309_v58 = vmul.f32 %v1271_v51, %v1271_v51  ;;  %v1208_v13 = vadd.f32 %v1207_v52, %v1135_v9  ;;  %3644 = vmatprep.subr.bf16.mxu1 %v5766_v55  ;;  %v2848_v51 = vld [vmem:[#allocation5 + $0x5b0] sm:$0xff] }
 0x17c   :  { %v1280_v31 = vpop.f32.mrf.mxu1  ;;  %v1209_v23 = vpop.f32.mrf.mxu0  ;;  %v5734_v34 = vcombine.high %v6606_v45, %v6608_v18  ;;  %v5764_v9 = vcombine.high %v2847_v26, %v2848_v51  ;;  %v5763_v55 = vcombine.low %v2847_v26, %v2848_v51  ;;  %v2843_v26 = vld [vmem:[#allocation5 + $0x510] sm:$0xff] }
 0x17d   :  { %v1312_v21 = vmul.f32 %v1277_v37, %v1277_v37  ;;  %v1210_v59 = vadd.f32 %v1209_v23, %v1137_v6  ;;  %v1325_v7 = vpack.c.bf16 %v1311_v48, %v1309_v58  ;;  %v1281_v33 = vadd.f32 %v1280_v31, %v1208_v13 }
 0x17e   :  { %v1282_v57 = vpop.f32.mrf.mxu1  ;;  %v1211_v61 = vpop.f32.mrf.mxu0  ;;  %3571 = vmatprep.subr.bf16.mxu0 %v5734_v34  ;;  %v1147_v48 = vadd.f32 %v6564_v4, %v6562_v2  ;;  %v1149_v31 = vadd.f32 %v6568_v11, %v6566_v10  ;;  %v2844_v10 = vld [vmem:[#allocation5 + $0x530] sm:$0xff] }
 0x17f   :  { %v1212_v3 = vadd.f32 %v1211_v61, %v1139_v56  ;;  %v1326_v12 = vpack.c.bf16 %v1312_v21, %v1310_v15  ;;  %v1283_v52 = vadd.f32 %v1282_v57, %v1210_v59  ;;  %v2845_v56 = vld [vmem:[#allocation5 + $0x550] sm:$0xff]  ;;  %v1145_v15 = vadd.f32 %v6560_v60, %v6558_v47 }
 0x180   :  { %v1284_v5 = vpop.f32.mrf.mxu1  ;;  %v1213_v32 = vpop.f32.mrf.mxu0  ;;  %v2846_v57 = vld [vmem:[#allocation5 + $0x570] sm:$0xff]  ;;  %v1313_v2 = vmul.f32 %v1281_v33, %v1281_v33 }
 0x181   :  { %v1214_v6 = vadd.f32 %v1213_v32, %v1141_v1  ;;  %v1285_v37 = vadd.f32 %v1284_v5, %v1212_v3  ;;  %2770 = vmatprep.mubr.bf16.mxu1 %v1326_v12  ;;  %v1314_v0 = vmul.f32 %v1283_v52, %v1283_v52  ;;  %v5762_v3 = vcombine.high %v2845_v56, %v2846_v57 }
 0x182   :  { %v1286_v28 = vpop.f32.mrf.mxu1  ;;  %v1217_v42 = vpop.f32.mrf.mxu0  ;;  %2771 = vmatmul.mubr.bf16.vlgmr.msra.gmra.mxu1 %v1325_v7  ;;  %v1151_v5 = vadd.f32 %v6572_v17, %v6570_v16  ;;  %v1157_v16 = vadd.f32 %v6580_v29, %v6578_v27 }
 0x183   :  { %v1287_v23 = vadd.f32 %v1286_v28, %v1214_v6  ;;  %3645 = vmatpush1.bf16.msra.mxu1 %v5765_v44  ;;  %v1315_v21 = vmul.f32 %v1285_v37, %v1285_v37  ;;  %v1218_v4 = vadd.f32 %v1217_v42, %v1145_v15  ;;  %v5761_v44 = vcombine.low %v2845_v56, %v2846_v57  ;;  %v2842_v56 = vld [vmem:[#allocation5 + $0x4f0] sm:$0xff] }
 0x184   :  { %v1290_v36 = vpop.f32.mrf.mxu1  ;;  %v1219_v59 = vpop.f32.mrf.mxu0  ;;  %3646 = vmatprep.subr.bf16.mxu1 %v5764_v9  ;;  %v5760_v28 = vcombine.high %v2843_v26, %v2844_v10  ;;  %v5759_v42 = vcombine.low %v2843_v26, %v2844_v10  ;;  %v2841_v9 = vld [vmem:[#allocation5 + $0x4d0] sm:$0xff] }
 0x185   :  { %v1316_v58 = vmul.f32 %v1287_v23, %v1287_v23  ;;  %v1220_v13 = vadd.f32 %v1219_v59, %v1147_v48  ;;  %v1327_v7 = vpack.c.bf16 %v1315_v21, %v1313_v2  ;;  %v1291_v6 = vadd.f32 %v1290_v36, %v1218_v4  ;;  %v2839_v2 = vld [vmem:[#allocation5 + $0x490] sm:$0xff] }
 0x186   :  { %v1292_v61 = vpop.f32.mrf.mxu1  ;;  %v1221_v1 = vpop.f32.mrf.mxu0  ;;  %v1155_v48 = vadd.f32 %v6576_v22, %v6574_v20  ;;  %v1159_v36 = vadd.f32 %v6584_v41, %v6582_v40  ;;  %v2840_v40 = vld [vmem:[#allocation5 + $0x4b0] sm:$0xff] }
 0x187   :  { %v1222_v12 = vadd.f32 %v1221_v1, %v1149_v31  ;;  %v1328_v60 = vpack.c.bf16 %v1316_v58, %v1314_v0  ;;  %3647 = vmatpush1.bf16.msra.mxu1 %v5763_v55  ;;  %v1293_v11 = vadd.f32 %v1292_v61, %v1220_v13  ;;  %v1317_v27 = vmul.f32 %v1291_v6, %v1291_v6  ;;  %v2835_v6 = vld [vmem:[#allocation5 + $0x410] sm:$0xff] }
 0x188   :  { %v1294_v47 = vpop.f32.mrf.mxu1  ;;  %v1223_v32 = vpop.f32.mrf.mxu0  ;;  %3648 = vmatprep.subr.bf16.mxu1 %v5762_v3  ;;  %v5758_v0 = vcombine.high %v2841_v9, %v2842_v56  ;;  %v1161_v58 = vadd.f32 %v6588_v53, %v6586_v50  ;;  %v5757_v61 = vcombine.low %v2841_v9, %v2842_v56  ;;  %v5755_v50 = vcombine.low %v2839_v2, %v2840_v40  ;;  %v2837_v53 = vld [vmem:[#allocation5 + $0x450] sm:$0xff] }
 0x189   :  { %v1224_v34 = vadd.f32 %v1223_v32, %v1151_v5  ;;  %v1295_v51 = vadd.f32 %v1294_v47, %v1222_v12  ;;  %2778 = vmatprep.mubr.bf16.mxu1 %v1328_v60  ;;  %v1318_v15 = vmul.f32 %v1293_v11, %v1293_v11  ;;  %v5756_v60 = vcombine.high %v2839_v2, %v2840_v40  ;;  %v2856_v2 = vld [vmem:[#allocation5 + $0x6b0] sm:$0xff] }
 0x18a   :  { %v1296_v52 = vpop.f32.mrf.mxu1  ;;  %v1227_v37 = vpop.f32.mrf.mxu0  ;;  %2779 = vmatmul.mubr.bf16.gmra.mxu1 %v1327_v7  ;;  %v2838_v7 = vld [vmem:[#allocation5 + $0x470] sm:$0xff] }
 0x18b   :  { %v1297_v17 = vadd.f32 %v1296_v52, %v1224_v34  ;;  %3649 = vmatpush1.bf16.msra.mxu1 %v5761_v44  ;;  %v1319_v23 = vmul.f32 %v1295_v51, %v1295_v51  ;;  %v1228_v29 = vadd.f32 %v1227_v37, %v1155_v48  ;;  %v5754_v34 = vcombine.high %v2837_v53, %v2838_v7  ;;  %v2853_v40 = vld [vmem:[#allocation5 + $0x650] sm:$0xff] }
 0x18c   :  { %v1300_v33 = vpop.f32.mrf.mxu1  ;;  %v1229_v55 = vpop.f32.mrf.mxu0  ;;  %3650 = vmatprep.subr.bf16.mxu1 %v5760_v28  ;;  %v5753_v52 = vcombine.low %v2837_v53, %v2838_v7  ;;  %v2836_v28 = vld [vmem:[#allocation5 + $0x430] sm:$0xff] }
 0x18d   :  { %v1320_v21 = vmul.f32 %v1297_v17, %v1297_v17  ;;  %v1230_v59 = vadd.f32 %v1229_v55, %v1157_v16  ;;  %v1329_v4 = vpack.c.bf16 %v1319_v23, %v1317_v27  ;;  %v1301_v47 = vadd.f32 %v1300_v33, %v1228_v29  ;;  %v2865_v33 = vld [vmem:[#allocation5 + $0x7d0] sm:$0xff] }
 0x18e   :  { %v1302_v57 = vpop.f32.mrf.mxu1  ;;  %v1231_v31 = vpop.f32.mrf.mxu0  ;;  %v5752_v16 = vcombine.high %v2835_v6, %v2836_v28  ;;  %v5751_v17 = vcombine.low %v2835_v6, %v2836_v28  ;;  %v2863_v23 = vld [vmem:[#allocation5 + $0x790] sm:$0xff] }
 0x18f   :  { %v1232_v13 = vadd.f32 %v1231_v31, %v1159_v36  ;;  %v1330_v22 = vpack.c.bf16 %v1320_v21, %v1318_v15  ;;  %3651 = vmatpush1.bf16.msra.mxu1 %v5759_v42  ;;  %v1303_v41 = vadd.f32 %v1302_v57, %v1230_v59  ;;  %v1321_v11 = vmul.f32 %v1301_v47, %v1301_v47  ;;  %v2866_v42 = vld [vmem:[#allocation5 + $0x7f0] sm:$0xff] }
 0x190   :  { %v1304_v20 = vpop.f32.mrf.mxu1  ;;  %v1233_v1 = vpop.f32.mrf.mxu0  ;;  %3652 = vmatprep.subr.bf16.mxu1 %v5758_v0  ;;  %v5782_v9 = vcombine.high %v2865_v33, %v2866_v42  ;;  %v5781_v48 = vcombine.low %v2865_v33, %v2866_v42  ;;  %v2864_v55 = vld [vmem:[#allocation5 + $0x7b0] sm:$0xff] }
 0x191   :  { %v1234_v3 = vadd.f32 %v1233_v1, %v1161_v58  ;;  %v1305_v5 = vadd.f32 %v1304_v20, %v1232_v13  ;;  %2786 = vmatprep.mubr.bf16.mxu1 %v1330_v22  ;;  %v1322_v32 = vmul.f32 %v1303_v41, %v1303_v41  ;;  %v5780_v56 = vcombine.high %v2863_v23, %v2864_v55  ;;  %v2861_v15 = vld [vmem:[#allocation5 + $0x750] sm:$0xff] }
 0x192   :  { %v1306_v12 = vpop.f32.mrf.mxu1  ;;  %2787 = vmatmul.mubr.bf16.gmra.mxu1 %v1329_v4  ;;  %v5779_v36 = vcombine.low %v2863_v23, %v2864_v55  ;;  %v2862_v21 = vld [vmem:[#allocation5 + $0x770] sm:$0xff] }
 0x193   :  { %v1307_v44 = vadd.f32 %v1306_v12, %v1234_v3  ;;  %3653 = vmatpush1.bf16.msra.mxu1 %v5757_v61  ;;  %v1323_v26 = vmul.f32 %v1305_v5, %v1305_v5  ;;  %v5778_v59 = vcombine.high %v2861_v15, %v2862_v21  ;;  %v5777_v57 = vcombine.low %v2861_v15, %v2862_v21  ;;  %v2859_v27 = vld [vmem:[#allocation5 + $0x710] sm:$0xff] }
 0x194   :  { %3654 = vmatprep.subr.bf16.mxu1 %v5756_v60  ;;  %v2860_v29 = vld [vmem:[#allocation5 + $0x730] sm:$0xff] }
 0x195   :  { %v1324_v10 = vmul.f32 %v1307_v44, %v1307_v44  ;;  %v1331_v37 = vpack.c.bf16 %v1323_v26, %v1321_v11  ;;  %v5776_v31 = vcombine.high %v2859_v27, %v2860_v29  ;;  %v5775_v0 = vcombine.low %v2859_v27, %v2860_v29  ;;  %v2857_v58 = vld [vmem:[#allocation5 + $0x6d0] sm:$0xff] }
 0x196   :  { %v2858_v13 = vld [vmem:[#allocation5 + $0x6f0] sm:$0xff] }
 0x197   :  { %v1332_v51 = vpack.c.bf16 %v1324_v10, %v1322_v32  ;;  %3655 = vmatpush1.bf16.msra.mxu1 %v5755_v50  ;;  %v5774_v20 = vcombine.high %v2857_v58, %v2858_v13  ;;  %v5773_v22 = vcombine.low %v2857_v58, %v2858_v13  ;;  %v2855_v61 = vld [vmem:[#allocation5 + $0x690] sm:$0xff] }
 0x198   :  { %3656 = vmatprep.subr.bf16.mxu1 %v5754_v34  ;;  %v5772_v4 = vcombine.high %v2855_v61, %v2856_v2  ;;  %v5771_v1 = vcombine.low %v2855_v61, %v2856_v2  ;;  %v2854_v41 = vld [vmem:[#allocation5 + $0x670] sm:$0xff] }
 0x199   :  { %2794 = vmatprep.mubr.bf16.mxu1 %v1332_v51  ;;  %v5770_v3 = vcombine.high %v2853_v40, %v2854_v41  ;;  %v5769_v47 = vcombine.low %v2853_v40, %v2854_v41  ;;  %v2851_v60 = vld [vmem:[#allocation5 + $0x610] sm:$0xff] }
 0x19a   :  { %2795 = vmatmul.mubr.bf16.gmra.mxu1 %v1331_v37  ;;  %v2852_v44 = vld [vmem:[#allocation5 + $0x630] sm:$0xff] }
 0x19b   :  { %3657 = vmatpush1.bf16.msra.mxu1 %v5753_v52  ;;  %3676 = vmatprep.mubr.bf16.mxu1 %v6380_v63  ;;  %v5768_v50 = vcombine.high %v2851_v60, %v2852_v44  ;;  %v5767_v7 = vcombine.low %v2851_v60, %v2852_v44  ;;  %v2913_v32 = vld [vmem:[#allocation5 + $0xdd0] sm:$0xff] }
 0x19c   :  { %3658 = vmatprep.subr.bf16.mxu1 %v5752_v16  ;;  %v2914_v10 = vld [vmem:[#allocation5 + $0xdf0] sm:$0xff] }
 0x19d   :  { %v5830_v11 = vcombine.high %v2913_v32, %v2914_v10  ;;  %v5829_v52 = vcombine.low %v2913_v32, %v2914_v10  ;;  %v2911_v6 = vld [vmem:[#allocation5 + $0xd90] sm:$0xff] }
 0x19e   :  { %v2912_v37 = vld [vmem:[#allocation5 + $0xdb0] sm:$0xff] }
 0x19f   :  { %3659 = vmatpush1.bf16.msra.mxu1 %v5751_v17  ;;  %v5828_v28 = vcombine.high %v2911_v6, %v2912_v37  ;;  %v5827_v33 = vcombine.low %v2911_v6, %v2912_v37  ;;  %v2909_v42 = vld [vmem:[#allocation5 + $0xd50] sm:$0xff] }
 0x1a0   :  { %3660 = vmatprep.subr.bf16.mxu1 %v5782_v9  ;;  %v2908_v21 = vld [vmem:[#allocation5 + $0xd30] sm:$0xff] }
 0x1a1   :  { %v2905_v29 = vld [vmem:[#allocation5 + $0xcd0] sm:$0xff] }
 0x1a2   :  { %v2904_v2 = vld [vmem:[#allocation5 + $0xcb0] sm:$0xff] }
 0x1a3   :  { %3661 = vmatpush2.bf16.msra.mxu1 %v5781_v48  ;;  %v2910_v48 = vld [vmem:[#allocation5 + $0xd70] sm:$0xff] }
 0x1a4   :  { %3662 = vmatprep.subr.bf16.mxu1 %v5780_v56  ;;  %v5826_v55 = vcombine.high %v2909_v42, %v2910_v48  ;;  %v5825_v56 = vcombine.low %v2909_v42, %v2910_v48  ;;  %v2901_v41 = vld [vmem:[#allocation5 + $0xc50] sm:$0xff] }
 0x1a5   :  { %v2900_v10 = vld [vmem:[#allocation5 + $0xc30] sm:$0xff] }
 0x1a6   :  { %v2929_v37 = vld [vmem:[#allocation5 + $0xfd0] sm:$0xff] }
 0x1a7   :  { %3663 = vmatpush2.bf16.msra.mxu1 %v5779_v36  ;;  %v2907_v36 = vld [vmem:[#allocation5 + $0xd10] sm:$0xff] }
 0x1a8   :  { %3664 = vmatprep.subr.bf16.mxu1 %v5778_v59  ;;  %v5823_v27 = vcombine.low %v2907_v36, %v2908_v21 }
 0x1ab   :  { %3665 = vmatpush2.bf16.msra.mxu1 %v5777_v57  ;;  %v5824_v57 = vcombine.high %v2907_v36, %v2908_v21  ;;  %v2928_v21 = vld [vmem:[#allocation5 + $0xfb0] sm:$0xff] }
 0x1ac   :  { %3666 = vmatprep.subr.bf16.mxu1 %v5776_v31 }
 0x1af   :  { %3667 = vmatpush2.bf16.msra.mxu1 %v5775_v0  ;;  %v2906_v0 = vld [vmem:[#allocation5 + $0xcf0] sm:$0xff] }
 0x1b0   :  { %3668 = vmatprep.subr.bf16.mxu1 %v5774_v20  ;;  %v5822_v13 = vcombine.high %v2905_v29, %v2906_v0  ;;  %v5821_v20 = vcombine.low %v2905_v29, %v2906_v0  ;;  %v2925_v0 = vld [vmem:[#allocation5 + $0xf50] sm:$0xff] }
 0x1b2   :  { %v6631_v5 = vpop.f32.mrf.mxu0 }
 0x1b3   :  { %3669 = vmatpush2.bf16.msra.mxu1 %v5773_v22  ;;  %v2903_v22 = vld [vmem:[#allocation5 + $0xc90] sm:$0xff] }
 0x1b4   :  { %3670 = vmatprep.subr.bf16.mxu1 %v5772_v4  ;;  %v6633_v12 = vpop.f32.mrf.mxu1  ;;  %v6635_v53 = vpop.f32.mrf.mxu0  ;;  %v5819_v40 = vcombine.low %v2903_v22, %v2904_v2 }
 0x1b6   :  { %v6637_v26 = vpop.f32.mrf.mxu1  ;;  %v6639_v34 = vpop.f32.mrf.mxu0 }
 0x1b7   :  { %3671 = vmatpush2.bf16.msra.mxu1 %v5771_v1  ;;  %v5820_v1 = vcombine.high %v2903_v22, %v2904_v2 }
 0x1b8   :  { %3672 = vmatprep.subr.bf16.mxu1 %v5770_v3  ;;  %v6641_v51 = vpop.f32.mrf.mxu1  ;;  %v6643_v16 = vpop.f32.mrf.mxu0 }
 0x1ba   :  { %v6646_v17 = vpop.f32.mrf.mxu1  ;;  %v6649_v9 = vpop.f32.mrf.mxu0 }
 0x1bb   :  { %3673 = vmatpush2.bf16.msra.mxu1 %v5769_v47  ;;  %v2902_v47 = vld [vmem:[#allocation5 + $0xc70] sm:$0xff] }
 0x1bc   :  { %3674 = vmatprep.subr.bf16.mxu1 %v5768_v50  ;;  %v6651_v23 = vpop.f32.mrf.mxu1  ;;  %v6653_v15 = vpop.f32.mrf.mxu0  ;;  %v5818_v44 = vcombine.high %v2901_v41, %v2902_v47  ;;  %v5817_v50 = vcombine.low %v2901_v41, %v2902_v47  ;;  %v2924_v47 = vld [vmem:[#allocation5 + $0xf30] sm:$0xff] }
 0x1be   :  { %v6655_v59 = vpop.f32.mrf.mxu1  ;;  %v6659_v31 = vpop.f32.mrf.mxu0 }
 0x1bf   :  { %3675 = vmatpush2.bf16.msra.mxu1 %v5767_v7  ;;  %v2899_v7 = vld [vmem:[#allocation5 + $0xc10] sm:$0xff] }
 0x1c0   :  { %3790 = vmatprep.subr.bf16.mxu1 %v5830_v11  ;;  %v6661_v58 = vpop.f32.mrf.mxu1  ;;  %v6663_v61 = vpop.f32.mrf.mxu0  ;;  %v5815_v6 = vcombine.low %v2899_v7, %v2900_v10 }
 0x1c2   :  { %3677 = vmatmul.mubr.bf16.vlgmr.msra.gmra.mxu1 %v6390_v25  ;;  %v6665_v4 = vpop.f32.mrf.mxu1  ;;  %v6669_v3 = vpop.f32.mrf.mxu0 }
 0x1c3   :  { %3791 = vmatpush1.bf16.msra.mxu1 %v5829_v52  ;;  %3686 = vmatprep.mubr.bf16.mxu1 %v6395_v35  ;;  %v5816_v52 = vcombine.high %v2899_v7, %v2900_v10  ;;  %v2921_v10 = vld [vmem:[#allocation5 + $0xed0] sm:$0xff] }
 0x1c4   :  { %3792 = vmatprep.subr.bf16.mxu1 %v5828_v28  ;;  %v6671_v60 = vpop.f32.mrf.mxu1  ;;  %v6673_v32 = vpop.f32.mrf.mxu0 }
 0x1c6   :  { %v6675_v11 = vpop.f32.mrf.mxu1  ;;  %v6679_v28 = vpop.f32.mrf.mxu0 }
 0x1c7   :  { %3793 = vmatpush1.bf16.msra.mxu1 %v5827_v33  ;;  %v2930_v33 = vld [vmem:[#allocation5 + $0xff0] sm:$0xff] }
 0x1c8   :  { %3794 = vmatprep.subr.bf16.mxu1 %v5826_v55  ;;  %v6681_v42 = vpop.f32.mrf.mxu1  ;;  %v5846_v48 = vcombine.high %v2929_v37, %v2930_v33  ;;  %v5845_v55 = vcombine.low %v2929_v37, %v2930_v33  ;;  %v6683_v36 = vpop.f32.mrf.mxu0 }
 0x1ca   :  { %3687 = vmatmul.mubr.bf16.gmra.mxu1 %v6402_v46 }
 0x1cb   :  { %3795 = vmatpush1.bf16.msra.mxu1 %v5825_v56  ;;  %3696 = vmatprep.mubr.bf16.mxu1 %v6407_v62  ;;  %v2927_v56 = vld [vmem:[#allocation5 + $0xf90] sm:$0xff] }
 0x1cc   :  { %3796 = vmatprep.subr.bf16.mxu1 %v5824_v57  ;;  %v6685_v57 = vpop.f32.mrf.mxu1  ;;  %v5843_v29 = vcombine.low %v2927_v56, %v2928_v21 }
 0x1ce   :  { %v6689_v22 = vpop.f32.mrf.mxu1 }
 0x1cf   :  { %3797 = vmatpush1.bf16.msra.mxu1 %v5823_v27  ;;  %v5844_v27 = vcombine.high %v2927_v56, %v2928_v21  ;;  %v2920_v21 = vld [vmem:[#allocation5 + $0xeb0] sm:$0xff] }
 0x1d0   :  { %3798 = vmatprep.subr.bf16.mxu1 %v5822_v13  ;;  %v6687_v13 = vpop.f32.mrf.mxu0 }
 0x1d2   :  { %3697 = vmatmul.mubr.bf16.gmra.mxu1 %v6414_v14  ;;  %v6691_v41 = vpop.f32.mrf.mxu0 }
 0x1d3   :  { %3799 = vmatpush1.bf16.msra.mxu1 %v5821_v20  ;;  %3706 = vmatprep.mubr.bf16.mxu1 %v6419_v24  ;;  %v2926_v20 = vld [vmem:[#allocation5 + $0xf70] sm:$0xff] }
 0x1d4   :  { %3800 = vmatprep.subr.bf16.mxu1 %v5820_v1  ;;  %v5842_v2 = vcombine.high %v2925_v0, %v2926_v20  ;;  %v5841_v1 = vcombine.low %v2925_v0, %v2926_v20  ;;  %v2243_v20 = vadd.f32 %v6637_v26, %v6635_v53  ;;  %v2247_v53 = vadd.f32 %v6646_v17, %v6643_v16 }
 0x1d5   :  { %v2251_v17 = vadd.f32 %v6651_v23, %v6649_v9 }
 0x1d7   :  { %3801 = vmatpush1.bf16.msra.mxu1 %v5819_v40  ;;  %v2923_v40 = vld [vmem:[#allocation5 + $0xf10] sm:$0xff] }
 0x1d8   :  { %3802 = vmatprep.subr.bf16.mxu1 %v5818_v44  ;;  %v6693_v44 = vpop.f32.mrf.mxu1  ;;  %v5839_v7 = vcombine.low %v2923_v40, %v2924_v47 }
 0x1da   :  { %3707 = vmatmul.mubr.bf16.gmra.mxu1 %v6434_v38  ;;  %v6697_v37 = vpop.f32.mrf.mxu1 }
 0x1db   :  { %3803 = vmatpush1.bf16.msra.mxu1 %v5817_v50  ;;  %3822 = vmatprep.mubr.bf16.mxu1 %v6443_v49  ;;  %v5840_v50 = vcombine.high %v2923_v40, %v2924_v47  ;;  %v2917_v40 = vld [vmem:[#allocation5 + $0xe50] sm:$0xff]  ;;  %v2241_v47 = vadd.f32 %v6633_v12, %v6631_v5 }
 0x1dc   :  { %3804 = vmatprep.subr.bf16.mxu1 %v5816_v52  ;;  %v6695_v52 = vpop.f32.mrf.mxu0  ;;  %v2916_v12 = vld [vmem:[#allocation5 + $0xe30] sm:$0xff] }
 0x1de   :  { %v6699_v56 = vpop.f32.mrf.mxu0 }
 0x1df   :  { %3805 = vmatpush1.bf16.msra.mxu1 %v5815_v6  ;;  %v2922_v6 = vld [vmem:[#allocation5 + $0xef0] sm:$0xff] }
 0x1e0   :  { %3806 = vmatprep.subr.bf16.mxu1 %v5846_v48  ;;  %v5838_v33 = vcombine.high %v2921_v10, %v2922_v6  ;;  %v5837_v48 = vcombine.low %v2921_v10, %v2922_v6  ;;  %v2245_v10 = vadd.f32 %v6641_v51, %v6639_v34 }
 0x1e3   :  { %3807 = vmatpush2.bf16.msra.mxu1 %v5845_v55  ;;  %v2919_v55 = vld [vmem:[#allocation5 + $0xe90] sm:$0xff] }
 0x1e4   :  { %3808 = vmatprep.subr.bf16.mxu1 %v5844_v27  ;;  %v6701_v27 = vpop.f32.mrf.mxu1 }
 0x1e7   :  { %3809 = vmatpush2.bf16.msra.mxu1 %v5843_v29  ;;  %v5836_v29 = vcombine.high %v2919_v55, %v2920_v21 }
 0x1e8   :  { %3810 = vmatprep.subr.bf16.mxu1 %v5842_v2 }
 0x1eb   :  { %3811 = vmatpush2.bf16.msra.mxu1 %v5841_v1  ;;  %v5835_v1 = vcombine.low %v2919_v55, %v2920_v21  ;;  %v2915_v21 = vld [vmem:[#allocation5 + $0xe10] sm:$0xff] }
 0x1ec   :  { %3812 = vmatprep.subr.bf16.mxu1 %v5840_v50 }
 0x1ef   :  { %3813 = vmatpush2.bf16.msra.mxu1 %v5839_v7  ;;  %v2918_v7 = vld [vmem:[#allocation5 + $0xe70] sm:$0xff] }
 0x1f0   :  { %3814 = vmatprep.subr.bf16.mxu1 %v5838_v33  ;;  %v5834_v30 = vcombine.high %v2917_v40, %v2918_v7  ;;  %v5833_v55 = vcombine.low %v2917_v40, %v2918_v7  ;;  %v2255_v40 = vadd.f32 %v6661_v58, %v6659_v31 }
 0x1f2   :  { %v2313_v0 = vpop.f32.mrf.mxu0 }
 0x1f3   :  { %3815 = vmatpush2.bf16.msra.mxu1 %v5837_v48  ;;  %v2314_v49 = vadd.f32 %v2313_v0, %v2241_v47  ;;  %v2253_v0 = vadd.f32 %v6655_v59, %v6653_v15 }
 0x1f4   :  { %v2386_v2 = vpop.f32.mrf.mxu1  ;;  %v2315_v50 = vpop.f32.mrf.mxu0  ;;  %3816 = vmatprep.subr.bf16.mxu1 %v5836_v29 }
 0x1f5   :  { %v2316_v6 = vadd.f32 %v2315_v50, %v2243_v20  ;;  %v2387_v51 = vadd.f32 %v2386_v2, %v2314_v49  ;;  %v5832_v50 = vcombine.high %v2915_v21, %v2916_v12 }
 0x1f6   :  { %v2388_v33 = vpop.f32.mrf.mxu1  ;;  %v2317_v38 = vpop.f32.mrf.mxu0 }
 0x1f7   :  { %v2318_v26 = vadd.f32 %v2317_v38, %v2245_v10  ;;  %3817 = vmatpush2.bf16.msra.mxu1 %v5835_v1  ;;  %v2389_v29 = vadd.f32 %v2388_v33, %v2316_v6  ;;  %v5831_v38 = vcombine.low %v2915_v21, %v2916_v12  ;;  %v2815_v6 = vld [vmem:[#allocation5 + $0x190] sm:$0xff]  ;;  %v2425_v15 = vmul.f32 %v2387_v51, %v2387_v51 }
 0x1f8   :  { %v2390_v48 = vpop.f32.mrf.mxu1  ;;  %v2319_v5 = vpop.f32.mrf.mxu0  ;;  %3818 = vmatprep.subr.bf16.mxu1 %v5834_v30  ;;  %v2816_v33 = vld [vmem:[#allocation5 + $0x1b0] sm:$0xff] }
 0x1f9   :  { %v2391_v24 = vadd.f32 %v2390_v48, %v2318_v26  ;;  %v2320_v14 = vadd.f32 %v2319_v5, %v2247_v53  ;;  %v2426_v7 = vmul.f32 %v2389_v29, %v2389_v29  ;;  %v2257_v53 = vadd.f32 %v6665_v4, %v6663_v61  ;;  %v2813_v12 = vld [vmem:[#allocation5 + $0x150] sm:$0xff] }
 0x1fa   :  { %v2392_v34 = vpop.f32.mrf.mxu1  ;;  %v2323_v20 = vpop.f32.mrf.mxu0  ;;  %v2814_v29 = vld [vmem:[#allocation5 + $0x170] sm:$0xff]  ;;  %v2263_v61 = vadd.f32 %v6675_v11, %v6673_v32 }
 0x1fb   :  { %v2393_v47 = vadd.f32 %v2392_v34, %v2320_v14  ;;  %3819 = vmatpush2.bf16.msra.mxu1 %v5833_v55  ;;  %v2427_v1 = vmul.f32 %v2391_v24, %v2391_v24  ;;  %v2324_v14 = vadd.f32 %v2323_v20, %v2251_v17  ;;  %v5732_v55 = vcombine.high %v2815_v6, %v2816_v33 }
 0x1fc   :  { %v2396_v16 = vpop.f32.mrf.mxu1  ;;  %v2325_v30 = vpop.f32.mrf.mxu0  ;;  %3820 = vmatprep.subr.bf16.mxu1 %v5832_v50  ;;  %v7072_v20 = vcombine.low %v6606_v45, %v6608_v18  ;;  %v5730_v17 = vcombine.high %v2813_v12, %v2814_v29  ;;  %v2811_v45 = vld [vmem:[#allocation5 + $0x110] sm:$0xff] }
 0x1fd   :  { %v2428_v49 = vmul.f32 %v2393_v47, %v2393_v47  ;;  %v2326_v2 = vadd.f32 %v2325_v30, %v2253_v0  ;;  %v2441_v23 = vpack.c.bf16 %v2427_v1, %v2425_v15  ;;  %v2397_v34 = vadd.f32 %v2396_v16, %v2324_v14  ;;  %v2812_v18 = vld [vmem:[#allocation5 + $0x130] sm:$0xff] }
 0x1fe   :  { %v2398_v10 = vpop.f32.mrf.mxu1  ;;  %v2327_v59 = vpop.f32.mrf.mxu0  ;;  %v5731_v0 = vcombine.low %v2815_v6, %v2816_v33  ;;  %v2261_v47 = vadd.f32 %v6671_v60, %v6669_v3  ;;  %v2265_v1 = vadd.f32 %v6681_v42, %v6679_v28  ;;  %v5729_v33 = vcombine.low %v2813_v12, %v2814_v29 }
 0x1ff   :  { %v2442_v26 = vpack.c.bf16 %v2428_v49, %v2426_v7  ;;  %v2328_v9 = vadd.f32 %v2327_v59, %v2255_v40  ;;  %3821 = vmatpush2.bf16.msra.mxu1 %v5831_v38  ;;  %v2399_v31 = vadd.f32 %v2398_v10, %v2326_v2  ;;  %v2429_v7 = vmul.f32 %v2397_v34, %v2397_v34 }
 0x200   :  { %v2400_v24 = vpop.f32.mrf.mxu1  ;;  %v2329_v48 = vpop.f32.mrf.mxu0  ;;  %v2267_v10 = vadd.f32 %v6685_v57, %v6683_v36  ;;  %v5728_v28 = vcombine.high %v2811_v45, %v2812_v18  ;;  %v2273_v36 = vadd.f32 %v6693_v44, %v6691_v41  ;;  %v2275_v29 = vadd.f32 %v6697_v37, %v6695_v52  ;;  %v2807_v44 = vld [vmem:[#allocation5 + $0x90] sm:$0xff] }
 0x201   :  { %v2330_v58 = vadd.f32 %v2329_v48, %v2257_v53  ;;  %v2401_v21 = vadd.f32 %v2400_v24, %v2328_v9  ;;  %2609 = vmatprep.mubr.bf16.mxu0 %v2442_v26  ;;  %v2430_v32 = vmul.f32 %v2399_v31, %v2399_v31  ;;  %v2809_v9 = vld [vmem:[#allocation5 + $0xd0] sm:$0xff]  ;;  %v5727_v31 = vcombine.low %v2811_v45, %v2812_v18 }
 0x202   :  { %v2402_v5 = vpop.f32.mrf.mxu1  ;;  %v2333_v51 = vpop.f32.mrf.mxu0  ;;  %2610 = vmatmul.mubr.bf16.vlgmr.msra.gmra.mxu0 %v2441_v23  ;;  %3823 = vmatmul.mubr.bf16.vlgmr.msra.gmra.mxu1 %v6454_v39  ;;  %v2810_v24 = vld [vmem:[#allocation5 + $0xf0] sm:$0xff] }
 0x203   :  { %v2403_v4 = vadd.f32 %v2402_v5, %v2330_v58  ;;  %3572 = vmatpush1.bf16.msra.mxu0 %v7072_v20  ;;  %3832 = vmatprep.mubr.bf16.mxu1 %v6459_v54  ;;  %v2431_v16 = vmul.f32 %v2401_v21, %v2401_v21  ;;  %v2334_v49 = vadd.f32 %v2333_v51, %v2261_v47  ;;  %v2806_v45 = vld [vmem:[#allocation5 + $0x70] sm:$0xff] }
 0x204   :  { %v2406_v50 = vpop.f32.mrf.mxu1  ;;  %v2335_v38 = vpop.f32.mrf.mxu0  ;;  %3573 = vmatprep.subr.bf16.mxu0 %v5732_v55  ;;  %v2271_v58 = vadd.f32 %v6689_v22, %v6687_v13  ;;  %v5726_v12 = vcombine.high %v2809_v9, %v2810_v24  ;;  %v2277_v47 = vadd.f32 %v6701_v27, %v6699_v56 }
 0x205   :  { %v2432_v11 = vmul.f32 %v2403_v4, %v2403_v4  ;;  %v2336_v30 = vadd.f32 %v2335_v38, %v2263_v61  ;;  %v2443_v15 = vpack.c.bf16 %v2431_v16, %v2429_v7  ;;  %v2407_v23 = vadd.f32 %v2406_v50, %v2334_v49  ;;  %v2808_v4 = vld [vmem:[#allocation5 + $0xb0] sm:$0xff]  ;;  %v7073_v7 = vld [vmem:[#allocation36_spill] sm:$0xff] }
 0x206   :  { %v2408_v40 = vpop.f32.mrf.mxu1  ;;  %v2337_v2 = vpop.f32.mrf.mxu0  ;;  %v5725_v38 = vcombine.low %v2809_v9, %v2810_v24  ;;  %v5724_v52 = vcombine.high %v2807_v44, %v2808_v4  ;;  %v5723_v27 = vcombine.low %v2807_v44, %v2808_v4  ;;  %v7075_v24 = vld [vmem:[#allocation12_spill] sm:$0xff] }
 0x207   :  { %v2444_v3 = vpack.c.bf16 %v2432_v11, %v2430_v32  ;;  %v2338_v60 = vadd.f32 %v2337_v2, %v2265_v1  ;;  %3574 = vmatpush1.bf16.msra.mxu0 %v5731_v0  ;;  %v2409_v42 = vadd.f32 %v2408_v40, %v2336_v30  ;;  %v2433_v20 = vmul.f32 %v2407_v23, %v2407_v23  ;;  %v2805_v40 = vld [vmem:[#allocation5 + $0x50] sm:$0xff] }
 0x208   :  { %v2410_v6 = vpop.f32.mrf.mxu1  ;;  %v2339_v14 = vpop.f32.mrf.mxu0  ;;  %3575 = vmatprep.subr.bf16.mxu0 %v5730_v17  ;;  %v5722_v2 = vcombine.high %v2805_v40, %v2806_v45 }
 0x209   :  { %v2340_v59 = vadd.f32 %v2339_v14, %v2267_v10  ;;  %v2411_v53 = vadd.f32 %v2410_v6, %v2338_v60  ;;  %2617 = vmatprep.mubr.bf16.mxu0 %v2444_v3  ;;  %v2434_v34 = vmul.f32 %v2409_v42, %v2409_v42  ;;  %v2803_v60 = vld [vmem:[#allocation5 + $0x10] sm:$0xff]  ;;  %v5721_v14 = vcombine.low %v2805_v40, %v2806_v45 }
 0x20a   :  { %v2412_v26 = vpop.f32.mrf.mxu1  ;;  %v2343_v48 = vpop.f32.mrf.mxu0  ;;  %2618 = vmatmul.mubr.bf16.gmra.mxu0 %v2443_v15  ;;  %3833 = vmatmul.mubr.bf16.gmra.mxu1 %v6466_v8  ;;  %v2804_v6 = vld [vmem:[#allocation5 + $0x30] sm:$0xff] }
 0x20b   :  { %v2413_v57 = vadd.f32 %v2412_v26, %v2340_v59  ;;  %3576 = vmatpush1.bf16.msra.mxu0 %v5729_v33  ;;  %3842 = vmatprep.mubr.bf16.mxu1 %v6471_v19  ;;  %v2435_v21 = vmul.f32 %v2411_v53, %v2411_v53  ;;  %v2344_v50 = vadd.f32 %v2343_v48, %v2271_v58  ;;  %v2833_v59 = vld [vmem:[#allocation5 + $0x3d0] sm:$0xff] }
 0x20c   :  { %v2416_v55 = vpop.f32.mrf.mxu1  ;;  %v2345_v5 = vpop.f32.mrf.mxu0  ;;  %3577 = vmatprep.subr.bf16.mxu0 %v5728_v28  ;;  %v5720_v42 = vcombine.high %v2803_v60, %v2804_v6  ;;  %v2834_v53 = vld [vmem:[#allocation5 + $0x3f0] sm:$0xff]  ;;  %v5719_v9 = vcombine.low %v2803_v60, %v2804_v6 }
 0x20d   :  { %v2436_v51 = vmul.f32 %v2413_v57, %v2413_v57  ;;  %v2346_v61 = vadd.f32 %v2345_v5, %v2273_v36  ;;  %v2445_v17 = vpack.c.bf16 %v2435_v21, %v2433_v20  ;;  %v2417_v18 = vadd.f32 %v2416_v55, %v2344_v50  ;;  %v7074_v26 = vld [vmem:[#allocation38_spill] sm:$0xff] }
 0x20e   :  { %v2418_v41 = vpop.f32.mrf.mxu1  ;;  %v2347_v0 = vpop.f32.mrf.mxu0  ;;  %v5750_v23 = vcombine.high %v2833_v59, %v2834_v53  ;;  %v2831_v48 = vld [vmem:[#allocation5 + $0x390] sm:$0xff]  ;;  %v5749_v57 = vcombine.low %v2833_v59, %v2834_v53 }
 0x20f   :  { %v2446_v13 = vpack.c.bf16 %v2436_v51, %v2434_v34  ;;  %v2348_v22 = vadd.f32 %v2347_v0, %v2275_v29  ;;  %3578 = vmatpush1.bf16.msra.mxu0 %v5727_v31  ;;  %v2419_v37 = vadd.f32 %v2418_v41, %v2346_v61  ;;  %v2437_v33 = vmul.f32 %v2417_v18, %v2417_v18  ;;  %v2832_v36 = vld [vmem:[#allocation5 + $0x3b0] sm:$0xff] }
 0x210   :  { %v2420_v16 = vpop.f32.mrf.mxu1  ;;  %v2349_v1 = vpop.f32.mrf.mxu0  ;;  %3579 = vmatprep.subr.bf16.mxu0 %v5726_v12  ;;  %v5748_v55 = vcombine.high %v2831_v48, %v2832_v36  ;;  %v2829_v31 = vld [vmem:[#allocation5 + $0x350] sm:$0xff]  ;;  %v5747_v21 = vcombine.low %v2831_v48, %v2832_v36 }
 0x211   :  { %v2350_v32 = vadd.f32 %v2349_v1, %v2277_v47  ;;  %v2421_v11 = vadd.f32 %v2420_v16, %v2348_v22  ;;  %2625 = vmatprep.mubr.bf16.mxu0 %v2446_v13  ;;  %v2438_v10 = vmul.f32 %v2419_v37, %v2419_v37  ;;  %v2830_v58 = vld [vmem:[#allocation5 + $0x370] sm:$0xff] }
 0x212   :  { %v2422_v30 = vpop.f32.mrf.mxu1  ;;  %2626 = vmatmul.mubr.bf16.gmra.mxu0 %v2445_v17  ;;  %3843 = vmatmul.mubr.bf16.gmra.mxu1 %v6478_v43  ;;  %v5746_v5 = vcombine.high %v2829_v31, %v2830_v58  ;;  %v2827_v12 = vld [vmem:[#allocation5 + $0x310] sm:$0xff]  ;;  %v5745_v34 = vcombine.low %v2829_v31, %v2830_v58  ;;  %v7079_v58 = vld [vmem:[#allocation16_spill] sm:$0xff] }
 0x213   :  { %v2423_v56 = vadd.f32 %v2422_v30, %v2350_v32  ;;  %3580 = vmatpush1.bf16.msra.mxu0 %v5725_v38  ;;  %3852 = vmatprep.mubr.bf16.mxu1 %v7073_v7  ;;  %v2439_v49 = vmul.f32 %v2421_v11, %v2421_v11  ;;  %v2828_v29 = vld [vmem:[#allocation5 + $0x330] sm:$0xff] }
 0x214   :  { %3581 = vmatprep.subr.bf16.mxu0 %v5724_v52  ;;  %v5744_v51 = vcombine.high %v2827_v12, %v2828_v29  ;;  %v2825_v61 = vld [vmem:[#allocation5 + $0x2d0] sm:$0xff]  ;;  %v5743_v44 = vcombine.low %v2827_v12, %v2828_v29 }
 0x215   :  { %v2440_v3 = vmul.f32 %v2423_v56, %v2423_v56  ;;  %v2447_v28 = vpack.c.bf16 %v2439_v49, %v2437_v33  ;;  %v2826_v41 = vld [vmem:[#allocation5 + $0x2f0] sm:$0xff] }
 0x216   :  { %v5742_v4 = vcombine.high %v2825_v61, %v2826_v41  ;;  %v2823_v20 = vld [vmem:[#allocation5 + $0x290] sm:$0xff]  ;;  %v5741_v0 = vcombine.low %v2825_v61, %v2826_v41 }
 0x217   :  { %v2448_v15 = vpack.c.bf16 %v2440_v3, %v2438_v10  ;;  %3582 = vmatpush1.bf16.msra.mxu0 %v5723_v27  ;;  %v2824_v50 = vld [vmem:[#allocation5 + $0x2b0] sm:$0xff]  ;;  %v7076_v10 = vld [vmem:[#allocation13_spill] sm:$0xff] }
 0x218   :  { %3583 = vmatprep.subr.bf16.mxu0 %v5722_v2  ;;  %v5740_v47 = vcombine.high %v2823_v20, %v2824_v50  ;;  %v2821_v13 = vld [vmem:[#allocation5 + $0x250] sm:$0xff]  ;;  %v5739_v16 = vcombine.low %v2823_v20, %v2824_v50 }
 0x219   :  { %2633 = vmatprep.mubr.bf16.mxu0 %v2448_v15  ;;  %v2822_v22 = vld [vmem:[#allocation5 + $0x270] sm:$0xff] }
 0x21a   :  { %2634 = vmatmul.mubr.bf16.gmra.mxu0 %v2447_v28  ;;  %3853 = vmatmul.mubr.bf16.gmra.mxu1 %v7074_v26  ;;  %v5738_v38 = vcombine.high %v2821_v13, %v2822_v22  ;;  %v2819_v17 = vld [vmem:[#allocation5 + $0x210] sm:$0xff]  ;;  %v5737_v52 = vcombine.low %v2821_v13, %v2822_v22  ;;  %v7081_v22 = vld [vmem:[#allocation19_spill] sm:$0xff] }
 0x21b   :  { %3584 = vmatpush1.bf16.msra.mxu0 %v5721_v14  ;;  %3603 = vmatprep.mubr.bf16.mxu0 %v7075_v24  ;;  %v2820_v1 = vld [vmem:[#allocation5 + $0x230] sm:$0xff] }
 0x21c   :  { %3585 = vmatprep.subr.bf16.mxu0 %v5720_v42  ;;  %4888 = vmatprep.mubr.bf16.mxu1 %v7075_v24  ;;  %v5736_v37 = vcombine.high %v2819_v17, %v2820_v1  ;;  %v2881_v32 = vld [vmem:[#allocation5 + $0x9d0] sm:$0xff]  ;;  %v5735_v30 = vcombine.low %v2819_v17, %v2820_v1 }
 0x21d   :  { %v2882_v11 = vld [vmem:[#allocation5 + $0x9f0] sm:$0xff] }
 0x21e   :  { %v5798_v40 = vcombine.high %v2881_v32, %v2882_v11  ;;  %v2879_v45 = vld [vmem:[#allocation5 + $0x990] sm:$0xff]  ;;  %v5797_v56 = vcombine.low %v2881_v32, %v2882_v11 }
 0x21f   :  { %3586 = vmatpush1.bf16.msra.mxu0 %v5719_v9  ;;  %v2880_v18 = vld [vmem:[#allocation5 + $0x9b0] sm:$0xff] }
 0x220   :  { %3587 = vmatprep.subr.bf16.mxu0 %v5750_v23  ;;  %v5796_v27 = vcombine.high %v2879_v45, %v2880_v18  ;;  %v2877_v49 = vld [vmem:[#allocation5 + $0x950] sm:$0xff]  ;;  %v5795_v60 = vcombine.low %v2879_v45, %v2880_v18 }
 0x221   :  { %v2878_v2 = vld [vmem:[#allocation5 + $0x970] sm:$0xff] }
 0x222   :  { %v7077_v6 = vld [vmem:[#allocation14_spill] sm:$0xff]  ;;  %v5794_v15 = vcombine.high %v2877_v49, %v2878_v2  ;;  %v5793_v53 = vcombine.low %v2877_v49, %v2878_v2  ;;  %v7083_v2 = vld [vmem:[#allocation23_spill] sm:$0xff] }
 0x223   :  { %3588 = vmatpush2.bf16.msra.mxu0 %v5749_v57  ;;  %v2875_v28 = vld [vmem:[#allocation5 + $0x910] sm:$0xff] }
 0x224   :  { %3589 = vmatprep.subr.bf16.mxu0 %v5748_v55  ;;  %v2876_v42 = vld [vmem:[#allocation5 + $0x930] sm:$0xff]  ;;  %v7078_v55 = vld [vmem:[#allocation15_spill] sm:$0xff] }
 0x225   :  { %v5792_v24 = vcombine.high %v2875_v28, %v2876_v42  ;;  %v2873_v48 = vld [vmem:[#allocation5 + $0x8d0] sm:$0xff]  ;;  %v5791_v31 = vcombine.low %v2875_v28, %v2876_v42 }
 0x226   :  { %v2874_v36 = vld [vmem:[#allocation5 + $0x8f0] sm:$0xff] }
 0x227   :  { %3590 = vmatpush2.bf16.msra.mxu0 %v5747_v21  ;;  %v2871_v29 = vld [vmem:[#allocation5 + $0x890] sm:$0xff]  ;;  %v5789_v61 = vcombine.low %v2873_v48, %v2874_v36 }
 0x228   :  { %3591 = vmatprep.subr.bf16.mxu0 %v5746_v5  ;;  %v5790_v5 = vcombine.high %v2873_v48, %v2874_v36  ;;  %v2869_v20 = vld [vmem:[#allocation5 + $0x850] sm:$0xff] }
 0x229   :  { %v2870_v50 = vld [vmem:[#allocation5 + $0x870] sm:$0xff] }
 0x22a   :  { %v2867_v1 = vld [vmem:[#allocation5 + $0x810] sm:$0xff]  ;;  %v5785_v32 = vcombine.low %v2869_v20, %v2870_v50 }
 0x22b   :  { %3592 = vmatpush2.bf16.msra.mxu0 %v5745_v34  ;;  %v2872_v34 = vld [vmem:[#allocation5 + $0x8b0] sm:$0xff] }
 0x22c   :  { %3593 = vmatprep.subr.bf16.mxu0 %v5744_v51  ;;  %v5787_v13 = vcombine.low %v2871_v29, %v2872_v34  ;;  %v2897_v45 = vld [vmem:[#allocation5 + $0xbd0] sm:$0xff] }
 0x22d   :  { %v2898_v18 = vld [vmem:[#allocation5 + $0xbf0] sm:$0xff] }
 0x22e   :  { %v2896_v28 = vld [vmem:[#allocation5 + $0xbb0] sm:$0xff] }
 0x22f   :  { %3594 = vmatpush2.bf16.msra.mxu0 %v5743_v44  ;;  %v5788_v44 = vcombine.high %v2871_v29, %v2872_v34  ;;  %v2893_v48 = vld [vmem:[#allocation5 + $0xb50] sm:$0xff] }
 0x230   :  { %3595 = vmatprep.subr.bf16.mxu0 %v5742_v4  ;;  %v2894_v36 = vld [vmem:[#allocation5 + $0xb70] sm:$0xff] }
 0x231   :  { %v5809_v29 = vcombine.low %v2893_v48, %v2894_v36 }
 0x233   :  { %3596 = vmatpush2.bf16.msra.mxu0 %v5741_v0 }
 0x234   :  { %3597 = vmatprep.subr.bf16.mxu0 %v5740_v47  ;;  %v7080_v47 = vld [vmem:[#allocation17_spill] sm:$0xff] }
 0x237   :  { %3598 = vmatpush2.bf16.msra.mxu0 %v5739_v16 }
 0x238   :  { %3599 = vmatprep.subr.bf16.mxu0 %v5738_v38  ;;  %v5786_v38 = vcombine.high %v2869_v20, %v2870_v50  ;;  %v2887_v20 = vld [vmem:[#allocation5 + $0xa90] sm:$0xff] }
 0x239   :  { %v2888_v50 = vld [vmem:[#allocation5 + $0xab0] sm:$0xff] }
 0x23b   :  { %3600 = vmatpush2.bf16.msra.mxu0 %v5737_v52  ;;  %v2868_v52 = vld [vmem:[#allocation5 + $0x830] sm:$0xff] }
 0x23c   :  { %3601 = vmatprep.subr.bf16.mxu0 %v5736_v37  ;;  %v5783_v49 = vcombine.low %v2867_v1, %v2868_v52 }
 0x23f   :  { %3602 = vmatpush2.bf16.msra.mxu0 %v5735_v30  ;;  %v5784_v30 = vcombine.high %v2867_v1, %v2868_v52  ;;  %v5803_v1 = vcombine.low %v2887_v20, %v2888_v50 }
 0x240   :  { %3717 = vmatprep.subr.bf16.mxu0 %v5798_v40 }
 0x242   :  { %3604 = vmatmul.mubr.bf16.vlgmr.msra.gmra.mxu0 %v7076_v10  ;;  %v6063_v3 = vpop.f32.mrf.mxu1 }
 0x243   :  { %3718 = vmatpush1.bf16.msra.mxu0 %v5797_v56  ;;  %3613 = vmatprep.mubr.bf16.mxu0 %v7077_v6 }
 0x244   :  { %v6064_v33 = vpop.f32.mrf.mxu1  ;;  %3719 = vmatprep.subr.bf16.mxu0 %v5796_v27  ;;  %v7082_v27 = vld [vmem:[#allocation21_spill] sm:$0xff] }
 0x245   :  { %v6749_v14 = vadd.f32 %v6064_v33, %v6063_v3 }
 0x246   :  { %v6066_v59 = vpop.f32.mrf.mxu1 }
 0x247   :  { %3720 = vmatpush1.bf16.msra.mxu0 %v5795_v60  ;;  %v5814_v60 = vcombine.high %v2897_v45, %v2898_v18 }
 0x248   :  { %v6067_v9 = vpop.f32.mrf.mxu1  ;;  %3721 = vmatprep.subr.bf16.mxu0 %v5794_v15  ;;  %v2895_v15 = vld [vmem:[#allocation5 + $0xb90] sm:$0xff] }
 0x249   :  { %v6751_v23 = vadd.f32 %v6067_v9, %v6066_v59  ;;  %v5813_v59 = vcombine.low %v2897_v45, %v2898_v18  ;;  %v5812_v9 = vcombine.high %v2895_v15, %v2896_v28  ;;  %v7084_v18 = vld [vmem:[#allocation25_spill] sm:$0xff] }
 0x24a   :  { %v6069_v57 = vpop.f32.mrf.mxu1  ;;  %3614 = vmatmul.mubr.bf16.gmra.mxu0 %v7078_v55 }
 0x24b   :  { %3722 = vmatpush1.bf16.msra.mxu0 %v5793_v53  ;;  %3623 = vmatprep.mubr.bf16.mxu0 %v7079_v58 }
 0x24c   :  { %v6070_v21 = vpop.f32.mrf.mxu1  ;;  %3723 = vmatprep.subr.bf16.mxu0 %v5792_v24 }
 0x24d   :  { %v6755_v12 = vadd.f32 %v6070_v21, %v6069_v57  ;;  %v5811_v57 = vcombine.low %v2895_v15, %v2896_v28  ;;  %v2891_v21 = vld [vmem:[#allocation5 + $0xb10] sm:$0xff]  ;;  %v7086_v15 = vld [vmem:[#allocation29_spill] sm:$0xff] }
 0x24e   :  { %v6072_v51 = vpop.f32.mrf.mxu1 }
 0x24f   :  { %3724 = vmatpush1.bf16.msra.mxu0 %v5791_v31  ;;  %v5810_v31 = vcombine.high %v2893_v48, %v2894_v36  ;;  %v4098_v48 = vld [vmem:[#allocation5 + $0x158] sm:$0xff] }
 0x250   :  { %v6073_v41 = vpop.f32.mrf.mxu1  ;;  %3725 = vmatprep.subr.bf16.mxu0 %v5790_v5  ;;  %v2892_v5 = vld [vmem:[#allocation5 + $0xb30] sm:$0xff]  ;;  %v4099_v36 = vld [vmem:[#allocation5 + $0x178] sm:$0xff] }
 0x251   :  { %v6757_v4 = vadd.f32 %v6073_v41, %v6072_v51  ;;  %v5808_v34 = vcombine.high %v2891_v21, %v2892_v5  ;;  %v2889_v51 = vld [vmem:[#allocation5 + $0xad0] sm:$0xff]  ;;  %v5807_v41 = vcombine.low %v2891_v21, %v2892_v5  ;;  %v4096_v21 = vld [vmem:[#allocation5 + $0x118] sm:$0xff] }
 0x252   :  { %v6075_v0 = vpop.f32.mrf.mxu1  ;;  %3624 = vmatmul.mubr.bf16.gmra.mxu0 %v7080_v47  ;;  %v4097_v5 = vld [vmem:[#allocation5 + $0x138] sm:$0xff] }
 0x253   :  { %3726 = vmatpush1.bf16.msra.mxu0 %v5789_v61  ;;  %3633 = vmatprep.mubr.bf16.mxu0 %v7081_v22  ;;  %v2890_v61 = vld [vmem:[#allocation5 + $0xaf0] sm:$0xff] }
 0x254   :  { %v6076_v16 = vpop.f32.mrf.mxu1  ;;  %3727 = vmatprep.subr.bf16.mxu0 %v5788_v44  ;;  %v5806_v44 = vcombine.high %v2889_v51, %v2890_v61 }
 0x255   :  { %v6761_v17 = vadd.f32 %v6076_v16, %v6075_v0  ;;  %v5805_v0 = vcombine.low %v2889_v51, %v2890_v61  ;;  %v2885_v16 = vld [vmem:[#allocation5 + $0xa50] sm:$0xff]  ;;  %v5872_v51 = vcombine.high %v4096_v21, %v4097_v5  ;;  %v7089_v61 = vld [vmem:[#allocation35_spill] sm:$0xff] }
 0x256   :  { %v6078_v37 = vpop.f32.mrf.mxu1 }
 0x257   :  { %3728 = vmatpush1.bf16.msra.mxu0 %v5787_v13  ;;  %v5804_v13 = vcombine.high %v2887_v20, %v2888_v50  ;;  %v5871_v20 = vcombine.low %v4096_v21, %v4097_v5  ;;  %v6216_v21 = vld [vmem:[#allocation7 + $0x120] sm:$0xff]   ;;  %v6217_v5 = vld [vmem:[#allocation7 + $0x158] sm:$0xff]  }
 0x258   :  { %v6079_v11 = vpop.f32.mrf.mxu1  ;;  %3729 = vmatprep.subr.bf16.mxu0 %v5786_v38  ;;  %v2886_v38 = vld [vmem:[#allocation5 + $0xa70] sm:$0xff] }
 0x259   :  { %v6763_v40 = vadd.f32 %v6079_v11, %v6078_v37  ;;  %v5802_v52 = vcombine.high %v2885_v16, %v2886_v38  ;;  %v2883_v37 = vld [vmem:[#allocation5 + $0xa10] sm:$0xff]  ;;  %v5801_v11 = vcombine.low %v2885_v16, %v2886_v38  ;;  %v6209_v16 = vld [vmem:[#allocation7 + $0x178] sm:$0xff]  }
 0x25a   :  { %v6081_v56 = vpop.f32.mrf.mxu1  ;;  %3634 = vmatmul.mubr.bf16.gmra.mxu0 %v7082_v27 }
 0x25b   :  { %3730 = vmatpush1.bf16.msra.mxu0 %v5785_v32  ;;  %3749 = vmatprep.mubr.bf16.mxu0 %v7083_v2  ;;  %v2884_v32 = vld [vmem:[#allocation5 + $0xa30] sm:$0xff] }
 0x25c   :  { %v6082_v3 = vpop.f32.mrf.mxu1  ;;  %3731 = vmatprep.subr.bf16.mxu0 %v5784_v30  ;;  %v5800_v30 = vcombine.high %v2883_v37, %v2884_v32  ;;  %v5799_v45 = vcombine.low %v2883_v37, %v2884_v32  ;;  %v4090_v32 = vld [vmem:[#allocation5 + $0x58] sm:$0xff] }
 0x25d   :  { %v6767_v33 = vadd.f32 %v6082_v3, %v6081_v56  ;;  %v7085_v56 = vld [vmem:[#allocation27_spill] sm:$0xff] }
 0x25e   :  { %v6084_v42 = vpop.f32.mrf.mxu1  ;;  %v4103_v3 = vld [vmem:[#allocation5 + $0x1f8] sm:$0xff] }
 0x25f   :  { %3732 = vmatpush1.bf16.msra.mxu0 %v5783_v49  ;;  %v4102_v49 = vld [vmem:[#allocation5 + $0x1d8] sm:$0xff] }
 0x260   :  { %v6085_v53 = vpop.f32.mrf.mxu1  ;;  %3733 = vmatprep.subr.bf16.mxu0 %v5814_v60  ;;  %v4100_v60 = vld [vmem:[#allocation5 + $0x198] sm:$0xff]  ;;  %v5877_v28 = vcombine.low %v4102_v49, %v4103_v3 }
 0x261   :  { %v6769_v24 = vadd.f32 %v6085_v53, %v6084_v42  ;;  %v5878_v42 = vcombine.high %v4102_v49, %v4103_v3  ;;  %v7087_v53 = vld [vmem:[#allocation31_spill] sm:$0xff]  ;;  %v6212_v49 = vld [vmem:[#allocation7 + $0x130] sm:$0xff]  }
 0x263   :  { %3734 = vmatpush2.bf16.msra.mxu0 %v5813_v59  ;;  %v4101_v59 = vld [vmem:[#allocation5 + $0x1b8] sm:$0xff]  ;;  %4856 = vmatprep.subr.bf16.mxu1 %v5878_v42  ;;  %v6213_v42 = vld [vmem:[#allocation7 + $0x168] sm:$0xff]  }
 0x264   :  { %3735 = vmatprep.subr.bf16.mxu0 %v5812_v9  ;;  %v5876_v9 = vcombine.high %v4100_v60, %v4101_v59  ;;  %4857 = vmatpush1.bf16.msra.mxu1 %v5877_v28  ;;  %v4089_v28 = vld [vmem:[#allocation5 + $0x38] sm:$0xff] }
 0x266   :  { %4858 = vmatprep.subr.bf16.mxu1 %v5876_v9  ;;  %v6214_v9 = vld [vmem:[#allocation7 + $0x128] sm:$0xff]  }
 0x267   :  { %3736 = vmatpush2.bf16.msra.mxu0 %v5811_v57  ;;  %v5875_v57 = vcombine.low %v4100_v60, %v4101_v59  ;;  %v4088_v60 = vld [vmem:[#allocation5 + $0x18] sm:$0xff] }
 0x268   :  { %3737 = vmatprep.subr.bf16.mxu0 %v5810_v31  ;;  %v5874_v31 = vcombine.high %v4098_v48, %v4099_v36 }
 0x269   :  { %4859 = vmatpush1.bf16.msra.mxu1 %v5875_v57  ;;  %v4118_v57 = vld [vmem:[#allocation5 + $0x3d8] sm:$0xff] }
 0x26a   :  { %4860 = vmatprep.subr.bf16.mxu1 %v5874_v31  ;;  %v4119_v31 = vld [vmem:[#allocation5 + $0x3f8] sm:$0xff] }
 0x26b   :  { %3738 = vmatpush2.bf16.msra.mxu0 %v5809_v29  ;;  %v5873_v29 = vcombine.low %v4098_v48, %v4099_v36  ;;  %v5864_v48 = vcombine.high %v4088_v60, %v4089_v28  ;;  %v6215_v36 = vld [vmem:[#allocation7 + $0x160] sm:$0xff]  }
 0x26c   :  { %3739 = vmatprep.subr.bf16.mxu0 %v5808_v34  ;;  %v7088_v34 = vld [vmem:[#allocation33_spill] sm:$0xff] }
 0x26d   :  { %4861 = vmatpush1.bf16.msra.mxu1 %v5873_v29  ;;  %v5863_v29 = vcombine.low %v4088_v60, %v4089_v28 }
 0x26e   :  { %4862 = vmatprep.subr.bf16.mxu1 %v5872_v51  ;;  %v5894_v51 = vcombine.high %v4118_v57, %v4119_v31 }
 0x26f   :  { %3740 = vmatpush2.bf16.msra.mxu0 %v5807_v41  ;;  %v4094_v41 = vld [vmem:[#allocation5 + $0xd8] sm:$0xff] }
 0x270   :  { %3741 = vmatprep.subr.bf16.mxu0 %v5806_v44  ;;  %v4095_v44 = vld [vmem:[#allocation5 + $0xf8] sm:$0xff] }
 0x271   :  { %v5870_v50 = vcombine.high %v4094_v41, %v4095_v44  ;;  %4863 = vmatpush1.bf16.msra.mxu1 %v5871_v20  ;;  %v5869_v38 = vcombine.low %v4094_v41, %v4095_v44  ;;  %v4116_v41 = vld [vmem:[#allocation5 + $0x398] sm:$0xff]  ;;  %v5893_v20 = vcombine.low %v4118_v57, %v4119_v31 }
 0x272   :  { %v4117_v44 = vld [vmem:[#allocation5 + $0x3b8] sm:$0xff] }
 0x273   :  { %3742 = vmatpush2.bf16.msra.mxu0 %v5805_v0  ;;  %v4092_v0 = vld [vmem:[#allocation5 + $0x98] sm:$0xff]  ;;  %4864 = vmatprep.subr.bf16.mxu1 %v5870_v50  ;;  %v5892_v50 = vcombine.high %v4116_v41, %v4117_v44 }
 0x274   :  { %3743 = vmatprep.subr.bf16.mxu0 %v5804_v13  ;;  %v4093_v13 = vld [vmem:[#allocation5 + $0xb8] sm:$0xff] }
 0x275   :  { %v5868_v37 = vcombine.high %v4092_v0, %v4093_v13  ;;  %4865 = vmatpush1.bf16.msra.mxu1 %v5869_v38  ;;  %v4109_v57 = vld [vmem:[#allocation5 + $0x2b8] sm:$0xff] }
 0x277   :  { %3744 = vmatpush2.bf16.msra.mxu0 %v5803_v1  ;;  %v6210_v1 = vld [vmem:[#allocation7 + $0x138] sm:$0xff]   ;;  %4866 = vmatprep.subr.bf16.mxu1 %v5868_v37 }
 0x278   :  { %3745 = vmatprep.subr.bf16.mxu0 %v5802_v52  ;;  %v7090_v52 = vld [vmem:[#allocation37_spill] sm:$0xff]  ;;  %v4113_v37 = vld [vmem:[#allocation5 + $0x338] sm:$0xff] }
 0x27b   :  { %3746 = vmatpush2.bf16.msra.mxu0 %v5801_v11  ;;  %v4091_v11 = vld [vmem:[#allocation5 + $0x78] sm:$0xff] }
 0x27c   :  { %3747 = vmatprep.subr.bf16.mxu0 %v5800_v30  ;;  %v6211_v30 = vld [vmem:[#allocation7 + $0x170] sm:$0xff]   ;;  %v5866_v3 = vcombine.high %v4090_v32, %v4091_v11  ;;  %v5865_v59 = vcombine.low %v4090_v32, %v4091_v11 }
 0x27f   :  { %3748 = vmatpush2.bf16.msra.mxu0 %v5799_v45  ;;  %v5867_v45 = vcombine.low %v4092_v0, %v4093_v13  ;;  %v4114_v0 = vld [vmem:[#allocation5 + $0x358] sm:$0xff] }
 0x280   :  { %6087 = vmatprep.subr.bf16.mxu0 %v6209_v16  ;;  %v4115_v13 = vld [vmem:[#allocation5 + $0x378] sm:$0xff]  ;;  %v5891_v16 = vcombine.low %v4116_v41, %v4117_v44  ;;  %v6221_v41 = vld [vmem:[#allocation7 + $0x148] sm:$0xff]  }
 0x281   :  { %4867 = vmatpush1.bf16.msra.mxu1 %v5867_v45  ;;  %v5890_v38 = vcombine.high %v4114_v0, %v4115_v13  ;;  %v5889_v32 = vcombine.low %v4114_v0, %v4115_v13  ;;  %v6218_v45 = vld [vmem:[#allocation7 + $0x118] sm:$0xff]  }
 0x282   :  { %3750 = vmatmul.mubr.bf16.vlgmr.msra.gmra.mxu0 %v7084_v18  ;;  %4868 = vmatprep.subr.bf16.mxu1 %v5866_v3  ;;  %v4111_v3 = vld [vmem:[#allocation5 + $0x2f8] sm:$0xff] }
 0x283   :  { %3759 = vmatprep.mubr.bf16.mxu0 %v7085_v56  ;;  %6088 = vmatpush3.bf16.msra.mxu0 %v6210_v1  ;;  %v4112_v1 = vld [vmem:[#allocation5 + $0x318] sm:$0xff] }
 0x284   :  { %6089 = vmatprep.subr.bf16.mxu0 %v6211_v30  ;;  %v5888_v11 = vcombine.high %v4112_v1, %v4113_v37  ;;  %v5887_v30 = vcombine.low %v4112_v1, %v4113_v37  ;;  %v4107_v0 = vld [vmem:[#allocation5 + $0x278] sm:$0xff] }
 0x285   :  { %4869 = vmatpush1.bf16.msra.mxu1 %v5865_v59  ;;  %v6219_v59 = vld [vmem:[#allocation7 + $0x150] sm:$0xff]  }
 0x286   :  { %4870 = vmatprep.subr.bf16.mxu1 %v5864_v48  ;;  %v6220_v48 = vld [vmem:[#allocation7 + $0x110] sm:$0xff]  }
 0x287   :  { %6090 = vmatpush3.bf16.msra.mxu0 %v6212_v49  ;;  %v4110_v49 = vld [vmem:[#allocation5 + $0x2d8] sm:$0xff] }
 0x288   :  { %6091 = vmatprep.subr.bf16.mxu0 %v6213_v42  ;;  %v5886_v60 = vcombine.high %v4110_v49, %v4111_v3  ;;  %v5885_v42 = vcombine.low %v4110_v49, %v4111_v3 }
 0x289   :  { %4871 = vmatpush1.bf16.msra.mxu1 %v5863_v29 }
 0x28a   :  { %3760 = vmatmul.mubr.bf16.gmra.mxu0 %v7086_v15  ;;  %4872 = vmatprep.subr.bf16.mxu1 %v5894_v51 }
 0x28b   :  { %3769 = vmatprep.mubr.bf16.mxu0 %v7087_v53  ;;  %6092 = vmatpush3.bf16.msra.mxu0 %v6214_v9 }
 0x28c   :  { %6093 = vmatprep.subr.bf16.mxu0 %v6215_v36  ;;  %v4108_v36 = vld [vmem:[#allocation5 + $0x298] sm:$0xff] }
 0x28d   :  { %4873 = vmatpush2.bf16.msra.mxu1 %v5893_v20  ;;  %v5883_v29 = vcombine.low %v4108_v36, %v4109_v57  ;;  %v6222_v20 = vld [vmem:[#allocation7 + $0x108] sm:$0xff]  }
 0x28e   :  { %4874 = vmatprep.subr.bf16.mxu1 %v5892_v50  ;;  %v4106_v50 = vld [vmem:[#allocation5 + $0x258] sm:$0xff] }
 0x28f   :  { %6094 = vmatpush3.bf16.msra.mxu0 %v6216_v21  ;;  %v5884_v21 = vcombine.high %v4108_v36, %v4109_v57  ;;  %v5881_v1 = vcombine.low %v4106_v50, %v4107_v0 }
 0x290   :  { %6095 = vmatprep.subr.bf16.mxu0 %v6217_v5 }
 0x291   :  { %4875 = vmatpush2.bf16.msra.mxu1 %v5891_v16  ;;  %v5882_v16 = vcombine.high %v4106_v50, %v4107_v0  ;;  %v4164_v50 = vld [vmem:[#allocation5 + $0x998] sm:$0xff] }
 0x292   :  { %3770 = vmatmul.mubr.bf16.gmra.mxu0 %v7088_v34  ;;  %4876 = vmatprep.subr.bf16.mxu1 %v5890_v38  ;;  %v4165_v0 = vld [vmem:[#allocation5 + $0x9b8] sm:$0xff] }
 0x293   :  { %3779 = vmatprep.mubr.bf16.mxu0 %v7089_v61  ;;  %6096 = vmatpush3.bf16.msra.mxu0 %v6218_v45  ;;  %v4105_v45 = vld [vmem:[#allocation5 + $0x238] sm:$0xff] }
 0x294   :  { %6097 = vmatprep.subr.bf16.mxu0 %v6219_v59  ;;  %v6786_v59 = vld [vmem:[#allocation5 + $0x5f8] sm:$0xff] }
 0x295   :  { %4877 = vmatpush2.bf16.msra.mxu1 %v5889_v32  ;;  %v6223_v32 = vld [vmem:[#allocation7 + $0x140] sm:$0xff]  }
 0x296   :  { %4878 = vmatprep.subr.bf16.mxu1 %v5888_v11  ;;  %v6224_v11 = vld [vmem:[#allocation7 + $0x100] sm:$0xff]  }
 0x297   :  { %6098 = vmatpush3.bf16.msra.mxu0 %v6220_v48 }
 0x298   :  { %6099 = vmatprep.subr.bf16.mxu0 %v6221_v41 }
 0x299   :  { %4879 = vmatpush2.bf16.msra.mxu1 %v5887_v30  ;;  %v4104_v30 = vld [vmem:[#allocation5 + $0x218] sm:$0xff] }
 0x29a   :  { %3780 = vmatmul.mubr.bf16.gmra.mxu0 %v7090_v52  ;;  %4880 = vmatprep.subr.bf16.mxu1 %v5886_v60  ;;  %v5880_v3 = vcombine.high %v4104_v30, %v4105_v45 }
 0x29b   :  { %6100 = vmatpush3.bf16.msra.mxu0 %v6222_v20 }
 0x29c   :  { %6101 = vmatprep.subr.bf16.mxu0 %v6223_v32 }
 0x29d   :  { %4881 = vmatpush2.bf16.msra.mxu1 %v5885_v42  ;;  %v6784_v42 = vld [vmem:[#allocation5 + $0x5d8] sm:$0xff] }
 0x29e   :  { %4882 = vmatprep.subr.bf16.mxu1 %v5884_v21  ;;  %v4167_v21 = vld [vmem:[#allocation5 + $0x9f8] sm:$0xff] }
 0x29f   :  { %6102 = vmatpush3.bf16.msra.mxu0 %v6224_v11 }
 0x2a1   :  { %4883 = vmatpush2.bf16.msra.mxu1 %v5883_v29 }
 0x2a2   :  { %4884 = vmatprep.subr.bf16.mxu1 %v5882_v16  ;;  %v5940_v16 = vcombine.high %v4164_v50, %v4165_v0 }
 0x2a5   :  { %4885 = vmatpush2.bf16.msra.mxu1 %v5881_v1  ;;  %v5939_v1 = vcombine.low %v4164_v50, %v4165_v0  ;;  %v4154_v50 = vld [vmem:[#allocation5 + $0x858] sm:$0xff] }
 0x2a6   :  { %4886 = vmatprep.subr.bf16.mxu1 %v5880_v3  ;;  %v4160_v3 = vld [vmem:[#allocation5 + $0x918] sm:$0xff] }
 0x2a7   :  { %v4155_v0 = vld [vmem:[#allocation5 + $0x878] sm:$0xff] }
 0x2c2   :  { %v6023_v28 = vpop.f32.mrf.mxu0 }
 0x2c4   :  { %v6024_v9 = vpop.f32.mrf.mxu0 }
 0x2c5   :  { %v6025_v31 = vadd.f32 %v6024_v9, %v6023_v28  ;;  %v5879_v28 = vcombine.low %v4104_v30, %v4105_v45  ;;  %v5910_v9 = vcombine.high %v6784_v42, %v6786_v59 }
 0x2c6   :  { %v6026_v5 = vpop.f32.mrf.mxu0 }
 0x2c7   :  { %v6779_v51 = vadd.f32 %v6749_v14, %v6025_v31  ;;  %4887 = vmatpush2.bf16.msra.mxu1 %v5879_v28  ;;  %4929 = vmatprep.subr.bf16.mxu0 %v5910_v9  ;;  %v4166_v31 = vld [vmem:[#allocation5 + $0x9d8] sm:$0xff] }
 0x2c8   :  { %v6027_v44 = vpop.f32.mrf.mxu0  ;;  %v5942_v29 = vcombine.high %v4166_v31, %v4167_v21 }
 0x2c9   :  { %7091 = vst [vmem:[#allocation12_spill] sm:$0xff] %v6779_v51  ;;  %v6028_v13 = vadd.f32 %v6027_v44, %v6026_v5 }
 0x2ca   :  { %v6029_v38 = vpop.f32.mrf.mxu0  ;;  %4889 = vmatmul.mubr.bf16.vlgmr.msra.gmra.mxu1 %v7076_v10  ;;  %5002 = vmatprep.subr.bf16.mxu1 %v5942_v29  ;;  %v4163_v10 = vld [vmem:[#allocation5 + $0x978] sm:$0xff] }
 0x2cb   :  { %v6782_v37 = vadd.f32 %v6751_v23, %v6028_v13  ;;  %4898 = vmatprep.mubr.bf16.mxu1 %v7077_v6 }
 0x2cc   :  { %v6030_v14 = vpop.f32.mrf.mxu0 }
 0x2cd   :  { %7092 = vst [vmem:[#allocation13_spill] sm:$0xff] %v6782_v37  ;;  %v6031_v49 = vadd.f32 %v6030_v14, %v6029_v38  ;;  %v4162_v14 = vld [vmem:[#allocation5 + $0x958] sm:$0xff] }
 0x2ce   :  { %v6032_v60 = vpop.f32.mrf.mxu0  ;;  %v5938_v30 = vcombine.high %v4162_v14, %v4163_v10  ;;  %v5937_v45 = vcombine.low %v4162_v14, %v4163_v10  ;;  %v4182_v14 = vld [vmem:[#allocation5 + $0xbd8] sm:$0xff] }
 0x2cf   :  { %v6789_v23 = vadd.f32 %v6755_v12, %v6031_v49  ;;  %v5941_v12 = vcombine.low %v4166_v31, %v4167_v21  ;;  %v4158_v21 = vld [vmem:[#allocation5 + $0x8d8] sm:$0xff] }
 0x2d0   :  { %v6033_v48 = vpop.f32.mrf.mxu0  ;;  %v4183_v10 = vld [vmem:[#allocation5 + $0xbf8] sm:$0xff] }
 0x2d1   :  { %7093 = vst [vmem:[#allocation14_spill] sm:$0xff] %v6789_v23  ;;  %v6034_v57 = vadd.f32 %v6033_v48, %v6032_v60  ;;  %5003 = vmatpush1.bf16.msra.mxu1 %v5941_v12  ;;  %v4161_v60 = vld [vmem:[#allocation5 + $0x938] sm:$0xff] }
 0x2d2   :  { %v6035_v5 = vpop.f32.mrf.mxu0  ;;  %5004 = vmatprep.subr.bf16.mxu1 %v5940_v16  ;;  %4899 = vmatmul.mubr.bf16.gmra.mxu1 %v7078_v55  ;;  %v5936_v9 = vcombine.high %v4160_v3, %v4161_v60  ;;  %v4159_v55 = vld [vmem:[#allocation5 + $0x8f8] sm:$0xff]  ;;  %v5930_v16 = vcombine.high %v4154_v50, %v4155_v0 }
 0x2d3   :  { %v6796_v41 = vadd.f32 %v6757_v4, %v6034_v57  ;;  %4908 = vmatprep.mubr.bf16.mxu1 %v7079_v58  ;;  %v5935_v57 = vcombine.low %v4160_v3, %v4161_v60  ;;  %v5933_v58 = vcombine.low %v4158_v21, %v4159_v55  ;;  %v4157_v12 = vld [vmem:[#allocation5 + $0x8b8] sm:$0xff] }
 0x2d4   :  { %v6036_v44 = vpop.f32.mrf.mxu0 }
 0x2d5   :  { %7094 = vst [vmem:[#allocation15_spill] sm:$0xff] %v6796_v41  ;;  %v6037_v20 = vadd.f32 %v6036_v44, %v6035_v5  ;;  %5005 = vmatpush1.bf16.msra.mxu1 %v5939_v1  ;;  %v5934_v5 = vcombine.high %v4158_v21, %v4159_v55  ;;  %v4176_v21 = vld [vmem:[#allocation5 + $0xb18] sm:$0xff] }
 0x2d6   :  { %v6038_v13 = vpop.f32.mrf.mxu0  ;;  %5006 = vmatprep.subr.bf16.mxu1 %v5938_v30  ;;  %v5958_v30 = vcombine.high %v4182_v14, %v4183_v10  ;;  %v4177_v55 = vld [vmem:[#allocation5 + $0xb38] sm:$0xff] }
 0x2d7   :  { %v6801_v38 = vadd.f32 %v6761_v17, %v6037_v20 }
 0x2d8   :  { %v6039_v32 = vpop.f32.mrf.mxu0 }
 0x2d9   :  { %7095 = vst [vmem:[#allocation16_spill] sm:$0xff] %v6801_v38  ;;  %v6040_v4 = vadd.f32 %v6039_v32, %v6038_v13  ;;  %5007 = vmatpush1.bf16.msra.mxu1 %v5937_v45  ;;  %v6816_v13 = vpop.f32.mrf.mxu1  ;;  %v5957_v45 = vcombine.low %v4182_v14, %v4183_v10  ;;  %v4170_v14 = vld [vmem:[#allocation5 + $0xa58] sm:$0xff] }
 0x2da   :  { %v6041_v11 = vpop.f32.mrf.mxu0  ;;  %5008 = vmatprep.subr.bf16.mxu1 %v5936_v9  ;;  %4909 = vmatmul.mubr.bf16.gmra.mxu1 %v7080_v47  ;;  %v4152_v47 = vld [vmem:[#allocation5 + $0x818] sm:$0xff] }
 0x2db   :  { %v6804_v6 = vadd.f32 %v6763_v40, %v6040_v4  ;;  %4918 = vmatprep.mubr.bf16.mxu1 %v7081_v22  ;;  %v4153_v22 = vld [vmem:[#allocation5 + $0x838] sm:$0xff]  ;;  %v6820_v1 = vpop.f32.mrf.mxu1 }
 0x2dc   :  { %v6042_v49 = vpop.f32.mrf.mxu0  ;;  %v5928_v32 = vcombine.high %v4152_v47, %v4153_v22  ;;  %v5927_v4 = vcombine.low %v4152_v47, %v4153_v22  ;;  %v4179_v9 = vld [vmem:[#allocation5 + $0xb78] sm:$0xff] }
 0x2dd   :  { %7096 = vst [vmem:[#allocation17_spill] sm:$0xff] %v6804_v6  ;;  %v6043_v17 = vadd.f32 %v6042_v49, %v6041_v11  ;;  %5009 = vmatpush1.bf16.msra.mxu1 %v5935_v57  ;;  %v6822_v11 = vpop.f32.mrf.mxu1  ;;  %v4181_v49 = vld [vmem:[#allocation5 + $0xbb8] sm:$0xff] }
 0x2de   :  { %v6044_v28 = vpop.f32.mrf.mxu0  ;;  %5010 = vmatprep.subr.bf16.mxu1 %v5934_v5  ;;  %v5952_v5 = vcombine.high %v4176_v21, %v4177_v55  ;;  %v4171_v10 = vld [vmem:[#allocation5 + $0xa78] sm:$0xff] }
 0x2df   :  { %v6809_v48 = vadd.f32 %v6767_v33, %v6043_v17  ;;  %v4156_v33 = vld [vmem:[#allocation5 + $0x898] sm:$0xff] }
 0x2e0   :  { %v6045_v31 = vpop.f32.mrf.mxu0  ;;  %v5932_v44 = vcombine.high %v4156_v33, %v4157_v12  ;;  %v5931_v20 = vcombine.low %v4156_v33, %v4157_v12  ;;  %v4174_v12 = vld [vmem:[#allocation5 + $0xad8] sm:$0xff] }
 0x2e1   :  { %7097 = vst [vmem:[#allocation19_spill] sm:$0xff] %v6809_v48  ;;  %v6046_v40 = vadd.f32 %v6045_v31, %v6044_v28  ;;  %5011 = vmatpush1.bf16.msra.mxu1 %v5933_v58  ;;  %v4178_v28 = vld [vmem:[#allocation5 + $0xb58] sm:$0xff]  ;;  %v5951_v58 = vcombine.low %v4176_v21, %v4177_v55 }
 0x2e2   :  { %5012 = vmatprep.subr.bf16.mxu1 %v5932_v44  ;;  %4919 = vmatmul.mubr.bf16.gmra.mxu1 %v7082_v27  ;;  %v4180_v27 = vld [vmem:[#allocation5 + $0xb98] sm:$0xff]  ;;  %v5954_v57 = vcombine.high %v4178_v28, %v4179_v9  ;;  %v5953_v31 = vcombine.low %v4178_v28, %v4179_v9 }
 0x2e3   :  { %v6812_v29 = vadd.f32 %v6769_v24, %v6046_v40  ;;  %v5929_v24 = vcombine.low %v4154_v50, %v4155_v0  ;;  %5034 = vmatprep.mubr.bf16.mxu1 %v7083_v2  ;;  %v6824_v2 = vpop.f32.mrf.mxu1  ;;  %v5956_v17 = vcombine.high %v4180_v27, %v4181_v49  ;;  %v5955_v3 = vcombine.low %v4180_v27, %v4181_v49  ;;  %v4175_v44 = vld [vmem:[#allocation5 + $0xaf8] sm:$0xff] }
 0x2e4   :  { %v5949_v50 = vcombine.low %v4174_v12, %v4175_v44  ;;  %v5945_v27 = vcombine.low %v4170_v14, %v4171_v10 }
 0x2e5   :  { %7098 = vst [vmem:[#allocation21_spill] sm:$0xff] %v6812_v29  ;;  %5013 = vmatpush1.bf16.msra.mxu1 %v5931_v20  ;;  %v6826_v60 = vpop.f32.mrf.mxu1  ;;  %v5950_v20 = vcombine.high %v4174_v12, %v4175_v44 }
 0x2e6   :  { %5014 = vmatprep.subr.bf16.mxu1 %v5930_v16  ;;  %v4172_v16 = vld [vmem:[#allocation5 + $0xa98] sm:$0xff] }
 0x2e7   :  { %v6828_v40 = vpop.f32.mrf.mxu1 }
 0x2e9   :  { %5015 = vmatpush1.bf16.msra.mxu1 %v5929_v24  ;;  %v6830_v33 = vpop.f32.mrf.mxu1  ;;  %v4173_v24 = vld [vmem:[#allocation5 + $0xab8] sm:$0xff] }
 0x2ea   :  { %5016 = vmatprep.subr.bf16.mxu1 %v5928_v32  ;;  %v5948_v22 = vcombine.high %v4172_v16, %v4173_v24  ;;  %v5947_v32 = vcombine.low %v4172_v16, %v4173_v24 }
 0x2eb   :  { %v6832_v0 = vpop.f32.mrf.mxu1 }
 0x2ed   :  { %5017 = vmatpush1.bf16.msra.mxu1 %v5927_v4  ;;  %v6834_v4 = vpop.f32.mrf.mxu1 }
 0x2ee   :  { %5018 = vmatprep.subr.bf16.mxu1 %v5958_v30 }
 0x2ef   :  { %v6836_v49 = vpop.f32.mrf.mxu1 }
 0x2f1   :  { %5019 = vmatpush2.bf16.msra.mxu1 %v5957_v45  ;;  %v5946_v45 = vcombine.high %v4170_v14, %v4171_v10 }
 0x2f2   :  { %5020 = vmatprep.subr.bf16.mxu1 %v5956_v17  ;;  %v4168_v17 = vld [vmem:[#allocation5 + $0xa18] sm:$0xff] }
 0x2f5   :  { %5021 = vmatpush2.bf16.msra.mxu1 %v5955_v3  ;;  %v4169_v3 = vld [vmem:[#allocation5 + $0xa38] sm:$0xff] }
 0x2f6   :  { %5022 = vmatprep.subr.bf16.mxu1 %v5954_v57  ;;  %v5944_v9 = vcombine.high %v4168_v17, %v4169_v3  ;;  %v5943_v57 = vcombine.low %v4168_v17, %v4169_v3 }
 0x2f9   :  { %5023 = vmatpush2.bf16.msra.mxu1 %v5953_v31  ;;  %v6838_v31 = vpop.f32.mrf.mxu1 }
 0x2fa   :  { %5024 = vmatprep.subr.bf16.mxu1 %v5952_v5 }
 0x2fb   :  { %v6840_v5 = vpop.f32.mrf.mxu1 }
 0x2fd   :  { %5025 = vmatpush2.bf16.msra.mxu1 %v5951_v58  ;;  %v6844_v12 = vpop.f32.mrf.mxu1 }
 0x2fe   :  { %5026 = vmatprep.subr.bf16.mxu1 %v5950_v20 }
 0x2ff   :  { %v6846_v20 = vpop.f32.mrf.mxu1 }
 0x301   :  { %5027 = vmatpush2.bf16.msra.mxu1 %v5949_v50  ;;  %v6850_v16 = vpop.f32.mrf.mxu1 }
 0x302   :  { %v3605_v47 = vpop.f32.mrf.mxu0  ;;  %5028 = vmatprep.subr.bf16.mxu1 %v5948_v22 }
 0x303   :  { %v6854_v22 = vpop.f32.mrf.mxu1 }
 0x304   :  { %v3607_v30 = vpop.f32.mrf.mxu0 }
 0x305   :  { %5029 = vmatpush2.bf16.msra.mxu1 %v5947_v32  ;;  %v3681_v29 = vadd.f32 %v6820_v1, %v3607_v30 }
 0x306   :  { %5030 = vmatprep.subr.bf16.mxu1 %v5946_v45  ;;  %v3609_v28 = vpop.f32.mrf.mxu0 }
 0x307   :  { %v3683_v38 = vadd.f32 %v6822_v11, %v3609_v28  ;;  %v4132_v28 = vld [vmem:[#allocation5 + $0x598] sm:$0xff] }
 0x308   :  { %v3611_v21 = vpop.f32.mrf.mxu0 }
 0x309   :  { %5031 = vmatpush2.bf16.msra.mxu1 %v5945_v27  ;;  %v3685_v51 = vadd.f32 %v6824_v2, %v3611_v21  ;;  %v4133_v21 = vld [vmem:[#allocation5 + $0x5b8] sm:$0xff] }
 0x30a   :  { %5032 = vmatprep.subr.bf16.mxu1 %v5944_v9  ;;  %v3615_v55 = vpop.f32.mrf.mxu0 }
 0x30b   :  { %v3689_v39 = vadd.f32 %v6826_v60, %v3615_v55  ;;  %v5908_v60 = vcombine.high %v4132_v28, %v4133_v21 }
 0x30c   :  { %v3617_v58 = vpop.f32.mrf.mxu0 }
 0x30d   :  { %5033 = vmatpush2.bf16.msra.mxu1 %v5943_v57 }
 0x30e   :  { %v3619_v44 = vpop.f32.mrf.mxu0 }
 0x310   :  { %5035 = vmatmul.mubr.bf16.vlgmr.msra.gmra.mxu1 %v7084_v18  ;;  %v3621_v50 = vpop.f32.mrf.mxu0  ;;  %v3824_v18 = vpop.f32.mrf.mxu1 }
 0x311   :  { %5044 = vmatprep.mubr.bf16.mxu1 %v7085_v56 }
 0x312   :  { %v6852_v24 = vpop.f32.mrf.mxu0  ;;  %v3826_v32 = vpop.f32.mrf.mxu1 }
 0x314   :  { %v6858_v56 = vpop.f32.mrf.mxu0 }
 0x316   :  { %v6860_v14 = vpop.f32.mrf.mxu0 }
 0x318   :  { %5045 = vmatmul.mubr.bf16.gmra.mxu1 %v7086_v15  ;;  %v3828_v15 = vpop.f32.mrf.mxu1 }
 0x319   :  { %5054 = vmatprep.mubr.bf16.mxu1 %v7087_v53  ;;  %v6863_v53 = vpop.f32.mrf.mxu0 }
 0x31a   :  { %v3830_v10 = vpop.f32.mrf.mxu1 }
 0x31b   :  { %v6865_v45 = vpop.f32.mrf.mxu0 }
 0x31c   :  { %v3834_v27 = vpop.f32.mrf.mxu1 }
 0x31d   :  { %v6867_v17 = vpop.f32.mrf.mxu0 }
 0x31f   :  { %v6869_v3 = vpop.f32.mrf.mxu0 }
 0x320   :  { %5055 = vmatmul.mubr.bf16.gmra.mxu1 %v7088_v34  ;;  %v3836_v34 = vpop.f32.mrf.mxu1 }
 0x321   :  { %5064 = vmatprep.mubr.bf16.mxu1 %v7089_v61  ;;  %v6871_v9 = vpop.f32.mrf.mxu0 }
 0x322   :  { %v3838_v61 = vpop.f32.mrf.mxu1 }
 0x324   :  { %v3840_v57 = vpop.f32.mrf.mxu1 }
 0x326   :  { %v6875_v6 = vpop.f32.mrf.mxu1 }
 0x328   :  { %5065 = vmatmul.mubr.bf16.gmra.mxu1 %v7090_v52  ;;  %v3679_v52 = vadd.f32 %v6816_v13, %v3605_v47  ;;  %v6879_v43 = vpop.f32.mrf.mxu1  ;;  %v3691_v13 = vadd.f32 %v6828_v40, %v3617_v58 }
 0x342   :  { %v3751_v36 = vpop.f32.mrf.mxu0 }
 0x343   :  { %v3752_v23 = vadd.f32 %v3751_v36, %v3679_v52  ;;  %v3848_v36 = vpop.f32.mrf.mxu1 }
 0x344   :  { %v3753_v48 = vpop.f32.mrf.mxu0 }
 0x345   :  { %v3754_v41 = vadd.f32 %v3753_v48, %v3681_v29  ;;  %v3825_v1 = vadd.f32 %v3824_v18, %v3752_v23  ;;  %v3693_v29 = vadd.f32 %v6830_v33, %v3619_v44  ;;  %v4131_v33 = vld [vmem:[#allocation5 + $0x578] sm:$0xff] }
 0x346   :  { %v3755_v37 = vpop.f32.mrf.mxu0 }
 0x347   :  { %v3756_v26 = vadd.f32 %v3755_v37, %v3683_v38  ;;  %v3827_v19 = vadd.f32 %v3826_v32, %v3754_v41  ;;  %v3863_v41 = vmul.f32 %v3825_v1, %v3825_v1 }
 0x348   :  { %v3757_v7 = vpop.f32.mrf.mxu0 }
 0x349   :  { %v3829_v8 = vadd.f32 %v3828_v15, %v3756_v26  ;;  %v3758_v54 = vadd.f32 %v3757_v7, %v3685_v51  ;;  %v3864_v2 = vmul.f32 %v3827_v19, %v3827_v19  ;;  %v3695_v51 = vadd.f32 %v6832_v0, %v3621_v50  ;;  %v4130_v19 = vld [vmem:[#allocation5 + $0x558] sm:$0xff] }
 0x34a   :  { %v3761_v30 = vpop.f32.mrf.mxu0  ;;  %v7099_v0 = vcombine.low %v6784_v42, %v6786_v59  ;;  %v5907_v50 = vcombine.low %v4132_v28, %v4133_v21  ;;  %v5906_v1 = vcombine.high %v4130_v19, %v4131_v33 }
 0x34b   :  { %v3831_v47 = vadd.f32 %v3830_v10, %v3758_v54  ;;  %v3865_v11 = vmul.f32 %v3829_v8, %v3829_v8  ;;  %v3762_v26 = vadd.f32 %v3761_v30, %v3689_v39  ;;  %v3850_v8 = vpop.f32.mrf.mxu1  ;;  %v3701_v39 = vadd.f32 %v6836_v49, %v6858_v56 }
 0x34c   :  { %v3763_v48 = vpop.f32.mrf.mxu0 }
 0x34d   :  { %v3866_v37 = vmul.f32 %v3831_v47, %v3831_v47  ;;  %v3764_v38 = vadd.f32 %v3763_v48, %v3691_v13  ;;  %v3879_v54 = vpack.c.bf16 %v3865_v11, %v3863_v41  ;;  %v3835_v44 = vadd.f32 %v3834_v27, %v3762_v26  ;;  %v6892_v30 = vpop.f32.mrf.mxu1  ;;  %v4129_v47 = vld [vmem:[#allocation5 + $0x538] sm:$0xff] }
 0x34e   :  { %v3765_v7 = vpop.f32.mrf.mxu0  ;;  %v3703_v27 = vadd.f32 %v6838_v31, %v6860_v14  ;;  %v4126_v41 = vld [vmem:[#allocation5 + $0x4d8] sm:$0xff] }
 0x34f   :  { %v3766_v23 = vadd.f32 %v3765_v7, %v3693_v29  ;;  %v3880_v40 = vpack.c.bf16 %v3866_v37, %v3864_v2  ;;  %v3837_v55 = vadd.f32 %v3836_v34, %v3764_v38  ;;  %v3699_v34 = vadd.f32 %v6834_v4, %v6852_v24  ;;  %v3856_v31 = vpop.f32.mrf.mxu1  ;;  %v4127_v26 = vld [vmem:[#allocation5 + $0x4f8] sm:$0xff] }
 0x350   :  { %v3767_v58 = vpop.f32.mrf.mxu0  ;;  %v3867_v42 = vmul.f32 %v3835_v44, %v3835_v44  ;;  %v3705_v4 = vadd.f32 %v6840_v5, %v6863_v53  ;;  %v5905_v29 = vcombine.low %v4130_v19, %v4131_v33  ;;  %v3711_v5 = vadd.f32 %v6846_v20, %v6867_v17  ;;  %v4125_v19 = vld [vmem:[#allocation5 + $0x4b8] sm:$0xff] }
 0x351   :  { %v3768_v18 = vadd.f32 %v3767_v58, %v3695_v51  ;;  %v3839_v32 = vadd.f32 %v3838_v61, %v3766_v23  ;;  %4047 = vmatprep.mubr.bf16.mxu0 %v3880_v40  ;;  %v3868_v13 = vmul.f32 %v3837_v55, %v3837_v55  ;;  %v3709_v40 = vadd.f32 %v6844_v12, %v6865_v45 }
 0x352   :  { %v3771_v15 = vpop.f32.mrf.mxu0  ;;  %4048 = vmatmul.mubr.bf16.vlgmr.msra.gmra.mxu0 %v3879_v54  ;;  %v5902_v58 = vcombine.high %v4126_v41, %v4127_v26  ;;  %v3715_v33 = vadd.f32 %v6854_v22, %v6871_v9  ;;  %v5901_v44 = vcombine.low %v4126_v41, %v4127_v26  ;;  %v4144_v26 = vld [vmem:[#allocation5 + $0x718] sm:$0xff] }
 0x353   :  { %v3841_v10 = vadd.f32 %v3840_v57, %v3768_v18  ;;  %4930 = vmatpush1.bf16.msra.mxu0 %v7099_v0  ;;  %v3869_v52 = vmul.f32 %v3839_v32, %v3839_v32  ;;  %v4128_v57 = vld [vmem:[#allocation5 + $0x518] sm:$0xff]  ;;  %v3772_v59 = vadd.f32 %v3771_v15, %v3699_v34 }
 0x354   :  { %v3773_v61 = vpop.f32.mrf.mxu0  ;;  %4931 = vmatprep.subr.bf16.mxu0 %v5908_v60  ;;  %v5904_v38 = vcombine.high %v4128_v57, %v4129_v47  ;;  %v5903_v23 = vcombine.low %v4128_v57, %v4129_v47  ;;  %v3713_v60 = vadd.f32 %v6850_v16, %v6869_v3  ;;  %v4124_v32 = vld [vmem:[#allocation5 + $0x498] sm:$0xff] }
 0x355   :  { %v3870_v49 = vmul.f32 %v3841_v10, %v3841_v10  ;;  %v3774_v56 = vadd.f32 %v3773_v61, %v3701_v39  ;;  %v3881_v2 = vpack.c.bf16 %v3869_v52, %v3867_v42  ;;  %v3845_v7 = vadd.f32 %v6875_v6, %v3772_v59  ;;  %v4122_v34 = vld [vmem:[#allocation5 + $0x458] sm:$0xff] }
 0x356   :  { %v3775_v11 = vpop.f32.mrf.mxu0  ;;  %v5900_v16 = vcombine.high %v4124_v32, %v4125_v19  ;;  %v4123_v52 = vld [vmem:[#allocation5 + $0x478] sm:$0xff]  ;;  %v5899_v22 = vcombine.low %v4124_v32, %v4125_v19 }
 0x357   :  { %v3882_v24 = vpack.c.bf16 %v3870_v49, %v3868_v13  ;;  %v3776_v48 = vadd.f32 %v3775_v11, %v3703_v27  ;;  %4932 = vmatpush1.bf16.msra.mxu0 %v5907_v50  ;;  %v3847_v14 = vadd.f32 %v6879_v43, %v3774_v56  ;;  %v3871_v20 = vmul.f32 %v3845_v7, %v3845_v7  ;;  %v4120_v56 = vld [vmem:[#allocation5 + $0x418] sm:$0xff] }
 0x358   :  { %v3777_v37 = vpop.f32.mrf.mxu0  ;;  %4933 = vmatprep.subr.bf16.mxu0 %v5906_v1  ;;  %v5898_v27 = vcombine.high %v4122_v34, %v4123_v52  ;;  %v4121_v57 = vld [vmem:[#allocation5 + $0x438] sm:$0xff]  ;;  %v5897_v59 = vcombine.low %v4122_v34, %v4123_v52 }
 0x359   :  { %v3778_v28 = vadd.f32 %v3777_v37, %v3705_v4  ;;  %v3849_v21 = vadd.f32 %v3848_v36, %v3776_v48  ;;  %4055 = vmatprep.mubr.bf16.mxu0 %v3882_v24  ;;  %v3858_v36 = vpop.f32.mrf.mxu1  ;;  %v3872_v6 = vmul.f32 %v3847_v14, %v3847_v14  ;;  %v5896_v4 = vcombine.high %v4120_v56, %v4121_v57  ;;  %v4151_v24 = vld [vmem:[#allocation5 + $0x7f8] sm:$0xff] }
 0x35a   :  { %v3781_v51 = vpop.f32.mrf.mxu0  ;;  %4056 = vmatmul.mubr.bf16.gmra.mxu0 %v3881_v2  ;;  %v5895_v48 = vcombine.low %v4120_v56, %v4121_v57  ;;  %v4148_v2 = vld [vmem:[#allocation5 + $0x798] sm:$0xff] }
 0x35b   :  { %v3851_v53 = vadd.f32 %v3850_v8, %v3778_v28  ;;  %4934 = vmatpush1.bf16.msra.mxu0 %v5905_v29  ;;  %v3873_v54 = vmul.f32 %v3849_v21, %v3849_v21  ;;  %v3782_v17 = vadd.f32 %v3781_v51, %v3709_v40  ;;  %v3860_v10 = vpop.f32.mrf.mxu1  ;;  %v4149_v37 = vld [vmem:[#allocation5 + $0x7b8] sm:$0xff] }
 0x35c   :  { %v3783_v43 = vpop.f32.mrf.mxu0  ;;  %4935 = vmatprep.subr.bf16.mxu0 %v5904_v38  ;;  %v4146_v14 = vld [vmem:[#allocation5 + $0x758] sm:$0xff]  ;;  %v5923_v21 = vcombine.low %v4148_v2, %v4149_v37 }
 0x35d   :  { %v3874_v55 = vmul.f32 %v3851_v53, %v3851_v53  ;;  %v3784_v18 = vadd.f32 %v3783_v43, %v3711_v5  ;;  %v3883_v15 = vpack.c.bf16 %v3873_v54, %v3871_v20  ;;  %v3855_v61 = vadd.f32 %v6892_v30, %v3782_v17  ;;  %v4150_v30 = vld [vmem:[#allocation5 + $0x7d8] sm:$0xff] }
 0x35e   :  { %v3785_v8 = vpop.f32.mrf.mxu0  ;;  %v5926_v29 = vcombine.high %v4150_v30, %v4151_v24  ;;  %v5925_v38 = vcombine.low %v4150_v30, %v4151_v24  ;;  %v4147_v28 = vld [vmem:[#allocation5 + $0x778] sm:$0xff] }
 0x35f   :  { %v3884_v12 = vpack.c.bf16 %v3874_v55, %v3872_v6  ;;  %v3786_v45 = vadd.f32 %v3785_v8, %v3713_v60  ;;  %4936 = vmatpush1.bf16.msra.mxu0 %v5903_v23  ;;  %v3857_v3 = vadd.f32 %v3856_v31, %v3784_v18  ;;  %v3875_v47 = vmul.f32 %v3855_v61, %v3855_v61  ;;  %v4145_v7 = vld [vmem:[#allocation5 + $0x738] sm:$0xff] }
 0x360   :  { %v3787_v39 = vpop.f32.mrf.mxu0  ;;  %4937 = vmatprep.subr.bf16.mxu0 %v5902_v58  ;;  %v5924_v31 = vcombine.high %v4148_v2, %v4149_v37  ;;  %v5922_v41 = vcombine.high %v4146_v14, %v4147_v28  ;;  %v5921_v51 = vcombine.low %v4146_v14, %v4147_v28  ;;  %v4142_v5 = vld [vmem:[#allocation5 + $0x6d8] sm:$0xff]  ;;  %v5919_v23 = vcombine.low %v4144_v26, %v4145_v7  ;;  %v7102_v2 = vld [vmem:[#allocation22_spill] sm:$0xff] }
 0x361   :  { %v3788_v0 = vadd.f32 %v3787_v39, %v3715_v33  ;;  %v3859_v50 = vadd.f32 %v3858_v36, %v3786_v45  ;;  %4063 = vmatprep.mubr.bf16.mxu0 %v3884_v12  ;;  %v3876_v13 = vmul.f32 %v3857_v3, %v3857_v3  ;;  %v4143_v53 = vld [vmem:[#allocation5 + $0x6f8] sm:$0xff] }
 0x362   :  { %4064 = vmatmul.mubr.bf16.gmra.mxu0 %v3883_v15  ;;  %v5918_v40 = vcombine.high %v4142_v5, %v4143_v53  ;;  %v4140_v54 = vld [vmem:[#allocation5 + $0x698] sm:$0xff]  ;;  %v5917_v36 = vcombine.low %v4142_v5, %v4143_v53 }
 0x363   :  { %v3861_v1 = vadd.f32 %v3860_v10, %v3788_v0  ;;  %4938 = vmatpush1.bf16.msra.mxu0 %v5901_v44  ;;  %v3877_v9 = vmul.f32 %v3859_v50, %v3859_v50  ;;  %v4141_v43 = vld [vmem:[#allocation5 + $0x6b8] sm:$0xff] }
 0x364   :  { %4939 = vmatprep.subr.bf16.mxu0 %v5900_v16  ;;  %v5916_v58 = vcombine.high %v4140_v54, %v4141_v43  ;;  %v4138_v60 = vld [vmem:[#allocation5 + $0x658] sm:$0xff]  ;;  %v5915_v55 = vcombine.low %v4140_v54, %v4141_v43 }
 0x365   :  { %v3878_v49 = vmul.f32 %v3861_v1, %v3861_v1  ;;  %v3885_v11 = vpack.c.bf16 %v3877_v9, %v3875_v47  ;;  %v4139_v6 = vld [vmem:[#allocation5 + $0x678] sm:$0xff] }
 0x366   :  { %v5914_v18 = vcombine.high %v4138_v60, %v4139_v6  ;;  %v4136_v32 = vld [vmem:[#allocation5 + $0x618] sm:$0xff]  ;;  %v5913_v20 = vcombine.low %v4138_v60, %v4139_v6 }
 0x367   :  { %v3886_v42 = vpack.c.bf16 %v3878_v49, %v3876_v13  ;;  %4940 = vmatpush1.bf16.msra.mxu0 %v5899_v22  ;;  %v4137_v19 = vld [vmem:[#allocation5 + $0x638] sm:$0xff] }
 0x368   :  { %4941 = vmatprep.subr.bf16.mxu0 %v5898_v27  ;;  %v5912_v17 = vcombine.high %v4136_v32, %v4137_v19  ;;  %v4198_v8 = vld [vmem:[#allocation5 + $0xdd8] sm:$0xff]  ;;  %v5911_v12 = vcombine.low %v4136_v32, %v4137_v19 }
 0x369   :  { %4071 = vmatprep.mubr.bf16.mxu0 %v3886_v42  ;;  %v4199_v33 = vld [vmem:[#allocation5 + $0xdf8] sm:$0xff]  ;;  %v7100_v42 = vld [vmem:[#allocation18_spill] sm:$0xff] }
 0x36a   :  { %4072 = vmatmul.mubr.bf16.gmra.mxu0 %v3885_v11  ;;  %v5974_v45 = vcombine.high %v4198_v8, %v4199_v33  ;;  %v4196_v44 = vld [vmem:[#allocation5 + $0xd98] sm:$0xff]  ;;  %v5973_v39 = vcombine.low %v4198_v8, %v4199_v33  ;;  %v7101_v11 = vld [vmem:[#allocation20_spill] sm:$0xff] }
 0x36b   :  { %4942 = vmatpush1.bf16.msra.mxu0 %v5897_v59  ;;  %4961 = vmatprep.mubr.bf16.mxu0 %v6380_v63  ;;  %v5920_v63 = vcombine.high %v4144_v26, %v4145_v7  ;;  %v4197_v15 = vld [vmem:[#allocation5 + $0xdb8] sm:$0xff] }
 0x36c   :  { %4943 = vmatprep.subr.bf16.mxu0 %v5896_v4  ;;  %v5972_v10 = vcombine.high %v4196_v44, %v4197_v15  ;;  %v4194_v16 = vld [vmem:[#allocation5 + $0xd58] sm:$0xff]  ;;  %v5971_v0 = vcombine.low %v4196_v44, %v4197_v15  ;;  %v7104_v15 = vld [vmem:[#allocation26_spill] sm:$0xff] }
 0x36d   :  { %v4195_v3 = vld [vmem:[#allocation5 + $0xd78] sm:$0xff] }
 0x36e   :  { %v5970_v50 = vcombine.high %v4194_v16, %v4195_v3  ;;  %v4192_v34 = vld [vmem:[#allocation5 + $0xd18] sm:$0xff]  ;;  %v5969_v61 = vcombine.low %v4194_v16, %v4195_v3  ;;  %v7107_v16 = vld [vmem:[#allocation32_spill] sm:$0xff]  ;;  %v7108_v3 = vld [vmem:[#allocation34_spill] sm:$0xff] }
 0x36f   :  { %4944 = vmatpush1.bf16.msra.mxu0 %v5895_v48  ;;  %v4193_v52 = vld [vmem:[#allocation5 + $0xd38] sm:$0xff] }
 0x370   :  { %4945 = vmatprep.subr.bf16.mxu0 %v5926_v29  ;;  %v5968_v1 = vcombine.high %v4192_v34, %v4193_v52  ;;  %v4190_v22 = vld [vmem:[#allocation5 + $0xcd8] sm:$0xff]  ;;  %v5967_v27 = vcombine.low %v4192_v34, %v4193_v52  ;;  %v7110_v52 = vld [vmem:[#allocation38_spill] sm:$0xff] }
 0x371   :  { %v4191_v9 = vld [vmem:[#allocation5 + $0xcf8] sm:$0xff] }
 0x372   :  { %v4188_v13 = vld [vmem:[#allocation5 + $0xc98] sm:$0xff]  ;;  %v5965_v49 = vcombine.low %v4190_v22, %v4191_v9 }
 0x373   :  { %4946 = vmatpush2.bf16.msra.mxu0 %v5925_v38  ;;  %v4186_v57 = vld [vmem:[#allocation5 + $0xc58] sm:$0xff]  ;;  %v7103_v38 = vld [vmem:[#allocation24_spill] sm:$0xff] }
 0x374   :  { %4947 = vmatprep.subr.bf16.mxu0 %v5924_v31  ;;  %v4187_v47 = vld [vmem:[#allocation5 + $0xc78] sm:$0xff] }
 0x375   :  { %v4184_v4 = vld [vmem:[#allocation5 + $0xc18] sm:$0xff]  ;;  %v5961_v30 = vcombine.low %v4186_v57, %v4187_v47 }
 0x376   :  { %v4214_v48 = vld [vmem:[#allocation5 + $0xfd8] sm:$0xff] }
 0x377   :  { %4948 = vmatpush2.bf16.msra.mxu0 %v5923_v21  ;;  %v4215_v29 = vld [vmem:[#allocation5 + $0xff8] sm:$0xff] }
 0x378   :  { %4949 = vmatprep.subr.bf16.mxu0 %v5922_v41  ;;  %v5990_v31 = vcombine.high %v4214_v48, %v4215_v29  ;;  %v4212_v14 = vld [vmem:[#allocation5 + $0xf98] sm:$0xff]  ;;  %v5989_v21 = vcombine.low %v4214_v48, %v4215_v29  ;;  %v6239_v29 = vld [vmem:[#allocation7 + $0x1c0] sm:$0xff]  }
 0x379   :  { %v4213_v28 = vld [vmem:[#allocation5 + $0xfb8] sm:$0xff] }
 0x37a   :  { %v5988_v41 = vcombine.high %v4212_v14, %v4213_v28  ;;  %v4210_v26 = vld [vmem:[#allocation5 + $0xf58] sm:$0xff] }
 0x37b   :  { %4950 = vmatpush2.bf16.msra.mxu0 %v5921_v51  ;;  %v4211_v7 = vld [vmem:[#allocation5 + $0xf78] sm:$0xff]  ;;  %v5987_v51 = vcombine.low %v4212_v14, %v4213_v28 }
 0x37c   :  { %4951 = vmatprep.subr.bf16.mxu0 %v5920_v63  ;;  %v5986_v63 = vcombine.high %v4210_v26, %v4211_v7  ;;  %v4208_v5 = vld [vmem:[#allocation5 + $0xf18] sm:$0xff] }
 0x37d   :  { %v4209_v53 = vld [vmem:[#allocation5 + $0xf38] sm:$0xff] }
 0x37e   :  { %v4206_v54 = vld [vmem:[#allocation5 + $0xed8] sm:$0xff] }
 0x37f   :  { %4952 = vmatpush2.bf16.msra.mxu0 %v5919_v23  ;;  %v5985_v23 = vcombine.low %v4210_v26, %v4211_v7  ;;  %v4207_v43 = vld [vmem:[#allocation5 + $0xef8] sm:$0xff] }
 0x380   :  { %4953 = vmatprep.subr.bf16.mxu0 %v5918_v40  ;;  %v5984_v40 = vcombine.high %v4208_v5, %v4209_v53  ;;  %v4204_v60 = vld [vmem:[#allocation5 + $0xe98] sm:$0xff] }
 0x381   :  { %v4205_v6 = vld [vmem:[#allocation5 + $0xeb8] sm:$0xff] }
 0x382   :  { %v4202_v32 = vld [vmem:[#allocation5 + $0xe58] sm:$0xff] }
 0x383   :  { %4954 = vmatpush2.bf16.msra.mxu0 %v5917_v36  ;;  %v5983_v36 = vcombine.low %v4208_v5, %v4209_v53  ;;  %v4203_v19 = vld [vmem:[#allocation5 + $0xe78] sm:$0xff] }
 0x384   :  { %4955 = vmatprep.subr.bf16.mxu0 %v5916_v58  ;;  %v5982_v58 = vcombine.high %v4206_v54, %v4207_v43  ;;  %v4200_v8 = vld [vmem:[#allocation5 + $0xe18] sm:$0xff] }
 0x385   :  { %v4201_v33 = vld [vmem:[#allocation5 + $0xe38] sm:$0xff] }
 0x386   :  { %v5975_v44 = vcombine.low %v4200_v8, %v4201_v33  ;;  %v6226_v34 = vld [vmem:[#allocation7 + $0x1b8] sm:$0xff]  }
 0x387   :  { %4956 = vmatpush2.bf16.msra.mxu0 %v5915_v55  ;;  %v5981_v55 = vcombine.low %v4206_v54, %v4207_v43  ;;  %v7116_v54 = vld [vmem:[#allocation16_spill] sm:$0xff] }
 0x388   :  { %4957 = vmatprep.subr.bf16.mxu0 %v5914_v18  ;;  %v5980_v18 = vcombine.high %v4204_v60, %v4205_v6 }
 0x38b   :  { %4958 = vmatpush2.bf16.msra.mxu0 %v5913_v20  ;;  %v5979_v20 = vcombine.low %v4204_v60, %v4205_v6  ;;  %v7118_v6 = vld [vmem:[#allocation17_spill] sm:$0xff] }
 0x38c   :  { %4959 = vmatprep.subr.bf16.mxu0 %v5912_v17  ;;  %v5978_v17 = vcombine.high %v4202_v32, %v4203_v19 }
 0x38f   :  { %4960 = vmatpush2.bf16.msra.mxu0 %v5911_v12  ;;  %v5977_v12 = vcombine.low %v4202_v32, %v4203_v19 }
 0x390   :  { %5075 = vmatprep.subr.bf16.mxu0 %v5974_v45  ;;  %v5976_v45 = vcombine.high %v4200_v8, %v4201_v33 }
 0x392   :  { %4962 = vmatmul.mubr.bf16.vlgmr.msra.gmra.mxu0 %v6390_v25  ;;  %v5966_v25 = vcombine.high %v4190_v22, %v4191_v9  ;;  %v6229_v22 = vld [vmem:[#allocation7 + $0x1e8] sm:$0xff]  }
 0x393   :  { %5076 = vmatpush1.bf16.msra.mxu0 %v5973_v39  ;;  %4971 = vmatprep.mubr.bf16.mxu0 %v6395_v35  ;;  %v4189_v35 = vld [vmem:[#allocation5 + $0xcb8] sm:$0xff]  ;;  %v7105_v39 = vld [vmem:[#allocation28_spill] sm:$0xff]  ;;  %v6230_v9 = vld [vmem:[#allocation7 + $0x1a8] sm:$0xff]  }
 0x394   :  { %5077 = vmatprep.subr.bf16.mxu0 %v5972_v10  ;;  %v5964_v56 = vcombine.high %v4188_v13, %v4189_v35  ;;  %v5963_v59 = vcombine.low %v4188_v13, %v4189_v35  ;;  %v7106_v10 = vld [vmem:[#allocation30_spill] sm:$0xff]  ;;  %v6233_v13 = vld [vmem:[#allocation7 + $0x1d8] sm:$0xff]  }
 0x395   :  { %v6234_v35 = vld [vmem:[#allocation7 + $0x198] sm:$0xff]  }
 0x397   :  { %5078 = vmatpush1.bf16.msra.mxu0 %v5971_v0  ;;  %v7109_v0 = vld [vmem:[#allocation36_spill] sm:$0xff] }
 0x398   :  { %5079 = vmatprep.subr.bf16.mxu0 %v5970_v50  ;;  %v6225_v50 = vld [vmem:[#allocation7 + $0x1f8] sm:$0xff]  }
 0x399   :  { %6127 = vmatprep.subr.bf16.mxu1 %v6225_v50 }
 0x39a   :  { %4972 = vmatmul.mubr.bf16.gmra.mxu0 %v6402_v46  ;;  %v5962_v46 = vcombine.high %v4186_v57, %v4187_v47  ;;  %6128 = vmatpush3.bf16.msra.mxu1 %v6226_v34  ;;  %v6236_v57 = vld [vmem:[#allocation7 + $0x190] sm:$0xff]  }
 0x39b   :  { %5080 = vmatpush1.bf16.msra.mxu0 %v5969_v61  ;;  %4981 = vmatprep.mubr.bf16.mxu0 %v6407_v62  ;;  %v4185_v62 = vld [vmem:[#allocation5 + $0xc38] sm:$0xff]  ;;  %v6227_v61 = vld [vmem:[#allocation7 + $0x1f0] sm:$0xff]  }
 0x39c   :  { %5081 = vmatprep.subr.bf16.mxu0 %v5968_v1  ;;  %v5960_v24 = vcombine.high %v4184_v4, %v4185_v62  ;;  %v5959_v37 = vcombine.low %v4184_v4, %v4185_v62  ;;  %6129 = vmatprep.subr.bf16.mxu1 %v6227_v61  ;;  %v6228_v1 = vld [vmem:[#allocation7 + $0x1b0] sm:$0xff]   ;;  %v6238_v62 = vld [vmem:[#allocation7 + $0x188] sm:$0xff]  }
 0x39e   :  { %6130 = vmatpush3.bf16.msra.mxu1 %v6228_v1 }
 0x39f   :  { %5082 = vmatpush1.bf16.msra.mxu0 %v5967_v27  ;;  %6131 = vmatprep.subr.bf16.mxu1 %v6229_v22  ;;  %v6231_v27 = vld [vmem:[#allocation7 + $0x1e0] sm:$0xff]  }
 0x3a0   :  { %5083 = vmatprep.subr.bf16.mxu0 %v5966_v25  ;;  %v6232_v25 = vld [vmem:[#allocation7 + $0x1a0] sm:$0xff]  }
 0x3a2   :  { %4982 = vmatmul.mubr.bf16.gmra.mxu0 %v7100_v42  ;;  %6132 = vmatpush3.bf16.msra.mxu1 %v6230_v9 }
 0x3a3   :  { %5084 = vmatpush1.bf16.msra.mxu0 %v5965_v49  ;;  %4991 = vmatprep.mubr.bf16.mxu0 %v7101_v11  ;;  %v6237_v11 = vld [vmem:[#allocation7 + $0x1c8] sm:$0xff]  }
 0x3a4   :  { %5085 = vmatprep.subr.bf16.mxu0 %v5964_v56  ;;  %6133 = vmatprep.subr.bf16.mxu1 %v6231_v27  ;;  %v6235_v56 = vld [vmem:[#allocation7 + $0x1d0] sm:$0xff]  }
 0x3a6   :  { %6134 = vmatpush3.bf16.msra.mxu1 %v6232_v25 }
 0x3a7   :  { %5086 = vmatpush1.bf16.msra.mxu0 %v5963_v59  ;;  %6135 = vmatprep.subr.bf16.mxu1 %v6233_v13 }
 0x3a8   :  { %5087 = vmatprep.subr.bf16.mxu0 %v5962_v46  ;;  %v7111_v46 = vld [vmem:[#allocation12_spill] sm:$0xff] }
 0x3aa   :  { %4992 = vmatmul.mubr.bf16.gmra.mxu0 %v7102_v2  ;;  %6136 = vmatpush3.bf16.msra.mxu1 %v6234_v35  ;;  %v7112_v2 = vld [vmem:[#allocation13_spill] sm:$0xff] }
 0x3ab   :  { %5088 = vmatpush1.bf16.msra.mxu0 %v5961_v30  ;;  %5107 = vmatprep.mubr.bf16.mxu0 %v7103_v38  ;;  %v6240_v38 = vld [vmem:[#allocation7 + $0x180] sm:$0xff]  }
 0x3ac   :  { %5089 = vmatprep.subr.bf16.mxu0 %v5960_v24  ;;  %6137 = vmatprep.subr.bf16.mxu1 %v6235_v56 }
 0x3ae   :  { %6138 = vmatpush3.bf16.msra.mxu1 %v6236_v57 }
 0x3af   :  { %5090 = vmatpush1.bf16.msra.mxu0 %v5959_v37  ;;  %6139 = vmatprep.subr.bf16.mxu1 %v6237_v11 }
 0x3b0   :  { %5091 = vmatprep.subr.bf16.mxu0 %v5990_v31 }
 0x3b2   :  { %6140 = vmatpush3.bf16.msra.mxu1 %v6238_v62 }
 0x3b3   :  { %5092 = vmatpush2.bf16.msra.mxu0 %v5989_v21  ;;  %6141 = vmatprep.subr.bf16.mxu1 %v6239_v29  ;;  %v7113_v21 = vld [vmem:[#allocation14_spill] sm:$0xff] }
 0x3b4   :  { %5093 = vmatprep.subr.bf16.mxu0 %v5988_v41 }
 0x3b6   :  { %6142 = vmatpush3.bf16.msra.mxu1 %v6240_v38 }
 0x3b7   :  { %5094 = vmatpush2.bf16.msra.mxu0 %v5987_v51 }
 0x3b8   :  { %5095 = vmatprep.subr.bf16.mxu0 %v5986_v63  ;;  %v7114_v63 = vld [vmem:[#allocation15_spill] sm:$0xff] }
 0x3bb   :  { %5096 = vmatpush2.bf16.msra.mxu0 %v5985_v23 }
 0x3bc   :  { %5097 = vmatprep.subr.bf16.mxu0 %v5984_v40 }
 0x3bf   :  { %5098 = vmatpush2.bf16.msra.mxu0 %v5983_v36 }
 0x3c0   :  { %5099 = vmatprep.subr.bf16.mxu0 %v5982_v58 }
 0x3c3   :  { %5100 = vmatpush2.bf16.msra.mxu0 %v5981_v55 }
 0x3c4   :  { %5101 = vmatprep.subr.bf16.mxu0 %v5980_v18 }
 0x3c7   :  { %5102 = vmatpush2.bf16.msra.mxu0 %v5979_v20  ;;  %v7120_v20 = vld [vmem:[#allocation19_spill] sm:$0xff] }
 0x3c8   :  { %5103 = vmatprep.subr.bf16.mxu0 %v5978_v17 }
 0x3cb   :  { %5104 = vmatpush2.bf16.msra.mxu0 %v5977_v12  ;;  %v4890_v12 = vpop.f32.mrf.mxu1 }
 0x3cc   :  { %5105 = vmatprep.subr.bf16.mxu0 %v5976_v45  ;;  %v7122_v45 = vld [vmem:[#allocation21_spill] sm:$0xff] }
 0x3cf   :  { %5106 = vmatpush2.bf16.msra.mxu0 %v5975_v44 }
 0x3d2   :  { %5108 = vmatmul.mubr.bf16.vlgmr.msra.gmra.mxu0 %v7104_v15  ;;  %v4892_v15 = vpop.f32.mrf.mxu1 }
 0x3d3   :  { %5117 = vmatprep.mubr.bf16.mxu0 %v7105_v39 }
 0x3d4   :  { %v4894_v39 = vpop.f32.mrf.mxu1 }
 0x3da   :  { %5118 = vmatmul.mubr.bf16.gmra.mxu0 %v7106_v10  ;;  %v4896_v10 = vpop.f32.mrf.mxu1 }
 0x3db   :  { %5127 = vmatprep.mubr.bf16.mxu0 %v7107_v16 }
 0x3dc   :  { %v4900_v16 = vpop.f32.mrf.mxu1 }
 0x3e2   :  { %5128 = vmatmul.mubr.bf16.gmra.mxu0 %v7108_v3  ;;  %v4902_v3 = vpop.f32.mrf.mxu1 }
 0x3e3   :  { %5137 = vmatprep.mubr.bf16.mxu0 %v7109_v0 }
 0x3e4   :  { %v4904_v0 = vpop.f32.mrf.mxu1 }
 0x3e6   :  { %v4906_v50 = vpop.f32.mrf.mxu1 }
 0x3e8   :  { %v6949_v34 = vpop.f32.mrf.mxu1 }
 0x3ea   :  { %5138 = vmatmul.mubr.bf16.gmra.mxu0 %v7110_v52  ;;  %v6951_v52 = vpop.f32.mrf.mxu1 }
 0x3ec   :  { %v6953_v1 = vpop.f32.mrf.mxu1 }
 0x3ee   :  { %v6955_v9 = vpop.f32.mrf.mxu1 }
 0x3f0   :  { %v6957_v25 = vpop.f32.mrf.mxu1 }
 0x412   :  { %v6103_v49 = vpop.f32.mrf.mxu0 }
 0x414   :  { %v6104_v47 = vpop.f32.mrf.mxu0 }
 0x415   :  { %v6105_v42 = vadd.f32 %v6104_v47, %v6103_v49  ;;  %v6959_v49 = vpop.f32.mrf.mxu1 }
 0x416   :  { %v6106_v59 = vpop.f32.mrf.mxu0 }
 0x417   :  { %v6926_v4 = vadd.f32 %v6105_v42, %v7111_v46  ;;  %v6961_v57 = vpop.f32.mrf.mxu1 }
 0x418   :  { %v6107_v30 = vpop.f32.mrf.mxu0 }
 0x419   :  { %v6108_v24 = vadd.f32 %v6107_v30, %v6106_v59  ;;  %v6963_v42 = vpop.f32.mrf.mxu1 }
 0x41a   :  { %v6109_v48 = vpop.f32.mrf.mxu0 }
 0x41b   :  { %v6929_v37 = vadd.f32 %v6108_v24, %v7112_v2  ;;  %v5036_v11 = vpop.f32.mrf.mxu1 }
 0x41c   :  { %v6110_v31 = vpop.f32.mrf.mxu0 }
 0x41d   :  { %v6111_v14 = vadd.f32 %v6110_v31, %v6109_v48  ;;  %v5038_v62 = vpop.f32.mrf.mxu1 }
 0x41e   :  { %v6112_v28 = vpop.f32.mrf.mxu0 }
 0x41f   :  { %v6932_v41 = vadd.f32 %v6111_v14, %v7113_v21  ;;  %v5040_v24 = vpop.f32.mrf.mxu1 }
 0x420   :  { %v6113_v26 = vpop.f32.mrf.mxu0 }
 0x421   :  { %v6114_v7 = vadd.f32 %v6113_v26, %v6112_v28  ;;  %v5042_v29 = vpop.f32.mrf.mxu1 }
 0x422   :  { %v6115_v51 = vpop.f32.mrf.mxu0 }
 0x423   :  { %v6935_v5 = vadd.f32 %v6114_v7, %v7114_v63  ;;  %v5046_v2 = vpop.f32.mrf.mxu1 }
 0x424   :  { %v6116_v53 = vpop.f32.mrf.mxu0 }
 0x425   :  { %7115 = vst [vmem:[#allocation23_spill] sm:$0xff] %v6935_v5  ;;  %v6117_v23 = vadd.f32 %v6116_v53, %v6115_v51  ;;  %v5048_v31 = vpop.f32.mrf.mxu1 }
 0x426   :  { %v6118_v40 = vpop.f32.mrf.mxu0 }
 0x427   :  { %v6938_v43 = vadd.f32 %v6117_v23, %v7116_v54  ;;  %v5050_v28 = vpop.f32.mrf.mxu1 }
 0x428   :  { %v6119_v36 = vpop.f32.mrf.mxu0 }
 0x429   :  { %7117 = vst [vmem:[#allocation25_spill] sm:$0xff] %v6938_v43  ;;  %v6120_v58 = vadd.f32 %v6119_v36, %v6118_v40  ;;  %v5052_v26 = vpop.f32.mrf.mxu1 }
 0x42a   :  { %v6121_v60 = vpop.f32.mrf.mxu0 }
 0x42b   :  { %v6941_v55 = vadd.f32 %v6120_v58, %v7118_v6  ;;  %v5056_v51 = vpop.f32.mrf.mxu1 }
 0x42c   :  { %v6122_v18 = vpop.f32.mrf.mxu0 }
 0x42d   :  { %7119 = vst [vmem:[#allocation27_spill] sm:$0xff] %v6941_v55  ;;  %v6123_v32 = vadd.f32 %v6122_v18, %v6121_v60  ;;  %v5058_v58 = vpop.f32.mrf.mxu1 }
 0x42e   :  { %v6124_v19 = vpop.f32.mrf.mxu0 }
 0x42f   :  { %v6944_v17 = vadd.f32 %v6123_v32, %v7120_v20 }
 0x430   :  { %v6125_v8 = vpop.f32.mrf.mxu0 }
 0x431   :  { %7121 = vst [vmem:[#allocation29_spill] sm:$0xff] %v6944_v17  ;;  %v6126_v33 = vadd.f32 %v6125_v8, %v6124_v19 }
 0x433   :  { %v6947_v44 = vadd.f32 %v6126_v33, %v7122_v45  ;;  %v5060_v45 = vpop.f32.mrf.mxu1 }
 0x435   :  { %7123 = vst [vmem:[#allocation31_spill] sm:$0xff] %v6947_v44 }
 0x452   :  { %v4963_v61 = vpop.f32.mrf.mxu0 }
 0x453   :  { %v4964_v40 = vadd.f32 %v4963_v61, %v4890_v12 }
 0x454   :  { %v4965_v22 = vpop.f32.mrf.mxu0 }
 0x455   :  { %v4966_v53 = vadd.f32 %v4965_v22, %v4892_v15  ;;  %v5037_v32 = vadd.f32 %v5036_v11, %v4964_v40 }
 0x456   :  { %v4967_v27 = vpop.f32.mrf.mxu0 }
 0x457   :  { %v4968_v23 = vadd.f32 %v4967_v27, %v4894_v39  ;;  %v5039_v6 = vadd.f32 %v5038_v62, %v4966_v53  ;;  %v5062_v27 = vpop.f32.mrf.mxu1 }
 0x458   :  { %v4969_v13 = vpop.f32.mrf.mxu0 }
 0x459   :  { %v4970_v36 = vadd.f32 %v4969_v13, %v4896_v10  ;;  %v5041_v18 = vadd.f32 %v5040_v24, %v4968_v23 }
 0x45a   :  { %v4973_v35 = vpop.f32.mrf.mxu0 }
 0x45b   :  { %v5043_v20 = vadd.f32 %v5042_v29, %v4970_v36  ;;  %v4974_v15 = vadd.f32 %v4973_v35, %v4900_v16 }
 0x45c   :  { %v4975_v56 = vpop.f32.mrf.mxu0 }
 0x45d   :  { %v4976_v55 = vadd.f32 %v4975_v56, %v4902_v3  ;;  %v5047_v53 = vadd.f32 %v5046_v2, %v4974_v15 }
 0x45e   :  { %v4977_v47 = vpop.f32.mrf.mxu0 }
 0x45f   :  { %v4978_v43 = vadd.f32 %v4977_v47, %v4904_v0  ;;  %v5049_v11 = vadd.f32 %v5048_v31, %v4976_v55 }
 0x460   :  { %v4979_v59 = vpop.f32.mrf.mxu0 }
 0x461   :  { %v4980_v61 = vadd.f32 %v4979_v59, %v4906_v50  ;;  %v5051_v24 = vadd.f32 %v5050_v28, %v4978_v43 }
 0x462   :  { %v4983_v46 = vpop.f32.mrf.mxu0 }
 0x463   :  { %v4984_v55 = vadd.f32 %v4983_v46, %v6949_v34 }
 0x464   :  { %v4985_v30 = vpop.f32.mrf.mxu0 }
 0x465   :  { %v4986_v50 = vadd.f32 %v4985_v30, %v6951_v52 }
 0x466   :  { %v4987_v48 = vpop.f32.mrf.mxu0 }
 0x468   :  { %v4989_v38 = vpop.f32.mrf.mxu0 }
 0x469   :  { %v4990_v56 = vadd.f32 %v4989_v38, %v6955_v9 }
 0x46a   :  { %v6965_v14 = vpop.f32.mrf.mxu0 }
 0x46b   :  { %v5063_v30 = vadd.f32 %v5062_v27, %v4990_v56 }
 0x46c   :  { %v6967_v21 = vpop.f32.mrf.mxu0 }
 0x46d   :  { %v4996_v9 = vadd.f32 %v6967_v21, %v6959_v49 }
 0x46e   :  { %v6969_v7 = vpop.f32.mrf.mxu0 }
 0x46f   :  { %v4998_v38 = vadd.f32 %v6969_v7, %v6961_v57 }
 0x470   :  { %v6971_v63 = vpop.f32.mrf.mxu0 }
 0x492   :  { %v5109_v54 = vpop.f32.mrf.mxu0 }
 0x493   :  { %v5110_v44 = vadd.f32 %v5109_v54, %v5037_v32  ;;  %v5053_v54 = vadd.f32 %v5052_v26, %v4980_v61  ;;  %v5059_v26 = vadd.f32 %v5058_v58, %v4986_v50 }
 0x494   :  { %v5111_v60 = vpop.f32.mrf.mxu0 }
 0x495   :  { %v5112_v8 = vadd.f32 %v5111_v60, %v5039_v6  ;;  %v5148_v13 = vmul.f32 %v5110_v44, %v5110_v44 }
 0x496   :  { %v5113_v19 = vpop.f32.mrf.mxu0 }
 0x497   :  { %v5114_v33 = vadd.f32 %v5113_v19, %v5041_v18  ;;  %v5149_v10 = vmul.f32 %v5112_v8, %v5112_v8  ;;  %v5057_v18 = vadd.f32 %v5056_v51, %v4984_v55  ;;  %v4994_v51 = vadd.f32 %v6965_v14, %v6957_v25 }
 0x498   :  { %v5115_v17 = vpop.f32.mrf.mxu0 }
 0x499   :  { %v5116_v5 = vadd.f32 %v5115_v17, %v5043_v20  ;;  %v5150_v39 = vmul.f32 %v5114_v33, %v5114_v33  ;;  %v5066_v17 = vpop.f32.mrf.mxu1  ;;  %v5000_v33 = vadd.f32 %v6971_v63, %v6963_v42 }
 0x49a   :  { %v5119_v12 = vpop.f32.mrf.mxu0  ;;  %v5067_v21 = vadd.f32 %v5066_v17, %v4994_v51 }
 0x49b   :  { %v5151_v22 = vmul.f32 %v5116_v5, %v5116_v5  ;;  %v5164_v23 = vpack.c.bf16 %v5150_v39, %v5148_v13  ;;  %v5120_v16 = vadd.f32 %v5119_v12, %v5047_v53  ;;  %v4988_v5 = vadd.f32 %v4987_v48, %v6953_v1  ;;  %v5068_v2 = vpop.f32.mrf.mxu1 }
 0x49c   :  { %v5121_v62 = vpop.f32.mrf.mxu0 }
 0x49d   :  { %v5165_v29 = vpack.c.bf16 %v5151_v22, %v5149_v10  ;;  %v5122_v36 = vadd.f32 %v5121_v62, %v5049_v11  ;;  %v5152_v31 = vmul.f32 %v5120_v16, %v5120_v16  ;;  %v5061_v60 = vadd.f32 %v5060_v45, %v4988_v5  ;;  %v5070_v34 = vpop.f32.mrf.mxu1 }
 0x49e   :  { %v5123_v40 = vpop.f32.mrf.mxu0  ;;  %v5069_v10 = vadd.f32 %v5068_v2, %v4996_v9  ;;  %v5071_v22 = vadd.f32 %v5070_v34, %v4998_v38  ;;  %v7124_v2 = vld [vmem:[#allocation23_spill] sm:$0xff]  ;;  %v7127_v34 = vld [vmem:[#allocation29_spill] sm:$0xff] }
 0x49f   :  { %v5124_v3 = vadd.f32 %v5123_v40, %v5051_v24  ;;  %5332 = vmatprep.mubr.bf16.mxu1 %v5165_v29  ;;  %v5153_v47 = vmul.f32 %v5122_v36, %v5122_v36  ;;  %v5072_v39 = vpop.f32.mrf.mxu1  ;;  %v7128_v38 = vld [vmem:[#allocation31_spill] sm:$0xff] }
 0x4a0   :  { %v5125_v0 = vpop.f32.mrf.mxu0  ;;  %5333 = vmatmul.mubr.bf16.vlgmr.msra.gmra.mxu1 %v5164_v23  ;;  %v5073_v7 = vadd.f32 %v5072_v39, %v5000_v33 }
 0x4a1   :  { %v5126_v44 = vadd.f32 %v5125_v0, %v5053_v54  ;;  %v5154_v43 = vmul.f32 %v5124_v3, %v5124_v3 }
 0x4a2   :  { %v5129_v35 = vpop.f32.mrf.mxu0 }
 0x4a3   :  { %v5155_v59 = vmul.f32 %v5126_v44, %v5126_v44  ;;  %v5166_v32 = vpack.c.bf16 %v5154_v43, %v5152_v31  ;;  %v5130_v46 = vadd.f32 %v5129_v35, %v5057_v18 }
 0x4a4   :  { %v5131_v28 = vpop.f32.mrf.mxu0 }
 0x4a5   :  { %v5167_v6 = vpack.c.bf16 %v5155_v59, %v5153_v47  ;;  %v5132_v1 = vadd.f32 %v5131_v28, %v5059_v26  ;;  %v5156_v12 = vmul.f32 %v5130_v46, %v5130_v46 }
 0x4a6   :  { %v5133_v52 = vpop.f32.mrf.mxu0 }
 0x4a7   :  { %v5134_v48 = vadd.f32 %v5133_v52, %v5061_v60  ;;  %5340 = vmatprep.mubr.bf16.mxu1 %v5167_v6  ;;  %v5157_v45 = vmul.f32 %v5132_v1, %v5132_v1  ;;  %v7125_v60 = vld [vmem:[#allocation25_spill] sm:$0xff]  ;;  %v7126_v52 = vld [vmem:[#allocation27_spill] sm:$0xff] }
 0x4a8   :  { %v5135_v19 = vpop.f32.mrf.mxu0  ;;  %5341 = vmatmul.mubr.bf16.gmra.mxu1 %v5166_v32 }
 0x4a9   :  { %v5136_v58 = vadd.f32 %v5135_v19, %v5063_v30  ;;  %v5158_v20 = vmul.f32 %v5134_v48, %v5134_v48 }
 0x4aa   :  { %v5139_v8 = vpop.f32.mrf.mxu0 }
 0x4ab   :  { %v5159_v15 = vmul.f32 %v5136_v58, %v5136_v58  ;;  %v5168_v27 = vpack.c.bf16 %v5158_v20, %v5156_v12  ;;  %v5140_v25 = vadd.f32 %v5139_v8, %v5067_v21 }
 0x4ac   :  { %v5141_v61 = vpop.f32.mrf.mxu0 }
 0x4ad   :  { %v5169_v49 = vpack.c.bf16 %v5159_v15, %v5157_v45  ;;  %v5142_v13 = vadd.f32 %v5141_v61, %v5069_v10  ;;  %v5160_v29 = vmul.f32 %v5140_v25, %v5140_v25 }
 0x4ae   :  { %v5143_v57 = vpop.f32.mrf.mxu0 }
 0x4af   :  { %v5144_v62 = vadd.f32 %v5143_v57, %v5071_v22  ;;  %5348 = vmatprep.mubr.bf16.mxu1 %v5169_v49  ;;  %v5161_v63 = vmul.f32 %v5142_v13, %v5142_v13 }
 0x4b0   :  { %v5145_v14 = vpop.f32.mrf.mxu0  ;;  %5349 = vmatmul.mubr.bf16.gmra.mxu1 %v5168_v27 }
 0x4b1   :  { %v5146_v11 = vadd.f32 %v5145_v14, %v5073_v7  ;;  %v5162_v42 = vmul.f32 %v5144_v62, %v5144_v62 }
 0x4b3   :  { %v5163_v24 = vmul.f32 %v5146_v11, %v5146_v11  ;;  %v5170_v23 = vpack.c.bf16 %v5162_v42, %v5160_v29 }
 0x4b5   :  { %v5171_v53 = vpack.c.bf16 %v5163_v24, %v5161_v63 }
 0x4b7   :  { %5356 = vmatprep.mubr.bf16.mxu1 %v5171_v53 }
 0x4b8   :  { %5357 = vmatmul.mubr.bf16.gmra.mxu1 %v5170_v23 }
 0x560   :  { %v6143_v40 = vpop.f32.mrf.mxu1 }
 0x562   :  { %v6144_v54 = vpop.f32.mrf.mxu1 }
 0x563   :  { %v6145_v36 = vadd.f32 %v6144_v54, %v6143_v40 }
 0x564   :  { %v6146_v3 = vpop.f32.mrf.mxu1 }
 0x565   :  { %v5365_v17 = vadd.f32 %v6145_v36, %v6926_v4 }
 0x566   :  { %v6147_v16 = vpop.f32.mrf.mxu1 }
 0x567   :  { %5373 = vst [vmem:[#allocation8] sm:$0xff] %v5365_v17  ;;  %v6148_v0 = vadd.f32 %v6147_v16, %v6146_v3 }
 0x568   :  { %v6149_v50 = vpop.f32.mrf.mxu1 }
 0x569   :  { %v5366_v5 = vadd.f32 %v6148_v0, %v6929_v37 }
 0x56a   :  { %v6150_v44 = vpop.f32.mrf.mxu1 }
 0x56b   :  { %5374 = vst [vmem:[#allocation8 + $0x8] sm:$0xff] %v5366_v5  ;;  %v6151_v55 = vadd.f32 %v6150_v44, %v6149_v50 }
 0x56c   :  { %v6152_v43 = vpop.f32.mrf.mxu1 }
 0x56d   :  { %v5367_v35 = vadd.f32 %v6151_v55, %v6932_v41 }
 0x56e   :  { %v6153_v56 = vpop.f32.mrf.mxu1 }
 0x56f   :  { %5375 = vst [vmem:[#allocation8 + $0x10] sm:$0xff] %v5367_v35  ;;  %v6154_v47 = vadd.f32 %v6153_v56, %v6152_v43 }
 0x570   :  { %v6155_v59 = vpop.f32.mrf.mxu1 }
 0x571   :  { %v5368_v31 = vadd.f32 %v6154_v47, %v7124_v2 }
 0x572   :  { %v6156_v28 = vpop.f32.mrf.mxu1 }
 0x573   :  { %5376 = vst [vmem:[#allocation8 + $0x18] sm:$0xff] %v5368_v31  ;;  %v6157_v4 = vadd.f32 %v6156_v28, %v6155_v59 }
 0x574   :  { %v6158_v26 = vpop.f32.mrf.mxu1 }
 0x575   :  { %v5369_v6 = vadd.f32 %v6157_v4, %v7125_v60 }
 0x576   :  { %v6159_v18 = vpop.f32.mrf.mxu1 }
 0x577   :  { %5377 = vst [vmem:[#allocation8 + $0x20] sm:$0xff] %v5369_v6  ;;  %v6160_v37 = vadd.f32 %v6159_v18, %v6158_v26 }
 0x578   :  { %v6161_v32 = vpop.f32.mrf.mxu1 }
 0x579   :  { %v5370_v30 = vadd.f32 %v6160_v37, %v7126_v52 }
 0x57a   :  { %v6162_v1 = vpop.f32.mrf.mxu1 }
 0x57b   :  { %5378 = vst [vmem:[#allocation8 + $0x28] sm:$0xff] %v5370_v30  ;;  %v6163_v41 = vadd.f32 %v6162_v1, %v6161_v32 }
 0x57c   :  { %v6164_v48 = vpop.f32.mrf.mxu1 }
 0x57d   :  { %v5371_v46 = vadd.f32 %v6163_v41, %v7127_v34 }
 0x57e   :  { %v6165_v19 = vpop.f32.mrf.mxu1 }
 0x57f   :  { %5379 = vst [vmem:[#allocation8 + $0x30] sm:$0xff] %v5371_v46  ;;  %v6166_v9 = vadd.f32 %v6165_v19, %v6164_v48 }
 0x581   :  { %v5372_v58 = vadd.f32 %v6166_v9, %v7128_v38 }
 0x583   :  { %5380 = vst [vmem:[#allocation8 + $0x38] sm:$0xff] %v5372_v58 }
 0x584   :  { %6312 = shalt.err (!%p6309_p5)
}
 0x585   :  { %s6335_s4 = smov 128   ;;  %s6336_s5 = smov 8  }
 0x586   :  { %5392 = dma.vmem_to_hbm [thread:$0]  %s5387_s2, 1024, %s6999_s3, [#allocation4], %s6335_s4, %s6335_s4, %s6336_s5  }
 0x587   :  { %6325 = dma.done.wait [#allocation4], 1024  }
 0x588   :  { %6326 = vsyncadd [#allocation4], 4294966272 }
 0x589   :  { %5396 = vsyncpa [#allocation3], 1 }
 0x58a   :  { %5397 = vsyncpa [#allocation6], 1 }
 0x58b   :  { %5398 = vsyncpa [#allocation4], 1 }

</bundles_post_ra>
